<compile_context>
chip_gen: v6e
topology: v6e:2x2x1
jax: 0.10.0
libtpu: 0.0.40
codegen_flags: <defaults>
</compile_context>

<pallas_src>
import math
import numpy as np
import jax
import jax.numpy as jnp
from jax import lax
from jax.experimental import pallas as pl
from jax.experimental.pallas import tpu as pltpu

# ----- small, deterministic config (mirrors cfgs.* of the module) -----
B = 2          # batch
T = 8          # sequence length (max_len)
V = 32         # token_size
E = 16         # WORD_EMBED_SIZE
H = 32         # RNN_HIDDEN_SIZE
LBL = 8        # label_size
C = 16         # CTRL_HIDDEN_SIZE (= attn_sz)
L_RNN = 2      # RNN_LAYER
L_CTRL = 2     # CTRL_LAYER
CACHE = 4      # CACHE_SIZE

HEAD_W = LBL + 3 * C + H            # pred | q0 | q1 | phi_h | z_pre  = 88
XG_W = 4 * H + 4 * C                # encoder-L0 gates | ctrl-L0 gates = 192
TROWS = T * 8                       # token rows padded to 8-sublane groups
OUT_W = 128                         # lane-dense output block

# ---------------------------------------------------------------------------
# Packed-parameter slab layout: (row_off, col_off, rows, cols), all static.
# ---------------------------------------------------------------------------
SLAB_ROWS, SLAB_COLS = 64, 768
SEGS = {
    # 32-row band (rows 0:32)
    "WA":       (0,   0, H, 8 * H),            # [Wi1 | Wr0]                (32, 256)
    "WB":       (0, 256, H, 4 * H + HEAD_W),   # [Wr1 | head weights]       (32, 216)
    "emb_fold": (0, 472, V, XG_W),             # emb @ [Wih0.T | W0_x.T]    (32, 192)
    "Wphi_z":   (0, 664, H, C),                # phi_proj z-part            (32, 16)
    "WC1":      (0, 680, 2 * C, 5 * C),        # [[W1_h|Ws1],[W1_x|0]]      (32, 80)
    # full-height column strip
    "Vblk":     (0, 760, CACHE * C, 2 * CACHE),  # block-diag(v0), block-diag(v1) (64, 8)
    # 16-row band (rows 32:48)
    "WC0":      (32, 0, C, 5 * C),             # [W0_h | Ws0]               (16, 80)
    "Wkey":     (32, 80, C, 2 * C),            # [lk0.T | lk1.T]            (16, 32)
    # 1-row vectors (rows 48..54)
    "b_xg":     (48, 0, 1, XG_W),              # [bih0+bhh0 | W0_b]
    "b1":       (49, 0, 1, 4 * H),             # bih1+bhh1
    "b_henc":   (50, 0, 1, HEAD_W),            # head bias (ls_b folded into q bias)
    "bkey":     (51, 0, 1, 2 * C),
    "b_ctrl1":  (52, 0, 1, 4 * C),
    "vpol":     (53, 0, 1, C),
    "bpol":     (54, 0, 1, 1),
}


# ---------------------------------------------------------------------------
# Pallas kernel: whole sequence in one invocation (unrolled T steps)
# ---------------------------------------------------------------------------
def _make_kernel(segs):
    def kernel(tok_ref, slab_ref, out_ref, xg_ref):
        def seg(name):
            ro, co, r, c = segs[name]
            return slab_ref[ro:ro + r, co:co + c]

        def dot(a, w):
            return jnp.dot(a, w, preferred_element_type=jnp.float32)

        # ---- prologue: one-hot embedding + ALL input-side gate pre-products ----
        tok = tok_ref[...]                                           # (TROWS, 1) int32
        onehot = (lax.broadcasted_iota(jnp.int32, (TROWS, V), 1) == tok
                  ).astype(jnp.float32)                              # (TROWS, V)
        xg_ref[...] = dot(onehot, seg("emb_fold")) + seg("b_xg")     # (TROWS, XG_W)

        # recurrent carries (None == known-zero, never read)
        c0 = c1 = None
        rec0 = rec1 = None                 # Whh0 / Whh1 pre-products for the next step
        summ_pre = [None, None]            # linear_summ pre-products for the next step
        key_hist = [[], []]                # per ctrl layer: list of (B, C) keys
        hc_hist = [[], []]                 # per ctrl layer: list of (B, 2C) [phi | c_ctrl]
        preds, pols = [], []

        for t in range(T):
            first = (t == 0)
            xg_t = xg_ref[t * 8:t * 8 + B, :]                        # (B, XG_W)

            # ------------------ 2-layer incremental LSTM encoder ----------------
            g = xg_t[:, :4 * H] if first else xg_t[:, :4 * H] + rec0
            sg, tg = jax.nn.sigmoid(g), jnp.tanh(g)
            i_g, f_g, g_g, o_g = sg[:, :H], sg[:, H:2 * H], tg[:, 2 * H:3 * H], sg[:, 3 * H:]
            c0 = i_g * g_g if first else f_g * c0 + i_g * g_g
            h0 = o_g * jnp.tanh(c0)

            # fused: [layer-1 input gates | next-step layer-0 recurrent gates]
            fA = dot(h0, seg("WA"))                                  # (B, 8H)
            g = (fA[:, :4 * H] + seg("b1") if first
                 else fA[:, :4 * H] + rec1 + seg("b1"))
            rec0 = fA[:, 4 * H:]
            sg, tg = jax.nn.sigmoid(g), jnp.tanh(g)
            i_g, f_g, g_g, o_g = sg[:, :H], sg[:, H:2 * H], tg[:, 2 * H:3 * H], sg[:, 3 * H:]
            c1 = i_g * g_g if first else f_g * c1 + i_g * g_g
            h_enc = o_g * jnp.tanh(c1)

            # fused: [next-step layer-1 recurrent gates | pred | q0 | q1 | phi_h | z_pre]
            fB = dot(h_enc, seg("WB"))                               # (B, 4H + 88)
            rec1 = fB[:, :4 * H]
            head = fB[:, 4 * H:] + seg("b_henc")                     # (B, 88)
            pred = head[:, :LBL]
            q = [head[:, LBL:LBL + C], head[:, LBL + C:LBL + 2 * C]]
            phi_h = head[:, LBL + 2 * C:LBL + 3 * C]
            z_pre = head[:, LBL + 3 * C:]

            # ------------------------ LSTMN controller stack --------------------
            xg_ctrl_t = xg_t[:, 4 * H:]                              # (B, 4C), bias folded
            x_ctrl = None
            cc_step = [None, None]
            for li in range(L_CTRL):
                hs = cs = None
                # attention over the (phi, cell) history window (lane-packed)
                if t == 1:
                    hc = hc_hist[li][0]                              # softmax over 1 == 1
                    hs, cs = hc[:, :C], hc[:, C:]
                elif t >= 2:
                    K = min(t, CACHE)
                    qs = q[li] + summ_pre[li]                        # (B, C)
                    kp = jnp.concatenate(key_hist[li][-K:], axis=-1)
                    e = jnp.tanh(jnp.concatenate([qs] * K, axis=-1) + kp)   # 1 EUP pass
                    vro, vco, _, _ = segs["Vblk"]
                    Vb = slab_ref[vro:vro + K * C,
                                  vco + li * CACHE:vco + li * CACHE + K]
                    s = dot(e, Vb)                                   # all K scores at once
                    p = jnp.exp(s - jnp.max(s, axis=-1, keepdims=True))
                    inv = pl.reciprocal(jnp.sum(p, axis=-1, keepdims=True), approx=True)
                    win = hc_hist[li][-K:]
                    acc = p[:, 0:1] * win[0]
                    for k in range(1, K):
                        acc = acc + p[:, k:k + 1] * win[k]
                    hc = acc * inv
                    hs, cs = hc[:, :C], hc[:, C:]

                # LSTMN cell (fused gate + next-step linear_summ matmuls)
                if li == 0:
                    if first:
                        gates = xg_ctrl_t
                    else:
                        fC = dot(hs, seg("WC0"))                     # (B, 5C)
                        gates = fC[:, :4 * C] + xg_ctrl_t
                        summ_pre[0] = fC[:, 4 * C:]
                else:
                    if first:
                        gates = dot(x_ctrl, seg("WC1")[C:, :4 * C]) + seg("b_ctrl1")
                    else:
                        fC = dot(jnp.concatenate([hs, x_ctrl], axis=-1), seg("WC1"))
                        gates = fC[:, :4 * C] + seg("b_ctrl1")
                        summ_pre[1] = fC[:, 4 * C:]
                sgc, tgc = jax.nn.sigmoid(gates), jnp.tanh(gates)
                f_c, o_c, i_c, ch_c = (sgc[:, :C], sgc[:, C:2 * C],
                                       sgc[:, 2 * C:3 * C], tgc[:, 3 * C:])
                cc = i_c * ch_c if first else f_c * cs + i_c * ch_c
                cc_step[li] = cc
                x_ctrl = o_c * jnp.tanh(cc)

            # ------------------------------ policy head --------------------------
            pol = jax.nn.sigmoid(jnp.sum(x_ctrl * seg("vpol"), axis=-1, keepdims=True)
                                 + seg("bpol"))
            preds.append(pred)
            pols.append(pol)

            # -------------- phi / key history (feeds future steps only) ----------
            if t + 1 < T:
                z = jnp.tanh(z_pre)                                  # exact fold of z_proj(pred)
                phi = jnp.tanh(phi_h + dot(z, seg("Wphi_z")))
                keys = dot(phi, seg("Wkey")) + seg("bkey")           # both layers' linear_key
                key_hist[0].append(keys[:, :C])
                key_hist[1].append(keys[:, C:])
                hc_hist[0].append(jnp.concatenate([phi, cc_step[0]], axis=-1))
                hc_hist[1].append(jnp.concatenate([phi, cc_step[1]], axis=-1))

        # single lane-dense store + one HBM writeback
        pad = jnp.zeros((B, OUT_W - T * LBL - T), jnp.float32)
        out_ref[...] = jnp.concatenate(preds + pols + [pad], axis=-1)

    return kernel


_KERNEL = _make_kernel(SEGS)


# ---------------------------------------------------------------------------
# Parameter init (deterministic, xavier-uniform for 2D weights)
# ---------------------------------------------------------------------------
def _xavier(key, shape):
    fan_out, fan_in = shape
    a = math.sqrt(6.0 / (fan_in + fan_out))
    return jax.random.uniform(key, shape, jnp.float32, -a, a)


def _bias(key, shape, scale=0.05):
    return jax.random.uniform(key, shape, jnp.float32, -scale, scale)


def init_params(key):
    keys = iter(jax.random.split(key, 64))
    p = {}
    p["embedding"] = _xavier(next(keys), (V, E))
    enc = []
    for l in range(L_RNN):
        in_sz = E if l == 0 else H
        enc += [_xavier(next(keys), (4 * H, in_sz)),
                _xavier(next(keys), (4 * H, H)),
                _bias(next(keys), (1, 4 * H)),
                _bias(next(keys), (1, 4 * H))]
    enc += [_xavier(next(keys), (LBL, H)), _bias(next(keys), (1, LBL))]
    p["encoder"] = enc
    ctrl = []
    for li in range(L_CTRL):
        in_sz = C + E if li == 0 else 2 * C
        ctrl += [_xavier(next(keys), (4 * C, in_sz)), _bias(next(keys), (1, 4 * C)),
                 _xavier(next(keys), (1, C)), _bias(next(keys), (1, 1)),
                 _xavier(next(keys), (C, H)), _bias(next(keys), (1, C)),
                 _xavier(next(keys), (C, C)), _bias(next(keys), (1, C)),
                 _xavier(next(keys), (C, C)), _bias(next(keys), (1, C))]
    p["ctrl"] = ctrl
    p["top"] = [_xavier(next(keys), (H, LBL)), _bias(next(keys), (1, H)),
                _xavier(next(keys), (C, 2 * H)), _bias(next(keys), (1, C)),
                _xavier(next(keys), (1, C)), _bias(next(keys), (1, 1))]
    return p


# ---------------------------------------------------------------------------
# Host-side packing: one lane-aligned f32 slab (pure numpy, runs ONCE, off jit)
# ---------------------------------------------------------------------------
def _blockdiag_v(v_row):
    v = np.asarray(v_row, np.float64).reshape(C)
    out = np.zeros((CACHE * C, CACHE), np.float64)
    for k in range(CACHE):
        out[k * C:(k + 1) * C, k] = v
    return out


def pack_params(p):
    f64 = lambda a: np.asarray(a, np.float64)
    enc, ctrl, top = p["encoder"], p["ctrl"], p["top"]
    wih0, whh0, bih0, bhh0 = map(f64, enc[0:4])
    wih1, whh1, bih1, bhh1 = map(f64, enc[4:8])
    wproj, bproj = f64(enc[8]), f64(enc[9])
    (W0_w, W0_b, v0_w, _v0_b, lq_w0, lq_b0, lk_w0, lk_b0, ls_w0, ls_b0) = map(f64, ctrl[0:10])
    (W1_w, W1_b, v1_w, _v1_b, lq_w1, lq_b1, lk_w1, lk_b1, ls_w1, ls_b1) = map(f64, ctrl[10:20])
    zproj_w, zproj_b, phiproj_w, phiproj_b, vpol_w, vpol_b = map(f64, top)
    emb = f64(p["embedding"])

    # exact linear folds (eval-mode dropout, linear pred head)
    W_zfold = wproj.T @ zproj_w.T                                   # (H, H)
    b_zfold = bproj @ zproj_w.T + zproj_b                           # (1, H)
    Wx = np.concatenate([wih0.T, W0_w[:, C:].T], axis=1)            # (E, 4H + 4C)
    emb_fold = emb @ Wx                                             # (V, 4H + 4C)
    b_xg = np.concatenate([bih0 + bhh0, W0_b], axis=1)              # (1, 4H + 4C)

    # fused h_enc head; linear_summ bias folded into the query bias
    W_head = np.concatenate([wproj.T, lq_w0.T, lq_w1.T,
                             phiproj_w[:, :H].T, W_zfold], axis=1)  # (32, 88)
    b_head = np.concatenate([bproj, lq_b0 + ls_b0, lq_b1 + ls_b1,
                             phiproj_b, b_zfold], axis=1)           # (1, 88)
    # NOTE: the score bias v_b is dropped — softmax is shift-invariant.

    mats = {
        "emb_fold": emb_fold, "b_xg": b_xg,
        "WA": np.concatenate([wih1.T, whh0.T], axis=1),                       # (32, 256)
        "WB": np.concatenate([whh1.T, W_head], axis=1),                       # (32, 216)
        "b1": bih1 + bhh1, "b_henc": b_head,
        "Wphi_z": phiproj_w[:, H:].T,                                         # (32, 16)
        "WC0": np.concatenate([W0_w[:, :C].T, ls_w0.T], axis=1),              # (16, 80)
        "WC1": np.concatenate([
            np.concatenate([W1_w[:, :C].T, ls_w1.T], axis=1),
            np.concatenate([W1_w[:, C:].T, np.zeros((C, C))], axis=1)],
            axis=0),                                                          # (32, 80)
        "b_ctrl1": W1_b,
        "Wkey": np.concatenate([lk_w0.T, lk_w1.T], axis=1),                   # (16, 32)
        "bkey": np.concatenate([lk_b0, lk_b1], axis=1),                       # (1, 32)
        "Vblk": np.concatenate([_blockdiag_v(v0_w), _blockdiag_v(v1_w)], axis=1),
        "vpol": vpol_w, "bpol": vpol_b,
    }
    slab = np.zeros((SLAB_ROWS, SLAB_COLS), np.float32)
    for name, (ro, co, r, c) in SEGS.items():
        m = np.asarray(mats[name], np.float32)
        assert m.shape == (r, c), (name, m.shape, (r, c))
        slab[ro:ro + r, co:co + c] = m
    return jnp.asarray(slab)


# ---------------------------------------------------------------------------
# Wrapper: token layout glue + single pallas_call
# ---------------------------------------------------------------------------
def revision_forward(x_tokens, slab):
    # tokens laid out t-major in 8-sublane groups: row t*8 + b
    tok = jnp.zeros((T, 8), jnp.int32).at[:, :B].set(jnp.transpose(x_tokens))
    tok = tok.reshape(TROWS, 1)

    o = pl.pallas_call(
        _KERNEL,
        out_shape=jax.ShapeDtypeStruct((B, OUT_W), jnp.float32),
        grid=(1,),
        in_specs=[pl.BlockSpec((TROWS, 1), lambda i: (0, 0)),
                  pl.BlockSpec((SLAB_ROWS, SLAB_COLS), lambda i: (0, 0))],
        out_specs=pl.BlockSpec((B, OUT_W), lambda i: (0, 0)),
        scratch_shapes=[pltpu.VMEM((TROWS, XG_W), jnp.float32)],
        compiler_params=pltpu.CompilerParams(
            dimension_semantics=("arbitrary",)),
    )(tok, slab)

    output = o[:, :T * LBL].reshape(B, T, LBL)
    rev = o[:, T * LBL:T * LBL + T]
    return output, rev


# ---------------------------------------------------------------------------
# Pure-JAX reference (mirrors the PyTorch forward, valid=False path)
# ---------------------------------------------------------------------------
def reference_forward(x_tokens, p):
    enc, ctrl, top = p["encoder"], p["ctrl"], p["top"]
    emb = jnp.take(p["embedding"], x_tokens, axis=0)
    h = jnp.zeros((L_RNN, B, H), jnp.float32)
    c = jnp.zeros((L_RNN, B, H), jnp.float32)
    hsumm = [jnp.zeros((B, C), jnp.float32) for _ in range(L_CTRL)]
    csumm = [jnp.zeros((B, C), jnp.float32) for _ in range(L_CTRL)]
    phi_hist, cell_hist = [], [[] for _ in range(L_CTRL)]
    outs, revs = [], []
    for t in range(T):
        x_t = emb[:, t, :]
        inp = x_t
        hn, cn = [], []
        for l in range(L_RNN):
            wih, whh, bih, bhh = enc[4 * l:4 * l + 4]
            gates = inp @ wih.T + h[l] @ whh.T + bih[0] + bhh[0]
            i_g = jax.nn.sigmoid(gates[:, :H]); f_g = jax.nn.sigmoid(gates[:, H:2 * H])
            g_g = jnp.tanh(gates[:, 2 * H:3 * H]); o_g = jax.nn.sigmoid(gates[:, 3 * H:])
            c_l = f_g * c[l] + i_g * g_g
            h_l = o_g * jnp.tanh(c_l)
            hn.append(h_l); cn.append(c_l); inp = h_l
        h, c = jnp.stack(hn), jnp.stack(cn)
        pred = inp @ enc[8].T + enc[9][0]
        h_enc = h[-1]
        x_ctrl = x_t
        for li in range(L_CTRL):
            (W_w, W_b, v_w, v_b, lq_w, lq_b, lk_w, lk_b, ls_w, ls_b) = ctrl[10 * li:10 * li + 10]
            if len(phi_hist) > 0:
                ph = jnp.stack(phi_hist[-CACHE:], axis=1)
                ch = jnp.stack(cell_hist[li][-CACHE:], axis=1)
                q = h_enc @ lq_w.T + lq_b[0]
                summ = hsumm[li] @ ls_w.T + ls_b[0]
                keys = ph @ lk_w.T + lk_b[0]
                e = jnp.tanh(q[:, None, :] + keys + summ[:, None, :])
                scores = jnp.sum(e * v_w[0], axis=-1) + v_b[0, 0]
                attn = jax.nn.softmax(scores, axis=-1)
                hsumm[li] = jnp.einsum("bk,bkc->bc", attn, ph)
                csumm[li] = jnp.einsum("bk,bkc->bc", attn, ch)
            gates = jnp.concatenate([hsumm[li], x_ctrl], axis=1) @ W_w.T + W_b[0]
            f_g = jax.nn.sigmoid(gates[:, :C]); o_g = jax.nn.sigmoid(gates[:, C:2 * C])
            i_g = jax.nn.sigmoid(gates[:, 2 * C:3 * C]); ch_g = jnp.tanh(gates[:, 3 * C:])
            c_ctrl = f_g * csumm[li] + i_g * ch_g
            h_ctrl = o_g * jnp.tanh(c_ctrl)
            cell_hist[li].append(c_ctrl)
            x_ctrl = h_ctrl
        zproj_w, zproj_b, phiproj_w, phiproj_b, vpol_w, vpol_b = top
        policy = jax.nn.sigmoid(x_ctrl @ vpol_w.T + vpol_b[0])
        z = jnp.tanh(pred @ zproj_w.T + zproj_b[0])
        phi = jnp.tanh(jnp.concatenate([h_enc, z], axis=1) @ phiproj_w.T + phiproj_b[0])
        phi_hist.append(phi)
        outs.append(pred); revs.append(policy)
    return jnp.stack(outs, axis=1), jnp.stack(revs, axis=1)[..., 0]


if __name__ == "__main__":
    key = jax.random.PRNGKey(0)
    pkey, xkey = jax.random.split(key)
    params = init_params(pkey)
    x_tokens = jax.random.randint(xkey, (B, T), 1, V, dtype=jnp.int32)

    slab = pack_params(params)          # packed once, off the per-call path

    fwd = jax.jit(revision_forward)
    out, rev = fwd(x_tokens, slab)
    out = jax.block_until_ready(out)
    rev = jax.block_until_ready(rev)

    assert out.shape == (B, T, LBL) and rev.shape == (B, T)
    assert bool(jnp.all(jnp.isfinite(out))) and bool(jnp.all(jnp.isfinite(rev)))

    ref_out, ref_rev = reference_forward(x_tokens, params)
    np.testing.assert_allclose(np.asarray(out), np.asarray(ref_out), rtol=5e-2, atol=5e-2)
    np.testing.assert_allclose(np.asarray(rev), np.asarray(ref_rev), rtol=5e-2, atol=5e-2)

    print("KERNEL_OK")
</pallas_src>

<mosaic_0001>
module attributes {stable_mosaic.version = 11 : i64} {
  func.func @kernel(%arg0: i32, %arg1: memref<64x1xi32, #tpu.memory_space<vmem>>, %arg2: memref<64x768xf32, #tpu.memory_space<vmem>>, %arg3: memref<2x128xf32, #tpu.memory_space<vmem>>, %arg4: memref<64x192xf32, #tpu.memory_space<vmem>>) attributes {dimension_semantics = [#tpu.dimension_semantics<arbitrary>], iteration_bounds = array<i64: 1>, scalar_prefetch = 0 : i64, scratch_operands = 1 : i64, tpu.core_type = #tpu.core_type<tc>, window_params = [{pipeline_mode = #tpu.pipeline_mode<synchronous>, transform_indices = @transform_0, window_bounds = array<i64: 64, 1>}, {pipeline_mode = #tpu.pipeline_mode<synchronous>, transform_indices = @transform_1, window_bounds = array<i64: 64, 768>}, {pipeline_mode = #tpu.pipeline_mode<synchronous>, transform_indices = @transform_2, window_bounds = array<i64: 2, 128>}]} {
    %c0 = arith.constant 0 : index
    %c0_0 = arith.constant 0 : index
    %0 = vector.load %arg1[%c0, %c0_0] : memref<64x1xi32, #tpu.memory_space<vmem>>, vector<64x1xi32>
    %1 = tpu.iota {dimensions = array<i32: 1>} : vector<64x32xi32>
    %2 = vector.broadcast %0 : vector<64x1xi32> to vector<64x32xi32>
    %3 = arith.cmpi eq, %1, %2 : vector<64x32xi32>
    %4 = arith.extui %3 : vector<64x32xi1> to vector<64x32xi32>
    %5 = arith.sitofp %4 : vector<64x32xi32> to vector<64x32xf32>
    %c0_1 = arith.constant 0 : index
    %c472 = arith.constant 472 : index
    %6 = vector.load %arg2[%c0_1, %c472] : memref<64x768xf32, #tpu.memory_space<vmem>>, vector<32x192xf32>
    %cst = arith.constant dense<0.000000e+00> : vector<64x192xf32>
    %7 = tpu.matmul %5, %6, %cst {dimension_numbers = #tpu.dot_dimension_numbers<[1], [0], [0], [1], [0, 0, 1, 1], [], []>} : vector<64x32xf32>, vector<32x192xf32>, vector<64x192xf32> -> vector<64x192xf32>
    %c48 = arith.constant 48 : index
    %c0_2 = arith.constant 0 : index
    %8 = vector.load %arg2[%c48, %c0_2] : memref<64x768xf32, #tpu.memory_space<vmem>>, vector<1x192xf32>
    %9 = vector.broadcast %8 : vector<1x192xf32> to vector<64x192xf32>
    %10 = arith.addf %7, %9 : vector<64x192xf32>
    %c0_3 = arith.constant 0 : index
    %c0_4 = arith.constant 0 : index
    %11 = vector.load %arg4[%c0_3, %c0_4] : memref<64x192xf32, #tpu.memory_space<vmem>>, vector<64x192xf32>
    tpu.vector_store %arg4[%c0_3, %c0_4], %10 {strides = array<i32>} : memref<64x192xf32, #tpu.memory_space<vmem>>, vector<64x192xf32>,
    %c0_5 = arith.constant 0 : index
    %c0_6 = arith.constant 0 : index
    %12 = vector.load %arg4[%c0_5, %c0_6] : memref<64x192xf32, #tpu.memory_space<vmem>>, vector<2x192xf32>
    %13 = vector.extract_strided_slice %12 {offsets = [0, 0], sizes = [2, 128], strides = [1, 1]} : vector<2x192xf32> to vector<2x128xf32>
    %14 = arith.negf %13 : vector<2x128xf32>
    %15 = math.exp %14 : vector<2x128xf32>
    %cst_7 = arith.constant 1.000000e+00 : f32
    %16 = vector.broadcast %cst_7 : f32 to vector<2x128xf32>
    %17 = arith.addf %16, %15 : vector<2x128xf32>
    %18 = arith.divf %16, %17 : vector<2x128xf32>
    %19 = math.tanh %13 : vector<2x128xf32>
    %20 = vector.extract_strided_slice %18 {offsets = [0, 0], sizes = [2, 32], strides = [1, 1]} : vector<2x128xf32> to vector<2x32xf32>
    %21 = vector.extract_strided_slice %19 {offsets = [0, 64], sizes = [2, 32], strides = [1, 1]} : vector<2x128xf32> to vector<2x32xf32>
    %22 = vector.extract_strided_slice %18 {offsets = [0, 96], sizes = [2, 32], strides = [1, 1]} : vector<2x128xf32> to vector<2x32xf32>
    %23 = arith.mulf %20, %21 : vector<2x32xf32>
    %24 = math.tanh %23 : vector<2x32xf32>
    %25 = arith.mulf %22, %24 : vector<2x32xf32>
    %c0_8 = arith.constant 0 : index
    %c0_9 = arith.constant 0 : index
    %26 = vector.load %arg2[%c0_8, %c0_9] : memref<64x768xf32, #tpu.memory_space<vmem>>, vector<32x256xf32>
    %cst_10 = arith.constant dense<0.000000e+00> : vector<2x256xf32>
    %27 = tpu.matmul %25, %26, %cst_10 {dimension_numbers = #tpu.dot_dimension_numbers<[1], [0], [0], [1], [0, 0, 1, 1], [], []>} : vector<2x32xf32>, vector<32x256xf32>, vector<2x256xf32> -> vector<2x256xf32>
    %28 = vector.extract_strided_slice %27 {offsets = [0, 0], sizes = [2, 128], strides = [1, 1]} : vector<2x256xf32> to vector<2x128xf32>
    %c49 = arith.constant 49 : index
    %c0_11 = arith.constant 0 : index
    %29 = vector.load %arg2[%c49, %c0_11] : memref<64x768xf32, #tpu.memory_space<vmem>>, vector<1x128xf32>
    %30 = vector.broadcast %29 : vector<1x128xf32> to vector<2x128xf32>
    %31 = arith.addf %28, %30 : vector<2x128xf32>
    %32 = vector.extract_strided_slice %27 {offsets = [0, 128], sizes = [2, 128], strides = [1, 1]} : vector<2x256xf32> to vector<2x128xf32>
    %33 = arith.negf %31 : vector<2x128xf32>
    %34 = math.exp %33 : vector<2x128xf32>
    %cst_12 = arith.constant 1.000000e+00 : f32
    %35 = vector.broadcast %cst_12 : f32 to vector<2x128xf32>
    %36 = arith.addf %35, %34 : vector<2x128xf32>
    %37 = arith.divf %35, %36 : vector<2x128xf32>
    %38 = math.tanh %31 : vector<2x128xf32>
    %39 = vector.extract_strided_slice %37 {offsets = [0, 0], sizes = [2, 32], strides = [1, 1]} : vector<2x128xf32> to vector<2x32xf32>
    %40 = vector.extract_strided_slice %38 {offsets = [0, 64], sizes = [2, 32], strides = [1, 1]} : vector<2x128xf32> to vector<2x32xf32>
    %41 = vector.extract_strided_slice %37 {offsets = [0, 96], sizes = [2, 32], strides = [1, 1]} : vector<2x128xf32> to vector<2x32xf32>
    %42 = arith.mulf %39, %40 : vector<2x32xf32>
    %43 = math.tanh %42 : vector<2x32xf32>
    %44 = arith.mulf %41, %43 : vector<2x32xf32>
    %c0_13 = arith.constant 0 : index
    %c256 = arith.constant 256 : index
    %45 = vector.load %arg2[%c0_13, %c256] : memref<64x768xf32, #tpu.memory_space<vmem>>, vector<32x216xf32>
    %cst_14 = arith.constant dense<0.000000e+00> : vector<2x216xf32>
    %46 = tpu.matmul %44, %45, %cst_14 {dimension_numbers = #tpu.dot_dimension_numbers<[1], [0], [0], [1], [0, 0, 1, 1], [], []>} : vector<2x32xf32>, vector<32x216xf32>, vector<2x216xf32> -> vector<2x216xf32>
    %47 = vector.extract_strided_slice %46 {offsets = [0, 0], sizes = [2, 128], strides = [1, 1]} : vector<2x216xf32> to vector<2x128xf32>
    %48 = vector.extract_strided_slice %46 {offsets = [0, 128], sizes = [2, 88], strides = [1, 1]} : vector<2x216xf32> to vector<2x88xf32>
    %c50 = arith.constant 50 : index
    %c0_15 = arith.constant 0 : index
    %49 = vector.load %arg2[%c50, %c0_15] : memref<64x768xf32, #tpu.memory_space<vmem>>, vector<1x88xf32>
    %50 = vector.broadcast %49 : vector<1x88xf32> to vector<2x88xf32>
    %51 = arith.addf %48, %50 : vector<2x88xf32>
    %52 = vector.extract_strided_slice %51 {offsets = [0, 0], sizes = [2, 8], strides = [1, 1]} : vector<2x88xf32> to vector<2x8xf32>
    %53 = vector.extract_strided_slice %51 {offsets = [0, 40], sizes = [2, 16], strides = [1, 1]} : vector<2x88xf32> to vector<2x16xf32>
    %54 = vector.extract_strided_slice %51 {offsets = [0, 56], sizes = [2, 32], strides = [1, 1]} : vector<2x88xf32> to vector<2x32xf32>
    %55 = vector.extract_strided_slice %12 {offsets = [0, 128], sizes = [2, 64], strides = [1, 1]} : vector<2x192xf32> to vector<2x64xf32>
    %56 = arith.negf %55 : vector<2x64xf32>
    %57 = math.exp %56 : vector<2x64xf32>
    %cst_16 = arith.constant 1.000000e+00 : f32
    %58 = vector.broadcast %cst_16 : f32 to vector<2x64xf32>
    %59 = arith.addf %58, %57 : vector<2x64xf32>
    %60 = arith.divf %58, %59 : vector<2x64xf32>
    %61 = math.tanh %55 : vector<2x64xf32>
    %62 = vector.extract_strided_slice %60 {offsets = [0, 16], sizes = [2, 16], strides = [1, 1]} : vector<2x64xf32> to vector<2x16xf32>
    %63 = vector.extract_strided_slice %60 {offsets = [0, 32], sizes = [2, 16], strides = [1, 1]} : vector<2x64xf32> to vector<2x16xf32>
    %64 = vector.extract_strided_slice %61 {offsets = [0, 48], sizes = [2, 16], strides = [1, 1]} : vector<2x64xf32> to vector<2x16xf32>
    %65 = arith.mulf %63, %64 : vector<2x16xf32>
    %66 = math.tanh %65 : vector<2x16xf32>
    %67 = arith.mulf %62, %66 : vector<2x16xf32>
    %c0_17 = arith.constant 0 : index
    %c680 = arith.constant 680 : index
    %68 = vector.load %arg2[%c0_17, %c680] : memref<64x768xf32, #tpu.memory_space<vmem>>, vector<32x80xf32>
    %69 = vector.extract_strided_slice %68 {offsets = [16, 0], sizes = [16, 64], strides = [1, 1]} : vector<32x80xf32> to vector<16x64xf32>
    %cst_18 = arith.constant dense<0.000000e+00> : vector<2x64xf32>
    %70 = tpu.matmul %67, %69, %cst_18 {dimension_numbers = #tpu.dot_dimension_numbers<[1], [0], [0], [1], [0, 0, 1, 1], [], []>} : vector<2x16xf32>, vector<16x64xf32>, vector<2x64xf32> -> vector<2x64xf32>
    %c52 = arith.constant 52 : index
    %c0_19 = arith.constant 0 : index
    %71 = vector.load %arg2[%c52, %c0_19] : memref<64x768xf32, #tpu.memory_space<vmem>>, vector<1x64xf32>
    %72 = vector.broadcast %71 : vector<1x64xf32> to vector<2x64xf32>
    %73 = arith.addf %70, %72 : vector<2x64xf32>
    %74 = arith.negf %73 : vector<2x64xf32>
    %75 = math.exp %74 : vector<2x64xf32>
    %cst_20 = arith.constant 1.000000e+00 : f32
    %76 = vector.broadcast %cst_20 : f32 to vector<2x64xf32>
    %77 = arith.addf %76, %75 : vector<2x64xf32>
    %78 = arith.divf %76, %77 : vector<2x64xf32>
    %79 = math.tanh %73 : vector<2x64xf32>
    %80 = vector.extract_strided_slice %78 {offsets = [0, 16], sizes = [2, 16], strides = [1, 1]} : vector<2x64xf32> to vector<2x16xf32>
    %81 = vector.extract_strided_slice %78 {offsets = [0, 32], sizes = [2, 16], strides = [1, 1]} : vector<2x64xf32> to vector<2x16xf32>
    %82 = vector.extract_strided_slice %79 {offsets = [0, 48], sizes = [2, 16], strides = [1, 1]} : vector<2x64xf32> to vector<2x16xf32>
    %83 = arith.mulf %81, %82 : vector<2x16xf32>
    %84 = math.tanh %83 : vector<2x16xf32>
    %85 = arith.mulf %80, %84 : vector<2x16xf32>
    %c53 = arith.constant 53 : index
    %c0_21 = arith.constant 0 : index
    %86 = vector.load %arg2[%c53, %c0_21] : memref<64x768xf32, #tpu.memory_space<vmem>>, vector<1x16xf32>
    %87 = vector.broadcast %86 : vector<1x16xf32> to vector<2x16xf32>
    %88 = arith.mulf %85, %87 : vector<2x16xf32>
    %cst_22 = arith.constant dense<0.000000e+00> : vector<2xf32>
    %89 = vector.multi_reduction <add>, %88, %cst_22 [1] : vector<2x16xf32> to vector<2xf32>
    %90 = vector.shape_cast %89 : vector<2xf32> to vector<2x1xf32>
    %c54 = arith.constant 54 : index
    %c0_23 = arith.constant 0 : index
    %91 = vector.load %arg2[%c54, %c0_23] : memref<64x768xf32, #tpu.memory_space<vmem>>, vector<1x1xf32>
    %92 = vector.broadcast %91 : vector<1x1xf32> to vector<2x1xf32>
    %93 = arith.addf %90, %92 : vector<2x1xf32>
    %94 = arith.negf %93 : vector<2x1xf32>
    %95 = math.exp %94 : vector<2x1xf32>
    %cst_24 = arith.constant 1.000000e+00 : f32
    %96 = vector.broadcast %cst_24 : f32 to vector<2x1xf32>
    %97 = arith.addf %96, %95 : vector<2x1xf32>
    %98 = arith.divf %96, %97 : vector<2x1xf32>
    %99 = math.tanh %54 : vector<2x32xf32>
    %c0_25 = arith.constant 0 : index
    %c664 = arith.constant 664 : index
    %100 = vector.load %arg2[%c0_25, %c664] : memref<64x768xf32, #tpu.memory_space<vmem>>, vector<32x16xf32>
    %cst_26 = arith.constant dense<0.000000e+00> : vector<2x16xf32>
    %101 = tpu.matmul %99, %100, %cst_26 {dimension_numbers = #tpu.dot_dimension_numbers<[1], [0], [0], [1], [0, 0, 1, 1], [], []>} : vector<2x32xf32>, vector<32x16xf32>, vector<2x16xf32> -> vector<2x16xf32>
    %102 = arith.addf %53, %101 : vector<2x16xf32>
    %103 = math.tanh %102 : vector<2x16xf32>
    %c32 = arith.constant 32 : index
    %c80 = arith.constant 80 : index
    %104 = vector.load %arg2[%c32, %c80] : memref<64x768xf32, #tpu.memory_space<vmem>>, vector<16x32xf32>
    %cst_27 = arith.constant dense<0.000000e+00> : vector<2x32xf32>
    %105 = tpu.matmul %103, %104, %cst_27 {dimension_numbers = #tpu.dot_dimension_numbers<[1], [0], [0], [1], [0, 0, 1, 1], [], []>} : vector<2x16xf32>, vector<16x32xf32>, vector<2x32xf32> -> vector<2x32xf32>
    %c51 = arith.constant 51 : index
    %c0_28 = arith.constant 0 : index
    %106 = vector.load %arg2[%c51, %c0_28] : memref<64x768xf32, #tpu.memory_space<vmem>>, vector<1x32xf32>
    %107 = vector.broadcast %106 : vector<1x32xf32> to vector<2x32xf32>
    %108 = arith.addf %105, %107 : vector<2x32xf32>
    %109 = vector.extract_strided_slice %108 {offsets = [0, 0], sizes = [2, 16], strides = [1, 1]} : vector<2x32xf32> to vector<2x16xf32>
    %110 = vector.extract_strided_slice %108 {offsets = [0, 16], sizes = [2, 16], strides = [1, 1]} : vector<2x32xf32> to vector<2x16xf32>
    %111 = tpu.concatenate %103, %65 in 1 : vector<2x16xf32>, vector<2x16xf32> -> vector<2x32xf32>
    %112 = tpu.concatenate %103, %83 in 1 : vector<2x16xf32>, vector<2x16xf32> -> vector<2x32xf32>
    %c8 = arith.constant 8 : index
    %c0_29 = arith.constant 0 : index
    %113 = vector.load %arg4[%c8, %c0_29] : memref<64x192xf32, #tpu.memory_space<vmem>>, vector<2x192xf32>
    %114 = vector.extract_strided_slice %113 {offsets = [0, 0], sizes = [2, 128], strides = [1, 1]} : vector<2x192xf32> to vector<2x128xf32>
    %115 = arith.addf %114, %32 : vector<2x128xf32>
    %116 = arith.negf %115 : vector<2x128xf32>
    %117 = math.exp %116 : vector<2x128xf32>
    %cst_30 = arith.constant 1.000000e+00 : f32
    %118 = vector.broadcast %cst_30 : f32 to vector<2x128xf32>
    %119 = arith.addf %118, %117 : vector<2x128xf32>
    %120 = arith.divf %118, %119 : vector<2x128xf32>
    %121 = math.tanh %115 : vector<2x128xf32>
    %122 = vector.extract_strided_slice %120 {offsets = [0, 0], sizes = [2, 32], strides = [1, 1]} : vector<2x128xf32> to vector<2x32xf32>
    %123 = vector.extract_strided_slice %120 {offsets = [0, 32], sizes = [2, 32], strides = [1, 1]} : vector<2x128xf32> to vector<2x32xf32>
    %124 = vector.extract_strided_slice %121 {offsets = [0, 64], sizes = [2, 32], strides = [1, 1]} : vector<2x128xf32> to vector<2x32xf32>
    %125 = vector.extract_strided_slice %120 {offsets = [0, 96], sizes = [2, 32], strides = [1, 1]} : vector<2x128xf32> to vector<2x32xf32>
    %126 = arith.mulf %123, %23 : vector<2x32xf32>
    %127 = arith.mulf %122, %124 : vector<2x32xf32>
    %128 = arith.addf %126, %127 : vector<2x32xf32>
    %129 = math.tanh %128 : vector<2x32xf32>
    %130 = arith.mulf %125, %129 : vector<2x32xf32>
    %c0_31 = arith.constant 0 : index
    %c0_32 = arith.constant 0 : index
    %131 = vector.load %arg2[%c0_31, %c0_32] : memref<64x768xf32, #tpu.memory_space<vmem>>, vector<32x256xf32>
    %cst_33 = arith.constant dense<0.000000e+00> : vector<2x256xf32>
    %132 = tpu.matmul %130, %131, %cst_33 {dimension_numbers = #tpu.dot_dimension_numbers<[1], [0], [0], [1], [0, 0, 1, 1], [], []>} : vector<2x32xf32>, vector<32x256xf32>, vector<2x256xf32> -> vector<2x256xf32>
    %133 = vector.extract_strided_slice %132 {offsets = [0, 0], sizes = [2, 128], strides = [1, 1]} : vector<2x256xf32> to vector<2x128xf32>
    %134 = arith.addf %133, %47 : vector<2x128xf32>
    %c49_34 = arith.constant 49 : index
    %c0_35 = arith.constant 0 : index
    %135 = vector.load %arg2[%c49_34, %c0_35] : memref<64x768xf32, #tpu.memory_space<vmem>>, vector<1x128xf32>
    %136 = vector.broadcast %135 : vector<1x128xf32> to vector<2x128xf32>
    %137 = arith.addf %134, %136 : vector<2x128xf32>
    %138 = vector.extract_strided_slice %132 {offsets = [0, 128], sizes = [2, 128], strides = [1, 1]} : vector<2x256xf32> to vector<2x128xf32>
    %139 = arith.negf %137 : vector<2x128xf32>
    %140 = math.exp %139 : vector<2x128xf32>
    %cst_36 = arith.constant 1.000000e+00 : f32
    %141 = vector.broadcast %cst_36 : f32 to vector<2x128xf32>
    %142 = arith.addf %141, %140 : vector<2x128xf32>
    %143 = arith.divf %141, %142 : vector<2x128xf32>
    %144 = math.tanh %137 : vector<2x128xf32>
    %145 = vector.extract_strided_slice %143 {offsets = [0, 0], sizes = [2, 32], strides = [1, 1]} : vector<2x128xf32> to vector<2x32xf32>
    %146 = vector.extract_strided_slice %143 {offsets = [0, 32], sizes = [2, 32], strides = [1, 1]} : vector<2x128xf32> to vector<2x32xf32>
    %147 = vector.extract_strided_slice %144 {offsets = [0, 64], sizes = [2, 32], strides = [1, 1]} : vector<2x128xf32> to vector<2x32xf32>
    %148 = vector.extract_strided_slice %143 {offsets = [0, 96], sizes = [2, 32], strides = [1, 1]} : vector<2x128xf32> to vector<2x32xf32>
    %149 = arith.mulf %146, %42 : vector<2x32xf32>
    %150 = arith.mulf %145, %147 : vector<2x32xf32>
    %151 = arith.addf %149, %150 : vector<2x32xf32>
    %152 = math.tanh %151 : vector<2x32xf32>
    %153 = arith.mulf %148, %152 : vector<2x32xf32>
    %c0_37 = arith.constant 0 : index
    %c256_38 = arith.constant 256 : index
    %154 = vector.load %arg2[%c0_37, %c256_38] : memref<64x768xf32, #tpu.memory_space<vmem>>, vector<32x216xf32>
    %cst_39 = arith.constant dense<0.000000e+00> : vector<2x216xf32>
    %155 = tpu.matmul %153, %154, %cst_39 {dimension_numbers = #tpu.dot_dimension_numbers<[1], [0], [0], [1], [0, 0, 1, 1], [], []>} : vector<2x32xf32>, vector<32x216xf32>, vector<2x216xf32> -> vector<2x216xf32>
    %156 = vector.extract_strided_slice %155 {offsets = [0, 0], sizes = [2, 128], strides = [1, 1]} : vector<2x216xf32> to vector<2x128xf32>
    %157 = vector.extract_strided_slice %155 {offsets = [0, 128], sizes = [2, 88], strides = [1, 1]} : vector<2x216xf32> to vector<2x88xf32>
    %c50_40 = arith.constant 50 : index
    %c0_41 = arith.constant 0 : index
    %158 = vector.load %arg2[%c50_40, %c0_41] : memref<64x768xf32, #tpu.memory_space<vmem>>, vector<1x88xf32>
    %159 = vector.broadcast %158 : vector<1x88xf32> to vector<2x88xf32>
    %160 = arith.addf %157, %159 : vector<2x88xf32>
    %161 = vector.extract_strided_slice %160 {offsets = [0, 0], sizes = [2, 8], strides = [1, 1]} : vector<2x88xf32> to vector<2x8xf32>
    %162 = vector.extract_strided_slice %160 {offsets = [0, 40], sizes = [2, 16], strides = [1, 1]} : vector<2x88xf32> to vector<2x16xf32>
    %163 = vector.extract_strided_slice %160 {offsets = [0, 56], sizes = [2, 32], strides = [1, 1]} : vector<2x88xf32> to vector<2x32xf32>
    %164 = vector.extract_strided_slice %113 {offsets = [0, 128], sizes = [2, 64], strides = [1, 1]} : vector<2x192xf32> to vector<2x64xf32>
    %165 = vector.extract_strided_slice %111 {offsets = [0, 0], sizes = [2, 16], strides = [1, 1]} : vector<2x32xf32> to vector<2x16xf32>
    %166 = vector.extract_strided_slice %111 {offsets = [0, 16], sizes = [2, 16], strides = [1, 1]} : vector<2x32xf32> to vector<2x16xf32>
    %c32_42 = arith.constant 32 : index
    %c0_43 = arith.constant 0 : index
    %167 = vector.load %arg2[%c32_42, %c0_43] : memref<64x768xf32, #tpu.memory_space<vmem>>, vector<16x80xf32>
    %cst_44 = arith.constant dense<0.000000e+00> : vector<2x80xf32>
    %168 = tpu.matmul %165, %167, %cst_44 {dimension_numbers = #tpu.dot_dimension_numbers<[1], [0], [0], [1], [0, 0, 1, 1], [], []>} : vector<2x16xf32>, vector<16x80xf32>, vector<2x80xf32> -> vector<2x80xf32>
    %169 = vector.extract_strided_slice %168 {offsets = [0, 0], sizes = [2, 64], strides = [1, 1]} : vector<2x80xf32> to vector<2x64xf32>
    %170 = arith.addf %169, %164 : vector<2x64xf32>
    %171 = vector.extract_strided_slice %168 {offsets = [0, 64], sizes = [2, 16], strides = [1, 1]} : vector<2x80xf32> to vector<2x16xf32>
    %172 = arith.negf %170 : vector<2x64xf32>
    %173 = math.exp %172 : vector<2x64xf32>
    %cst_45 = arith.constant 1.000000e+00 : f32
    %174 = vector.broadcast %cst_45 : f32 to vector<2x64xf32>
    %175 = arith.addf %174, %173 : vector<2x64xf32>
    %176 = arith.divf %174, %175 : vector<2x64xf32>
    %177 = math.tanh %170 : vector<2x64xf32>
    %178 = vector.extract_strided_slice %176 {offsets = [0, 0], sizes = [2, 16], strides = [1, 1]} : vector<2x64xf32> to vector<2x16xf32>
    %179 = vector.extract_strided_slice %176 {offsets = [0, 16], sizes = [2, 16], strides = [1, 1]} : vector<2x64xf32> to vector<2x16xf32>
    %180 = vector.extract_strided_slice %176 {offsets = [0, 32], sizes = [2, 16], strides = [1, 1]} : vector<2x64xf32> to vector<2x16xf32>
    %181 = vector.extract_strided_slice %177 {offsets = [0, 48], sizes = [2, 16], strides = [1, 1]} : vector<2x64xf32> to vector<2x16xf32>
    %182 = arith.mulf %178, %166 : vector<2x16xf32>
    %183 = arith.mulf %180, %181 : vector<2x16xf32>
    %184 = arith.addf %182, %183 : vector<2x16xf32>
    %185 = math.tanh %184 : vector<2x16xf32>
    %186 = arith.mulf %179, %185 : vector<2x16xf32>
    %187 = vector.extract_strided_slice %112 {offsets = [0, 0], sizes = [2, 16], strides = [1, 1]} : vector<2x32xf32> to vector<2x16xf32>
    %188 = vector.extract_strided_slice %112 {offsets = [0, 16], sizes = [2, 16], strides = [1, 1]} : vector<2x32xf32> to vector<2x16xf32>
    %189 = tpu.concatenate %187, %186 in 1 : vector<2x16xf32>, vector<2x16xf32> -> vector<2x32xf32>
    %c0_46 = arith.constant 0 : index
    %c680_47 = arith.constant 680 : index
    %190 = vector.load %arg2[%c0_46, %c680_47] : memref<64x768xf32, #tpu.memory_space<vmem>>, vector<32x80xf32>
    %cst_48 = arith.constant dense<0.000000e+00> : vector<2x80xf32>
    %191 = tpu.matmul %189, %190, %cst_48 {dimension_numbers = #tpu.dot_dimension_numbers<[1], [0], [0], [1], [0, 0, 1, 1], [], []>} : vector<2x32xf32>, vector<32x80xf32>, vector<2x80xf32> -> vector<2x80xf32>
    %192 = vector.extract_strided_slice %191 {offsets = [0, 0], sizes = [2, 64], strides = [1, 1]} : vector<2x80xf32> to vector<2x64xf32>
    %c52_49 = arith.constant 52 : index
    %c0_50 = arith.constant 0 : index
    %193 = vector.load %arg2[%c52_49, %c0_50] : memref<64x768xf32, #tpu.memory_space<vmem>>, vector<1x64xf32>
    %194 = vector.broadcast %193 : vector<1x64xf32> to vector<2x64xf32>
    %195 = arith.addf %192, %194 : vector<2x64xf32>
    %196 = vector.extract_strided_slice %191 {offsets = [0, 64], sizes = [2, 16], strides = [1, 1]} : vector<2x80xf32> to vector<2x16xf32>
    %197 = arith.negf %195 : vector<2x64xf32>
    %198 = math.exp %197 : vector<2x64xf32>
    %cst_51 = arith.constant 1.000000e+00 : f32
    %199 = vector.broadcast %cst_51 : f32 to vector<2x64xf32>
    %200 = arith.addf %199, %198 : vector<2x64xf32>
    %201 = arith.divf %199, %200 : vector<2x64xf32>
    %202 = math.tanh %195 : vector<2x64xf32>
    %203 = vector.extract_strided_slice %201 {offsets = [0, 0], sizes = [2, 16], strides = [1, 1]} : vector<2x64xf32> to vector<2x16xf32>
    %204 = vector.extract_strided_slice %201 {offsets = [0, 16], sizes = [2, 16], strides = [1, 1]} : vector<2x64xf32> to vector<2x16xf32>
    %205 = vector.extract_strided_slice %201 {offsets = [0, 32], sizes = [2, 16], strides = [1, 1]} : vector<2x64xf32> to vector<2x16xf32>
    %206 = vector.extract_strided_slice %202 {offsets = [0, 48], sizes = [2, 16], strides = [1, 1]} : vector<2x64xf32> to vector<2x16xf32>
    %207 = arith.mulf %203, %188 : vector<2x16xf32>
    %208 = arith.mulf %205, %206 : vector<2x16xf32>
    %209 = arith.addf %207, %208 : vector<2x16xf32>
    %210 = math.tanh %209 : vector<2x16xf32>
    %211 = arith.mulf %204, %210 : vector<2x16xf32>
    %c53_52 = arith.constant 53 : index
    %c0_53 = arith.constant 0 : index
    %212 = vector.load %arg2[%c53_52, %c0_53] : memref<64x768xf32, #tpu.memory_space<vmem>>, vector<1x16xf32>
    %213 = vector.broadcast %212 : vector<1x16xf32> to vector<2x16xf32>
    %214 = arith.mulf %211, %213 : vector<2x16xf32>
    %cst_54 = arith.constant dense<0.000000e+00> : vector<2xf32>
    %215 = vector.multi_reduction <add>, %214, %cst_54 [1] : vector<2x16xf32> to vector<2xf32>
    %216 = vector.shape_cast %215 : vector<2xf32> to vector<2x1xf32>
    %c54_55 = arith.constant 54 : index
    %c0_56 = arith.constant 0 : index
    %217 = vector.load %arg2[%c54_55, %c0_56] : memref<64x768xf32, #tpu.memory_space<vmem>>, vector<1x1xf32>
    %218 = vector.broadcast %217 : vector<1x1xf32> to vector<2x1xf32>
    %219 = arith.addf %216, %218 : vector<2x1xf32>
    %220 = arith.negf %219 : vector<2x1xf32>
    %221 = math.exp %220 : vector<2x1xf32>
    %cst_57 = arith.constant 1.000000e+00 : f32
    %222 = vector.broadcast %cst_57 : f32 to vector<2x1xf32>
    %223 = arith.addf %222, %221 : vector<2x1xf32>
    %224 = arith.divf %222, %223 : vector<2x1xf32>
    %225 = math.tanh %163 : vector<2x32xf32>
    %c0_58 = arith.constant 0 : index
    %c664_59 = arith.constant 664 : index
    %226 = vector.load %arg2[%c0_58, %c664_59] : memref<64x768xf32, #tpu.memory_space<vmem>>, vector<32x16xf32>
    %cst_60 = arith.constant dense<0.000000e+00> : vector<2x16xf32>
    %227 = tpu.matmul %225, %226, %cst_60 {dimension_numbers = #tpu.dot_dimension_numbers<[1], [0], [0], [1], [0, 0, 1, 1], [], []>} : vector<2x32xf32>, vector<32x16xf32>, vector<2x16xf32> -> vector<2x16xf32>
    %228 = arith.addf %162, %227 : vector<2x16xf32>
    %229 = math.tanh %228 : vector<2x16xf32>
    %c32_61 = arith.constant 32 : index
    %c80_62 = arith.constant 80 : index
    %230 = vector.load %arg2[%c32_61, %c80_62] : memref<64x768xf32, #tpu.memory_space<vmem>>, vector<16x32xf32>
    %cst_63 = arith.constant dense<0.000000e+00> : vector<2x32xf32>
    %231 = tpu.matmul %229, %230, %cst_63 {dimension_numbers = #tpu.dot_dimension_numbers<[1], [0], [0], [1], [0, 0, 1, 1], [], []>} : vector<2x16xf32>, vector<16x32xf32>, vector<2x32xf32> -> vector<2x32xf32>
    %c51_64 = arith.constant 51 : index
    %c0_65 = arith.constant 0 : index
    %232 = vector.load %arg2[%c51_64, %c0_65] : memref<64x768xf32, #tpu.memory_space<vmem>>, vector<1x32xf32>
    %233 = vector.broadcast %232 : vector<1x32xf32> to vector<2x32xf32>
    %234 = arith.addf %231, %233 : vector<2x32xf32>
    %235 = vector.extract_strided_slice %234 {offsets = [0, 0], sizes = [2, 16], strides = [1, 1]} : vector<2x32xf32> to vector<2x16xf32>
    %236 = vector.extract_strided_slice %234 {offsets = [0, 16], sizes = [2, 16], strides = [1, 1]} : vector<2x32xf32> to vector<2x16xf32>
    %237 = tpu.concatenate %229, %184 in 1 : vector<2x16xf32>, vector<2x16xf32> -> vector<2x32xf32>
    %238 = tpu.concatenate %229, %209 in 1 : vector<2x16xf32>, vector<2x16xf32> -> vector<2x32xf32>
    %c16 = arith.constant 16 : index
    %c0_66 = arith.constant 0 : index
    %239 = vector.load %arg4[%c16, %c0_66] : memref<64x192xf32, #tpu.memory_space<vmem>>, vector<2x192xf32>
    %240 = vector.extract_strided_slice %239 {offsets = [0, 0], sizes = [2, 128], strides = [1, 1]} : vector<2x192xf32> to vector<2x128xf32>
    %241 = arith.addf %240, %138 : vector<2x128xf32>
    %242 = arith.negf %241 : vector<2x128xf32>
    %243 = math.exp %242 : vector<2x128xf32>
    %cst_67 = arith.constant 1.000000e+00 : f32
    %244 = vector.broadcast %cst_67 : f32 to vector<2x128xf32>
    %245 = arith.addf %244, %243 : vector<2x128xf32>
    %246 = arith.divf %244, %245 : vector<2x128xf32>
    %247 = math.tanh %241 : vector<2x128xf32>
    %248 = vector.extract_strided_slice %246 {offsets = [0, 0], sizes = [2, 32], strides = [1, 1]} : vector<2x128xf32> to vector<2x32xf32>
    %249 = vector.extract_strided_slice %246 {offsets = [0, 32], sizes = [2, 32], strides = [1, 1]} : vector<2x128xf32> to vector<2x32xf32>
    %250 = vector.extract_strided_slice %247 {offsets = [0, 64], sizes = [2, 32], strides = [1, 1]} : vector<2x128xf32> to vector<2x32xf32>
    %251 = vector.extract_strided_slice %246 {offsets = [0, 96], sizes = [2, 32], strides = [1, 1]} : vector<2x128xf32> to vector<2x32xf32>
    %252 = arith.mulf %249, %128 : vector<2x32xf32>
    %253 = arith.mulf %248, %250 : vector<2x32xf32>
    %254 = arith.addf %252, %253 : vector<2x32xf32>
    %255 = math.tanh %254 : vector<2x32xf32>
    %256 = arith.mulf %251, %255 : vector<2x32xf32>
    %c0_68 = arith.constant 0 : index
    %c0_69 = arith.constant 0 : index
    %257 = vector.load %arg2[%c0_68, %c0_69] : memref<64x768xf32, #tpu.memory_space<vmem>>, vector<32x256xf32>
    %cst_70 = arith.constant dense<0.000000e+00> : vector<2x256xf32>
    %258 = tpu.matmul %256, %257, %cst_70 {dimension_numbers = #tpu.dot_dimension_numbers<[1], [0], [0], [1], [0, 0, 1, 1], [], []>} : vector<2x32xf32>, vector<32x256xf32>, vector<2x256xf32> -> vector<2x256xf32>
    %259 = vector.extract_strided_slice %258 {offsets = [0, 0], sizes = [2, 128], strides = [1, 1]} : vector<2x256xf32> to vector<2x128xf32>
    %260 = arith.addf %259, %156 : vector<2x128xf32>
    %c49_71 = arith.constant 49 : index
    %c0_72 = arith.constant 0 : index
    %261 = vector.load %arg2[%c49_71, %c0_72] : memref<64x768xf32, #tpu.memory_space<vmem>>, vector<1x128xf32>
    %262 = vector.broadcast %261 : vector<1x128xf32> to vector<2x128xf32>
    %263 = arith.addf %260, %262 : vector<2x128xf32>
    %264 = vector.extract_strided_slice %258 {offsets = [0, 128], sizes = [2, 128], strides = [1, 1]} : vector<2x256xf32> to vector<2x128xf32>
    %265 = arith.negf %263 : vector<2x128xf32>
    %266 = math.exp %265 : vector<2x128xf32>
    %cst_73 = arith.constant 1.000000e+00 : f32
    %267 = vector.broadcast %cst_73 : f32 to vector<2x128xf32>
    %268 = arith.addf %267, %266 : vector<2x128xf32>
    %269 = arith.divf %267, %268 : vector<2x128xf32>
    %270 = math.tanh %263 : vector<2x128xf32>
    %271 = vector.extract_strided_slice %269 {offsets = [0, 0], sizes = [2, 32], strides = [1, 1]} : vector<2x128xf32> to vector<2x32xf32>
    %272 = vector.extract_strided_slice %269 {offsets = [0, 32], sizes = [2, 32], strides = [1, 1]} : vector<2x128xf32> to vector<2x32xf32>
    %273 = vector.extract_strided_slice %270 {offsets = [0, 64], sizes = [2, 32], strides = [1, 1]} : vector<2x128xf32> to vector<2x32xf32>
    %274 = vector.extract_strided_slice %269 {offsets = [0, 96], sizes = [2, 32], strides = [1, 1]} : vector<2x128xf32> to vector<2x32xf32>
    %275 = arith.mulf %272, %151 : vector<2x32xf32>
    %276 = arith.mulf %271, %273 : vector<2x32xf32>
    %277 = arith.addf %275, %276 : vector<2x32xf32>
    %278 = math.tanh %277 : vector<2x32xf32>
    %279 = arith.mulf %274, %278 : vector<2x32xf32>
    %c0_74 = arith.constant 0 : index
    %c256_75 = arith.constant 256 : index
    %280 = vector.load %arg2[%c0_74, %c256_75] : memref<64x768xf32, #tpu.memory_space<vmem>>, vector<32x216xf32>
    %cst_76 = arith.constant dense<0.000000e+00> : vector<2x216xf32>
    %281 = tpu.matmul %279, %280, %cst_76 {dimension_numbers = #tpu.dot_dimension_numbers<[1], [0], [0], [1], [0, 0, 1, 1], [], []>} : vector<2x32xf32>, vector<32x216xf32>, vector<2x216xf32> -> vector<2x216xf32>
    %282 = vector.extract_strided_slice %281 {offsets = [0, 0], sizes = [2, 128], strides = [1, 1]} : vector<2x216xf32> to vector<2x128xf32>
    %283 = vector.extract_strided_slice %281 {offsets = [0, 128], sizes = [2, 88], strides = [1, 1]} : vector<2x216xf32> to vector<2x88xf32>
    %c50_77 = arith.constant 50 : index
    %c0_78 = arith.constant 0 : index
    %284 = vector.load %arg2[%c50_77, %c0_78] : memref<64x768xf32, #tpu.memory_space<vmem>>, vector<1x88xf32>
    %285 = vector.broadcast %284 : vector<1x88xf32> to vector<2x88xf32>
    %286 = arith.addf %283, %285 : vector<2x88xf32>
    %287 = vector.extract_strided_slice %286 {offsets = [0, 0], sizes = [2, 8], strides = [1, 1]} : vector<2x88xf32> to vector<2x8xf32>
    %288 = vector.extract_strided_slice %286 {offsets = [0, 8], sizes = [2, 16], strides = [1, 1]} : vector<2x88xf32> to vector<2x16xf32>
    %289 = vector.extract_strided_slice %286 {offsets = [0, 24], sizes = [2, 16], strides = [1, 1]} : vector<2x88xf32> to vector<2x16xf32>
    %290 = vector.extract_strided_slice %286 {offsets = [0, 40], sizes = [2, 16], strides = [1, 1]} : vector<2x88xf32> to vector<2x16xf32>
    %291 = vector.extract_strided_slice %286 {offsets = [0, 56], sizes = [2, 32], strides = [1, 1]} : vector<2x88xf32> to vector<2x32xf32>
    %292 = vector.extract_strided_slice %239 {offsets = [0, 128], sizes = [2, 64], strides = [1, 1]} : vector<2x192xf32> to vector<2x64xf32>
    %293 = arith.addf %288, %171 : vector<2x16xf32>
    %294 = tpu.concatenate %109, %235 in 1 : vector<2x16xf32>, vector<2x16xf32> -> vector<2x32xf32>
    %295 = tpu.concatenate %293, %293 in 1 : vector<2x16xf32>, vector<2x16xf32> -> vector<2x32xf32>
    %296 = arith.addf %295, %294 : vector<2x32xf32>
    %297 = math.tanh %296 : vector<2x32xf32>
    %c0_79 = arith.constant 0 : index
    %c760 = arith.constant 760 : index
    %298 = vector.load %arg2[%c0_79, %c760] : memref<64x768xf32, #tpu.memory_space<vmem>>, vector<32x2xf32>
    %cst_80 = arith.constant dense<0.000000e+00> : vector<2x2xf32>
    %299 = tpu.matmul %297, %298, %cst_80 {dimension_numbers = #tpu.dot_dimension_numbers<[1], [0], [0], [1], [0, 0, 1, 1], [], []>} : vector<2x32xf32>, vector<32x2xf32>, vector<2x2xf32> -> vector<2x2xf32>
    %cst_81 = arith.constant dense<0xFF800000> : vector<2xf32>
    %300 = vector.multi_reduction <maximumf>, %299, %cst_81 [1] : vector<2x2xf32> to vector<2xf32>
    %301 = vector.shape_cast %300 : vector<2xf32> to vector<2x1xf32>
    %302 = vector.broadcast %301 : vector<2x1xf32> to vector<2x2xf32>
    %303 = arith.subf %299, %302 : vector<2x2xf32>
    %304 = math.exp %303 : vector<2x2xf32>
    %cst_82 = arith.constant dense<0.000000e+00> : vector<2xf32>
    %305 = vector.multi_reduction <add>, %304, %cst_82 [1] : vector<2x2xf32> to vector<2xf32>
    %306 = vector.shape_cast %305 : vector<2xf32> to vector<2x1xf32>
    %307 = tpu.reciprocal %306 {approx = true} : vector<2x1xf32> -> vector<2x1xf32>
    %308 = vector.extract_strided_slice %304 {offsets = [0, 0], sizes = [2, 1], strides = [1, 1]} : vector<2x2xf32> to vector<2x1xf32>
    %309 = vector.broadcast %308 : vector<2x1xf32> to vector<2x32xf32>
    %310 = arith.mulf %309, %111 : vector<2x32xf32>
    %311 = vector.extract_strided_slice %304 {offsets = [0, 1], sizes = [2, 1], strides = [1, 1]} : vector<2x2xf32> to vector<2x1xf32>
    %312 = vector.broadcast %311 : vector<2x1xf32> to vector<2x32xf32>
    %313 = arith.mulf %312, %237 : vector<2x32xf32>
    %314 = arith.addf %310, %313 : vector<2x32xf32>
    %315 = vector.broadcast %307 : vector<2x1xf32> to vector<2x32xf32>
    %316 = arith.mulf %314, %315 : vector<2x32xf32>
    %317 = vector.extract_strided_slice %316 {offsets = [0, 0], sizes = [2, 16], strides = [1, 1]} : vector<2x32xf32> to vector<2x16xf32>
    %318 = vector.extract_strided_slice %316 {offsets = [0, 16], sizes = [2, 16], strides = [1, 1]} : vector<2x32xf32> to vector<2x16xf32>
    %c32_83 = arith.constant 32 : index
    %c0_84 = arith.constant 0 : index
    %319 = vector.load %arg2[%c32_83, %c0_84] : memref<64x768xf32, #tpu.memory_space<vmem>>, vector<16x80xf32>
    %cst_85 = arith.constant dense<0.000000e+00> : vector<2x80xf32>
    %320 = tpu.matmul %317, %319, %cst_85 {dimension_numbers = #tpu.dot_dimension_numbers<[1], [0], [0], [1], [0, 0, 1, 1], [], []>} : vector<2x16xf32>, vector<16x80xf32>, vector<2x80xf32> -> vector<2x80xf32>
    %321 = vector.extract_strided_slice %320 {offsets = [0, 0], sizes = [2, 64], strides = [1, 1]} : vector<2x80xf32> to vector<2x64xf32>
    %322 = arith.addf %321, %292 : vector<2x64xf32>
    %323 = vector.extract_strided_slice %320 {offsets = [0, 64], sizes = [2, 16], strides = [1, 1]} : vector<2x80xf32> to vector<2x16xf32>
    %324 = arith.negf %322 : vector<2x64xf32>
    %325 = math.exp %324 : vector<2x64xf32>
    %cst_86 = arith.constant 1.000000e+00 : f32
    %326 = vector.broadcast %cst_86 : f32 to vector<2x64xf32>
    %327 = arith.addf %326, %325 : vector<2x64xf32>
    %328 = arith.divf %326, %327 : vector<2x64xf32>
    %329 = math.tanh %322 : vector<2x64xf32>
    %330 = vector.extract_strided_slice %328 {offsets = [0, 0], sizes = [2, 16], strides = [1, 1]} : vector<2x64xf32> to vector<2x16xf32>
    %331 = vector.extract_strided_slice %328 {offsets = [0, 16], sizes = [2, 16], strides = [1, 1]} : vector<2x64xf32> to vector<2x16xf32>
    %332 = vector.extract_strided_slice %328 {offsets = [0, 32], sizes = [2, 16], strides = [1, 1]} : vector<2x64xf32> to vector<2x16xf32>
    %333 = vector.extract_strided_slice %329 {offsets = [0, 48], sizes = [2, 16], strides = [1, 1]} : vector<2x64xf32> to vector<2x16xf32>
    %334 = arith.mulf %330, %318 : vector<2x16xf32>
    %335 = arith.mulf %332, %333 : vector<2x16xf32>
    %336 = arith.addf %334, %335 : vector<2x16xf32>
    %337 = math.tanh %336 : vector<2x16xf32>
    %338 = arith.mulf %331, %337 : vector<2x16xf32>
    %339 = arith.addf %289, %196 : vector<2x16xf32>
    %340 = tpu.concatenate %110, %236 in 1 : vector<2x16xf32>, vector<2x16xf32> -> vector<2x32xf32>
    %341 = tpu.concatenate %339, %339 in 1 : vector<2x16xf32>, vector<2x16xf32> -> vector<2x32xf32>
    %342 = arith.addf %341, %340 : vector<2x32xf32>
    %343 = math.tanh %342 : vector<2x32xf32>
    %c0_87 = arith.constant 0 : index
    %c764 = arith.constant 764 : index
    %344 = vector.load %arg2[%c0_87, %c764] : memref<64x768xf32, #tpu.memory_space<vmem>>, vector<32x2xf32>
    %cst_88 = arith.constant dense<0.000000e+00> : vector<2x2xf32>
    %345 = tpu.matmul %343, %344, %cst_88 {dimension_numbers = #tpu.dot_dimension_numbers<[1], [0], [0], [1], [0, 0, 1, 1], [], []>} : vector<2x32xf32>, vector<32x2xf32>, vector<2x2xf32> -> vector<2x2xf32>
    %cst_89 = arith.constant dense<0xFF800000> : vector<2xf32>
    %346 = vector.multi_reduction <maximumf>, %345, %cst_89 [1] : vector<2x2xf32> to vector<2xf32>
    %347 = vector.shape_cast %346 : vector<2xf32> to vector<2x1xf32>
    %348 = vector.broadcast %347 : vector<2x1xf32> to vector<2x2xf32>
    %349 = arith.subf %345, %348 : vector<2x2xf32>
    %350 = math.exp %349 : vector<2x2xf32>
    %cst_90 = arith.constant dense<0.000000e+00> : vector<2xf32>
    %351 = vector.multi_reduction <add>, %350, %cst_90 [1] : vector<2x2xf32> to vector<2xf32>
    %352 = vector.shape_cast %351 : vector<2xf32> to vector<2x1xf32>
    %353 = tpu.reciprocal %352 {approx = true} : vector<2x1xf32> -> vector<2x1xf32>
    %354 = vector.extract_strided_slice %350 {offsets = [0, 0], sizes = [2, 1], strides = [1, 1]} : vector<2x2xf32> to vector<2x1xf32>
    %355 = vector.broadcast %354 : vector<2x1xf32> to vector<2x32xf32>
    %356 = arith.mulf %355, %112 : vector<2x32xf32>
    %357 = vector.extract_strided_slice %350 {offsets = [0, 1], sizes = [2, 1], strides = [1, 1]} : vector<2x2xf32> to vector<2x1xf32>
    %358 = vector.broadcast %357 : vector<2x1xf32> to vector<2x32xf32>
    %359 = arith.mulf %358, %238 : vector<2x32xf32>
    %360 = arith.addf %356, %359 : vector<2x32xf32>
    %361 = vector.broadcast %353 : vector<2x1xf32> to vector<2x32xf32>
    %362 = arith.mulf %360, %361 : vector<2x32xf32>
    %363 = vector.extract_strided_slice %362 {offsets = [0, 0], sizes = [2, 16], strides = [1, 1]} : vector<2x32xf32> to vector<2x16xf32>
    %364 = vector.extract_strided_slice %362 {offsets = [0, 16], sizes = [2, 16], strides = [1, 1]} : vector<2x32xf32> to vector<2x16xf32>
    %365 = tpu.concatenate %363, %338 in 1 : vector<2x16xf32>, vector<2x16xf32> -> vector<2x32xf32>
    %c0_91 = arith.constant 0 : index
    %c680_92 = arith.constant 680 : index
    %366 = vector.load %arg2[%c0_91, %c680_92] : memref<64x768xf32, #tpu.memory_space<vmem>>, vector<32x80xf32>
    %cst_93 = arith.constant dense<0.000000e+00> : vector<2x80xf32>
    %367 = tpu.matmul %365, %366, %cst_93 {dimension_numbers = #tpu.dot_dimension_numbers<[1], [0], [0], [1], [0, 0, 1, 1], [], []>} : vector<2x32xf32>, vector<32x80xf32>, vector<2x80xf32> -> vector<2x80xf32>
    %368 = vector.extract_strided_slice %367 {offsets = [0, 0], sizes = [2, 64], strides = [1, 1]} : vector<2x80xf32> to vector<2x64xf32>
    %c52_94 = arith.constant 52 : index
    %c0_95 = arith.constant 0 : index
    %369 = vector.load %arg2[%c52_94, %c0_95] : memref<64x768xf32, #tpu.memory_space<vmem>>, vector<1x64xf32>
    %370 = vector.broadcast %369 : vector<1x64xf32> to vector<2x64xf32>
    %371 = arith.addf %368, %370 : vector<2x64xf32>
    %372 = vector.extract_strided_slice %367 {offsets = [0, 64], sizes = [2, 16], strides = [1, 1]} : vector<2x80xf32> to vector<2x16xf32>
    %373 = arith.negf %371 : vector<2x64xf32>
    %374 = math.exp %373 : vector<2x64xf32>
    %cst_96 = arith.constant 1.000000e+00 : f32
    %375 = vector.broadcast %cst_96 : f32 to vector<2x64xf32>
    %376 = arith.addf %375, %374 : vector<2x64xf32>
    %377 = arith.divf %375, %376 : vector<2x64xf32>
    %378 = math.tanh %371 : vector<2x64xf32>
    %379 = vector.extract_strided_slice %377 {offsets = [0, 0], sizes = [2, 16], strides = [1, 1]} : vector<2x64xf32> to vector<2x16xf32>
    %380 = vector.extract_strided_slice %377 {offsets = [0, 16], sizes = [2, 16], strides = [1, 1]} : vector<2x64xf32> to vector<2x16xf32>
    %381 = vector.extract_strided_slice %377 {offsets = [0, 32], sizes = [2, 16], strides = [1, 1]} : vector<2x64xf32> to vector<2x16xf32>
    %382 = vector.extract_strided_slice %378 {offsets = [0, 48], sizes = [2, 16], strides = [1, 1]} : vector<2x64xf32> to vector<2x16xf32>
    %383 = arith.mulf %379, %364 : vector<2x16xf32>
    %384 = arith.mulf %381, %382 : vector<2x16xf32>
    %385 = arith.addf %383, %384 : vector<2x16xf32>
    %386 = math.tanh %385 : vector<2x16xf32>
    %387 = arith.mulf %380, %386 : vector<2x16xf32>
    %c53_97 = arith.constant 53 : index
    %c0_98 = arith.constant 0 : index
    %388 = vector.load %arg2[%c53_97, %c0_98] : memref<64x768xf32, #tpu.memory_space<vmem>>, vector<1x16xf32>
    %389 = vector.broadcast %388 : vector<1x16xf32> to vector<2x16xf32>
    %390 = arith.mulf %387, %389 : vector<2x16xf32>
    %cst_99 = arith.constant dense<0.000000e+00> : vector<2xf32>
    %391 = vector.multi_reduction <add>, %390, %cst_99 [1] : vector<2x16xf32> to vector<2xf32>
    %392 = vector.shape_cast %391 : vector<2xf32> to vector<2x1xf32>
    %c54_100 = arith.constant 54 : index
    %c0_101 = arith.constant 0 : index
    %393 = vector.load %arg2[%c54_100, %c0_101] : memref<64x768xf32, #tpu.memory_space<vmem>>, vector<1x1xf32>
    %394 = vector.broadcast %393 : vector<1x1xf32> to vector<2x1xf32>
    %395 = arith.addf %392, %394 : vector<2x1xf32>
    %396 = arith.negf %395 : vector<2x1xf32>
    %397 = math.exp %396 : vector<2x1xf32>
    %cst_102 = arith.constant 1.000000e+00 : f32
    %398 = vector.broadcast %cst_102 : f32 to vector<2x1xf32>
    %399 = arith.addf %398, %397 : vector<2x1xf32>
    %400 = arith.divf %398, %399 : vector<2x1xf32>
    %401 = math.tanh %291 : vector<2x32xf32>
    %c0_103 = arith.constant 0 : index
    %c664_104 = arith.constant 664 : index
    %402 = vector.load %arg2[%c0_103, %c664_104] : memref<64x768xf32, #tpu.memory_space<vmem>>, vector<32x16xf32>
    %cst_105 = arith.constant dense<0.000000e+00> : vector<2x16xf32>
    %403 = tpu.matmul %401, %402, %cst_105 {dimension_numbers = #tpu.dot_dimension_numbers<[1], [0], [0], [1], [0, 0, 1, 1], [], []>} : vector<2x32xf32>, vector<32x16xf32>, vector<2x16xf32> -> vector<2x16xf32>
    %404 = arith.addf %290, %403 : vector<2x16xf32>
    %405 = math.tanh %404 : vector<2x16xf32>
    %c32_106 = arith.constant 32 : index
    %c80_107 = arith.constant 80 : index
    %406 = vector.load %arg2[%c32_106, %c80_107] : memref<64x768xf32, #tpu.memory_space<vmem>>, vector<16x32xf32>
    %cst_108 = arith.constant dense<0.000000e+00> : vector<2x32xf32>
    %407 = tpu.matmul %405, %406, %cst_108 {dimension_numbers = #tpu.dot_dimension_numbers<[1], [0], [0], [1], [0, 0, 1, 1], [], []>} : vector<2x16xf32>, vector<16x32xf32>, vector<2x32xf32> -> vector<2x32xf32>
    %c51_109 = arith.constant 51 : index
    %c0_110 = arith.constant 0 : index
    %408 = vector.load %arg2[%c51_109, %c0_110] : memref<64x768xf32, #tpu.memory_space<vmem>>, vector<1x32xf32>
    %409 = vector.broadcast %408 : vector<1x32xf32> to vector<2x32xf32>
    %410 = arith.addf %407, %409 : vector<2x32xf32>
    %411 = vector.extract_strided_slice %410 {offsets = [0, 0], sizes = [2, 16], strides = [1, 1]} : vector<2x32xf32> to vector<2x16xf32>
    %412 = vector.extract_strided_slice %410 {offsets = [0, 16], sizes = [2, 16], strides = [1, 1]} : vector<2x32xf32> to vector<2x16xf32>
    %413 = tpu.concatenate %405, %336 in 1 : vector<2x16xf32>, vector<2x16xf32> -> vector<2x32xf32>
    %414 = tpu.concatenate %405, %385 in 1 : vector<2x16xf32>, vector<2x16xf32> -> vector<2x32xf32>
    %c24 = arith.constant 24 : index
    %c0_111 = arith.constant 0 : index
    %415 = vector.load %arg4[%c24, %c0_111] : memref<64x192xf32, #tpu.memory_space<vmem>>, vector<2x192xf32>
    %416 = vector.extract_strided_slice %415 {offsets = [0, 0], sizes = [2, 128], strides = [1, 1]} : vector<2x192xf32> to vector<2x128xf32>
    %417 = arith.addf %416, %264 : vector<2x128xf32>
    %418 = arith.negf %417 : vector<2x128xf32>
    %419 = math.exp %418 : vector<2x128xf32>
    %cst_112 = arith.constant 1.000000e+00 : f32
    %420 = vector.broadcast %cst_112 : f32 to vector<2x128xf32>
    %421 = arith.addf %420, %419 : vector<2x128xf32>
    %422 = arith.divf %420, %421 : vector<2x128xf32>
    %423 = math.tanh %417 : vector<2x128xf32>
    %424 = vector.extract_strided_slice %422 {offsets = [0, 0], sizes = [2, 32], strides = [1, 1]} : vector<2x128xf32> to vector<2x32xf32>
    %425 = vector.extract_strided_slice %422 {offsets = [0, 32], sizes = [2, 32], strides = [1, 1]} : vector<2x128xf32> to vector<2x32xf32>
    %426 = vector.extract_strided_slice %423 {offsets = [0, 64], sizes = [2, 32], strides = [1, 1]} : vector<2x128xf32> to vector<2x32xf32>
    %427 = vector.extract_strided_slice %422 {offsets = [0, 96], sizes = [2, 32], strides = [1, 1]} : vector<2x128xf32> to vector<2x32xf32>
    %428 = arith.mulf %425, %254 : vector<2x32xf32>
    %429 = arith.mulf %424, %426 : vector<2x32xf32>
    %430 = arith.addf %428, %429 : vector<2x32xf32>
    %431 = math.tanh %430 : vector<2x32xf32>
    %432 = arith.mulf %427, %431 : vector<2x32xf32>
    %c0_113 = arith.constant 0 : index
    %c0_114 = arith.constant 0 : index
    %433 = vector.load %arg2[%c0_113, %c0_114] : memref<64x768xf32, #tpu.memory_space<vmem>>, vector<32x256xf32>
    %cst_115 = arith.constant dense<0.000000e+00> : vector<2x256xf32>
    %434 = tpu.matmul %432, %433, %cst_115 {dimension_numbers = #tpu.dot_dimension_numbers<[1], [0], [0], [1], [0, 0, 1, 1], [], []>} : vector<2x32xf32>, vector<32x256xf32>, vector<2x256xf32> -> vector<2x256xf32>
    %435 = vector.extract_strided_slice %434 {offsets = [0, 0], sizes = [2, 128], strides = [1, 1]} : vector<2x256xf32> to vector<2x128xf32>
    %436 = arith.addf %435, %282 : vector<2x128xf32>
    %c49_116 = arith.constant 49 : index
    %c0_117 = arith.constant 0 : index
    %437 = vector.load %arg2[%c49_116, %c0_117] : memref<64x768xf32, #tpu.memory_space<vmem>>, vector<1x128xf32>
    %438 = vector.broadcast %437 : vector<1x128xf32> to vector<2x128xf32>
    %439 = arith.addf %436, %438 : vector<2x128xf32>
    %440 = vector.extract_strided_slice %434 {offsets = [0, 128], sizes = [2, 128], strides = [1, 1]} : vector<2x256xf32> to vector<2x128xf32>
    %441 = arith.negf %439 : vector<2x128xf32>
    %442 = math.exp %441 : vector<2x128xf32>
    %cst_118 = arith.constant 1.000000e+00 : f32
    %443 = vector.broadcast %cst_118 : f32 to vector<2x128xf32>
    %444 = arith.addf %443, %442 : vector<2x128xf32>
    %445 = arith.divf %443, %444 : vector<2x128xf32>
    %446 = math.tanh %439 : vector<2x128xf32>
    %447 = vector.extract_strided_slice %445 {offsets = [0, 0], sizes = [2, 32], strides = [1, 1]} : vector<2x128xf32> to vector<2x32xf32>
    %448 = vector.extract_strided_slice %445 {offsets = [0, 32], sizes = [2, 32], strides = [1, 1]} : vector<2x128xf32> to vector<2x32xf32>
    %449 = vector.extract_strided_slice %446 {offsets = [0, 64], sizes = [2, 32], strides = [1, 1]} : vector<2x128xf32> to vector<2x32xf32>
    %450 = vector.extract_strided_slice %445 {offsets = [0, 96], sizes = [2, 32], strides = [1, 1]} : vector<2x128xf32> to vector<2x32xf32>
    %451 = arith.mulf %448, %277 : vector<2x32xf32>
    %452 = arith.mulf %447, %449 : vector<2x32xf32>
    %453 = arith.addf %451, %452 : vector<2x32xf32>
    %454 = math.tanh %453 : vector<2x32xf32>
    %455 = arith.mulf %450, %454 : vector<2x32xf32>
    %c0_119 = arith.constant 0 : index
    %c256_120 = arith.constant 256 : index
    %456 = vector.load %arg2[%c0_119, %c256_120] : memref<64x768xf32, #tpu.memory_space<vmem>>, vector<32x216xf32>
    %cst_121 = arith.constant dense<0.000000e+00> : vector<2x216xf32>
    %457 = tpu.matmul %455, %456, %cst_121 {dimension_numbers = #tpu.dot_dimension_numbers<[1], [0], [0], [1], [0, 0, 1, 1], [], []>} : vector<2x32xf32>, vector<32x216xf32>, vector<2x216xf32> -> vector<2x216xf32>
    %458 = vector.extract_strided_slice %457 {offsets = [0, 0], sizes = [2, 128], strides = [1, 1]} : vector<2x216xf32> to vector<2x128xf32>
    %459 = vector.extract_strided_slice %457 {offsets = [0, 128], sizes = [2, 88], strides = [1, 1]} : vector<2x216xf32> to vector<2x88xf32>
    %c50_122 = arith.constant 50 : index
    %c0_123 = arith.constant 0 : index
    %460 = vector.load %arg2[%c50_122, %c0_123] : memref<64x768xf32, #tpu.memory_space<vmem>>, vector<1x88xf32>
    %461 = vector.broadcast %460 : vector<1x88xf32> to vector<2x88xf32>
    %462 = arith.addf %459, %461 : vector<2x88xf32>
    %463 = vector.extract_strided_slice %462 {offsets = [0, 0], sizes = [2, 8], strides = [1, 1]} : vector<2x88xf32> to vector<2x8xf32>
    %464 = vector.extract_strided_slice %462 {offsets = [0, 8], sizes = [2, 16], strides = [1, 1]} : vector<2x88xf32> to vector<2x16xf32>
    %465 = vector.extract_strided_slice %462 {offsets = [0, 24], sizes = [2, 16], strides = [1, 1]} : vector<2x88xf32> to vector<2x16xf32>
    %466 = vector.extract_strided_slice %462 {offsets = [0, 40], sizes = [2, 16], strides = [1, 1]} : vector<2x88xf32> to vector<2x16xf32>
    %467 = vector.extract_strided_slice %462 {offsets = [0, 56], sizes = [2, 32], strides = [1, 1]} : vector<2x88xf32> to vector<2x32xf32>
    %468 = vector.extract_strided_slice %415 {offsets = [0, 128], sizes = [2, 64], strides = [1, 1]} : vector<2x192xf32> to vector<2x64xf32>
    %469 = arith.addf %464, %323 : vector<2x16xf32>
    %470 = tpu.concatenate %109, %235, %411 in 1 : vector<2x16xf32>, vector<2x16xf32>, vector<2x16xf32> -> vector<2x48xf32>
    %471 = tpu.concatenate %469, %469, %469 in 1 : vector<2x16xf32>, vector<2x16xf32>, vector<2x16xf32> -> vector<2x48xf32>
    %472 = arith.addf %471, %470 : vector<2x48xf32>
    %473 = math.tanh %472 : vector<2x48xf32>
    %c0_124 = arith.constant 0 : index
    %c760_125 = arith.constant 760 : index
    %474 = vector.load %arg2[%c0_124, %c760_125] : memref<64x768xf32, #tpu.memory_space<vmem>>, vector<48x3xf32>
    %cst_126 = arith.constant dense<0.000000e+00> : vector<2x3xf32>
    %475 = tpu.matmul %473, %474, %cst_126 {dimension_numbers = #tpu.dot_dimension_numbers<[1], [0], [0], [1], [0, 0, 1, 1], [], []>} : vector<2x48xf32>, vector<48x3xf32>, vector<2x3xf32> -> vector<2x3xf32>
    %cst_127 = arith.constant dense<0xFF800000> : vector<2xf32>
    %476 = vector.multi_reduction <maximumf>, %475, %cst_127 [1] : vector<2x3xf32> to vector<2xf32>
    %477 = vector.shape_cast %476 : vector<2xf32> to vector<2x1xf32>
    %478 = vector.broadcast %477 : vector<2x1xf32> to vector<2x3xf32>
    %479 = arith.subf %475, %478 : vector<2x3xf32>
    %480 = math.exp %479 : vector<2x3xf32>
    %cst_128 = arith.constant dense<0.000000e+00> : vector<2xf32>
    %481 = vector.multi_reduction <add>, %480, %cst_128 [1] : vector<2x3xf32> to vector<2xf32>
    %482 = vector.shape_cast %481 : vector<2xf32> to vector<2x1xf32>
    %483 = tpu.reciprocal %482 {approx = true} : vector<2x1xf32> -> vector<2x1xf32>
    %484 = vector.extract_strided_slice %480 {offsets = [0, 0], sizes = [2, 1], strides = [1, 1]} : vector<2x3xf32> to vector<2x1xf32>
    %485 = vector.broadcast %484 : vector<2x1xf32> to vector<2x32xf32>
    %486 = arith.mulf %485, %111 : vector<2x32xf32>
    %487 = vector.extract_strided_slice %480 {offsets = [0, 1], sizes = [2, 1], strides = [1, 1]} : vector<2x3xf32> to vector<2x1xf32>
    %488 = vector.broadcast %487 : vector<2x1xf32> to vector<2x32xf32>
    %489 = arith.mulf %488, %237 : vector<2x32xf32>
    %490 = arith.addf %486, %489 : vector<2x32xf32>
    %491 = vector.extract_strided_slice %480 {offsets = [0, 2], sizes = [2, 1], strides = [1, 1]} : vector<2x3xf32> to vector<2x1xf32>
    %492 = vector.broadcast %491 : vector<2x1xf32> to vector<2x32xf32>
    %493 = arith.mulf %492, %413 : vector<2x32xf32>
    %494 = arith.addf %490, %493 : vector<2x32xf32>
    %495 = vector.broadcast %483 : vector<2x1xf32> to vector<2x32xf32>
    %496 = arith.mulf %494, %495 : vector<2x32xf32>
    %497 = vector.extract_strided_slice %496 {offsets = [0, 0], sizes = [2, 16], strides = [1, 1]} : vector<2x32xf32> to vector<2x16xf32>
    %498 = vector.extract_strided_slice %496 {offsets = [0, 16], sizes = [2, 16], strides = [1, 1]} : vector<2x32xf32> to vector<2x16xf32>
    %c32_129 = arith.constant 32 : index
    %c0_130 = arith.constant 0 : index
    %499 = vector.load %arg2[%c32_129, %c0_130] : memref<64x768xf32, #tpu.memory_space<vmem>>, vector<16x80xf32>
    %cst_131 = arith.constant dense<0.000000e+00> : vector<2x80xf32>
    %500 = tpu.matmul %497, %499, %cst_131 {dimension_numbers = #tpu.dot_dimension_numbers<[1], [0], [0], [1], [0, 0, 1, 1], [], []>} : vector<2x16xf32>, vector<16x80xf32>, vector<2x80xf32> -> vector<2x80xf32>
    %501 = vector.extract_strided_slice %500 {offsets = [0, 0], sizes = [2, 64], strides = [1, 1]} : vector<2x80xf32> to vector<2x64xf32>
    %502 = arith.addf %501, %468 : vector<2x64xf32>
    %503 = vector.extract_strided_slice %500 {offsets = [0, 64], sizes = [2, 16], strides = [1, 1]} : vector<2x80xf32> to vector<2x16xf32>
    %504 = arith.negf %502 : vector<2x64xf32>
    %505 = math.exp %504 : vector<2x64xf32>
    %cst_132 = arith.constant 1.000000e+00 : f32
    %506 = vector.broadcast %cst_132 : f32 to vector<2x64xf32>
    %507 = arith.addf %506, %505 : vector<2x64xf32>
    %508 = arith.divf %506, %507 : vector<2x64xf32>
    %509 = math.tanh %502 : vector<2x64xf32>
    %510 = vector.extract_strided_slice %508 {offsets = [0, 0], sizes = [2, 16], strides = [1, 1]} : vector<2x64xf32> to vector<2x16xf32>
    %511 = vector.extract_strided_slice %508 {offsets = [0, 16], sizes = [2, 16], strides = [1, 1]} : vector<2x64xf32> to vector<2x16xf32>
    %512 = vector.extract_strided_slice %508 {offsets = [0, 32], sizes = [2, 16], strides = [1, 1]} : vector<2x64xf32> to vector<2x16xf32>
    %513 = vector.extract_strided_slice %509 {offsets = [0, 48], sizes = [2, 16], strides = [1, 1]} : vector<2x64xf32> to vector<2x16xf32>
    %514 = arith.mulf %510, %498 : vector<2x16xf32>
    %515 = arith.mulf %512, %513 : vector<2x16xf32>
    %516 = arith.addf %514, %515 : vector<2x16xf32>
    %517 = math.tanh %516 : vector<2x16xf32>
    %518 = arith.mulf %511, %517 : vector<2x16xf32>
    %519 = arith.addf %465, %372 : vector<2x16xf32>
    %520 = tpu.concatenate %110, %236, %412 in 1 : vector<2x16xf32>, vector<2x16xf32>, vector<2x16xf32> -> vector<2x48xf32>
    %521 = tpu.concatenate %519, %519, %519 in 1 : vector<2x16xf32>, vector<2x16xf32>, vector<2x16xf32> -> vector<2x48xf32>
    %522 = arith.addf %521, %520 : vector<2x48xf32>
    %523 = math.tanh %522 : vector<2x48xf32>
    %c0_133 = arith.constant 0 : index
    %c764_134 = arith.constant 764 : index
    %524 = vector.load %arg2[%c0_133, %c764_134] : memref<64x768xf32, #tpu.memory_space<vmem>>, vector<48x3xf32>
    %cst_135 = arith.constant dense<0.000000e+00> : vector<2x3xf32>
    %525 = tpu.matmul %523, %524, %cst_135 {dimension_numbers = #tpu.dot_dimension_numbers<[1], [0], [0], [1], [0, 0, 1, 1], [], []>} : vector<2x48xf32>, vector<48x3xf32>, vector<2x3xf32> -> vector<2x3xf32>
    %cst_136 = arith.constant dense<0xFF800000> : vector<2xf32>
    %526 = vector.multi_reduction <maximumf>, %525, %cst_136 [1] : vector<2x3xf32> to vector<2xf32>
    %527 = vector.shape_cast %526 : vector<2xf32> to vector<2x1xf32>
    %528 = vector.broadcast %527 : vector<2x1xf32> to vector<2x3xf32>
    %529 = arith.subf %525, %528 : vector<2x3xf32>
    %530 = math.exp %529 : vector<2x3xf32>
    %cst_137 = arith.constant dense<0.000000e+00> : vector<2xf32>
    %531 = vector.multi_reduction <add>, %530, %cst_137 [1] : vector<2x3xf32> to vector<2xf32>
    %532 = vector.shape_cast %531 : vector<2xf32> to vector<2x1xf32>
    %533 = tpu.reciprocal %532 {approx = true} : vector<2x1xf32> -> vector<2x1xf32>
    %534 = vector.extract_strided_slice %530 {offsets = [0, 0], sizes = [2, 1], strides = [1, 1]} : vector<2x3xf32> to vector<2x1xf32>
    %535 = vector.broadcast %534 : vector<2x1xf32> to vector<2x32xf32>
    %536 = arith.mulf %535, %112 : vector<2x32xf32>
    %537 = vector.extract_strided_slice %530 {offsets = [0, 1], sizes = [2, 1], strides = [1, 1]} : vector<2x3xf32> to vector<2x1xf32>
    %538 = vector.broadcast %537 : vector<2x1xf32> to vector<2x32xf32>
    %539 = arith.mulf %538, %238 : vector<2x32xf32>
    %540 = arith.addf %536, %539 : vector<2x32xf32>
    %541 = vector.extract_strided_slice %530 {offsets = [0, 2], sizes = [2, 1], strides = [1, 1]} : vector<2x3xf32> to vector<2x1xf32>
    %542 = vector.broadcast %541 : vector<2x1xf32> to vector<2x32xf32>
    %543 = arith.mulf %542, %414 : vector<2x32xf32>
    %544 = arith.addf %540, %543 : vector<2x32xf32>
    %545 = vector.broadcast %533 : vector<2x1xf32> to vector<2x32xf32>
    %546 = arith.mulf %544, %545 : vector<2x32xf32>
    %547 = vector.extract_strided_slice %546 {offsets = [0, 0], sizes = [2, 16], strides = [1, 1]} : vector<2x32xf32> to vector<2x16xf32>
    %548 = vector.extract_strided_slice %546 {offsets = [0, 16], sizes = [2, 16], strides = [1, 1]} : vector<2x32xf32> to vector<2x16xf32>
    %549 = tpu.concatenate %547, %518 in 1 : vector<2x16xf32>, vector<2x16xf32> -> vector<2x32xf32>
    %c0_138 = arith.constant 0 : index
    %c680_139 = arith.constant 680 : index
    %550 = vector.load %arg2[%c0_138, %c680_139] : memref<64x768xf32, #tpu.memory_space<vmem>>, vector<32x80xf32>
    %cst_140 = arith.constant dense<0.000000e+00> : vector<2x80xf32>
    %551 = tpu.matmul %549, %550, %cst_140 {dimension_numbers = #tpu.dot_dimension_numbers<[1], [0], [0], [1], [0, 0, 1, 1], [], []>} : vector<2x32xf32>, vector<32x80xf32>, vector<2x80xf32> -> vector<2x80xf32>
    %552 = vector.extract_strided_slice %551 {offsets = [0, 0], sizes = [2, 64], strides = [1, 1]} : vector<2x80xf32> to vector<2x64xf32>
    %c52_141 = arith.constant 52 : index
    %c0_142 = arith.constant 0 : index
    %553 = vector.load %arg2[%c52_141, %c0_142] : memref<64x768xf32, #tpu.memory_space<vmem>>, vector<1x64xf32>
    %554 = vector.broadcast %553 : vector<1x64xf32> to vector<2x64xf32>
    %555 = arith.addf %552, %554 : vector<2x64xf32>
    %556 = vector.extract_strided_slice %551 {offsets = [0, 64], sizes = [2, 16], strides = [1, 1]} : vector<2x80xf32> to vector<2x16xf32>
    %557 = arith.negf %555 : vector<2x64xf32>
    %558 = math.exp %557 : vector<2x64xf32>
    %cst_143 = arith.constant 1.000000e+00 : f32
    %559 = vector.broadcast %cst_143 : f32 to vector<2x64xf32>
    %560 = arith.addf %559, %558 : vector<2x64xf32>
    %561 = arith.divf %559, %560 : vector<2x64xf32>
    %562 = math.tanh %555 : vector<2x64xf32>
    %563 = vector.extract_strided_slice %561 {offsets = [0, 0], sizes = [2, 16], strides = [1, 1]} : vector<2x64xf32> to vector<2x16xf32>
    %564 = vector.extract_strided_slice %561 {offsets = [0, 16], sizes = [2, 16], strides = [1, 1]} : vector<2x64xf32> to vector<2x16xf32>
    %565 = vector.extract_strided_slice %561 {offsets = [0, 32], sizes = [2, 16], strides = [1, 1]} : vector<2x64xf32> to vector<2x16xf32>
    %566 = vector.extract_strided_slice %562 {offsets = [0, 48], sizes = [2, 16], strides = [1, 1]} : vector<2x64xf32> to vector<2x16xf32>
    %567 = arith.mulf %563, %548 : vector<2x16xf32>
    %568 = arith.mulf %565, %566 : vector<2x16xf32>
    %569 = arith.addf %567, %568 : vector<2x16xf32>
    %570 = math.tanh %569 : vector<2x16xf32>
    %571 = arith.mulf %564, %570 : vector<2x16xf32>
    %c53_144 = arith.constant 53 : index
    %c0_145 = arith.constant 0 : index
    %572 = vector.load %arg2[%c53_144, %c0_145] : memref<64x768xf32, #tpu.memory_space<vmem>>, vector<1x16xf32>
    %573 = vector.broadcast %572 : vector<1x16xf32> to vector<2x16xf32>
    %574 = arith.mulf %571, %573 : vector<2x16xf32>
    %cst_146 = arith.constant dense<0.000000e+00> : vector<2xf32>
    %575 = vector.multi_reduction <add>, %574, %cst_146 [1] : vector<2x16xf32> to vector<2xf32>
    %576 = vector.shape_cast %575 : vector<2xf32> to vector<2x1xf32>
    %c54_147 = arith.constant 54 : index
    %c0_148 = arith.constant 0 : index
    %577 = vector.load %arg2[%c54_147, %c0_148] : memref<64x768xf32, #tpu.memory_space<vmem>>, vector<1x1xf32>
    %578 = vector.broadcast %577 : vector<1x1xf32> to vector<2x1xf32>
    %579 = arith.addf %576, %578 : vector<2x1xf32>
    %580 = arith.negf %579 : vector<2x1xf32>
    %581 = math.exp %580 : vector<2x1xf32>
    %cst_149 = arith.constant 1.000000e+00 : f32
    %582 = vector.broadcast %cst_149 : f32 to vector<2x1xf32>
    %583 = arith.addf %582, %581 : vector<2x1xf32>
    %584 = arith.divf %582, %583 : vector<2x1xf32>
    %585 = math.tanh %467 : vector<2x32xf32>
    %c0_150 = arith.constant 0 : index
    %c664_151 = arith.constant 664 : index
    %586 = vector.load %arg2[%c0_150, %c664_151] : memref<64x768xf32, #tpu.memory_space<vmem>>, vector<32x16xf32>
    %cst_152 = arith.constant dense<0.000000e+00> : vector<2x16xf32>
    %587 = tpu.matmul %585, %586, %cst_152 {dimension_numbers = #tpu.dot_dimension_numbers<[1], [0], [0], [1], [0, 0, 1, 1], [], []>} : vector<2x32xf32>, vector<32x16xf32>, vector<2x16xf32> -> vector<2x16xf32>
    %588 = arith.addf %466, %587 : vector<2x16xf32>
    %589 = math.tanh %588 : vector<2x16xf32>
    %c32_153 = arith.constant 32 : index
    %c80_154 = arith.constant 80 : index
    %590 = vector.load %arg2[%c32_153, %c80_154] : memref<64x768xf32, #tpu.memory_space<vmem>>, vector<16x32xf32>
    %cst_155 = arith.constant dense<0.000000e+00> : vector<2x32xf32>
    %591 = tpu.matmul %589, %590, %cst_155 {dimension_numbers = #tpu.dot_dimension_numbers<[1], [0], [0], [1], [0, 0, 1, 1], [], []>} : vector<2x16xf32>, vector<16x32xf32>, vector<2x32xf32> -> vector<2x32xf32>
    %c51_156 = arith.constant 51 : index
    %c0_157 = arith.constant 0 : index
    %592 = vector.load %arg2[%c51_156, %c0_157] : memref<64x768xf32, #tpu.memory_space<vmem>>, vector<1x32xf32>
    %593 = vector.broadcast %592 : vector<1x32xf32> to vector<2x32xf32>
    %594 = arith.addf %591, %593 : vector<2x32xf32>
    %595 = vector.extract_strided_slice %594 {offsets = [0, 0], sizes = [2, 16], strides = [1, 1]} : vector<2x32xf32> to vector<2x16xf32>
    %596 = vector.extract_strided_slice %594 {offsets = [0, 16], sizes = [2, 16], strides = [1, 1]} : vector<2x32xf32> to vector<2x16xf32>
    %597 = tpu.concatenate %589, %516 in 1 : vector<2x16xf32>, vector<2x16xf32> -> vector<2x32xf32>
    %598 = tpu.concatenate %589, %569 in 1 : vector<2x16xf32>, vector<2x16xf32> -> vector<2x32xf32>
    %c32_158 = arith.constant 32 : index
    %c0_159 = arith.constant 0 : index
    %599 = vector.load %arg4[%c32_158, %c0_159] : memref<64x192xf32, #tpu.memory_space<vmem>>, vector<2x192xf32>
    %600 = vector.extract_strided_slice %599 {offsets = [0, 0], sizes = [2, 128], strides = [1, 1]} : vector<2x192xf32> to vector<2x128xf32>
    %601 = arith.addf %600, %440 : vector<2x128xf32>
    %602 = arith.negf %601 : vector<2x128xf32>
    %603 = math.exp %602 : vector<2x128xf32>
    %cst_160 = arith.constant 1.000000e+00 : f32
    %604 = vector.broadcast %cst_160 : f32 to vector<2x128xf32>
    %605 = arith.addf %604, %603 : vector<2x128xf32>
    %606 = arith.divf %604, %605 : vector<2x128xf32>
    %607 = math.tanh %601 : vector<2x128xf32>
    %608 = vector.extract_strided_slice %606 {offsets = [0, 0], sizes = [2, 32], strides = [1, 1]} : vector<2x128xf32> to vector<2x32xf32>
    %609 = vector.extract_strided_slice %606 {offsets = [0, 32], sizes = [2, 32], strides = [1, 1]} : vector<2x128xf32> to vector<2x32xf32>
    %610 = vector.extract_strided_slice %607 {offsets = [0, 64], sizes = [2, 32], strides = [1, 1]} : vector<2x128xf32> to vector<2x32xf32>
    %611 = vector.extract_strided_slice %606 {offsets = [0, 96], sizes = [2, 32], strides = [1, 1]} : vector<2x128xf32> to vector<2x32xf32>
    %612 = arith.mulf %609, %430 : vector<2x32xf32>
    %613 = arith.mulf %608, %610 : vector<2x32xf32>
    %614 = arith.addf %612, %613 : vector<2x32xf32>
    %615 = math.tanh %614 : vector<2x32xf32>
    %616 = arith.mulf %611, %615 : vector<2x32xf32>
    %c0_161 = arith.constant 0 : index
    %c0_162 = arith.constant 0 : index
    %617 = vector.load %arg2[%c0_161, %c0_162] : memref<64x768xf32, #tpu.memory_space<vmem>>, vector<32x256xf32>
    %cst_163 = arith.constant dense<0.000000e+00> : vector<2x256xf32>
    %618 = tpu.matmul %616, %617, %cst_163 {dimension_numbers = #tpu.dot_dimension_numbers<[1], [0], [0], [1], [0, 0, 1, 1], [], []>} : vector<2x32xf32>, vector<32x256xf32>, vector<2x256xf32> -> vector<2x256xf32>
    %619 = vector.extract_strided_slice %618 {offsets = [0, 0], sizes = [2, 128], strides = [1, 1]} : vector<2x256xf32> to vector<2x128xf32>
    %620 = arith.addf %619, %458 : vector<2x128xf32>
    %c49_164 = arith.constant 49 : index
    %c0_165 = arith.constant 0 : index
    %621 = vector.load %arg2[%c49_164, %c0_165] : memref<64x768xf32, #tpu.memory_space<vmem>>, vector<1x128xf32>
    %622 = vector.broadcast %621 : vector<1x128xf32> to vector<2x128xf32>
    %623 = arith.addf %620, %622 : vector<2x128xf32>
    %624 = vector.extract_strided_slice %618 {offsets = [0, 128], sizes = [2, 128], strides = [1, 1]} : vector<2x256xf32> to vector<2x128xf32>
    %625 = arith.negf %623 : vector<2x128xf32>
    %626 = math.exp %625 : vector<2x128xf32>
    %cst_166 = arith.constant 1.000000e+00 : f32
    %627 = vector.broadcast %cst_166 : f32 to vector<2x128xf32>
    %628 = arith.addf %627, %626 : vector<2x128xf32>
    %629 = arith.divf %627, %628 : vector<2x128xf32>
    %630 = math.tanh %623 : vector<2x128xf32>
    %631 = vector.extract_strided_slice %629 {offsets = [0, 0], sizes = [2, 32], strides = [1, 1]} : vector<2x128xf32> to vector<2x32xf32>
    %632 = vector.extract_strided_slice %629 {offsets = [0, 32], sizes = [2, 32], strides = [1, 1]} : vector<2x128xf32> to vector<2x32xf32>
    %633 = vector.extract_strided_slice %630 {offsets = [0, 64], sizes = [2, 32], strides = [1, 1]} : vector<2x128xf32> to vector<2x32xf32>
    %634 = vector.extract_strided_slice %629 {offsets = [0, 96], sizes = [2, 32], strides = [1, 1]} : vector<2x128xf32> to vector<2x32xf32>
    %635 = arith.mulf %632, %453 : vector<2x32xf32>
    %636 = arith.mulf %631, %633 : vector<2x32xf32>
    %637 = arith.addf %635, %636 : vector<2x32xf32>
    %638 = math.tanh %637 : vector<2x32xf32>
    %639 = arith.mulf %634, %638 : vector<2x32xf32>
    %c0_167 = arith.constant 0 : index
    %c256_168 = arith.constant 256 : index
    %640 = vector.load %arg2[%c0_167, %c256_168] : memref<64x768xf32, #tpu.memory_space<vmem>>, vector<32x216xf32>
    %cst_169 = arith.constant dense<0.000000e+00> : vector<2x216xf32>
    %641 = tpu.matmul %639, %640, %cst_169 {dimension_numbers = #tpu.dot_dimension_numbers<[1], [0], [0], [1], [0, 0, 1, 1], [], []>} : vector<2x32xf32>, vector<32x216xf32>, vector<2x216xf32> -> vector<2x216xf32>
    %642 = vector.extract_strided_slice %641 {offsets = [0, 0], sizes = [2, 128], strides = [1, 1]} : vector<2x216xf32> to vector<2x128xf32>
    %643 = vector.extract_strided_slice %641 {offsets = [0, 128], sizes = [2, 88], strides = [1, 1]} : vector<2x216xf32> to vector<2x88xf32>
    %c50_170 = arith.constant 50 : index
    %c0_171 = arith.constant 0 : index
    %644 = vector.load %arg2[%c50_170, %c0_171] : memref<64x768xf32, #tpu.memory_space<vmem>>, vector<1x88xf32>
    %645 = vector.broadcast %644 : vector<1x88xf32> to vector<2x88xf32>
    %646 = arith.addf %643, %645 : vector<2x88xf32>
    %647 = vector.extract_strided_slice %646 {offsets = [0, 0], sizes = [2, 8], strides = [1, 1]} : vector<2x88xf32> to vector<2x8xf32>
    %648 = vector.extract_strided_slice %646 {offsets = [0, 8], sizes = [2, 16], strides = [1, 1]} : vector<2x88xf32> to vector<2x16xf32>
    %649 = vector.extract_strided_slice %646 {offsets = [0, 24], sizes = [2, 16], strides = [1, 1]} : vector<2x88xf32> to vector<2x16xf32>
    %650 = vector.extract_strided_slice %646 {offsets = [0, 40], sizes = [2, 16], strides = [1, 1]} : vector<2x88xf32> to vector<2x16xf32>
    %651 = vector.extract_strided_slice %646 {offsets = [0, 56], sizes = [2, 32], strides = [1, 1]} : vector<2x88xf32> to vector<2x32xf32>
    %652 = vector.extract_strided_slice %599 {offsets = [0, 128], sizes = [2, 64], strides = [1, 1]} : vector<2x192xf32> to vector<2x64xf32>
    %653 = arith.addf %648, %503 : vector<2x16xf32>
    %654 = tpu.concatenate %109, %235, %411, %595 in 1 : vector<2x16xf32>, vector<2x16xf32>, vector<2x16xf32>, vector<2x16xf32> -> vector<2x64xf32>
    %655 = tpu.concatenate %653, %653, %653, %653 in 1 : vector<2x16xf32>, vector<2x16xf32>, vector<2x16xf32>, vector<2x16xf32> -> vector<2x64xf32>
    %656 = arith.addf %655, %654 : vector<2x64xf32>
    %657 = math.tanh %656 : vector<2x64xf32>
    %c0_172 = arith.constant 0 : index
    %c760_173 = arith.constant 760 : index
    %658 = vector.load %arg2[%c0_172, %c760_173] : memref<64x768xf32, #tpu.memory_space<vmem>>, vector<64x4xf32>
    %cst_174 = arith.constant dense<0.000000e+00> : vector<2x4xf32>
    %659 = tpu.matmul %657, %658, %cst_174 {dimension_numbers = #tpu.dot_dimension_numbers<[1], [0], [0], [1], [0, 0, 1, 1], [], []>} : vector<2x64xf32>, vector<64x4xf32>, vector<2x4xf32> -> vector<2x4xf32>
    %cst_175 = arith.constant dense<0xFF800000> : vector<2xf32>
    %660 = vector.multi_reduction <maximumf>, %659, %cst_175 [1] : vector<2x4xf32> to vector<2xf32>
    %661 = vector.shape_cast %660 : vector<2xf32> to vector<2x1xf32>
    %662 = vector.broadcast %661 : vector<2x1xf32> to vector<2x4xf32>
    %663 = arith.subf %659, %662 : vector<2x4xf32>
    %664 = math.exp %663 : vector<2x4xf32>
    %cst_176 = arith.constant dense<0.000000e+00> : vector<2xf32>
    %665 = vector.multi_reduction <add>, %664, %cst_176 [1] : vector<2x4xf32> to vector<2xf32>
    %666 = vector.shape_cast %665 : vector<2xf32> to vector<2x1xf32>
    %667 = tpu.reciprocal %666 {approx = true} : vector<2x1xf32> -> vector<2x1xf32>
    %668 = vector.extract_strided_slice %664 {offsets = [0, 0], sizes = [2, 1], strides = [1, 1]} : vector<2x4xf32> to vector<2x1xf32>
    %669 = vector.broadcast %668 : vector<2x1xf32> to vector<2x32xf32>
    %670 = arith.mulf %669, %111 : vector<2x32xf32>
    %671 = vector.extract_strided_slice %664 {offsets = [0, 1], sizes = [2, 1], strides = [1, 1]} : vector<2x4xf32> to vector<2x1xf32>
    %672 = vector.broadcast %671 : vector<2x1xf32> to vector<2x32xf32>
    %673 = arith.mulf %672, %237 : vector<2x32xf32>
    %674 = arith.addf %670, %673 : vector<2x32xf32>
    %675 = vector.extract_strided_slice %664 {offsets = [0, 2], sizes = [2, 1], strides = [1, 1]} : vector<2x4xf32> to vector<2x1xf32>
    %676 = vector.broadcast %675 : vector<2x1xf32> to vector<2x32xf32>
    %677 = arith.mulf %676, %413 : vector<2x32xf32>
    %678 = arith.addf %674, %677 : vector<2x32xf32>
    %679 = vector.extract_strided_slice %664 {offsets = [0, 3], sizes = [2, 1], strides = [1, 1]} : vector<2x4xf32> to vector<2x1xf32>
    %680 = vector.broadcast %679 : vector<2x1xf32> to vector<2x32xf32>
    %681 = arith.mulf %680, %597 : vector<2x32xf32>
    %682 = arith.addf %678, %681 : vector<2x32xf32>
    %683 = vector.broadcast %667 : vector<2x1xf32> to vector<2x32xf32>
    %684 = arith.mulf %682, %683 : vector<2x32xf32>
    %685 = vector.extract_strided_slice %684 {offsets = [0, 0], sizes = [2, 16], strides = [1, 1]} : vector<2x32xf32> to vector<2x16xf32>
    %686 = vector.extract_strided_slice %684 {offsets = [0, 16], sizes = [2, 16], strides = [1, 1]} : vector<2x32xf32> to vector<2x16xf32>
    %c32_177 = arith.constant 32 : index
    %c0_178 = arith.constant 0 : index
    %687 = vector.load %arg2[%c32_177, %c0_178] : memref<64x768xf32, #tpu.memory_space<vmem>>, vector<16x80xf32>
    %cst_179 = arith.constant dense<0.000000e+00> : vector<2x80xf32>
    %688 = tpu.matmul %685, %687, %cst_179 {dimension_numbers = #tpu.dot_dimension_numbers<[1], [0], [0], [1], [0, 0, 1, 1], [], []>} : vector<2x16xf32>, vector<16x80xf32>, vector<2x80xf32> -> vector<2x80xf32>
    %689 = vector.extract_strided_slice %688 {offsets = [0, 0], sizes = [2, 64], strides = [1, 1]} : vector<2x80xf32> to vector<2x64xf32>
    %690 = arith.addf %689, %652 : vector<2x64xf32>
    %691 = vector.extract_strided_slice %688 {offsets = [0, 64], sizes = [2, 16], strides = [1, 1]} : vector<2x80xf32> to vector<2x16xf32>
    %692 = arith.negf %690 : vector<2x64xf32>
    %693 = math.exp %692 : vector<2x64xf32>
    %cst_180 = arith.constant 1.000000e+00 : f32
    %694 = vector.broadcast %cst_180 : f32 to vector<2x64xf32>
    %695 = arith.addf %694, %693 : vector<2x64xf32>
    %696 = arith.divf %694, %695 : vector<2x64xf32>
    %697 = math.tanh %690 : vector<2x64xf32>
    %698 = vector.extract_strided_slice %696 {offsets = [0, 0], sizes = [2, 16], strides = [1, 1]} : vector<2x64xf32> to vector<2x16xf32>
    %699 = vector.extract_strided_slice %696 {offsets = [0, 16], sizes = [2, 16], strides = [1, 1]} : vector<2x64xf32> to vector<2x16xf32>
    %700 = vector.extract_strided_slice %696 {offsets = [0, 32], sizes = [2, 16], strides = [1, 1]} : vector<2x64xf32> to vector<2x16xf32>
    %701 = vector.extract_strided_slice %697 {offsets = [0, 48], sizes = [2, 16], strides = [1, 1]} : vector<2x64xf32> to vector<2x16xf32>
    %702 = arith.mulf %698, %686 : vector<2x16xf32>
    %703 = arith.mulf %700, %701 : vector<2x16xf32>
    %704 = arith.addf %702, %703 : vector<2x16xf32>
    %705 = math.tanh %704 : vector<2x16xf32>
    %706 = arith.mulf %699, %705 : vector<2x16xf32>
    %707 = arith.addf %649, %556 : vector<2x16xf32>
    %708 = tpu.concatenate %110, %236, %412, %596 in 1 : vector<2x16xf32>, vector<2x16xf32>, vector<2x16xf32>, vector<2x16xf32> -> vector<2x64xf32>
    %709 = tpu.concatenate %707, %707, %707, %707 in 1 : vector<2x16xf32>, vector<2x16xf32>, vector<2x16xf32>, vector<2x16xf32> -> vector<2x64xf32>
    %710 = arith.addf %709, %708 : vector<2x64xf32>
    %711 = math.tanh %710 : vector<2x64xf32>
    %c0_181 = arith.constant 0 : index
    %c764_182 = arith.constant 764 : index
    %712 = vector.load %arg2[%c0_181, %c764_182] : memref<64x768xf32, #tpu.memory_space<vmem>>, vector<64x4xf32>
    %cst_183 = arith.constant dense<0.000000e+00> : vector<2x4xf32>
    %713 = tpu.matmul %711, %712, %cst_183 {dimension_numbers = #tpu.dot_dimension_numbers<[1], [0], [0], [1], [0, 0, 1, 1], [], []>} : vector<2x64xf32>, vector<64x4xf32>, vector<2x4xf32> -> vector<2x4xf32>
    %cst_184 = arith.constant dense<0xFF800000> : vector<2xf32>
    %714 = vector.multi_reduction <maximumf>, %713, %cst_184 [1] : vector<2x4xf32> to vector<2xf32>
    %715 = vector.shape_cast %714 : vector<2xf32> to vector<2x1xf32>
    %716 = vector.broadcast %715 : vector<2x1xf32> to vector<2x4xf32>
    %717 = arith.subf %713, %716 : vector<2x4xf32>
    %718 = math.exp %717 : vector<2x4xf32>
    %cst_185 = arith.constant dense<0.000000e+00> : vector<2xf32>
    %719 = vector.multi_reduction <add>, %718, %cst_185 [1] : vector<2x4xf32> to vector<2xf32>
    %720 = vector.shape_cast %719 : vector<2xf32> to vector<2x1xf32>
    %721 = tpu.reciprocal %720 {approx = true} : vector<2x1xf32> -> vector<2x1xf32>
    %722 = vector.extract_strided_slice %718 {offsets = [0, 0], sizes = [2, 1], strides = [1, 1]} : vector<2x4xf32> to vector<2x1xf32>
    %723 = vector.broadcast %722 : vector<2x1xf32> to vector<2x32xf32>
    %724 = arith.mulf %723, %112 : vector<2x32xf32>
    %725 = vector.extract_strided_slice %718 {offsets = [0, 1], sizes = [2, 1], strides = [1, 1]} : vector<2x4xf32> to vector<2x1xf32>
    %726 = vector.broadcast %725 : vector<2x1xf32> to vector<2x32xf32>
    %727 = arith.mulf %726, %238 : vector<2x32xf32>
    %728 = arith.addf %724, %727 : vector<2x32xf32>
    %729 = vector.extract_strided_slice %718 {offsets = [0, 2], sizes = [2, 1], strides = [1, 1]} : vector<2x4xf32> to vector<2x1xf32>
    %730 = vector.broadcast %729 : vector<2x1xf32> to vector<2x32xf32>
    %731 = arith.mulf %730, %414 : vector<2x32xf32>
    %732 = arith.addf %728, %731 : vector<2x32xf32>
    %733 = vector.extract_strided_slice %718 {offsets = [0, 3], sizes = [2, 1], strides = [1, 1]} : vector<2x4xf32> to vector<2x1xf32>
    %734 = vector.broadcast %733 : vector<2x1xf32> to vector<2x32xf32>
    %735 = arith.mulf %734, %598 : vector<2x32xf32>
    %736 = arith.addf %732, %735 : vector<2x32xf32>
    %737 = vector.broadcast %721 : vector<2x1xf32> to vector<2x32xf32>
    %738 = arith.mulf %736, %737 : vector<2x32xf32>
    %739 = vector.extract_strided_slice %738 {offsets = [0, 0], sizes = [2, 16], strides = [1, 1]} : vector<2x32xf32> to vector<2x16xf32>
    %740 = vector.extract_strided_slice %738 {offsets = [0, 16], sizes = [2, 16], strides = [1, 1]} : vector<2x32xf32> to vector<2x16xf32>
    %741 = tpu.concatenate %739, %706 in 1 : vector<2x16xf32>, vector<2x16xf32> -> vector<2x32xf32>
    %c0_186 = arith.constant 0 : index
    %c680_187 = arith.constant 680 : index
    %742 = vector.load %arg2[%c0_186, %c680_187] : memref<64x768xf32, #tpu.memory_space<vmem>>, vector<32x80xf32>
    %cst_188 = arith.constant dense<0.000000e+00> : vector<2x80xf32>
    %743 = tpu.matmul %741, %742, %cst_188 {dimension_numbers = #tpu.dot_dimension_numbers<[1], [0], [0], [1], [0, 0, 1, 1], [], []>} : vector<2x32xf32>, vector<32x80xf32>, vector<2x80xf32> -> vector<2x80xf32>
    %744 = vector.extract_strided_slice %743 {offsets = [0, 0], sizes = [2, 64], strides = [1, 1]} : vector<2x80xf32> to vector<2x64xf32>
    %c52_189 = arith.constant 52 : index
    %c0_190 = arith.constant 0 : index
    %745 = vector.load %arg2[%c52_189, %c0_190] : memref<64x768xf32, #tpu.memory_space<vmem>>, vector<1x64xf32>
    %746 = vector.broadcast %745 : vector<1x64xf32> to vector<2x64xf32>
    %747 = arith.addf %744, %746 : vector<2x64xf32>
    %748 = vector.extract_strided_slice %743 {offsets = [0, 64], sizes = [2, 16], strides = [1, 1]} : vector<2x80xf32> to vector<2x16xf32>
    %749 = arith.negf %747 : vector<2x64xf32>
    %750 = math.exp %749 : vector<2x64xf32>
    %cst_191 = arith.constant 1.000000e+00 : f32
    %751 = vector.broadcast %cst_191 : f32 to vector<2x64xf32>
    %752 = arith.addf %751, %750 : vector<2x64xf32>
    %753 = arith.divf %751, %752 : vector<2x64xf32>
    %754 = math.tanh %747 : vector<2x64xf32>
    %755 = vector.extract_strided_slice %753 {offsets = [0, 0], sizes = [2, 16], strides = [1, 1]} : vector<2x64xf32> to vector<2x16xf32>
    %756 = vector.extract_strided_slice %753 {offsets = [0, 16], sizes = [2, 16], strides = [1, 1]} : vector<2x64xf32> to vector<2x16xf32>
    %757 = vector.extract_strided_slice %753 {offsets = [0, 32], sizes = [2, 16], strides = [1, 1]} : vector<2x64xf32> to vector<2x16xf32>
    %758 = vector.extract_strided_slice %754 {offsets = [0, 48], sizes = [2, 16], strides = [1, 1]} : vector<2x64xf32> to vector<2x16xf32>
    %759 = arith.mulf %755, %740 : vector<2x16xf32>
    %760 = arith.mulf %757, %758 : vector<2x16xf32>
    %761 = arith.addf %759, %760 : vector<2x16xf32>
    %762 = math.tanh %761 : vector<2x16xf32>
    %763 = arith.mulf %756, %762 : vector<2x16xf32>
    %c53_192 = arith.constant 53 : index
    %c0_193 = arith.constant 0 : index
    %764 = vector.load %arg2[%c53_192, %c0_193] : memref<64x768xf32, #tpu.memory_space<vmem>>, vector<1x16xf32>
    %765 = vector.broadcast %764 : vector<1x16xf32> to vector<2x16xf32>
    %766 = arith.mulf %763, %765 : vector<2x16xf32>
    %cst_194 = arith.constant dense<0.000000e+00> : vector<2xf32>
    %767 = vector.multi_reduction <add>, %766, %cst_194 [1] : vector<2x16xf32> to vector<2xf32>
    %768 = vector.shape_cast %767 : vector<2xf32> to vector<2x1xf32>
    %c54_195 = arith.constant 54 : index
    %c0_196 = arith.constant 0 : index
    %769 = vector.load %arg2[%c54_195, %c0_196] : memref<64x768xf32, #tpu.memory_space<vmem>>, vector<1x1xf32>
    %770 = vector.broadcast %769 : vector<1x1xf32> to vector<2x1xf32>
    %771 = arith.addf %768, %770 : vector<2x1xf32>
    %772 = arith.negf %771 : vector<2x1xf32>
    %773 = math.exp %772 : vector<2x1xf32>
    %cst_197 = arith.constant 1.000000e+00 : f32
    %774 = vector.broadcast %cst_197 : f32 to vector<2x1xf32>
    %775 = arith.addf %774, %773 : vector<2x1xf32>
    %776 = arith.divf %774, %775 : vector<2x1xf32>
    %777 = math.tanh %651 : vector<2x32xf32>
    %c0_198 = arith.constant 0 : index
    %c664_199 = arith.constant 664 : index
    %778 = vector.load %arg2[%c0_198, %c664_199] : memref<64x768xf32, #tpu.memory_space<vmem>>, vector<32x16xf32>
    %cst_200 = arith.constant dense<0.000000e+00> : vector<2x16xf32>
    %779 = tpu.matmul %777, %778, %cst_200 {dimension_numbers = #tpu.dot_dimension_numbers<[1], [0], [0], [1], [0, 0, 1, 1], [], []>} : vector<2x32xf32>, vector<32x16xf32>, vector<2x16xf32> -> vector<2x16xf32>
    %780 = arith.addf %650, %779 : vector<2x16xf32>
    %781 = math.tanh %780 : vector<2x16xf32>
    %c32_201 = arith.constant 32 : index
    %c80_202 = arith.constant 80 : index
    %782 = vector.load %arg2[%c32_201, %c80_202] : memref<64x768xf32, #tpu.memory_space<vmem>>, vector<16x32xf32>
    %cst_203 = arith.constant dense<0.000000e+00> : vector<2x32xf32>
    %783 = tpu.matmul %781, %782, %cst_203 {dimension_numbers = #tpu.dot_dimension_numbers<[1], [0], [0], [1], [0, 0, 1, 1], [], []>} : vector<2x16xf32>, vector<16x32xf32>, vector<2x32xf32> -> vector<2x32xf32>
    %c51_204 = arith.constant 51 : index
    %c0_205 = arith.constant 0 : index
    %784 = vector.load %arg2[%c51_204, %c0_205] : memref<64x768xf32, #tpu.memory_space<vmem>>, vector<1x32xf32>
    %785 = vector.broadcast %784 : vector<1x32xf32> to vector<2x32xf32>
    %786 = arith.addf %783, %785 : vector<2x32xf32>
    %787 = vector.extract_strided_slice %786 {offsets = [0, 0], sizes = [2, 16], strides = [1, 1]} : vector<2x32xf32> to vector<2x16xf32>
    %788 = vector.extract_strided_slice %786 {offsets = [0, 16], sizes = [2, 16], strides = [1, 1]} : vector<2x32xf32> to vector<2x16xf32>
    %789 = tpu.concatenate %781, %704 in 1 : vector<2x16xf32>, vector<2x16xf32> -> vector<2x32xf32>
    %790 = tpu.concatenate %781, %761 in 1 : vector<2x16xf32>, vector<2x16xf32> -> vector<2x32xf32>
    %c40 = arith.constant 40 : index
    %c0_206 = arith.constant 0 : index
    %791 = vector.load %arg4[%c40, %c0_206] : memref<64x192xf32, #tpu.memory_space<vmem>>, vector<2x192xf32>
    %792 = vector.extract_strided_slice %791 {offsets = [0, 0], sizes = [2, 128], strides = [1, 1]} : vector<2x192xf32> to vector<2x128xf32>
    %793 = arith.addf %792, %624 : vector<2x128xf32>
    %794 = arith.negf %793 : vector<2x128xf32>
    %795 = math.exp %794 : vector<2x128xf32>
    %cst_207 = arith.constant 1.000000e+00 : f32
    %796 = vector.broadcast %cst_207 : f32 to vector<2x128xf32>
    %797 = arith.addf %796, %795 : vector<2x128xf32>
    %798 = arith.divf %796, %797 : vector<2x128xf32>
    %799 = math.tanh %793 : vector<2x128xf32>
    %800 = vector.extract_strided_slice %798 {offsets = [0, 0], sizes = [2, 32], strides = [1, 1]} : vector<2x128xf32> to vector<2x32xf32>
    %801 = vector.extract_strided_slice %798 {offsets = [0, 32], sizes = [2, 32], strides = [1, 1]} : vector<2x128xf32> to vector<2x32xf32>
    %802 = vector.extract_strided_slice %799 {offsets = [0, 64], sizes = [2, 32], strides = [1, 1]} : vector<2x128xf32> to vector<2x32xf32>
    %803 = vector.extract_strided_slice %798 {offsets = [0, 96], sizes = [2, 32], strides = [1, 1]} : vector<2x128xf32> to vector<2x32xf32>
    %804 = arith.mulf %801, %614 : vector<2x32xf32>
    %805 = arith.mulf %800, %802 : vector<2x32xf32>
    %806 = arith.addf %804, %805 : vector<2x32xf32>
    %807 = math.tanh %806 : vector<2x32xf32>
    %808 = arith.mulf %803, %807 : vector<2x32xf32>
    %c0_208 = arith.constant 0 : index
    %c0_209 = arith.constant 0 : index
    %809 = vector.load %arg2[%c0_208, %c0_209] : memref<64x768xf32, #tpu.memory_space<vmem>>, vector<32x256xf32>
    %cst_210 = arith.constant dense<0.000000e+00> : vector<2x256xf32>
    %810 = tpu.matmul %808, %809, %cst_210 {dimension_numbers = #tpu.dot_dimension_numbers<[1], [0], [0], [1], [0, 0, 1, 1], [], []>} : vector<2x32xf32>, vector<32x256xf32>, vector<2x256xf32> -> vector<2x256xf32>
    %811 = vector.extract_strided_slice %810 {offsets = [0, 0], sizes = [2, 128], strides = [1, 1]} : vector<2x256xf32> to vector<2x128xf32>
    %812 = arith.addf %811, %642 : vector<2x128xf32>
    %c49_211 = arith.constant 49 : index
    %c0_212 = arith.constant 0 : index
    %813 = vector.load %arg2[%c49_211, %c0_212] : memref<64x768xf32, #tpu.memory_space<vmem>>, vector<1x128xf32>
    %814 = vector.broadcast %813 : vector<1x128xf32> to vector<2x128xf32>
    %815 = arith.addf %812, %814 : vector<2x128xf32>
    %816 = vector.extract_strided_slice %810 {offsets = [0, 128], sizes = [2, 128], strides = [1, 1]} : vector<2x256xf32> to vector<2x128xf32>
    %817 = arith.negf %815 : vector<2x128xf32>
    %818 = math.exp %817 : vector<2x128xf32>
    %cst_213 = arith.constant 1.000000e+00 : f32
    %819 = vector.broadcast %cst_213 : f32 to vector<2x128xf32>
    %820 = arith.addf %819, %818 : vector<2x128xf32>
    %821 = arith.divf %819, %820 : vector<2x128xf32>
    %822 = math.tanh %815 : vector<2x128xf32>
    %823 = vector.extract_strided_slice %821 {offsets = [0, 0], sizes = [2, 32], strides = [1, 1]} : vector<2x128xf32> to vector<2x32xf32>
    %824 = vector.extract_strided_slice %821 {offsets = [0, 32], sizes = [2, 32], strides = [1, 1]} : vector<2x128xf32> to vector<2x32xf32>
    %825 = vector.extract_strided_slice %822 {offsets = [0, 64], sizes = [2, 32], strides = [1, 1]} : vector<2x128xf32> to vector<2x32xf32>
    %826 = vector.extract_strided_slice %821 {offsets = [0, 96], sizes = [2, 32], strides = [1, 1]} : vector<2x128xf32> to vector<2x32xf32>
    %827 = arith.mulf %824, %637 : vector<2x32xf32>
    %828 = arith.mulf %823, %825 : vector<2x32xf32>
    %829 = arith.addf %827, %828 : vector<2x32xf32>
    %830 = math.tanh %829 : vector<2x32xf32>
    %831 = arith.mulf %826, %830 : vector<2x32xf32>
    %c0_214 = arith.constant 0 : index
    %c256_215 = arith.constant 256 : index
    %832 = vector.load %arg2[%c0_214, %c256_215] : memref<64x768xf32, #tpu.memory_space<vmem>>, vector<32x216xf32>
    %cst_216 = arith.constant dense<0.000000e+00> : vector<2x216xf32>
    %833 = tpu.matmul %831, %832, %cst_216 {dimension_numbers = #tpu.dot_dimension_numbers<[1], [0], [0], [1], [0, 0, 1, 1], [], []>} : vector<2x32xf32>, vector<32x216xf32>, vector<2x216xf32> -> vector<2x216xf32>
    %834 = vector.extract_strided_slice %833 {offsets = [0, 0], sizes = [2, 128], strides = [1, 1]} : vector<2x216xf32> to vector<2x128xf32>
    %835 = vector.extract_strided_slice %833 {offsets = [0, 128], sizes = [2, 88], strides = [1, 1]} : vector<2x216xf32> to vector<2x88xf32>
    %c50_217 = arith.constant 50 : index
    %c0_218 = arith.constant 0 : index
    %836 = vector.load %arg2[%c50_217, %c0_218] : memref<64x768xf32, #tpu.memory_space<vmem>>, vector<1x88xf32>
    %837 = vector.broadcast %836 : vector<1x88xf32> to vector<2x88xf32>
    %838 = arith.addf %835, %837 : vector<2x88xf32>
    %839 = vector.extract_strided_slice %838 {offsets = [0, 0], sizes = [2, 8], strides = [1, 1]} : vector<2x88xf32> to vector<2x8xf32>
    %840 = vector.extract_strided_slice %838 {offsets = [0, 8], sizes = [2, 16], strides = [1, 1]} : vector<2x88xf32> to vector<2x16xf32>
    %841 = vector.extract_strided_slice %838 {offsets = [0, 24], sizes = [2, 16], strides = [1, 1]} : vector<2x88xf32> to vector<2x16xf32>
    %842 = vector.extract_strided_slice %838 {offsets = [0, 40], sizes = [2, 16], strides = [1, 1]} : vector<2x88xf32> to vector<2x16xf32>
    %843 = vector.extract_strided_slice %838 {offsets = [0, 56], sizes = [2, 32], strides = [1, 1]} : vector<2x88xf32> to vector<2x32xf32>
    %844 = vector.extract_strided_slice %791 {offsets = [0, 128], sizes = [2, 64], strides = [1, 1]} : vector<2x192xf32> to vector<2x64xf32>
    %845 = arith.addf %840, %691 : vector<2x16xf32>
    %846 = tpu.concatenate %235, %411, %595, %787 in 1 : vector<2x16xf32>, vector<2x16xf32>, vector<2x16xf32>, vector<2x16xf32> -> vector<2x64xf32>
    %847 = tpu.concatenate %845, %845, %845, %845 in 1 : vector<2x16xf32>, vector<2x16xf32>, vector<2x16xf32>, vector<2x16xf32> -> vector<2x64xf32>
    %848 = arith.addf %847, %846 : vector<2x64xf32>
    %849 = math.tanh %848 : vector<2x64xf32>
    %c0_219 = arith.constant 0 : index
    %c760_220 = arith.constant 760 : index
    %850 = vector.load %arg2[%c0_219, %c760_220] : memref<64x768xf32, #tpu.memory_space<vmem>>, vector<64x4xf32>
    %cst_221 = arith.constant dense<0.000000e+00> : vector<2x4xf32>
    %851 = tpu.matmul %849, %850, %cst_221 {dimension_numbers = #tpu.dot_dimension_numbers<[1], [0], [0], [1], [0, 0, 1, 1], [], []>} : vector<2x64xf32>, vector<64x4xf32>, vector<2x4xf32> -> vector<2x4xf32>
    %cst_222 = arith.constant dense<0xFF800000> : vector<2xf32>
    %852 = vector.multi_reduction <maximumf>, %851, %cst_222 [1] : vector<2x4xf32> to vector<2xf32>
    %853 = vector.shape_cast %852 : vector<2xf32> to vector<2x1xf32>
    %854 = vector.broadcast %853 : vector<2x1xf32> to vector<2x4xf32>
    %855 = arith.subf %851, %854 : vector<2x4xf32>
    %856 = math.exp %855 : vector<2x4xf32>
    %cst_223 = arith.constant dense<0.000000e+00> : vector<2xf32>
    %857 = vector.multi_reduction <add>, %856, %cst_223 [1] : vector<2x4xf32> to vector<2xf32>
    %858 = vector.shape_cast %857 : vector<2xf32> to vector<2x1xf32>
    %859 = tpu.reciprocal %858 {approx = true} : vector<2x1xf32> -> vector<2x1xf32>
    %860 = vector.extract_strided_slice %856 {offsets = [0, 0], sizes = [2, 1], strides = [1, 1]} : vector<2x4xf32> to vector<2x1xf32>
    %861 = vector.broadcast %860 : vector<2x1xf32> to vector<2x32xf32>
    %862 = arith.mulf %861, %237 : vector<2x32xf32>
    %863 = vector.extract_strided_slice %856 {offsets = [0, 1], sizes = [2, 1], strides = [1, 1]} : vector<2x4xf32> to vector<2x1xf32>
    %864 = vector.broadcast %863 : vector<2x1xf32> to vector<2x32xf32>
    %865 = arith.mulf %864, %413 : vector<2x32xf32>
    %866 = arith.addf %862, %865 : vector<2x32xf32>
    %867 = vector.extract_strided_slice %856 {offsets = [0, 2], sizes = [2, 1], strides = [1, 1]} : vector<2x4xf32> to vector<2x1xf32>
    %868 = vector.broadcast %867 : vector<2x1xf32> to vector<2x32xf32>
    %869 = arith.mulf %868, %597 : vector<2x32xf32>
    %870 = arith.addf %866, %869 : vector<2x32xf32>
    %871 = vector.extract_strided_slice %856 {offsets = [0, 3], sizes = [2, 1], strides = [1, 1]} : vector<2x4xf32> to vector<2x1xf32>
    %872 = vector.broadcast %871 : vector<2x1xf32> to vector<2x32xf32>
    %873 = arith.mulf %872, %789 : vector<2x32xf32>
    %874 = arith.addf %870, %873 : vector<2x32xf32>
    %875 = vector.broadcast %859 : vector<2x1xf32> to vector<2x32xf32>
    %876 = arith.mulf %874, %875 : vector<2x32xf32>
    %877 = vector.extract_strided_slice %876 {offsets = [0, 0], sizes = [2, 16], strides = [1, 1]} : vector<2x32xf32> to vector<2x16xf32>
    %878 = vector.extract_strided_slice %876 {offsets = [0, 16], sizes = [2, 16], strides = [1, 1]} : vector<2x32xf32> to vector<2x16xf32>
    %c32_224 = arith.constant 32 : index
    %c0_225 = arith.constant 0 : index
    %879 = vector.load %arg2[%c32_224, %c0_225] : memref<64x768xf32, #tpu.memory_space<vmem>>, vector<16x80xf32>
    %cst_226 = arith.constant dense<0.000000e+00> : vector<2x80xf32>
    %880 = tpu.matmul %877, %879, %cst_226 {dimension_numbers = #tpu.dot_dimension_numbers<[1], [0], [0], [1], [0, 0, 1, 1], [], []>} : vector<2x16xf32>, vector<16x80xf32>, vector<2x80xf32> -> vector<2x80xf32>
    %881 = vector.extract_strided_slice %880 {offsets = [0, 0], sizes = [2, 64], strides = [1, 1]} : vector<2x80xf32> to vector<2x64xf32>
    %882 = arith.addf %881, %844 : vector<2x64xf32>
    %883 = vector.extract_strided_slice %880 {offsets = [0, 64], sizes = [2, 16], strides = [1, 1]} : vector<2x80xf32> to vector<2x16xf32>
    %884 = arith.negf %882 : vector<2x64xf32>
    %885 = math.exp %884 : vector<2x64xf32>
    %cst_227 = arith.constant 1.000000e+00 : f32
    %886 = vector.broadcast %cst_227 : f32 to vector<2x64xf32>
    %887 = arith.addf %886, %885 : vector<2x64xf32>
    %888 = arith.divf %886, %887 : vector<2x64xf32>
    %889 = math.tanh %882 : vector<2x64xf32>
    %890 = vector.extract_strided_slice %888 {offsets = [0, 0], sizes = [2, 16], strides = [1, 1]} : vector<2x64xf32> to vector<2x16xf32>
    %891 = vector.extract_strided_slice %888 {offsets = [0, 16], sizes = [2, 16], strides = [1, 1]} : vector<2x64xf32> to vector<2x16xf32>
    %892 = vector.extract_strided_slice %888 {offsets = [0, 32], sizes = [2, 16], strides = [1, 1]} : vector<2x64xf32> to vector<2x16xf32>
    %893 = vector.extract_strided_slice %889 {offsets = [0, 48], sizes = [2, 16], strides = [1, 1]} : vector<2x64xf32> to vector<2x16xf32>
    %894 = arith.mulf %890, %878 : vector<2x16xf32>
    %895 = arith.mulf %892, %893 : vector<2x16xf32>
    %896 = arith.addf %894, %895 : vector<2x16xf32>
    %897 = math.tanh %896 : vector<2x16xf32>
    %898 = arith.mulf %891, %897 : vector<2x16xf32>
    %899 = arith.addf %841, %748 : vector<2x16xf32>
    %900 = tpu.concatenate %236, %412, %596, %788 in 1 : vector<2x16xf32>, vector<2x16xf32>, vector<2x16xf32>, vector<2x16xf32> -> vector<2x64xf32>
    %901 = tpu.concatenate %899, %899, %899, %899 in 1 : vector<2x16xf32>, vector<2x16xf32>, vector<2x16xf32>, vector<2x16xf32> -> vector<2x64xf32>
    %902 = arith.addf %901, %900 : vector<2x64xf32>
    %903 = math.tanh %902 : vector<2x64xf32>
    %c0_228 = arith.constant 0 : index
    %c764_229 = arith.constant 764 : index
    %904 = vector.load %arg2[%c0_228, %c764_229] : memref<64x768xf32, #tpu.memory_space<vmem>>, vector<64x4xf32>
    %cst_230 = arith.constant dense<0.000000e+00> : vector<2x4xf32>
    %905 = tpu.matmul %903, %904, %cst_230 {dimension_numbers = #tpu.dot_dimension_numbers<[1], [0], [0], [1], [0, 0, 1, 1], [], []>} : vector<2x64xf32>, vector<64x4xf32>, vector<2x4xf32> -> vector<2x4xf32>
    %cst_231 = arith.constant dense<0xFF800000> : vector<2xf32>
    %906 = vector.multi_reduction <maximumf>, %905, %cst_231 [1] : vector<2x4xf32> to vector<2xf32>
    %907 = vector.shape_cast %906 : vector<2xf32> to vector<2x1xf32>
    %908 = vector.broadcast %907 : vector<2x1xf32> to vector<2x4xf32>
    %909 = arith.subf %905, %908 : vector<2x4xf32>
    %910 = math.exp %909 : vector<2x4xf32>
    %cst_232 = arith.constant dense<0.000000e+00> : vector<2xf32>
    %911 = vector.multi_reduction <add>, %910, %cst_232 [1] : vector<2x4xf32> to vector<2xf32>
    %912 = vector.shape_cast %911 : vector<2xf32> to vector<2x1xf32>
    %913 = tpu.reciprocal %912 {approx = true} : vector<2x1xf32> -> vector<2x1xf32>
    %914 = vector.extract_strided_slice %910 {offsets = [0, 0], sizes = [2, 1], strides = [1, 1]} : vector<2x4xf32> to vector<2x1xf32>
    %915 = vector.broadcast %914 : vector<2x1xf32> to vector<2x32xf32>
    %916 = arith.mulf %915, %238 : vector<2x32xf32>
    %917 = vector.extract_strided_slice %910 {offsets = [0, 1], sizes = [2, 1], strides = [1, 1]} : vector<2x4xf32> to vector<2x1xf32>
    %918 = vector.broadcast %917 : vector<2x1xf32> to vector<2x32xf32>
    %919 = arith.mulf %918, %414 : vector<2x32xf32>
    %920 = arith.addf %916, %919 : vector<2x32xf32>
    %921 = vector.extract_strided_slice %910 {offsets = [0, 2], sizes = [2, 1], strides = [1, 1]} : vector<2x4xf32> to vector<2x1xf32>
    %922 = vector.broadcast %921 : vector<2x1xf32> to vector<2x32xf32>
    %923 = arith.mulf %922, %598 : vector<2x32xf32>
    %924 = arith.addf %920, %923 : vector<2x32xf32>
    %925 = vector.extract_strided_slice %910 {offsets = [0, 3], sizes = [2, 1], strides = [1, 1]} : vector<2x4xf32> to vector<2x1xf32>
    %926 = vector.broadcast %925 : vector<2x1xf32> to vector<2x32xf32>
    %927 = arith.mulf %926, %790 : vector<2x32xf32>
    %928 = arith.addf %924, %927 : vector<2x32xf32>
    %929 = vector.broadcast %913 : vector<2x1xf32> to vector<2x32xf32>
    %930 = arith.mulf %928, %929 : vector<2x32xf32>
    %931 = vector.extract_strided_slice %930 {offsets = [0, 0], sizes = [2, 16], strides = [1, 1]} : vector<2x32xf32> to vector<2x16xf32>
    %932 = vector.extract_strided_slice %930 {offsets = [0, 16], sizes = [2, 16], strides = [1, 1]} : vector<2x32xf32> to vector<2x16xf32>
    %933 = tpu.concatenate %931, %898 in 1 : vector<2x16xf32>, vector<2x16xf32> -> vector<2x32xf32>
    %c0_233 = arith.constant 0 : index
    %c680_234 = arith.constant 680 : index
    %934 = vector.load %arg2[%c0_233, %c680_234] : memref<64x768xf32, #tpu.memory_space<vmem>>, vector<32x80xf32>
    %cst_235 = arith.constant dense<0.000000e+00> : vector<2x80xf32>
    %935 = tpu.matmul %933, %934, %cst_235 {dimension_numbers = #tpu.dot_dimension_numbers<[1], [0], [0], [1], [0, 0, 1, 1], [], []>} : vector<2x32xf32>, vector<32x80xf32>, vector<2x80xf32> -> vector<2x80xf32>
    %936 = vector.extract_strided_slice %935 {offsets = [0, 0], sizes = [2, 64], strides = [1, 1]} : vector<2x80xf32> to vector<2x64xf32>
    %c52_236 = arith.constant 52 : index
    %c0_237 = arith.constant 0 : index
    %937 = vector.load %arg2[%c52_236, %c0_237] : memref<64x768xf32, #tpu.memory_space<vmem>>, vector<1x64xf32>
    %938 = vector.broadcast %937 : vector<1x64xf32> to vector<2x64xf32>
    %939 = arith.addf %936, %938 : vector<2x64xf32>
    %940 = vector.extract_strided_slice %935 {offsets = [0, 64], sizes = [2, 16], strides = [1, 1]} : vector<2x80xf32> to vector<2x16xf32>
    %941 = arith.negf %939 : vector<2x64xf32>
    %942 = math.exp %941 : vector<2x64xf32>
    %cst_238 = arith.constant 1.000000e+00 : f32
    %943 = vector.broadcast %cst_238 : f32 to vector<2x64xf32>
    %944 = arith.addf %943, %942 : vector<2x64xf32>
    %945 = arith.divf %943, %944 : vector<2x64xf32>
    %946 = math.tanh %939 : vector<2x64xf32>
    %947 = vector.extract_strided_slice %945 {offsets = [0, 0], sizes = [2, 16], strides = [1, 1]} : vector<2x64xf32> to vector<2x16xf32>
    %948 = vector.extract_strided_slice %945 {offsets = [0, 16], sizes = [2, 16], strides = [1, 1]} : vector<2x64xf32> to vector<2x16xf32>
    %949 = vector.extract_strided_slice %945 {offsets = [0, 32], sizes = [2, 16], strides = [1, 1]} : vector<2x64xf32> to vector<2x16xf32>
    %950 = vector.extract_strided_slice %946 {offsets = [0, 48], sizes = [2, 16], strides = [1, 1]} : vector<2x64xf32> to vector<2x16xf32>
    %951 = arith.mulf %947, %932 : vector<2x16xf32>
    %952 = arith.mulf %949, %950 : vector<2x16xf32>
    %953 = arith.addf %951, %952 : vector<2x16xf32>
    %954 = math.tanh %953 : vector<2x16xf32>
    %955 = arith.mulf %948, %954 : vector<2x16xf32>
    %c53_239 = arith.constant 53 : index
    %c0_240 = arith.constant 0 : index
    %956 = vector.load %arg2[%c53_239, %c0_240] : memref<64x768xf32, #tpu.memory_space<vmem>>, vector<1x16xf32>
    %957 = vector.broadcast %956 : vector<1x16xf32> to vector<2x16xf32>
    %958 = arith.mulf %955, %957 : vector<2x16xf32>
    %cst_241 = arith.constant dense<0.000000e+00> : vector<2xf32>
    %959 = vector.multi_reduction <add>, %958, %cst_241 [1] : vector<2x16xf32> to vector<2xf32>
    %960 = vector.shape_cast %959 : vector<2xf32> to vector<2x1xf32>
    %c54_242 = arith.constant 54 : index
    %c0_243 = arith.constant 0 : index
    %961 = vector.load %arg2[%c54_242, %c0_243] : memref<64x768xf32, #tpu.memory_space<vmem>>, vector<1x1xf32>
    %962 = vector.broadcast %961 : vector<1x1xf32> to vector<2x1xf32>
    %963 = arith.addf %960, %962 : vector<2x1xf32>
    %964 = arith.negf %963 : vector<2x1xf32>
    %965 = math.exp %964 : vector<2x1xf32>
    %cst_244 = arith.constant 1.000000e+00 : f32
    %966 = vector.broadcast %cst_244 : f32 to vector<2x1xf32>
    %967 = arith.addf %966, %965 : vector<2x1xf32>
    %968 = arith.divf %966, %967 : vector<2x1xf32>
    %969 = math.tanh %843 : vector<2x32xf32>
    %c0_245 = arith.constant 0 : index
    %c664_246 = arith.constant 664 : index
    %970 = vector.load %arg2[%c0_245, %c664_246] : memref<64x768xf32, #tpu.memory_space<vmem>>, vector<32x16xf32>
    %cst_247 = arith.constant dense<0.000000e+00> : vector<2x16xf32>
    %971 = tpu.matmul %969, %970, %cst_247 {dimension_numbers = #tpu.dot_dimension_numbers<[1], [0], [0], [1], [0, 0, 1, 1], [], []>} : vector<2x32xf32>, vector<32x16xf32>, vector<2x16xf32> -> vector<2x16xf32>
    %972 = arith.addf %842, %971 : vector<2x16xf32>
    %973 = math.tanh %972 : vector<2x16xf32>
    %c32_248 = arith.constant 32 : index
    %c80_249 = arith.constant 80 : index
    %974 = vector.load %arg2[%c32_248, %c80_249] : memref<64x768xf32, #tpu.memory_space<vmem>>, vector<16x32xf32>
    %cst_250 = arith.constant dense<0.000000e+00> : vector<2x32xf32>
    %975 = tpu.matmul %973, %974, %cst_250 {dimension_numbers = #tpu.dot_dimension_numbers<[1], [0], [0], [1], [0, 0, 1, 1], [], []>} : vector<2x16xf32>, vector<16x32xf32>, vector<2x32xf32> -> vector<2x32xf32>
    %c51_251 = arith.constant 51 : index
    %c0_252 = arith.constant 0 : index
    %976 = vector.load %arg2[%c51_251, %c0_252] : memref<64x768xf32, #tpu.memory_space<vmem>>, vector<1x32xf32>
    %977 = vector.broadcast %976 : vector<1x32xf32> to vector<2x32xf32>
    %978 = arith.addf %975, %977 : vector<2x32xf32>
    %979 = vector.extract_strided_slice %978 {offsets = [0, 0], sizes = [2, 16], strides = [1, 1]} : vector<2x32xf32> to vector<2x16xf32>
    %980 = vector.extract_strided_slice %978 {offsets = [0, 16], sizes = [2, 16], strides = [1, 1]} : vector<2x32xf32> to vector<2x16xf32>
    %981 = tpu.concatenate %973, %896 in 1 : vector<2x16xf32>, vector<2x16xf32> -> vector<2x32xf32>
    %982 = tpu.concatenate %973, %953 in 1 : vector<2x16xf32>, vector<2x16xf32> -> vector<2x32xf32>
    %c48_253 = arith.constant 48 : index
    %c0_254 = arith.constant 0 : index
    %983 = vector.load %arg4[%c48_253, %c0_254] : memref<64x192xf32, #tpu.memory_space<vmem>>, vector<2x192xf32>
    %984 = vector.extract_strided_slice %983 {offsets = [0, 0], sizes = [2, 128], strides = [1, 1]} : vector<2x192xf32> to vector<2x128xf32>
    %985 = arith.addf %984, %816 : vector<2x128xf32>
    %986 = arith.negf %985 : vector<2x128xf32>
    %987 = math.exp %986 : vector<2x128xf32>
    %cst_255 = arith.constant 1.000000e+00 : f32
    %988 = vector.broadcast %cst_255 : f32 to vector<2x128xf32>
    %989 = arith.addf %988, %987 : vector<2x128xf32>
    %990 = arith.divf %988, %989 : vector<2x128xf32>
    %991 = math.tanh %985 : vector<2x128xf32>
    %992 = vector.extract_strided_slice %990 {offsets = [0, 0], sizes = [2, 32], strides = [1, 1]} : vector<2x128xf32> to vector<2x32xf32>
    %993 = vector.extract_strided_slice %990 {offsets = [0, 32], sizes = [2, 32], strides = [1, 1]} : vector<2x128xf32> to vector<2x32xf32>
    %994 = vector.extract_strided_slice %991 {offsets = [0, 64], sizes = [2, 32], strides = [1, 1]} : vector<2x128xf32> to vector<2x32xf32>
    %995 = vector.extract_strided_slice %990 {offsets = [0, 96], sizes = [2, 32], strides = [1, 1]} : vector<2x128xf32> to vector<2x32xf32>
    %996 = arith.mulf %993, %806 : vector<2x32xf32>
    %997 = arith.mulf %992, %994 : vector<2x32xf32>
    %998 = arith.addf %996, %997 : vector<2x32xf32>
    %999 = math.tanh %998 : vector<2x32xf32>
    %1000 = arith.mulf %995, %999 : vector<2x32xf32>
    %c0_256 = arith.constant 0 : index
    %c0_257 = arith.constant 0 : index
    %1001 = vector.load %arg2[%c0_256, %c0_257] : memref<64x768xf32, #tpu.memory_space<vmem>>, vector<32x256xf32>
    %cst_258 = arith.constant dense<0.000000e+00> : vector<2x256xf32>
    %1002 = tpu.matmul %1000, %1001, %cst_258 {dimension_numbers = #tpu.dot_dimension_numbers<[1], [0], [0], [1], [0, 0, 1, 1], [], []>} : vector<2x32xf32>, vector<32x256xf32>, vector<2x256xf32> -> vector<2x256xf32>
    %1003 = vector.extract_strided_slice %1002 {offsets = [0, 0], sizes = [2, 128], strides = [1, 1]} : vector<2x256xf32> to vector<2x128xf32>
    %1004 = arith.addf %1003, %834 : vector<2x128xf32>
    %c49_259 = arith.constant 49 : index
    %c0_260 = arith.constant 0 : index
    %1005 = vector.load %arg2[%c49_259, %c0_260] : memref<64x768xf32, #tpu.memory_space<vmem>>, vector<1x128xf32>
    %1006 = vector.broadcast %1005 : vector<1x128xf32> to vector<2x128xf32>
    %1007 = arith.addf %1004, %1006 : vector<2x128xf32>
    %1008 = vector.extract_strided_slice %1002 {offsets = [0, 128], sizes = [2, 128], strides = [1, 1]} : vector<2x256xf32> to vector<2x128xf32>
    %1009 = arith.negf %1007 : vector<2x128xf32>
    %1010 = math.exp %1009 : vector<2x128xf32>
    %cst_261 = arith.constant 1.000000e+00 : f32
    %1011 = vector.broadcast %cst_261 : f32 to vector<2x128xf32>
    %1012 = arith.addf %1011, %1010 : vector<2x128xf32>
    %1013 = arith.divf %1011, %1012 : vector<2x128xf32>
    %1014 = math.tanh %1007 : vector<2x128xf32>
    %1015 = vector.extract_strided_slice %1013 {offsets = [0, 0], sizes = [2, 32], strides = [1, 1]} : vector<2x128xf32> to vector<2x32xf32>
    %1016 = vector.extract_strided_slice %1013 {offsets = [0, 32], sizes = [2, 32], strides = [1, 1]} : vector<2x128xf32> to vector<2x32xf32>
    %1017 = vector.extract_strided_slice %1014 {offsets = [0, 64], sizes = [2, 32], strides = [1, 1]} : vector<2x128xf32> to vector<2x32xf32>
    %1018 = vector.extract_strided_slice %1013 {offsets = [0, 96], sizes = [2, 32], strides = [1, 1]} : vector<2x128xf32> to vector<2x32xf32>
    %1019 = arith.mulf %1016, %829 : vector<2x32xf32>
    %1020 = arith.mulf %1015, %1017 : vector<2x32xf32>
    %1021 = arith.addf %1019, %1020 : vector<2x32xf32>
    %1022 = math.tanh %1021 : vector<2x32xf32>
    %1023 = arith.mulf %1018, %1022 : vector<2x32xf32>
    %c0_262 = arith.constant 0 : index
    %c256_263 = arith.constant 256 : index
    %1024 = vector.load %arg2[%c0_262, %c256_263] : memref<64x768xf32, #tpu.memory_space<vmem>>, vector<32x216xf32>
    %cst_264 = arith.constant dense<0.000000e+00> : vector<2x216xf32>
    %1025 = tpu.matmul %1023, %1024, %cst_264 {dimension_numbers = #tpu.dot_dimension_numbers<[1], [0], [0], [1], [0, 0, 1, 1], [], []>} : vector<2x32xf32>, vector<32x216xf32>, vector<2x216xf32> -> vector<2x216xf32>
    %1026 = vector.extract_strided_slice %1025 {offsets = [0, 0], sizes = [2, 128], strides = [1, 1]} : vector<2x216xf32> to vector<2x128xf32>
    %1027 = vector.extract_strided_slice %1025 {offsets = [0, 128], sizes = [2, 88], strides = [1, 1]} : vector<2x216xf32> to vector<2x88xf32>
    %c50_265 = arith.constant 50 : index
    %c0_266 = arith.constant 0 : index
    %1028 = vector.load %arg2[%c50_265, %c0_266] : memref<64x768xf32, #tpu.memory_space<vmem>>, vector<1x88xf32>
    %1029 = vector.broadcast %1028 : vector<1x88xf32> to vector<2x88xf32>
    %1030 = arith.addf %1027, %1029 : vector<2x88xf32>
    %1031 = vector.extract_strided_slice %1030 {offsets = [0, 0], sizes = [2, 8], strides = [1, 1]} : vector<2x88xf32> to vector<2x8xf32>
    %1032 = vector.extract_strided_slice %1030 {offsets = [0, 8], sizes = [2, 16], strides = [1, 1]} : vector<2x88xf32> to vector<2x16xf32>
    %1033 = vector.extract_strided_slice %1030 {offsets = [0, 24], sizes = [2, 16], strides = [1, 1]} : vector<2x88xf32> to vector<2x16xf32>
    %1034 = vector.extract_strided_slice %1030 {offsets = [0, 40], sizes = [2, 16], strides = [1, 1]} : vector<2x88xf32> to vector<2x16xf32>
    %1035 = vector.extract_strided_slice %1030 {offsets = [0, 56], sizes = [2, 32], strides = [1, 1]} : vector<2x88xf32> to vector<2x32xf32>
    %1036 = vector.extract_strided_slice %983 {offsets = [0, 128], sizes = [2, 64], strides = [1, 1]} : vector<2x192xf32> to vector<2x64xf32>
    %1037 = arith.addf %1032, %883 : vector<2x16xf32>
    %1038 = tpu.concatenate %411, %595, %787, %979 in 1 : vector<2x16xf32>, vector<2x16xf32>, vector<2x16xf32>, vector<2x16xf32> -> vector<2x64xf32>
    %1039 = tpu.concatenate %1037, %1037, %1037, %1037 in 1 : vector<2x16xf32>, vector<2x16xf32>, vector<2x16xf32>, vector<2x16xf32> -> vector<2x64xf32>
    %1040 = arith.addf %1039, %1038 : vector<2x64xf32>
    %1041 = math.tanh %1040 : vector<2x64xf32>
    %c0_267 = arith.constant 0 : index
    %c760_268 = arith.constant 760 : index
    %1042 = vector.load %arg2[%c0_267, %c760_268] : memref<64x768xf32, #tpu.memory_space<vmem>>, vector<64x4xf32>
    %cst_269 = arith.constant dense<0.000000e+00> : vector<2x4xf32>
    %1043 = tpu.matmul %1041, %1042, %cst_269 {dimension_numbers = #tpu.dot_dimension_numbers<[1], [0], [0], [1], [0, 0, 1, 1], [], []>} : vector<2x64xf32>, vector<64x4xf32>, vector<2x4xf32> -> vector<2x4xf32>
    %cst_270 = arith.constant dense<0xFF800000> : vector<2xf32>
    %1044 = vector.multi_reduction <maximumf>, %1043, %cst_270 [1] : vector<2x4xf32> to vector<2xf32>
    %1045 = vector.shape_cast %1044 : vector<2xf32> to vector<2x1xf32>
    %1046 = vector.broadcast %1045 : vector<2x1xf32> to vector<2x4xf32>
    %1047 = arith.subf %1043, %1046 : vector<2x4xf32>
    %1048 = math.exp %1047 : vector<2x4xf32>
    %cst_271 = arith.constant dense<0.000000e+00> : vector<2xf32>
    %1049 = vector.multi_reduction <add>, %1048, %cst_271 [1] : vector<2x4xf32> to vector<2xf32>
    %1050 = vector.shape_cast %1049 : vector<2xf32> to vector<2x1xf32>
    %1051 = tpu.reciprocal %1050 {approx = true} : vector<2x1xf32> -> vector<2x1xf32>
    %1052 = vector.extract_strided_slice %1048 {offsets = [0, 0], sizes = [2, 1], strides = [1, 1]} : vector<2x4xf32> to vector<2x1xf32>
    %1053 = vector.broadcast %1052 : vector<2x1xf32> to vector<2x32xf32>
    %1054 = arith.mulf %1053, %413 : vector<2x32xf32>
    %1055 = vector.extract_strided_slice %1048 {offsets = [0, 1], sizes = [2, 1], strides = [1, 1]} : vector<2x4xf32> to vector<2x1xf32>
    %1056 = vector.broadcast %1055 : vector<2x1xf32> to vector<2x32xf32>
    %1057 = arith.mulf %1056, %597 : vector<2x32xf32>
    %1058 = arith.addf %1054, %1057 : vector<2x32xf32>
    %1059 = vector.extract_strided_slice %1048 {offsets = [0, 2], sizes = [2, 1], strides = [1, 1]} : vector<2x4xf32> to vector<2x1xf32>
    %1060 = vector.broadcast %1059 : vector<2x1xf32> to vector<2x32xf32>
    %1061 = arith.mulf %1060, %789 : vector<2x32xf32>
    %1062 = arith.addf %1058, %1061 : vector<2x32xf32>
    %1063 = vector.extract_strided_slice %1048 {offsets = [0, 3], sizes = [2, 1], strides = [1, 1]} : vector<2x4xf32> to vector<2x1xf32>
    %1064 = vector.broadcast %1063 : vector<2x1xf32> to vector<2x32xf32>
    %1065 = arith.mulf %1064, %981 : vector<2x32xf32>
    %1066 = arith.addf %1062, %1065 : vector<2x32xf32>
    %1067 = vector.broadcast %1051 : vector<2x1xf32> to vector<2x32xf32>
    %1068 = arith.mulf %1066, %1067 : vector<2x32xf32>
    %1069 = vector.extract_strided_slice %1068 {offsets = [0, 0], sizes = [2, 16], strides = [1, 1]} : vector<2x32xf32> to vector<2x16xf32>
    %1070 = vector.extract_strided_slice %1068 {offsets = [0, 16], sizes = [2, 16], strides = [1, 1]} : vector<2x32xf32> to vector<2x16xf32>
    %c32_272 = arith.constant 32 : index
    %c0_273 = arith.constant 0 : index
    %1071 = vector.load %arg2[%c32_272, %c0_273] : memref<64x768xf32, #tpu.memory_space<vmem>>, vector<16x80xf32>
    %cst_274 = arith.constant dense<0.000000e+00> : vector<2x80xf32>
    %1072 = tpu.matmul %1069, %1071, %cst_274 {dimension_numbers = #tpu.dot_dimension_numbers<[1], [0], [0], [1], [0, 0, 1, 1], [], []>} : vector<2x16xf32>, vector<16x80xf32>, vector<2x80xf32> -> vector<2x80xf32>
    %1073 = vector.extract_strided_slice %1072 {offsets = [0, 0], sizes = [2, 64], strides = [1, 1]} : vector<2x80xf32> to vector<2x64xf32>
    %1074 = arith.addf %1073, %1036 : vector<2x64xf32>
    %1075 = vector.extract_strided_slice %1072 {offsets = [0, 64], sizes = [2, 16], strides = [1, 1]} : vector<2x80xf32> to vector<2x16xf32>
    %1076 = arith.negf %1074 : vector<2x64xf32>
    %1077 = math.exp %1076 : vector<2x64xf32>
    %cst_275 = arith.constant 1.000000e+00 : f32
    %1078 = vector.broadcast %cst_275 : f32 to vector<2x64xf32>
    %1079 = arith.addf %1078, %1077 : vector<2x64xf32>
    %1080 = arith.divf %1078, %1079 : vector<2x64xf32>
    %1081 = math.tanh %1074 : vector<2x64xf32>
    %1082 = vector.extract_strided_slice %1080 {offsets = [0, 0], sizes = [2, 16], strides = [1, 1]} : vector<2x64xf32> to vector<2x16xf32>
    %1083 = vector.extract_strided_slice %1080 {offsets = [0, 16], sizes = [2, 16], strides = [1, 1]} : vector<2x64xf32> to vector<2x16xf32>
    %1084 = vector.extract_strided_slice %1080 {offsets = [0, 32], sizes = [2, 16], strides = [1, 1]} : vector<2x64xf32> to vector<2x16xf32>
    %1085 = vector.extract_strided_slice %1081 {offsets = [0, 48], sizes = [2, 16], strides = [1, 1]} : vector<2x64xf32> to vector<2x16xf32>
    %1086 = arith.mulf %1082, %1070 : vector<2x16xf32>
    %1087 = arith.mulf %1084, %1085 : vector<2x16xf32>
    %1088 = arith.addf %1086, %1087 : vector<2x16xf32>
    %1089 = math.tanh %1088 : vector<2x16xf32>
    %1090 = arith.mulf %1083, %1089 : vector<2x16xf32>
    %1091 = arith.addf %1033, %940 : vector<2x16xf32>
    %1092 = tpu.concatenate %412, %596, %788, %980 in 1 : vector<2x16xf32>, vector<2x16xf32>, vector<2x16xf32>, vector<2x16xf32> -> vector<2x64xf32>
    %1093 = tpu.concatenate %1091, %1091, %1091, %1091 in 1 : vector<2x16xf32>, vector<2x16xf32>, vector<2x16xf32>, vector<2x16xf32> -> vector<2x64xf32>
    %1094 = arith.addf %1093, %1092 : vector<2x64xf32>
    %1095 = math.tanh %1094 : vector<2x64xf32>
    %c0_276 = arith.constant 0 : index
    %c764_277 = arith.constant 764 : index
    %1096 = vector.load %arg2[%c0_276, %c764_277] : memref<64x768xf32, #tpu.memory_space<vmem>>, vector<64x4xf32>
    %cst_278 = arith.constant dense<0.000000e+00> : vector<2x4xf32>
    %1097 = tpu.matmul %1095, %1096, %cst_278 {dimension_numbers = #tpu.dot_dimension_numbers<[1], [0], [0], [1], [0, 0, 1, 1], [], []>} : vector<2x64xf32>, vector<64x4xf32>, vector<2x4xf32> -> vector<2x4xf32>
    %cst_279 = arith.constant dense<0xFF800000> : vector<2xf32>
    %1098 = vector.multi_reduction <maximumf>, %1097, %cst_279 [1] : vector<2x4xf32> to vector<2xf32>
    %1099 = vector.shape_cast %1098 : vector<2xf32> to vector<2x1xf32>
    %1100 = vector.broadcast %1099 : vector<2x1xf32> to vector<2x4xf32>
    %1101 = arith.subf %1097, %1100 : vector<2x4xf32>
    %1102 = math.exp %1101 : vector<2x4xf32>
    %cst_280 = arith.constant dense<0.000000e+00> : vector<2xf32>
    %1103 = vector.multi_reduction <add>, %1102, %cst_280 [1] : vector<2x4xf32> to vector<2xf32>
    %1104 = vector.shape_cast %1103 : vector<2xf32> to vector<2x1xf32>
    %1105 = tpu.reciprocal %1104 {approx = true} : vector<2x1xf32> -> vector<2x1xf32>
    %1106 = vector.extract_strided_slice %1102 {offsets = [0, 0], sizes = [2, 1], strides = [1, 1]} : vector<2x4xf32> to vector<2x1xf32>
    %1107 = vector.broadcast %1106 : vector<2x1xf32> to vector<2x32xf32>
    %1108 = arith.mulf %1107, %414 : vector<2x32xf32>
    %1109 = vector.extract_strided_slice %1102 {offsets = [0, 1], sizes = [2, 1], strides = [1, 1]} : vector<2x4xf32> to vector<2x1xf32>
    %1110 = vector.broadcast %1109 : vector<2x1xf32> to vector<2x32xf32>
    %1111 = arith.mulf %1110, %598 : vector<2x32xf32>
    %1112 = arith.addf %1108, %1111 : vector<2x32xf32>
    %1113 = vector.extract_strided_slice %1102 {offsets = [0, 2], sizes = [2, 1], strides = [1, 1]} : vector<2x4xf32> to vector<2x1xf32>
    %1114 = vector.broadcast %1113 : vector<2x1xf32> to vector<2x32xf32>
    %1115 = arith.mulf %1114, %790 : vector<2x32xf32>
    %1116 = arith.addf %1112, %1115 : vector<2x32xf32>
    %1117 = vector.extract_strided_slice %1102 {offsets = [0, 3], sizes = [2, 1], strides = [1, 1]} : vector<2x4xf32> to vector<2x1xf32>
    %1118 = vector.broadcast %1117 : vector<2x1xf32> to vector<2x32xf32>
    %1119 = arith.mulf %1118, %982 : vector<2x32xf32>
    %1120 = arith.addf %1116, %1119 : vector<2x32xf32>
    %1121 = vector.broadcast %1105 : vector<2x1xf32> to vector<2x32xf32>
    %1122 = arith.mulf %1120, %1121 : vector<2x32xf32>
    %1123 = vector.extract_strided_slice %1122 {offsets = [0, 0], sizes = [2, 16], strides = [1, 1]} : vector<2x32xf32> to vector<2x16xf32>
    %1124 = vector.extract_strided_slice %1122 {offsets = [0, 16], sizes = [2, 16], strides = [1, 1]} : vector<2x32xf32> to vector<2x16xf32>
    %1125 = tpu.concatenate %1123, %1090 in 1 : vector<2x16xf32>, vector<2x16xf32> -> vector<2x32xf32>
    %c0_281 = arith.constant 0 : index
    %c680_282 = arith.constant 680 : index
    %1126 = vector.load %arg2[%c0_281, %c680_282] : memref<64x768xf32, #tpu.memory_space<vmem>>, vector<32x80xf32>
    %cst_283 = arith.constant dense<0.000000e+00> : vector<2x80xf32>
    %1127 = tpu.matmul %1125, %1126, %cst_283 {dimension_numbers = #tpu.dot_dimension_numbers<[1], [0], [0], [1], [0, 0, 1, 1], [], []>} : vector<2x32xf32>, vector<32x80xf32>, vector<2x80xf32> -> vector<2x80xf32>
    %1128 = vector.extract_strided_slice %1127 {offsets = [0, 0], sizes = [2, 64], strides = [1, 1]} : vector<2x80xf32> to vector<2x64xf32>
    %c52_284 = arith.constant 52 : index
    %c0_285 = arith.constant 0 : index
    %1129 = vector.load %arg2[%c52_284, %c0_285] : memref<64x768xf32, #tpu.memory_space<vmem>>, vector<1x64xf32>
    %1130 = vector.broadcast %1129 : vector<1x64xf32> to vector<2x64xf32>
    %1131 = arith.addf %1128, %1130 : vector<2x64xf32>
    %1132 = vector.extract_strided_slice %1127 {offsets = [0, 64], sizes = [2, 16], strides = [1, 1]} : vector<2x80xf32> to vector<2x16xf32>
    %1133 = arith.negf %1131 : vector<2x64xf32>
    %1134 = math.exp %1133 : vector<2x64xf32>
    %cst_286 = arith.constant 1.000000e+00 : f32
    %1135 = vector.broadcast %cst_286 : f32 to vector<2x64xf32>
    %1136 = arith.addf %1135, %1134 : vector<2x64xf32>
    %1137 = arith.divf %1135, %1136 : vector<2x64xf32>
    %1138 = math.tanh %1131 : vector<2x64xf32>
    %1139 = vector.extract_strided_slice %1137 {offsets = [0, 0], sizes = [2, 16], strides = [1, 1]} : vector<2x64xf32> to vector<2x16xf32>
    %1140 = vector.extract_strided_slice %1137 {offsets = [0, 16], sizes = [2, 16], strides = [1, 1]} : vector<2x64xf32> to vector<2x16xf32>
    %1141 = vector.extract_strided_slice %1137 {offsets = [0, 32], sizes = [2, 16], strides = [1, 1]} : vector<2x64xf32> to vector<2x16xf32>
    %1142 = vector.extract_strided_slice %1138 {offsets = [0, 48], sizes = [2, 16], strides = [1, 1]} : vector<2x64xf32> to vector<2x16xf32>
    %1143 = arith.mulf %1139, %1124 : vector<2x16xf32>
    %1144 = arith.mulf %1141, %1142 : vector<2x16xf32>
    %1145 = arith.addf %1143, %1144 : vector<2x16xf32>
    %1146 = math.tanh %1145 : vector<2x16xf32>
    %1147 = arith.mulf %1140, %1146 : vector<2x16xf32>
    %c53_287 = arith.constant 53 : index
    %c0_288 = arith.constant 0 : index
    %1148 = vector.load %arg2[%c53_287, %c0_288] : memref<64x768xf32, #tpu.memory_space<vmem>>, vector<1x16xf32>
    %1149 = vector.broadcast %1148 : vector<1x16xf32> to vector<2x16xf32>
    %1150 = arith.mulf %1147, %1149 : vector<2x16xf32>
    %cst_289 = arith.constant dense<0.000000e+00> : vector<2xf32>
    %1151 = vector.multi_reduction <add>, %1150, %cst_289 [1] : vector<2x16xf32> to vector<2xf32>
    %1152 = vector.shape_cast %1151 : vector<2xf32> to vector<2x1xf32>
    %c54_290 = arith.constant 54 : index
    %c0_291 = arith.constant 0 : index
    %1153 = vector.load %arg2[%c54_290, %c0_291] : memref<64x768xf32, #tpu.memory_space<vmem>>, vector<1x1xf32>
    %1154 = vector.broadcast %1153 : vector<1x1xf32> to vector<2x1xf32>
    %1155 = arith.addf %1152, %1154 : vector<2x1xf32>
    %1156 = arith.negf %1155 : vector<2x1xf32>
    %1157 = math.exp %1156 : vector<2x1xf32>
    %cst_292 = arith.constant 1.000000e+00 : f32
    %1158 = vector.broadcast %cst_292 : f32 to vector<2x1xf32>
    %1159 = arith.addf %1158, %1157 : vector<2x1xf32>
    %1160 = arith.divf %1158, %1159 : vector<2x1xf32>
    %1161 = math.tanh %1035 : vector<2x32xf32>
    %c0_293 = arith.constant 0 : index
    %c664_294 = arith.constant 664 : index
    %1162 = vector.load %arg2[%c0_293, %c664_294] : memref<64x768xf32, #tpu.memory_space<vmem>>, vector<32x16xf32>
    %cst_295 = arith.constant dense<0.000000e+00> : vector<2x16xf32>
    %1163 = tpu.matmul %1161, %1162, %cst_295 {dimension_numbers = #tpu.dot_dimension_numbers<[1], [0], [0], [1], [0, 0, 1, 1], [], []>} : vector<2x32xf32>, vector<32x16xf32>, vector<2x16xf32> -> vector<2x16xf32>
    %1164 = arith.addf %1034, %1163 : vector<2x16xf32>
    %1165 = math.tanh %1164 : vector<2x16xf32>
    %c32_296 = arith.constant 32 : index
    %c80_297 = arith.constant 80 : index
    %1166 = vector.load %arg2[%c32_296, %c80_297] : memref<64x768xf32, #tpu.memory_space<vmem>>, vector<16x32xf32>
    %cst_298 = arith.constant dense<0.000000e+00> : vector<2x32xf32>
    %1167 = tpu.matmul %1165, %1166, %cst_298 {dimension_numbers = #tpu.dot_dimension_numbers<[1], [0], [0], [1], [0, 0, 1, 1], [], []>} : vector<2x16xf32>, vector<16x32xf32>, vector<2x32xf32> -> vector<2x32xf32>
    %c51_299 = arith.constant 51 : index
    %c0_300 = arith.constant 0 : index
    %1168 = vector.load %arg2[%c51_299, %c0_300] : memref<64x768xf32, #tpu.memory_space<vmem>>, vector<1x32xf32>
    %1169 = vector.broadcast %1168 : vector<1x32xf32> to vector<2x32xf32>
    %1170 = arith.addf %1167, %1169 : vector<2x32xf32>
    %1171 = vector.extract_strided_slice %1170 {offsets = [0, 0], sizes = [2, 16], strides = [1, 1]} : vector<2x32xf32> to vector<2x16xf32>
    %1172 = vector.extract_strided_slice %1170 {offsets = [0, 16], sizes = [2, 16], strides = [1, 1]} : vector<2x32xf32> to vector<2x16xf32>
    %1173 = tpu.concatenate %1165, %1088 in 1 : vector<2x16xf32>, vector<2x16xf32> -> vector<2x32xf32>
    %1174 = tpu.concatenate %1165, %1145 in 1 : vector<2x16xf32>, vector<2x16xf32> -> vector<2x32xf32>
    %c56 = arith.constant 56 : index
    %c0_301 = arith.constant 0 : index
    %1175 = vector.load %arg4[%c56, %c0_301] : memref<64x192xf32, #tpu.memory_space<vmem>>, vector<2x192xf32>
    %1176 = vector.extract_strided_slice %1175 {offsets = [0, 0], sizes = [2, 128], strides = [1, 1]} : vector<2x192xf32> to vector<2x128xf32>
    %1177 = arith.addf %1176, %1008 : vector<2x128xf32>
    %1178 = arith.negf %1177 : vector<2x128xf32>
    %1179 = math.exp %1178 : vector<2x128xf32>
    %cst_302 = arith.constant 1.000000e+00 : f32
    %1180 = vector.broadcast %cst_302 : f32 to vector<2x128xf32>
    %1181 = arith.addf %1180, %1179 : vector<2x128xf32>
    %1182 = arith.divf %1180, %1181 : vector<2x128xf32>
    %1183 = math.tanh %1177 : vector<2x128xf32>
    %1184 = vector.extract_strided_slice %1182 {offsets = [0, 0], sizes = [2, 32], strides = [1, 1]} : vector<2x128xf32> to vector<2x32xf32>
    %1185 = vector.extract_strided_slice %1182 {offsets = [0, 32], sizes = [2, 32], strides = [1, 1]} : vector<2x128xf32> to vector<2x32xf32>
    %1186 = vector.extract_strided_slice %1183 {offsets = [0, 64], sizes = [2, 32], strides = [1, 1]} : vector<2x128xf32> to vector<2x32xf32>
    %1187 = vector.extract_strided_slice %1182 {offsets = [0, 96], sizes = [2, 32], strides = [1, 1]} : vector<2x128xf32> to vector<2x32xf32>
    %1188 = arith.mulf %1185, %998 : vector<2x32xf32>
    %1189 = arith.mulf %1184, %1186 : vector<2x32xf32>
    %1190 = arith.addf %1188, %1189 : vector<2x32xf32>
    %1191 = math.tanh %1190 : vector<2x32xf32>
    %1192 = arith.mulf %1187, %1191 : vector<2x32xf32>
    %c0_303 = arith.constant 0 : index
    %c0_304 = arith.constant 0 : index
    %1193 = vector.load %arg2[%c0_303, %c0_304] : memref<64x768xf32, #tpu.memory_space<vmem>>, vector<32x256xf32>
    %cst_305 = arith.constant dense<0.000000e+00> : vector<2x256xf32>
    %1194 = tpu.matmul %1192, %1193, %cst_305 {dimension_numbers = #tpu.dot_dimension_numbers<[1], [0], [0], [1], [0, 0, 1, 1], [], []>} : vector<2x32xf32>, vector<32x256xf32>, vector<2x256xf32> -> vector<2x256xf32>
    %1195 = vector.extract_strided_slice %1194 {offsets = [0, 0], sizes = [2, 128], strides = [1, 1]} : vector<2x256xf32> to vector<2x128xf32>
    %1196 = arith.addf %1195, %1026 : vector<2x128xf32>
    %c49_306 = arith.constant 49 : index
    %c0_307 = arith.constant 0 : index
    %1197 = vector.load %arg2[%c49_306, %c0_307] : memref<64x768xf32, #tpu.memory_space<vmem>>, vector<1x128xf32>
    %1198 = vector.broadcast %1197 : vector<1x128xf32> to vector<2x128xf32>
    %1199 = arith.addf %1196, %1198 : vector<2x128xf32>
    %1200 = arith.negf %1199 : vector<2x128xf32>
    %1201 = math.exp %1200 : vector<2x128xf32>
    %cst_308 = arith.constant 1.000000e+00 : f32
    %1202 = vector.broadcast %cst_308 : f32 to vector<2x128xf32>
    %1203 = arith.addf %1202, %1201 : vector<2x128xf32>
    %1204 = arith.divf %1202, %1203 : vector<2x128xf32>
    %1205 = math.tanh %1199 : vector<2x128xf32>
    %1206 = vector.extract_strided_slice %1204 {offsets = [0, 0], sizes = [2, 32], strides = [1, 1]} : vector<2x128xf32> to vector<2x32xf32>
    %1207 = vector.extract_strided_slice %1204 {offsets = [0, 32], sizes = [2, 32], strides = [1, 1]} : vector<2x128xf32> to vector<2x32xf32>
    %1208 = vector.extract_strided_slice %1205 {offsets = [0, 64], sizes = [2, 32], strides = [1, 1]} : vector<2x128xf32> to vector<2x32xf32>
    %1209 = vector.extract_strided_slice %1204 {offsets = [0, 96], sizes = [2, 32], strides = [1, 1]} : vector<2x128xf32> to vector<2x32xf32>
    %1210 = arith.mulf %1207, %1021 : vector<2x32xf32>
    %1211 = arith.mulf %1206, %1208 : vector<2x32xf32>
    %1212 = arith.addf %1210, %1211 : vector<2x32xf32>
    %1213 = math.tanh %1212 : vector<2x32xf32>
    %1214 = arith.mulf %1209, %1213 : vector<2x32xf32>
    %c0_309 = arith.constant 0 : index
    %c256_310 = arith.constant 256 : index
    %1215 = vector.load %arg2[%c0_309, %c256_310] : memref<64x768xf32, #tpu.memory_space<vmem>>, vector<32x216xf32>
    %cst_311 = arith.constant dense<0.000000e+00> : vector<2x216xf32>
    %1216 = tpu.matmul %1214, %1215, %cst_311 {dimension_numbers = #tpu.dot_dimension_numbers<[1], [0], [0], [1], [0, 0, 1, 1], [], []>} : vector<2x32xf32>, vector<32x216xf32>, vector<2x216xf32> -> vector<2x216xf32>
    %1217 = vector.extract_strided_slice %1216 {offsets = [0, 128], sizes = [2, 88], strides = [1, 1]} : vector<2x216xf32> to vector<2x88xf32>
    %c50_312 = arith.constant 50 : index
    %c0_313 = arith.constant 0 : index
    %1218 = vector.load %arg2[%c50_312, %c0_313] : memref<64x768xf32, #tpu.memory_space<vmem>>, vector<1x88xf32>
    %1219 = vector.broadcast %1218 : vector<1x88xf32> to vector<2x88xf32>
    %1220 = arith.addf %1217, %1219 : vector<2x88xf32>
    %1221 = vector.extract_strided_slice %1220 {offsets = [0, 0], sizes = [2, 8], strides = [1, 1]} : vector<2x88xf32> to vector<2x8xf32>
    %1222 = vector.extract_strided_slice %1220 {offsets = [0, 8], sizes = [2, 16], strides = [1, 1]} : vector<2x88xf32> to vector<2x16xf32>
    %1223 = vector.extract_strided_slice %1220 {offsets = [0, 24], sizes = [2, 16], strides = [1, 1]} : vector<2x88xf32> to vector<2x16xf32>
    %1224 = vector.extract_strided_slice %1175 {offsets = [0, 128], sizes = [2, 64], strides = [1, 1]} : vector<2x192xf32> to vector<2x64xf32>
    %1225 = arith.addf %1222, %1075 : vector<2x16xf32>
    %1226 = tpu.concatenate %595, %787, %979, %1171 in 1 : vector<2x16xf32>, vector<2x16xf32>, vector<2x16xf32>, vector<2x16xf32> -> vector<2x64xf32>
    %1227 = tpu.concatenate %1225, %1225, %1225, %1225 in 1 : vector<2x16xf32>, vector<2x16xf32>, vector<2x16xf32>, vector<2x16xf32> -> vector<2x64xf32>
    %1228 = arith.addf %1227, %1226 : vector<2x64xf32>
    %1229 = math.tanh %1228 : vector<2x64xf32>
    %c0_314 = arith.constant 0 : index
    %c760_315 = arith.constant 760 : index
    %1230 = vector.load %arg2[%c0_314, %c760_315] : memref<64x768xf32, #tpu.memory_space<vmem>>, vector<64x4xf32>
    %cst_316 = arith.constant dense<0.000000e+00> : vector<2x4xf32>
    %1231 = tpu.matmul %1229, %1230, %cst_316 {dimension_numbers = #tpu.dot_dimension_numbers<[1], [0], [0], [1], [0, 0, 1, 1], [], []>} : vector<2x64xf32>, vector<64x4xf32>, vector<2x4xf32> -> vector<2x4xf32>
    %cst_317 = arith.constant dense<0xFF800000> : vector<2xf32>
    %1232 = vector.multi_reduction <maximumf>, %1231, %cst_317 [1] : vector<2x4xf32> to vector<2xf32>
    %1233 = vector.shape_cast %1232 : vector<2xf32> to vector<2x1xf32>
    %1234 = vector.broadcast %1233 : vector<2x1xf32> to vector<2x4xf32>
    %1235 = arith.subf %1231, %1234 : vector<2x4xf32>
    %1236 = math.exp %1235 : vector<2x4xf32>
    %cst_318 = arith.constant dense<0.000000e+00> : vector<2xf32>
    %1237 = vector.multi_reduction <add>, %1236, %cst_318 [1] : vector<2x4xf32> to vector<2xf32>
    %1238 = vector.shape_cast %1237 : vector<2xf32> to vector<2x1xf32>
    %1239 = tpu.reciprocal %1238 {approx = true} : vector<2x1xf32> -> vector<2x1xf32>
    %1240 = vector.extract_strided_slice %1236 {offsets = [0, 0], sizes = [2, 1], strides = [1, 1]} : vector<2x4xf32> to vector<2x1xf32>
    %1241 = vector.broadcast %1240 : vector<2x1xf32> to vector<2x32xf32>
    %1242 = arith.mulf %1241, %597 : vector<2x32xf32>
    %1243 = vector.extract_strided_slice %1236 {offsets = [0, 1], sizes = [2, 1], strides = [1, 1]} : vector<2x4xf32> to vector<2x1xf32>
    %1244 = vector.broadcast %1243 : vector<2x1xf32> to vector<2x32xf32>
    %1245 = arith.mulf %1244, %789 : vector<2x32xf32>
    %1246 = arith.addf %1242, %1245 : vector<2x32xf32>
    %1247 = vector.extract_strided_slice %1236 {offsets = [0, 2], sizes = [2, 1], strides = [1, 1]} : vector<2x4xf32> to vector<2x1xf32>
    %1248 = vector.broadcast %1247 : vector<2x1xf32> to vector<2x32xf32>
    %1249 = arith.mulf %1248, %981 : vector<2x32xf32>
    %1250 = arith.addf %1246, %1249 : vector<2x32xf32>
    %1251 = vector.extract_strided_slice %1236 {offsets = [0, 3], sizes = [2, 1], strides = [1, 1]} : vector<2x4xf32> to vector<2x1xf32>
    %1252 = vector.broadcast %1251 : vector<2x1xf32> to vector<2x32xf32>
    %1253 = arith.mulf %1252, %1173 : vector<2x32xf32>
    %1254 = arith.addf %1250, %1253 : vector<2x32xf32>
    %1255 = vector.broadcast %1239 : vector<2x1xf32> to vector<2x32xf32>
    %1256 = arith.mulf %1254, %1255 : vector<2x32xf32>
    %1257 = vector.extract_strided_slice %1256 {offsets = [0, 0], sizes = [2, 16], strides = [1, 1]} : vector<2x32xf32> to vector<2x16xf32>
    %1258 = vector.extract_strided_slice %1256 {offsets = [0, 16], sizes = [2, 16], strides = [1, 1]} : vector<2x32xf32> to vector<2x16xf32>
    %c32_319 = arith.constant 32 : index
    %c0_320 = arith.constant 0 : index
    %1259 = vector.load %arg2[%c32_319, %c0_320] : memref<64x768xf32, #tpu.memory_space<vmem>>, vector<16x80xf32>
    %cst_321 = arith.constant dense<0.000000e+00> : vector<2x80xf32>
    %1260 = tpu.matmul %1257, %1259, %cst_321 {dimension_numbers = #tpu.dot_dimension_numbers<[1], [0], [0], [1], [0, 0, 1, 1], [], []>} : vector<2x16xf32>, vector<16x80xf32>, vector<2x80xf32> -> vector<2x80xf32>
    %1261 = vector.extract_strided_slice %1260 {offsets = [0, 0], sizes = [2, 64], strides = [1, 1]} : vector<2x80xf32> to vector<2x64xf32>
    %1262 = arith.addf %1261, %1224 : vector<2x64xf32>
    %1263 = arith.negf %1262 : vector<2x64xf32>
    %1264 = math.exp %1263 : vector<2x64xf32>
    %cst_322 = arith.constant 1.000000e+00 : f32
    %1265 = vector.broadcast %cst_322 : f32 to vector<2x64xf32>
    %1266 = arith.addf %1265, %1264 : vector<2x64xf32>
    %1267 = arith.divf %1265, %1266 : vector<2x64xf32>
    %1268 = math.tanh %1262 : vector<2x64xf32>
    %1269 = vector.extract_strided_slice %1267 {offsets = [0, 0], sizes = [2, 16], strides = [1, 1]} : vector<2x64xf32> to vector<2x16xf32>
    %1270 = vector.extract_strided_slice %1267 {offsets = [0, 16], sizes = [2, 16], strides = [1, 1]} : vector<2x64xf32> to vector<2x16xf32>
    %1271 = vector.extract_strided_slice %1267 {offsets = [0, 32], sizes = [2, 16], strides = [1, 1]} : vector<2x64xf32> to vector<2x16xf32>
    %1272 = vector.extract_strided_slice %1268 {offsets = [0, 48], sizes = [2, 16], strides = [1, 1]} : vector<2x64xf32> to vector<2x16xf32>
    %1273 = arith.mulf %1269, %1258 : vector<2x16xf32>
    %1274 = arith.mulf %1271, %1272 : vector<2x16xf32>
    %1275 = arith.addf %1273, %1274 : vector<2x16xf32>
    %1276 = math.tanh %1275 : vector<2x16xf32>
    %1277 = arith.mulf %1270, %1276 : vector<2x16xf32>
    %1278 = arith.addf %1223, %1132 : vector<2x16xf32>
    %1279 = tpu.concatenate %596, %788, %980, %1172 in 1 : vector<2x16xf32>, vector<2x16xf32>, vector<2x16xf32>, vector<2x16xf32> -> vector<2x64xf32>
    %1280 = tpu.concatenate %1278, %1278, %1278, %1278 in 1 : vector<2x16xf32>, vector<2x16xf32>, vector<2x16xf32>, vector<2x16xf32> -> vector<2x64xf32>
    %1281 = arith.addf %1280, %1279 : vector<2x64xf32>
    %1282 = math.tanh %1281 : vector<2x64xf32>
    %c0_323 = arith.constant 0 : index
    %c764_324 = arith.constant 764 : index
    %1283 = vector.load %arg2[%c0_323, %c764_324] : memref<64x768xf32, #tpu.memory_space<vmem>>, vector<64x4xf32>
    %cst_325 = arith.constant dense<0.000000e+00> : vector<2x4xf32>
    %1284 = tpu.matmul %1282, %1283, %cst_325 {dimension_numbers = #tpu.dot_dimension_numbers<[1], [0], [0], [1], [0, 0, 1, 1], [], []>} : vector<2x64xf32>, vector<64x4xf32>, vector<2x4xf32> -> vector<2x4xf32>
    %cst_326 = arith.constant dense<0xFF800000> : vector<2xf32>
    %1285 = vector.multi_reduction <maximumf>, %1284, %cst_326 [1] : vector<2x4xf32> to vector<2xf32>
    %1286 = vector.shape_cast %1285 : vector<2xf32> to vector<2x1xf32>
    %1287 = vector.broadcast %1286 : vector<2x1xf32> to vector<2x4xf32>
    %1288 = arith.subf %1284, %1287 : vector<2x4xf32>
    %1289 = math.exp %1288 : vector<2x4xf32>
    %cst_327 = arith.constant dense<0.000000e+00> : vector<2xf32>
    %1290 = vector.multi_reduction <add>, %1289, %cst_327 [1] : vector<2x4xf32> to vector<2xf32>
    %1291 = vector.shape_cast %1290 : vector<2xf32> to vector<2x1xf32>
    %1292 = tpu.reciprocal %1291 {approx = true} : vector<2x1xf32> -> vector<2x1xf32>
    %1293 = vector.extract_strided_slice %1289 {offsets = [0, 0], sizes = [2, 1], strides = [1, 1]} : vector<2x4xf32> to vector<2x1xf32>
    %1294 = vector.broadcast %1293 : vector<2x1xf32> to vector<2x32xf32>
    %1295 = arith.mulf %1294, %598 : vector<2x32xf32>
    %1296 = vector.extract_strided_slice %1289 {offsets = [0, 1], sizes = [2, 1], strides = [1, 1]} : vector<2x4xf32> to vector<2x1xf32>
    %1297 = vector.broadcast %1296 : vector<2x1xf32> to vector<2x32xf32>
    %1298 = arith.mulf %1297, %790 : vector<2x32xf32>
    %1299 = arith.addf %1295, %1298 : vector<2x32xf32>
    %1300 = vector.extract_strided_slice %1289 {offsets = [0, 2], sizes = [2, 1], strides = [1, 1]} : vector<2x4xf32> to vector<2x1xf32>
    %1301 = vector.broadcast %1300 : vector<2x1xf32> to vector<2x32xf32>
    %1302 = arith.mulf %1301, %982 : vector<2x32xf32>
    %1303 = arith.addf %1299, %1302 : vector<2x32xf32>
    %1304 = vector.extract_strided_slice %1289 {offsets = [0, 3], sizes = [2, 1], strides = [1, 1]} : vector<2x4xf32> to vector<2x1xf32>
    %1305 = vector.broadcast %1304 : vector<2x1xf32> to vector<2x32xf32>
    %1306 = arith.mulf %1305, %1174 : vector<2x32xf32>
    %1307 = arith.addf %1303, %1306 : vector<2x32xf32>
    %1308 = vector.broadcast %1292 : vector<2x1xf32> to vector<2x32xf32>
    %1309 = arith.mulf %1307, %1308 : vector<2x32xf32>
    %1310 = vector.extract_strided_slice %1309 {offsets = [0, 0], sizes = [2, 16], strides = [1, 1]} : vector<2x32xf32> to vector<2x16xf32>
    %1311 = vector.extract_strided_slice %1309 {offsets = [0, 16], sizes = [2, 16], strides = [1, 1]} : vector<2x32xf32> to vector<2x16xf32>
    %1312 = tpu.concatenate %1310, %1277 in 1 : vector<2x16xf32>, vector<2x16xf32> -> vector<2x32xf32>
    %c0_328 = arith.constant 0 : index
    %c680_329 = arith.constant 680 : index
    %1313 = vector.load %arg2[%c0_328, %c680_329] : memref<64x768xf32, #tpu.memory_space<vmem>>, vector<32x80xf32>
    %cst_330 = arith.constant dense<0.000000e+00> : vector<2x80xf32>
    %1314 = tpu.matmul %1312, %1313, %cst_330 {dimension_numbers = #tpu.dot_dimension_numbers<[1], [0], [0], [1], [0, 0, 1, 1], [], []>} : vector<2x32xf32>, vector<32x80xf32>, vector<2x80xf32> -> vector<2x80xf32>
    %1315 = vector.extract_strided_slice %1314 {offsets = [0, 0], sizes = [2, 64], strides = [1, 1]} : vector<2x80xf32> to vector<2x64xf32>
    %c52_331 = arith.constant 52 : index
    %c0_332 = arith.constant 0 : index
    %1316 = vector.load %arg2[%c52_331, %c0_332] : memref<64x768xf32, #tpu.memory_space<vmem>>, vector<1x64xf32>
    %1317 = vector.broadcast %1316 : vector<1x64xf32> to vector<2x64xf32>
    %1318 = arith.addf %1315, %1317 : vector<2x64xf32>
    %1319 = arith.negf %1318 : vector<2x64xf32>
    %1320 = math.exp %1319 : vector<2x64xf32>
    %cst_333 = arith.constant 1.000000e+00 : f32
    %1321 = vector.broadcast %cst_333 : f32 to vector<2x64xf32>
    %1322 = arith.addf %1321, %1320 : vector<2x64xf32>
    %1323 = arith.divf %1321, %1322 : vector<2x64xf32>
    %1324 = math.tanh %1318 : vector<2x64xf32>
    %1325 = vector.extract_strided_slice %1323 {offsets = [0, 0], sizes = [2, 16], strides = [1, 1]} : vector<2x64xf32> to vector<2x16xf32>
    %1326 = vector.extract_strided_slice %1323 {offsets = [0, 16], sizes = [2, 16], strides = [1, 1]} : vector<2x64xf32> to vector<2x16xf32>
    %1327 = vector.extract_strided_slice %1323 {offsets = [0, 32], sizes = [2, 16], strides = [1, 1]} : vector<2x64xf32> to vector<2x16xf32>
    %1328 = vector.extract_strided_slice %1324 {offsets = [0, 48], sizes = [2, 16], strides = [1, 1]} : vector<2x64xf32> to vector<2x16xf32>
    %1329 = arith.mulf %1325, %1311 : vector<2x16xf32>
    %1330 = arith.mulf %1327, %1328 : vector<2x16xf32>
    %1331 = arith.addf %1329, %1330 : vector<2x16xf32>
    %1332 = math.tanh %1331 : vector<2x16xf32>
    %1333 = arith.mulf %1326, %1332 : vector<2x16xf32>
    %c53_334 = arith.constant 53 : index
    %c0_335 = arith.constant 0 : index
    %1334 = vector.load %arg2[%c53_334, %c0_335] : memref<64x768xf32, #tpu.memory_space<vmem>>, vector<1x16xf32>
    %1335 = vector.broadcast %1334 : vector<1x16xf32> to vector<2x16xf32>
    %1336 = arith.mulf %1333, %1335 : vector<2x16xf32>
    %cst_336 = arith.constant dense<0.000000e+00> : vector<2xf32>
    %1337 = vector.multi_reduction <add>, %1336, %cst_336 [1] : vector<2x16xf32> to vector<2xf32>
    %1338 = vector.shape_cast %1337 : vector<2xf32> to vector<2x1xf32>
    %c54_337 = arith.constant 54 : index
    %c0_338 = arith.constant 0 : index
    %1339 = vector.load %arg2[%c54_337, %c0_338] : memref<64x768xf32, #tpu.memory_space<vmem>>, vector<1x1xf32>
    %1340 = vector.broadcast %1339 : vector<1x1xf32> to vector<2x1xf32>
    %1341 = arith.addf %1338, %1340 : vector<2x1xf32>
    %1342 = arith.negf %1341 : vector<2x1xf32>
    %1343 = math.exp %1342 : vector<2x1xf32>
    %cst_339 = arith.constant 1.000000e+00 : f32
    %1344 = vector.broadcast %cst_339 : f32 to vector<2x1xf32>
    %1345 = arith.addf %1344, %1343 : vector<2x1xf32>
    %1346 = arith.divf %1344, %1345 : vector<2x1xf32>
    %cst_340 = arith.constant 0.000000e+00 : f32
    %1347 = vector.broadcast %cst_340 : f32 to vector<2x56xf32>
    %1348 = tpu.concatenate %52, %161, %287, %463, %647, %839, %1031, %1221, %98, %224, %400, %584, %776, %968, %1160, %1346 in 1 : vector<2x8xf32>, vector<2x8xf32>, vector<2x8xf32>, vector<2x8xf32>, vector<2x8xf32>, vector<2x8xf32>, vector<2x8xf32>, vector<2x8xf32>, vector<2x1xf32>, vector<2x1xf32>, vector<2x1xf32>, vector<2x1xf32>, vector<2x1xf32>, vector<2x1xf32>, vector<2x1xf32>, vector<2x1xf32> -> vector<2x72xf32>
    %1349 = tpu.concatenate %1348, %1347 in 1 : vector<2x72xf32>, vector<2x56xf32> -> vector<2x128xf32>
    %c0_341 = arith.constant 0 : index
    %c0_342 = arith.constant 0 : index
    %1350 = vector.load %arg3[%c0_341, %c0_342] : memref<2x128xf32, #tpu.memory_space<vmem>>, vector<2x128xf32>
    tpu.vector_store %arg3[%c0_341, %c0_342], %1349 {strides = array<i32>} : memref<2x128xf32, #tpu.memory_space<vmem>>, vector<2x128xf32>,
    return
  }
  func.func @transform_0(%arg0: i32) -> (i32, i32) {
    %c0_i32 = arith.constant 0 : i32
    %c0_i32_0 = arith.constant 0 : i32
    %c0_i32_1 = arith.constant 0 : i32
    return %c0_i32, %c0_i32_0 : i32, i32
  }
  func.func @transform_1(%arg0: i32) -> (i32, i32) {
    %c0_i32 = arith.constant 0 : i32
    %c0_i32_0 = arith.constant 0 : i32
    %c0_i32_1 = arith.constant 0 : i32
    return %c0_i32, %c0_i32_0 : i32, i32
  }
  func.func @transform_2(%arg0: i32) -> (i32, i32) {
    %c0_i32 = arith.constant 0 : i32
    %c0_i32_0 = arith.constant 0 : i32
    %c0_i32_1 = arith.constant 0 : i32
    return %c0_i32, %c0_i32_0 : i32, i32
  }
}

</mosaic_0001>

<bundles_post_ra>
// kernel: revision_forward.1
= control target key start
LH: loop header
LB: loop body
LE: loop exit
PB: predicated region body
PF: predicated region fallthrough
CT: control target
= control target key end

     0   :  { %7 = vsyncpa [#allocation4], 0  ;;  %s8025_s9 = smov [#allocation3]   ;;  %s10065_s0 = inlined_call_operand.vmem [shape: s32[64,1], index: 0, kind: input, shape index: {}]   ;;  %s10066_s1 = inlined_call_operand.hbm [shape: f32[64,768], index: 1, kind: input, shape index: {}]   ;;  %s10067_s2 = inlined_call_operand.vmem [shape: f32[2,128], index: 2, kind: output, shape index: {}]  }
   0x1   :  { %s15_s10 = sshll.u32 %s8025_s9, 4  ;;  %s16_s10 = int_to_ptr.vmem [resolvable:$true] %s15_s10 }
   0x2   :  { %s8011_s11 = scalar_lea.vmem %s16_s10, 6144  ;;  %p8016_p1 = scmp.lt.s32.totalorder %s16_s10, %s16_s10 }
   0x3   :  { %p8012_p0 = scmp.ne.s32.totalorder %s16_s10, %s8011_s11  ;;  %p8017_p2 = scmp.lt.s32.totalorder %s8011_s11, %s8011_s11 }
   0x5   :  { %p8018_p3 = por %p8017_p2, %p8016_p1 }
   0x7   :  { %p8019_p4 = pnand %p8018_p3, %p8012_p0 }
   0x9   :  { %8022 = shalt.err (!%p8019_p4)
}
   0xa   :  { %s8026_s12 = smov 768   ;;  %s8027_s13 = smov 48  }
   0xb   :  { %21 = dma.hbm_to_vmem [thread:$0]  %s10066_s1, 6144, %s16_s10, [#allocation4], %s8026_s12, %s8026_s12, %s8027_s13  }
   0xc   :  { %8023 = dma.done.wait [#allocation4], 6144  }
   0xd   :  { %8024 = vsyncadd [#allocation4], 4294961152  ;;  %v10070_v0 = vmov 0   ;;  %v10072_v1 = vmov 0.0   ;;  %v93_v2 = vld [vmem:[#allocation3 + $0xb0] sm:$0xff]  ;;  %v8078_v3 = vld [vmem:[#allocation3 + $0xa8] sm:$0xff]  ;;  %v33_v27 = vlaneseq }
   0xe   :  { %7508 = vset.pattern.permute.xlu1 %v10070_v0  ;;  %7509 = vset.pattern.permute.xlu0 %v10070_v0  ;;  %s8030_s16 = smov 40   ;;  %v8083_v4 = vld [vmem:[#allocation3 + $0xb8] sm:$0xff]  ;;  %v25_v5 = vld [vmem:[%s10065_s0] sm:$0xff]  ;;  %v8090_v7 = vld [vmem:[#allocation3 + $0x88] sm:$0xff]  ;;  %vm144_vm0 = vcmask 326656   ;;  %vm161_vm2 = vcmask 261120  }
   0xf   :  { %250 = vmatprep.mubr.f32.mxu0 %v10072_v1  ;;  %413 = vmatprep.mubr.f32.mxu1 %v10072_v1  ;;  %v90_v6 = vld [vmem:[#allocation3 + $0x80] sm:$0xff]  ;;  %v8095_v8 = vld [vmem:[#allocation3 + $0x78] sm:$0xff]  ;;  %v87_v9 = vld [vmem:[#allocation3 + $0x50] sm:$0xff]  ;;  %v8122_v31 = vand.u32 127, %v33_v27  ;;  %v99_v39 = vshrl.u32 %v33_v27, 7  ;;  %vm300_vm3 = vcmask 523264  }
  0x10   :  { %140 = vrot.lane.b32.xlu0 %v93_v2, %s8030_s16  ;;  %138 = vrot.lane.b32.xlu1 %v8078_v3, %s8030_s16  ;;  %v8100_v10 = vld [vmem:[#allocation3 + $0x58] sm:$0xff]  ;;  %v8102_v11 = vld [vmem:[#allocation3 + $0x48] sm:$0xff]  ;;  %v84_v12 = vld [vmem:[#allocation3 + $0x20] sm:$0xff]  ;;  %s8031_s18 = smov 64   ;;  %s8032_s19 = smov 96   ;;  %vm8037_vm6 = vmmov 0  }
  0x11   :  { %v8108_v13 = vld [vmem:[#allocation3 + $0x28] sm:$0xff]  ;;  %v8113_v14 = vld [vmem:[#allocation3 + $0x18] sm:$0xff]  ;;  %v100_v40 = vsub.s32 0, %v99_v39  ;;  %v104_v42 = vsub.s32 1, %v99_v39  ;;  %v8145_v60 = vld [vmem:[#allocation3 + $0x90] sm:$0xff]  ;;  %s8033_s22 = smov 32  }
  0x12   :  { %v96_v41 = vld [vmem:[#allocation3 + $0x120] ss:$8 sm:$0x3]  ;;  %v8143_v59 = vld [vmem:[#allocation3 + $0x98] sm:$0xff]  ;;  %v8157_v2 = vld [vmem:[#allocation3 + $0x30] sm:$0xff]  ;;  %s8034_s29 = smov 112  }
  0x13   :  { %v8131_v43 = vrot.slane %v96_v41, %v100_v40  ;;  %v8133_v44 = vrot.slane %v96_v41, %v104_v42  ;;  %v26_v58 = vld [vmem:[%s10065_s0 + $0x8] sm:$0xff]  ;;  %373 = vmatprep.subr.mxu1 %v8143_v59  ;;  %v8150_v62 = vld [vmem:[#allocation3 + $0x60] sm:$0xff]  ;;  %v8154_v63 = vld [vmem:[#allocation3 + $0x38] sm:$0xff]  ;;  %s8035_s8 = smov 88   ;;  %s8036_s9 = smov 104   ;;  %vm560_vm12 = vcmask 130048  }
  0x14   :  { %142 = vrot.lane.b32.xlu0 %v8083_v4, %s8030_s16  ;;  %36 = vperm.xlu1 %7508, %v25_v5   ;;  %v8147_v61 = vld [vmem:[#allocation3 + $0x68] sm:$0xff]  ;;  %v8199_v39 = vld [vmem:[#allocation3 + $0x70] sm:$0xff]  ;;  %v8203_v40 = vld [vmem:[#allocation3 + $0x40] sm:$0xff]  ;;  %s8039_s10 = smov 16   ;;  %s8040_s11 = smov 8   ;;  %vm1784_vm13 = vcmask 9216  }
  0x15   :  { %374 = vmatpush1.msra.mxu1 %v8145_v60  ;;  %v8161_v5 = vld [vmem:[#allocation3 + $0x8] sm:$0xff]  ;;  %v8207_v41 = vld [vmem:[#allocation3 + $0x10] sm:$0xff]  ;;  %s8041_s12 = smov 120   ;;  %s8043_s14 = smov 4   ;;  %vm2583_vm14 = vcmask 392192   ;;  %vm2657_vm15 = vcmask 17408  }
  0x16   :  { %375 = vmatprep.subr.mxu1 %v8147_v61  ;;  %s8044_s15 = smov 24   ;;  %s8049_s1 = smov 67  }
  0x17   :  { %376 = vmatpush1.msra.mxu1 %v8150_v62  ;;  %s8050_s17 = smov 66   ;;  %s8053_s20 = smov 70  }
  0x18   :  { %134 = vrot.lane.b32.xlu0 %v90_v6, %s8030_s16  ;;  %136 = vrot.lane.b32.xlu1 %v8090_v7, %s8030_s16  ;;  %v8165_v6 = vld [vmem:[#allocation3] sm:$0xff]  ;;  %s8054_s21 = smov 71  }
  0x19   :  { %377 = vmatprep.subr.mxu1 %v8154_v63 }
  0x1a   :  { %378 = vmatpush1.msra.mxu1 %v8157_v2 }
  0x1b   :  { %379 = vmatprep.subr.mxu1 %v8161_v5 }
  0x1c   :  { %132 = vrot.lane.b32.xlu0 %v8095_v8, %s8030_s16  ;;  %128 = vrot.lane.b32.xlu1 %v87_v9, %s8030_s16 }
  0x1d   :  { %380 = vmatpush1.msra.mxu1 %v8165_v6 }
  0x1e   :  { %477 = vmatprep.subr.mxu1 %v8078_v3 }
  0x20   :  { %130 = vrot.lane.b32.xlu0 %v8100_v10, %s8030_s16  ;;  %126 = vrot.lane.b32.xlu1 %v8102_v11, %s8030_s16 }
  0x24   :  { %122 = vrot.lane.b32.xlu0 %v84_v12, %s8030_s16  ;;  %124 = vrot.lane.b32.xlu1 %v8108_v13, %s8030_s16 }
  0x28   :  { %120 = vrot.lane.b32.xlu0 %v8113_v14, %s8030_s16 }
  0x82   :  { %v141_v15 = vpop.permute.xlu0 %140  ;;  %v139_v16 = vpop.permute.xlu1 %138 }
  0x83   :  { %v151_v19 = vsel %vm144_vm0, %v139_v16, %v141_v15 }
  0x86   :  { %v143_v17 = vpop.permute.xlu0 %142 }
  0x87   :  { %v152_v18 = vsel %vm144_vm0, %v141_v15, %v143_v17 }
  0x88   :  { %210 = vmatprep.subr.mxu0 %v152_v18 }
  0x89   :  { %211 = vmatpush1.msra.mxu0 %v151_v19 }
  0x8a   :  { %v135_v20 = vpop.permute.xlu0 %134 }
  0x8e   :  { %v133_v21 = vpop.permute.xlu0 %132 }
  0x8f   :  { %v37_v22 = vpop.permute.xlu1 %36  ;;  %v149_v26 = vsel %vm144_vm0, %v133_v21, %v135_v20 }
  0x90   :  { %vm59_vm1 = vcmp.eq.s32.totalorder %v8122_v31, %v37_v22  ;;  %v8187_v22 = vld [vmem:[#allocation3 + $0x121] ss:$0 sm:$0xff] }
  0x91   :  { %v6691_v38 = vsel %vm59_vm1, 1.0, %v10072_v1  ;;  %vm3564_vm1 = vcmask 25600  }
  0x92   :  { %v131_v23 = vpop.permute.xlu0 %130 }
  0x93   :  { %v137_v24 = vpop.permute.xlu1 %136 }
  0x94   :  { %v150_v25 = vsel %vm144_vm0, %v135_v20, %v137_v24 }
  0x95   :  { %212 = vmatprep.subr.mxu0 %v150_v25 }
  0x96   :  { %213 = vmatpush1.msra.mxu0 %v149_v26  ;;  %v123_v29 = vpop.permute.xlu0 %122 }
  0x97   :  { %v129_v28 = vpop.permute.xlu1 %128 }
  0x98   :  { %v148_v30 = vsel %vm144_vm0, %v129_v28, %v131_v23 }
  0x99   :  { %214 = vmatprep.subr.mxu0 %v148_v30 }
  0x9a   :  { %v121_v34 = vpop.permute.xlu0 %120 }
  0x9b   :  { %v127_v32 = vpop.permute.xlu1 %126  ;;  %v145_v37 = vsel %vm144_vm0, %v121_v34, %v123_v29 }
  0x9c   :  { %v147_v33 = vsel %vm144_vm0, %v127_v32, %v129_v28 }
  0x9d   :  { %215 = vmatpush1.msra.mxu0 %v147_v33 }
  0x9f   :  { %v125_v35 = vpop.permute.xlu1 %124 }
  0xa0   :  { %v146_v36 = vsel %vm144_vm0, %v123_v29, %v125_v35 }
  0xa1   :  { %216 = vmatprep.subr.mxu0 %v146_v36 }
  0xa2   :  { %217 = vmatpush1.msra.mxu0 %v145_v37 }
  0xa3   :  { %6699 = vmatmul.mubr.msk.f32.vlgmr.msra.gmra.mxu0 %vm161_vm2, %v6691_v38  ;;  %926 = vmatprep.subr.mxu0 %v8143_v59  ;;  %v8197_v38 = vld [vmem:[#allocation3 + $0xa0] sm:$0xff] }
  0xa4   :  { %256 = vmatprep.mubr.f32.mxu0 %v10072_v1  ;;  %927 = vmatpush1.msra.mxu0 %v8145_v60 }
  0xa5   :  { %928 = vmatprep.subr.mxu0 %v8147_v61 }
  0xa6   :  { %929 = vmatpush1.msra.mxu0 %v8150_v62 }
  0xa7   :  { %930 = vmatprep.subr.mxu0 %v8154_v63 }
  0xa8   :  { %931 = vmatpush1.msra.mxu0 %v8157_v2 }
  0xa9   :  { %932 = vmatprep.subr.mxu0 %v8161_v5 }
  0xaa   :  { %933 = vmatpush1.msra.mxu0 %v8165_v6 }
  0xab   :  { %7040 = vmatprep.subr.mxu0 %v10072_v1 }
 0x163   :  { %v252_v45 = vpop.f32.mrf.mxu0 }
 0x164   :  { %v253_v46 = vadd.f32 %v252_v45, %v8131_v43 }
 0x165   :  { %v254_v47 = vpop.f32.mrf.mxu0 }
 0x166   :  { %299 = vst [vmem:[#allocation2] sm:$0xff] %v253_v46  ;;  %v255_v48 = vadd.f32 %v254_v47, %v8133_v44 }
 0x168   :  { %301 = vst.msk [vmem:[#allocation2 + $0x8] sm:$0xff] %vm300_vm3, %v255_v48 }
 0x16d   :  { %v316_v49 = vld [vmem:[#allocation2] sm:$0x3] }
 0x16e   :  { %7548 = vtanh.f32 %v316_v49  ;;  %v6707_v51 = vmul.f32 -1.442695, %v316_v49 }
 0x170   :  { %7550 = vpow2.f32 %v6707_v51 }
 0x17b   :  { %v7549_v50 = vpop.eup %7548 }
 0x17c   :  { %326 = vrot.lane.b32.xlu1 %v7549_v50, %s8031_s18 }
 0x17d   :  { %v7551_v52 = vpop.eup %7550 }
 0x17e   :  { %v321_v53 = vadd.f32 1.0, %v7551_v52  ;;  %v317_v52 = vld [vmem:[#allocation2 + $0x8] sm:$0x3] }
 0x180   :  { %7552 = vrcp.f32 %v321_v53  ;;  %v27_v53 = vld [vmem:[%s10065_s0 + $0x10] sm:$0xff] }
 0x18d   :  { %v7553_v54 = vpop.eup %7552 }
 0x1ee   :  { %v327_v55 = vpop.permute.xlu1 %326 }
 0x1ef   :  { %v329_v56 = vmul.f32 %v7553_v54, %v327_v55  ;;  %v31_v55 = vld [vmem:[%s10065_s0 + $0x30] sm:$0xff] }
 0x1f1   :  { %7554 = vtanh.f32 %v329_v56 }
 0x1fe   :  { %v7555_v57 = vpop.eup %7554 }
 0x1ff   :  { %332 = vrot.lane.b32.xlu0 %v7555_v57, %s8032_s19  ;;  %v6711_v57 = vmul.f32 -1.442695, %v317_v52 }
 0x203   :  { %39 = vperm.xlu0 %7509, %v26_v58  }
 0x271   :  { %v333_v9 = vpop.permute.xlu0 %332 }
 0x272   :  { %v335_v12 = vmul.f32 %v7553_v54, %v333_v9  ;;  %v29_v54 = vld [vmem:[%s10065_s0 + $0x20] sm:$0xff] }
 0x274   :  { %345 = vrot.lane.b32.xlu1 %v335_v12, %s8033_s22 }
 0x27e   :  { %v40_v15 = vpop.permute.xlu0 %39 }
 0x27f   :  { %vm60_vm4 = vcmp.eq.s32.totalorder %v8122_v31, %v40_v15 }
 0x280   :  { %v6692_v16 = vsel %vm60_vm4, 1.0, %v10072_v1  ;;  %vm661_vm4 = vcmask 123904  }
 0x281   :  { %6700 = vmatmul.mubr.msk.f32.gmra.mxu0 %vm161_vm2, %v6692_v16 }
 0x282   :  { %262 = vmatprep.mubr.f32.mxu0 %v10072_v1 }
 0x2e6   :  { %v346_v17 = vpop.permute.xlu1 %345 }
 0x2e7   :  { %6708 = vmatmul.mubr.msk.f32.vlgmr.msra.gmra.mxu1 %vm161_vm2, %v346_v17 }
 0x2e8   :  { %517 = vmatprep.mubr.f32.mxu1 %v10072_v1  ;;  %478 = vmatpush1.msra.mxu1 %v8197_v38 }
 0x2e9   :  { %479 = vmatprep.subr.mxu1 %v8095_v8 }
 0x2ea   :  { %480 = vmatpush1.msra.mxu1 %v8199_v39 }
 0x2eb   :  { %481 = vmatprep.subr.mxu1 %v8102_v11 }
 0x2ec   :  { %482 = vmatpush1.msra.mxu1 %v8203_v40 }
 0x2ed   :  { %483 = vmatprep.subr.mxu1 %v8113_v14 }
 0x2ee   :  { %484 = vmatpush1.msra.mxu1 %v8207_v41 }
 0x2ef   :  { %7015 = vmatprep.subr.mxu1 %v10072_v1 }
 0x341   :  { %v258_v18 = vpop.f32.mrf.mxu0 }
 0x342   :  { %v259_v19 = vadd.f32 %v258_v18, %v8131_v43 }
 0x343   :  { %v260_v20 = vpop.f32.mrf.mxu0 }
 0x344   :  { %302 = vst [vmem:[#allocation2 + $0x10] sm:$0xff] %v259_v19  ;;  %v261_v21 = vadd.f32 %v260_v20, %v8133_v44 }
 0x346   :  { %303 = vst.msk [vmem:[#allocation2 + $0x18] sm:$0xff] %vm300_vm3, %v261_v21 }
 0x34b   :  { %v866_v24 = vld [vmem:[#allocation2 + $0x10] sm:$0x3] }
 0x3a7   :  { %v415_v23 = vpop.f32.mrf.mxu1 }
 0x3a8   :  { %v421_v25 = vadd.f32 %v8187_v22, %v415_v23 }
 0x3a9   :  { %v417_v26 = vpop.f32.mrf.mxu1 }
 0x3aa   :  { %7556 = vtanh.f32 %v421_v25  ;;  %v868_v27 = vadd.f32 %v866_v24, %v417_v26  ;;  %v6709_v30 = vmul.f32 -1.442695, %v421_v25  ;;  %v28_v24 = vld [vmem:[%s10065_s0 + $0x18] sm:$0xff]  ;;  %v30_v26 = vld [vmem:[%s10065_s0 + $0x28] sm:$0xff] }
 0x3ac   :  { %7558 = vtanh.f32 %v868_v27  ;;  %v6717_v42 = vmul.f32 -1.442695, %v868_v27 }
 0x3ad   :  { %7560 = vpow2.f32 %v6709_v30  ;;  %v32_v30 = vld [vmem:[%s10065_s0 + $0x38] sm:$0xff]  ;;  %s8038_s0 = smov 72  }
 0x3b7   :  { %v7557_v28 = vpop.eup %7556 }
 0x3b8   :  { %430 = vrot.lane.b32.xlu1 %v7557_v28, %s8031_s18 }
 0x3b9   :  { %v7559_v29 = vpop.eup %7558 }
 0x3ba   :  { %882 = vrot.lane.b32.xlu0 %v7559_v29, %s8031_s18  ;;  %v7561_v32 = vpop.eup %7560 }
 0x3bb   :  { %v425_v33 = vadd.f32 1.0, %v7561_v32 }
 0x3bd   :  { %7562 = vrcp.f32 %v425_v33 }
 0x3be   :  { %877 = vrot.lane.b32.xlu0 %v329_v56, %s8033_s22 }
 0x3ca   :  { %v7563_v34 = vpop.eup %7562 }
 0x42a   :  { %v431_v35 = vpop.permute.xlu1 %430 }
 0x42b   :  { %v8193_v36 = vmul.f32 %v7563_v34, %v431_v35 }
 0x42c   :  { %v883_v49 = vpop.permute.xlu0 %882 }
 0x42d   :  { %7564 = vtanh.f32 %v8193_v36 }
 0x42e   :  { %7566 = vpow2.f32 %v6717_v42 }
 0x430   :  { %v878_v58 = vpop.permute.xlu0 %877 }
 0x43a   :  { %v7565_v37 = vpop.eup %7564 }
 0x43b   :  { %436 = vrot.lane.b32.xlu1 %v7565_v37, %s8032_s19  ;;  %v7567_v45 = vpop.eup %7566 }
 0x43c   :  { %v872_v46 = vadd.f32 1.0, %v7567_v45 }
 0x43e   :  { %7568 = vrcp.f32 %v872_v46 }
 0x43f   :  { %7570 = vtanh.f32 %v317_v52 }
 0x440   :  { %7572 = vpow2.f32 %v6711_v57 }
 0x44b   :  { %v7569_v50 = vpop.eup %7568 }
 0x44c   :  { %v885_v51 = vmul.f32 %v7569_v50, %v883_v49  ;;  %v7571_v56 = vpop.eup %7570  ;;  %v880_v12 = vmul.f32 %v7569_v50, %v878_v58 }
 0x44d   :  { %v7573_v17 = vpop.eup %7572 }
 0x44e   :  { %v529_v18 = vadd.f32 1.0, %v7573_v17 }
 0x4ad   :  { %v437_v47 = vpop.permute.xlu1 %436 }
 0x4ae   :  { %v439_v48 = vmul.f32 %v7563_v34, %v437_v47 }
 0x4b0   :  { %449 = vrot.lane.b32.xlu1 %v439_v48, %s8033_s22 }
 0x4b4   :  { %887 = vrot.lane.b32.xlu1 %v885_v51, %s8033_s22 }
 0x4b8   :  { %42 = vperm.xlu1 %7508, %v27_v53  }
 0x4bc   :  { %48 = vperm.xlu1 %7508, %v29_v54  }
 0x4c0   :  { %54 = vperm.xlu1 %7508, %v31_v55  }
 0x4c4   :  { %534 = vrot.lane.b32.xlu1 %v7571_v56, %s8034_s29 }
 0x522   :  { %v450_v9 = vpop.permute.xlu1 %449 }
 0x523   :  { %6710 = vmatmul.mubr.msk.f32.vlgmr.msra.gmra.mxu1 %vm161_vm2, %v450_v9 }
 0x524   :  { %7019 = vmatprep.mubr.msk.f32.mxu1 %vm8037_vm6, %v10072_v1 }
 0x526   :  { %v888_v15 = vpop.permute.xlu1 %887 }
 0x527   :  { %v8226_v16 = vadd.f32 %v888_v15, %v880_v12 }
 0x529   :  { %7574 = vtanh.f32 %v8226_v16 }
 0x52a   :  { %7576 = vrcp.f32 %v529_v18 }
 0x533   :  { %v43_v19 = vpop.permute.xlu1 %42 }
 0x534   :  { %vm61_vm5 = vcmp.eq.s32.totalorder %v8122_v31, %v43_v19 }
 0x535   :  { %v6693_v20 = vsel %vm61_vm5, 1.0, %v10072_v1  ;;  %vm6658_vm5 = vcmask 64512  }
 0x536   :  { %v7575_v21 = vpop.eup %7574  ;;  %6701 = vmatmul.mubr.msk.f32.gmra.mxu0 %vm161_vm2, %v6693_v20 }
 0x537   :  { %v49_v23 = vpop.permute.xlu1 %48  ;;  %893 = vrot.lane.b32.xlu0 %v7575_v21, %s8031_s18  ;;  %268 = vmatprep.mubr.f32.mxu0 %v10072_v1  ;;  %v7577_v27 = vpop.eup %7576 }
 0x538   :  { %vm63_vm8 = vcmp.eq.s32.totalorder %v8122_v31, %v49_v23 }
 0x539   :  { %v6695_v45 = vsel %vm63_vm8, 1.0, %v10072_v1  ;;  %vm6669_vm8 = vcmask 531456  }
 0x53b   :  { %v55_v25 = vpop.permute.xlu1 %54  ;;  %45 = vperm.xlu0 %7509, %v28_v24  }
 0x53c   :  { %vm65_vm10 = vcmp.eq.s32.totalorder %v8122_v31, %v55_v25 }
 0x53d   :  { %v6697_v49 = vsel %vm65_vm10, 1.0, %v10072_v1  ;;  %vm6673_vm10 = vcmask 547840  }
 0x53f   :  { %v535_v28 = vpop.permute.xlu1 %534  ;;  %51 = vperm.xlu0 %7509, %v30_v26  }
 0x540   :  { %v8240_v29 = vmul.f32 %v7577_v27, %v535_v28 }
 0x542   :  { %7578 = vtanh.f32 %v8240_v29 }
 0x543   :  { %57 = vperm.xlu0 %7509, %v32_v30  }
 0x54f   :  { %v7579_v32 = vpop.eup %7578 }
 0x550   :  { %540 = vrot.lane.b32.xlu1 %v7579_v32, %s8034_s29 }
 0x554   :  { %554 = vrot.lane.b32.xlu1 %v8090_v7, %s8035_s8 }
 0x558   :  { %685 = vrot.lane.b32.xlu1 %v8083_v4, %s8036_s9 }
 0x55c   :  { %681 = vrot.lane.b32.xlu1 %v8100_v10, %s8036_s9 }
 0x5a9   :  { %v894_v33 = vpop.permute.xlu0 %893 }
 0x5aa   :  { %v896_v34 = vmul.f32 %v7569_v50, %v894_v33 }
 0x5ac   :  { %898 = vrot.lane.b32.xlu0 %v896_v34, %s8033_s22 }
 0x5b0   :  { %556 = vrot.lane.b32.xlu0 %v8083_v4, %s8035_s8 }
 0x5b6   :  { %v46_v35 = vpop.permute.xlu0 %45 }
 0x5b7   :  { %vm62_vm7 = vcmp.eq.s32.totalorder %v8122_v31, %v46_v35 }
 0x5b8   :  { %v6694_v37 = vsel %vm62_vm7, 1.0, %v10072_v1  ;;  %vm6666_vm7 = vcmask 457728  }
 0x5b9   :  { %6702 = vmatmul.mubr.msk.f32.gmra.mxu0 %vm161_vm2, %v6694_v37 }
 0x5ba   :  { %v52_v42 = vpop.permute.xlu0 %51  ;;  %274 = vmatprep.mubr.f32.mxu0 %v10072_v1 }
 0x5bb   :  { %vm64_vm9 = vcmp.eq.s32.totalorder %v8122_v31, %v52_v42 }
 0x5bc   :  { %v6696_v4 = vsel %vm64_vm9, 1.0, %v10072_v1  ;;  %vm6671_vm9 = vcmask 539648  }
 0x5bd   :  { %6703 = vmatmul.mubr.msk.f32.gmra.mxu0 %vm161_vm2, %v6695_v45 }
 0x5be   :  { %280 = vmatprep.mubr.f32.mxu0 %v10072_v1  ;;  %v58_v46 = vpop.permute.xlu0 %57 }
 0x5bf   :  { %vm66_vm11 = vcmp.eq.s32.totalorder %v8122_v31, %v58_v46  ;;  %v8285_v31 = vld [vmem:[#allocation3 + $0x122] ss:$0 sm:$0xff] }
 0x5c0   :  { %v6698_v50 = vsel %vm66_vm11, 1.0, %v10072_v1  ;;  %vm6675_vm11 = vcmask 556032  }
 0x5c1   :  { %6704 = vmatmul.mubr.msk.f32.gmra.mxu0 %vm161_vm2, %v6696_v4 }
 0x5c2   :  { %v541_v47 = vpop.permute.xlu1 %540  ;;  %286 = vmatprep.mubr.f32.mxu0 %v10072_v1 }
 0x5c3   :  { %v543_v48 = vmul.f32 %v7577_v27, %v541_v47 }
 0x5c5   :  { %550 = vrot.lane.b32.xlu0 %v543_v48, %s8034_s29  ;;  %6705 = vmatmul.mubr.msk.f32.gmra.mxu0 %vm161_vm2, %v6697_v49 }
 0x5c6   :  { %292 = vmatprep.mubr.f32.mxu0 %v10072_v1  ;;  %v8302_v9 = vpop.permute.xlu1 %554 }
 0x5c7   :  { %10140 = vst [vmem:[#allocation7_spill] sm:$0xff] %v8302_v9 }
 0x5c9   :  { %6706 = vmatmul.mubr.msk.f32.gmra.mxu0 %vm161_vm2, %v6698_v50  ;;  %683 = vrot.lane.b32.xlu0 %v8090_v7, %s8036_s9 }
 0x5ca   :  { %966 = vmatprep.mubr.f32.mxu0 %v10072_v1 }
 0x5cd   :  { %679 = vrot.lane.b32.xlu0 %v8108_v13, %s8036_s9 }
 0x5e3   :  { %v8283_v51 = vpop.f32.mrf.mxu1 }
 0x5e5   :  { %v521_v52 = vpop.f32.mrf.mxu1 }
 0x5e6   :  { %v8288_v53 = vadd.f32 %v8285_v31, %v521_v52 }
 0x5e8   :  { %10139 = vst [vmem:[#allocation6_spill] sm:$0xff] %v8288_v53  ;;  %7580 = vtanh.f32 %v8288_v53 }
 0x5f5   :  { %v7581_v54 = vpop.eup %7580 }
 0x5f6   :  { %v264_v55 = vpop.f32.mrf.mxu0  ;;  %675 = vrot.lane.b32.xlu1 %v7581_v54, %s8038_s0 }
 0x5f7   :  { %v265_v7 = vadd.f32 %v264_v55, %v8131_v43 }
 0x5f8   :  { %v266_v56 = vpop.f32.mrf.mxu0 }
 0x5f9   :  { %304 = vst [vmem:[#allocation2 + $0x20] sm:$0xff] %v265_v7  ;;  %v267_v13 = vadd.f32 %v266_v56, %v8133_v44  ;;  %v8350_v56 = vld [vmem:[#allocation3 + $0xf0] sm:$0xff] }
 0x5fa   :  { %983 = vrot.lane.b32.xlu1 %v8193_v36, %s8033_s22  ;;  %v8308_v36 = vpop.permute.xlu1 %685 }
 0x5fb   :  { %305 = vst.msk [vmem:[#allocation2 + $0x28] sm:$0xff] %vm300_vm3, %v267_v13 }
 0x5fe   :  { %v8317_v17 = vpop.permute.xlu1 %681 }
 0x61e   :  { %v899_v57 = vpop.permute.xlu0 %898 }
 0x61f   :  { %6718 = vmatmul.mubr.msk.f32.vlgmr.msra.gmra.mxu0 %vm161_vm2, %v899_v57 }
 0x620   :  { %7044 = vmatprep.mubr.msk.f32.mxu0 %vm8037_vm6, %v10072_v1  ;;  %7041 = vmatpush3.msra.mxu0 %v8350_v56 }
 0x621   :  { %7042 = vmatprep.subr.mxu0 %v10072_v1 }
 0x622   :  { %v8300_v58 = vpop.permute.xlu0 %556 }
 0x623   :  { %7016 = vmatpush3.msra.mxu1 %v8300_v58 }
 0x624   :  { %7017 = vmatprep.subr.mxu1 %v10072_v1 }
 0x625   :  { %7018 = vmatpush3.msra.mxu1 %v8302_v9 }
 0x626   :  { %7022 = vmatprep.subr.mxu1 %v10072_v1 }
 0x637   :  { %v551_v12 = vpop.permute.xlu0 %550 }
 0x638   :  { %7020 = vmatmul.mubr.msk.f32.vlgmr.msra.gmra.mxu1 %vm560_vm12, %v551_v12 }
 0x639   :  { %7023 = vmatpush3.msra.mxu1 %v8308_v36  ;;  %7030 = vmatprep.mubr.msk.f32.mxu1 %vm8037_vm6, %v10072_v1 }
 0x63a   :  { %7024 = vmatprep.subr.mxu1 %v10072_v1 }
 0x63b   :  { %v8315_v15 = vpop.permute.xlu0 %683 }
 0x63c   :  { %7025 = vmatpush3.msra.mxu1 %v8315_v15 }
 0x63d   :  { %7026 = vmatprep.subr.mxu1 %v10072_v1 }
 0x63e   :  { %7027 = vmatpush3.msra.mxu1 %v8317_v17 }
 0x63f   :  { %7028 = vmatprep.subr.mxu1 %v10072_v1  ;;  %v8323_v18 = vpop.permute.xlu0 %679 }
 0x640   :  { %7029 = vmatpush3.msra.mxu1 %v8323_v18 }
 0x641   :  { %7033 = vmatprep.subr.mxu1 %v10072_v1 }
 0x668   :  { %v676_v19 = vpop.permute.xlu1 %675 }
 0x669   :  { %7031 = vmatmul.mubr.msk.f32.vlgmr.msra.gmra.mxu1 %vm161_vm2, %v676_v19 }
 0x66a   :  { %7037 = vmatprep.mubr.msk.f32.mxu1 %vm8037_vm6, %v10072_v1 }
 0x679   :  { %v270_v20 = vpop.f32.mrf.mxu0 }
 0x67a   :  { %v271_v21 = vadd.f32 %v270_v20, %v8131_v43 }
 0x67b   :  { %v272_v23 = vpop.f32.mrf.mxu0 }
 0x67c   :  { %306 = vst [vmem:[#allocation2 + $0x30] sm:$0xff] %v271_v21  ;;  %v273_v24 = vadd.f32 %v272_v23, %v8133_v44  ;;  %v8358_v21 = vld [vmem:[#allocation3 + $0xc0] sm:$0xff]  ;;  %v984_v23 = vpop.permute.xlu1 %983 }
 0x67d   :  { %v276_v25 = vpop.f32.mrf.mxu0  ;;  %7043 = vmatpush3.msra.mxu0 %v8358_v21 }
 0x67e   :  { %307 = vst.msk [vmem:[#allocation2 + $0x38] sm:$0xff] %vm300_vm3, %v273_v24  ;;  %v277_v26 = vadd.f32 %v276_v25, %v8131_v43  ;;  %7058 = vmatprep.subr.mxu0 %v10072_v1 }
 0x67f   :  { %v278_v27 = vpop.f32.mrf.mxu0 }
 0x680   :  { %308 = vst [vmem:[#allocation2 + $0x40] sm:$0xff] %v277_v26  ;;  %v279_v28 = vadd.f32 %v278_v27, %v8133_v44  ;;  %v1473_v27 = vld [vmem:[#allocation2 + $0x20] sm:$0x3] }
 0x681   :  { %v282_v30 = vpop.f32.mrf.mxu0 }
 0x682   :  { %309 = vst.msk [vmem:[#allocation2 + $0x48] sm:$0xff] %vm300_vm3, %v279_v28  ;;  %v283_v32 = vadd.f32 %v282_v30, %v8131_v43 }
 0x683   :  { %v284_v33 = vpop.f32.mrf.mxu0 }
 0x684   :  { %310 = vst [vmem:[#allocation2 + $0x50] sm:$0xff] %v283_v32  ;;  %v285_v34 = vadd.f32 %v284_v33, %v8133_v44 }
 0x685   :  { %v288_v35 = vpop.f32.mrf.mxu0 }
 0x686   :  { %311 = vst.msk [vmem:[#allocation2 + $0x58] sm:$0xff] %vm300_vm3, %v285_v34  ;;  %v289_v37 = vadd.f32 %v288_v35, %v8131_v43 }
 0x687   :  { %v290_v42 = vpop.f32.mrf.mxu0 }
 0x688   :  { %312 = vst [vmem:[#allocation2 + $0x60] sm:$0xff] %v289_v37  ;;  %v291_v45 = vadd.f32 %v290_v42, %v8133_v44 }
 0x689   :  { %v294_v4 = vpop.f32.mrf.mxu0 }
 0x68a   :  { %313 = vst.msk [vmem:[#allocation2 + $0x68] sm:$0xff] %vm300_vm3, %v291_v45  ;;  %v295_v46 = vadd.f32 %v294_v4, %v8131_v43 }
 0x68b   :  { %v296_v47 = vpop.f32.mrf.mxu0 }
 0x68c   :  { %314 = vst [vmem:[#allocation2 + $0x70] sm:$0xff] %v295_v46  ;;  %v297_v48 = vadd.f32 %v296_v47, %v8133_v44 }
 0x68e   :  { %315 = vst.msk [vmem:[#allocation2 + $0x78] sm:$0xff] %vm300_vm3, %v297_v48 }
 0x6df   :  { %v968_v49 = vpop.f32.mrf.mxu0 }
 0x6e0   :  { %v973_v50 = vadd.f32 %v968_v49, %v8283_v51 }
 0x6e1   :  { %v970_v24 = vpop.f32.mrf.mxu0 }
 0x6e2   :  { %v974_v52 = vadd.f32 %v973_v50, %v8187_v22  ;;  %v1475_v28 = vadd.f32 %v1473_v27, %v970_v24 }
 0x6e4   :  { %7582 = vtanh.f32 %v974_v52  ;;  %v6719_v51 = vmul.f32 -1.442695, %v974_v52  ;;  %v6728_v45 = vmul.f32 -1.442695, %v1475_v28 }
 0x6e6   :  { %7584 = vpow2.f32 %v6719_v51 }
 0x6f1   :  { %v7583_v54 = vpop.eup %7582 }
 0x6f2   :  { %988 = vrot.lane.b32.xlu0 %v7583_v54, %s8031_s18 }
 0x6f3   :  { %v7585_v13 = vpop.eup %7584 }
 0x6f4   :  { %v978_v57 = vadd.f32 1.0, %v7585_v13 }
 0x6f6   :  { %7586 = vrcp.f32 %v978_v57 }
 0x6f8   :  { %v8348_v55 = vpop.f32.mrf.mxu1 }
 0x6fa   :  { %v7021_v7 = vpop.f32.mrf.mxu1 }
 0x703   :  { %v7587_v12 = vpop.eup %7586 }
 0x704   :  { %v986_v34 = vmul.f32 %v7587_v12, %v984_v23  ;;  %v867_v23 = vld [vmem:[#allocation2 + $0x18] sm:$0x3] }
 0x729   :  { %v759_v43 = vpop.f32.mrf.mxu1 }
 0x72a   :  { %764 = vrot.lane.b32.xlu1 %v759_v43, %s8030_s16 }
 0x72b   :  { %v7032_v44 = vpop.f32.mrf.mxu1 }
 0x72e   :  { %779 = vrot.lane.b32.xlu1 %v8350_v56, %s8027_s13 }
 0x764   :  { %v989_v19 = vpop.permute.xlu0 %988 }
 0x765   :  { %v991_v20 = vmul.f32 %v7587_v12, %v989_v19 }
 0x767   :  { %993 = vrot.lane.b32.xlu0 %v991_v20, %s8033_s22 }
 0x79c   :  { %v765_v25 = vpop.permute.xlu1 %764 }
 0x79d   :  { %v767_v26 = vadd.f32 %v765_v25, %v8288_v53 }
 0x79f   :  { %7588 = vtanh.f32 %v767_v26 }
 0x7a0   :  { %v8363_v30 = vpop.permute.xlu1 %779  ;;  %7590 = vtanh.f32 %v1475_v28 }
 0x7a1   :  { %7034 = vmatpush3.msra.mxu1 %v8363_v30 }
 0x7a2   :  { %7035 = vmatprep.subr.mxu1 %v10072_v1 }
 0x7ac   :  { %v7589_v32 = vpop.eup %7588 }
 0x7ad   :  { %773 = vrot.lane.b32.xlu1 %v7589_v32, %s8035_s8  ;;  %v7591_v33 = vpop.eup %7590 }
 0x7b1   :  { %1485 = vrot.lane.b32.xlu1 %v7591_v33, %s8031_s18 }
 0x7d9   :  { %v994_v35 = vpop.permute.xlu0 %993 }
 0x7da   :  { %v8369_v37 = vadd.f32 %v994_v35, %v986_v34 }
 0x7dc   :  { %7592 = vtanh.f32 %v8369_v37 }
 0x7dd   :  { %7594 = vpow2.f32 %v6728_v45 }
 0x7e9   :  { %v7593_v42 = vpop.eup %7592 }
 0x7ea   :  { %999 = vrot.lane.b32.xlu0 %v7593_v42, %s8031_s18  ;;  %v7595_v4 = vpop.eup %7594 }
 0x7eb   :  { %v1479_v46 = vadd.f32 1.0, %v7595_v4  ;;  %v8454_v4 = vld [vmem:[#allocation3 + $0x124] ss:$0 sm:$0xff] }
 0x7ed   :  { %7596 = vrcp.f32 %v1479_v46  ;;  %v630_v46 = vadd.f32 %v8348_v55, %v8454_v4 }
 0x7ee   :  { %777 = vrot.lane.b32.xlu0 %v8358_v21, %s8027_s13 }
 0x7fa   :  { %v7597_v52 = vpop.eup %7596 }
 0x81f   :  { %v8375_v47 = vpop.permute.xlu1 %773 }
 0x823   :  { %v1486_v50 = vpop.permute.xlu1 %1485 }
 0x824   :  { %v1488_v7 = vmul.f32 %v7597_v52, %v1486_v50 }
 0x85c   :  { %v1000_v48 = vpop.permute.xlu0 %999 }
 0x85d   :  { %v1002_v49 = vmul.f32 %v7587_v12, %v1000_v48 }
 0x85f   :  { %1004 = vrot.lane.b32.xlu0 %v1002_v49, %s8033_s22 }
 0x860   :  { %v8378_v54 = vpop.permute.xlu0 %777 }
 0x861   :  { %7036 = vmatpush3.msra.mxu1 %v8378_v54 }
 0x862   :  { %7038 = vmatmul.mubr.msk.f32.vlgmr.msra.gmra.mxu1 %vm560_vm12, %v8375_v47  ;;  %1032 = vmatprep.subr.mxu1 %v8078_v3 }
 0x863   :  { %1490 = vrot.lane.b32.xlu0 %v1488_v7, %s8033_s22  ;;  %1033 = vmatpush1.msra.mxu1 %v8197_v38 }
 0x864   :  { %1034 = vmatprep.subr.mxu1 %v8095_v8  ;;  %1072 = vmatprep.mubr.f32.mxu1 %v10072_v1  ;;  %v1483_v8 = vmul.f32 %v7597_v52, %v8226_v16 }
 0x865   :  { %1035 = vmatpush1.msra.mxu1 %v8199_v39 }
 0x866   :  { %1036 = vmatprep.subr.mxu1 %v8102_v11 }
 0x867   :  { %857 = vrot.lane.b32.xlu0 %v8240_v29, %s8034_s29  ;;  %1037 = vmatpush1.msra.mxu1 %v8203_v40 }
 0x868   :  { %1038 = vmatprep.subr.mxu1 %v8113_v14 }
 0x869   :  { %1039 = vmatpush1.msra.mxu1 %v8207_v41 }
 0x86a   :  { %7047 = vmatprep.subr.mxu1 %v10072_v1 }
 0x8d1   :  { %v1005_v3 = vpop.permute.xlu0 %1004 }
 0x8d2   :  { %6720 = vmatmul.mubr.msk.f32.vlgmr.msra.gmra.mxu1 %vm161_vm2, %v1005_v3 }
 0x8d3   :  { %7048 = vmatpush3.msra.mxu1 %v8300_v58  ;;  %7055 = vmatprep.mubr.msk.f32.mxu1 %vm8037_vm6, %v10072_v1 }
 0x8d4   :  { %7049 = vmatprep.subr.mxu1 %v10072_v1 }
 0x8d5   :  { %7050 = vmatpush3.msra.mxu1 %v8302_v9  ;;  %v1491_v11 = vpop.permute.xlu0 %1490 }
 0x8d6   :  { %v8403_v14 = vadd.f32 %v1491_v11, %v1483_v8  ;;  %7051 = vmatprep.subr.mxu1 %v10072_v1  ;;  %v6713_v8 = vmul.f32 -1.442695, %v630_v46 }
 0x8d8   :  { %7598 = vtanh.f32 %v8403_v14 }
 0x8d9   :  { %v858_v29 = vpop.permute.xlu0 %857 }
 0x8da   :  { %v8409_v43 = vsel %vm560_vm12, %v8375_v47, %v858_v29 }
 0x8db   :  { %7045 = vmatmul.mubr.msk.f32.vlgmr.msra.gmra.mxu0 %vm560_vm12, %v8409_v43 }
 0x8dc   :  { %7059 = vmatpush3.msra.mxu0 %v8308_v36  ;;  %7066 = vmatprep.mubr.msk.f32.mxu0 %vm8037_vm6, %v10072_v1 }
 0x8dd   :  { %7060 = vmatprep.subr.mxu0 %v10072_v1 }
 0x8de   :  { %7061 = vmatpush3.msra.mxu0 %v8315_v15 }
 0x8df   :  { %7062 = vmatprep.subr.mxu0 %v10072_v1 }
 0x8e0   :  { %7063 = vmatpush3.msra.mxu0 %v8317_v17 }
 0x8e1   :  { %7064 = vmatprep.subr.mxu0 %v10072_v1 }
 0x8e2   :  { %7065 = vmatpush3.msra.mxu0 %v8323_v18 }
 0x8e3   :  { %1529 = vmatprep.subr.mxu0 %v8143_v59 }
 0x8e5   :  { %v7599_v16 = vpop.eup %7598 }
 0x8e6   :  { %1496 = vrot.lane.b32.xlu1 %v7599_v16, %s8031_s18 }
 0x922   :  { %v8424_v44 = vpop.f32.mrf.mxu1 }
 0x924   :  { %v7039_v51 = vpop.f32.mrf.mxu1 }
 0x958   :  { %v1497_v13 = vpop.permute.xlu1 %1496 }
 0x959   :  { %v1499_v57 = vmul.f32 %v7597_v52, %v1497_v13 }
 0x95b   :  { %1501 = vrot.lane.b32.xlu0 %v1499_v57, %s8033_s22 }
 0x992   :  { %v1074_v12 = vpop.f32.mrf.mxu1 }
 0x994   :  { %v1076_v19 = vpop.f32.mrf.mxu1 }
 0x995   :  { %v8428_v20 = vadd.f32 %v1076_v19, %v8285_v31 }
 0x997   :  { %10141 = vst [vmem:[#allocation8_spill] sm:$0xff] %v8428_v20  ;;  %7600 = vtanh.f32 %v8428_v20 }
 0x99b   :  { %v8431_v24 = vpop.f32.mrf.mxu0 }
 0x99c   :  { %v1153_v59 = vadd.f32 %v8431_v24, %v867_v23 }
 0x99d   :  { %v7046_v25 = vpop.f32.mrf.mxu0 }
 0x99e   :  { %7602 = vtanh.f32 %v1153_v59  ;;  %v6722_v33 = vmul.f32 -1.442695, %v1153_v59 }
 0x9a4   :  { %v7601_v26 = vpop.eup %7600 }
 0x9a5   :  { %1307 = vrot.lane.b32.xlu1 %v7601_v26, %s8038_s0 }
 0x9ab   :  { %v7603_v27 = vpop.eup %7602 }
 0x9ac   :  { %1166 = vrot.lane.b32.xlu0 %v7603_v27, %s8034_s29 }
 0x9b0   :  { %1161 = vrot.lane.b32.xlu0 %v8409_v43, %s8034_s29 }
 0x9cd   :  { %v1502_v32 = vpop.permute.xlu0 %1501 }
 0xa17   :  { %v1308_v28 = vpop.permute.xlu1 %1307 }
 0xa18   :  { %7067 = vmatmul.mubr.msk.f32.vlgmr.msra.gmra.mxu0 %vm161_vm2, %v1308_v28 }
 0xa19   :  { %1530 = vmatpush1.msra.mxu0 %v8145_v60  ;;  %1569 = vmatprep.mubr.f32.mxu0 %v10072_v1 }
 0xa1a   :  { %1531 = vmatprep.subr.mxu0 %v8147_v61 }
 0xa1b   :  { %1532 = vmatpush1.msra.mxu0 %v8150_v62 }
 0xa1c   :  { %1533 = vmatprep.subr.mxu0 %v8154_v63 }
 0xa1d   :  { %1534 = vmatpush1.msra.mxu0 %v8157_v2 }
 0xa1e   :  { %1535 = vmatprep.subr.mxu0 %v8161_v5  ;;  %v1167_v50 = vpop.permute.xlu0 %1166 }
 0xa1f   :  { %1536 = vmatpush1.msra.mxu0 %v8165_v6 }
 0xa20   :  { %6729 = vmatmul.mubr.msk.f32.vlgmr.msra.gmra.mxu0 %vm161_vm2, %v1502_v32  ;;  %7076 = vmatprep.subr.mxu0 %v10072_v1 }
 0xa21   :  { %7084 = vmatprep.mubr.msk.f32.mxu0 %vm8037_vm6, %v10072_v1 }
 0xa22   :  { %v1162_v11 = vpop.permute.xlu0 %1161 }
 0xad8   :  { %v1377_v60 = vpop.f32.mrf.mxu0 }
 0xad9   :  { %1382 = vrot.lane.b32.xlu0 %v1377_v60, %s8030_s16  ;;  %v8487_v60 = vld [vmem:[#allocation3 + $0x28] sm:$0xff] }
 0xada   :  { %v7068_v61 = vpop.f32.mrf.mxu0 }
 0xae0   :  { %v1571_v62 = vpop.f32.mrf.mxu0 }
 0xae1   :  { %v1576_v63 = vadd.f32 %v1571_v62, %v1074_v12 }
 0xae3   :  { %v1577_v2 = vadd.f32 %v1576_v63, %v8187_v22 }
 0xae5   :  { %7604 = vtanh.f32 %v1577_v2  ;;  %v6730_v6 = vmul.f32 -1.442695, %v1577_v2 }
 0xae7   :  { %7606 = vpow2.f32 %v6730_v6 }
 0xae8   :  { %7608 = vpow2.f32 %v6722_v33 }
 0xaf2   :  { %v7605_v5 = vpop.eup %7604 }
 0xaf3   :  { %1587 = vrot.lane.b32.xlu1 %v7605_v5, %s8031_s18 }
 0xaf4   :  { %v7607_v34 = vpop.eup %7606 }
 0xaf5   :  { %v1581_v35 = vadd.f32 1.0, %v7607_v34  ;;  %v7609_v42 = vpop.eup %7608  ;;  %v8512_v34 = vld [vmem:[#allocation3 + $0xa8] sm:$0xff] }
 0xaf6   :  { %v1157_v45 = vadd.f32 1.0, %v7609_v42  ;;  %v8521_v42 = vld [vmem:[#allocation3 + $0x48] sm:$0xff] }
 0xaf7   :  { %7610 = vrcp.f32 %v1581_v35  ;;  %v8517_v35 = vld [vmem:[#allocation3 + $0x78] sm:$0xff] }
 0xaf8   :  { %7612 = vrcp.f32 %v1157_v45  ;;  %v8525_v45 = vld [vmem:[#allocation3 + $0x18] sm:$0xff] }
 0xaf9   :  { %7614 = vtanh.f32 %v630_v46 }
 0xafa   :  { %7616 = vpow2.f32 %v6713_v8  ;;  %v7942_v8 = vld [vmem:[#allocation3 + $0xb8] sm:$0xff] }
 0xb04   :  { %v7611_v22 = vpop.eup %7610 }
 0xb05   :  { %v7613_v52 = vpop.eup %7612  ;;  %v1585_v13 = vmul.f32 %v7611_v22, %v8369_v37 }
 0xb06   :  { %v1169_v7 = vmul.f32 %v7613_v52, %v1167_v50  ;;  %v7615_v3 = vpop.eup %7614  ;;  %v1164_v19 = vmul.f32 %v7613_v52, %v1162_v11 }
 0xb07   :  { %v7617_v55 = vpop.eup %7616 }
 0xb08   :  { %v636_v29 = vadd.f32 1.0, %v7617_v55 }
 0xb0a   :  { %7618 = vrcp.f32 %v636_v29 }
 0xb17   :  { %v8471_v59 = vpop.eup %7618 }
 0xb18   :  { %10142 = vst [vmem:[#allocation9_spill] sm:$0xff] %v8471_v59 }
 0xb4b   :  { %v1383_v16 = vpop.permute.xlu0 %1382 }
 0xb4c   :  { %v1385_v51 = vadd.f32 %v1383_v16, %v8428_v20 }
 0xb4e   :  { %7620 = vtanh.f32 %v1385_v51 }
 0xb5b   :  { %v7621_v27 = vpop.eup %7620 }
 0xb65   :  { %v1588_v48 = vpop.permute.xlu1 %1587 }
 0xb66   :  { %v1590_v49 = vmul.f32 %v7611_v22, %v1588_v48 }
 0xb68   :  { %1592 = vrot.lane.b32.xlu1 %v1590_v49, %s8033_s22 }
 0xb6c   :  { %1171 = vrot.lane.b32.xlu1 %v1169_v7, %s8032_s19 }
 0xb70   :  { %641 = vrot.lane.b32.xlu1 %v7615_v3, %s8034_s29  ;;  %v8554_v3 = vld [vmem:[#allocation3 + $0x88] sm:$0xff] }
 0xb74   :  { %1184 = vrot.lane.b32.xlu1 %v8100_v10, %s8035_s8 }
 0xbda   :  { %v1593_v57 = vpop.permute.xlu1 %1592 }
 0xbdb   :  { %v8465_v12 = vadd.f32 %v1593_v57, %v1585_v13 }
 0xbdd   :  { %7622 = vtanh.f32 %v8465_v12 }
 0xbde   :  { %v1172_v23 = vpop.permute.xlu1 %1171 }
 0xbdf   :  { %v8468_v10 = vadd.f32 %v1172_v23, %v1164_v19 }
 0xbe1   :  { %7624 = vtanh.f32 %v8468_v10 }
 0xbe2   :  { %v642_v25 = vpop.permute.xlu1 %641 }
 0xbe3   :  { %v8474_v26 = vmul.f32 %v8471_v59, %v642_v25 }
 0xbe5   :  { %10143 = vst [vmem:[#allocation10_spill] sm:$0xff] %v8474_v26  ;;  %862 = vrot.lane.b32.xlu1 %v8474_v26, %s8034_s29 }
 0xbe6   :  { %v8478_v37 = vpop.permute.xlu1 %1184 }
 0xbe7   :  { %10144 = vst [vmem:[#allocation11_spill] sm:$0xff] %v8478_v37  ;;  %7052 = vmatpush3.msra.mxu1 %v8478_v37 }
 0xbe8   :  { %7053 = vmatprep.subr.mxu1 %v10072_v1 }
 0xbe9   :  { %1388 = vrot.lane.b32.xlu1 %v7621_v27, %s8035_s8 }
 0xbea   :  { %v7623_v28 = vpop.eup %7622 }
 0xbeb   :  { %1598 = vrot.lane.b32.xlu0 %v7623_v28, %s8031_s18  ;;  %v1573_v28 = vpop.f32.mrf.mxu0 }
 0xbed   :  { %1680 = vrot.lane.b32.xlu1 %v8431_v24, %s8038_s0 }
 0xbee   :  { %v7625_v32 = vpop.eup %7624 }
 0xbef   :  { %1177 = vrot.lane.b32.xlu0 %v7625_v32, %s8039_s10 }
 0xbf3   :  { %1182 = vrot.lane.b32.xlu0 %v8487_v60, %s8035_s8 }
 0xc57   :  { %v863_v2 = vpop.permute.xlu1 %862 }
 0xc58   :  { %v8494_v6 = vsel %vm560_vm12, %v8375_v47, %v863_v2 }
 0xc5b   :  { %v8507_v47 = vpop.permute.xlu1 %1388 }
 0xc5d   :  { %v1599_v61 = vpop.permute.xlu0 %1598 }
 0xc5e   :  { %v1601_v62 = vmul.f32 %v7611_v22, %v1599_v61 }
 0xc60   :  { %1603 = vrot.lane.b32.xlu0 %v1601_v62, %s8033_s22 }
 0xc61   :  { %v1178_v63 = vpop.permute.xlu0 %1177 }
 0xc62   :  { %v1180_v5 = vmul.f32 %v7613_v52, %v1178_v63  ;;  %v1681_v52 = vpop.permute.xlu1 %1680  ;;  %v10068_v63 = vmov 1  }
 0xc63   :  { %7510 = vset.pattern.permute.xlu0 %v10068_v63 }
 0xc64   :  { %v1181_v33 = vsel %vm560_vm12, %v8494_v6, %v1180_v5 }
 0xc65   :  { %v8496_v24 = vpop.permute.xlu0 %1182 }
 0xc66   :  { %10145 = vst [vmem:[#allocation12_spill] sm:$0xff] %v8496_v24  ;;  %7054 = vmatpush3.msra.mxu1 %v8496_v24 }
 0xc67   :  { %7056 = vmatmul.mubr.msk.f32.vlgmr.msra.gmra.mxu1 %vm161_vm2, %v1181_v33  ;;  %7069 = vmatprep.subr.mxu1 %v10072_v1 }
 0xc68   :  { %7070 = vmatpush3.msra.mxu1 %v8363_v30  ;;  %7073 = vmatprep.mubr.msk.f32.mxu1 %vm8037_vm6, %v10072_v1 }
 0xc69   :  { %7071 = vmatprep.subr.mxu1 %v10072_v1 }
 0xc6a   :  { %7072 = vmatpush3.msra.mxu1 %v8378_v54 }
 0xc6b   :  { %7074 = vmatmul.mubr.msk.f32.vlgmr.msra.gmra.mxu1 %vm560_vm12, %v8507_v47  ;;  %1631 = vmatprep.subr.mxu1 %v8512_v34 }
 0xc6c   :  { %1632 = vmatpush1.msra.mxu1 %v8197_v38  ;;  %1671 = vmatprep.mubr.f32.mxu1 %v10072_v1 }
 0xc6d   :  { %1633 = vmatprep.subr.mxu1 %v8517_v35 }
 0xc6e   :  { %1634 = vmatpush1.msra.mxu1 %v8199_v39 }
 0xc6f   :  { %1635 = vmatprep.subr.mxu1 %v8521_v42 }
 0xc70   :  { %1636 = vmatpush1.msra.mxu1 %v8203_v40 }
 0xc71   :  { %1637 = vmatprep.subr.mxu1 %v8525_v45 }
 0xc72   :  { %1638 = vmatpush1.msra.mxu1 %v8207_v41  ;;  %v8539_v41 = vld [vmem:[#allocation3 + $0x123] ss:$0 sm:$0xff] }
 0xc73   :  { %7087 = vmatprep.subr.mxu1 %v10072_v1  ;;  %v852_v11 = vadd.f32 %v8424_v44, %v8539_v41 }
 0xcd2   :  { %v1604_v38 = vpop.permute.xlu0 %1603 }
 0xcd3   :  { %6731 = vmatmul.mubr.msk.f32.vlgmr.msra.gmra.mxu1 %vm161_vm2, %v1604_v38 }
 0xcd4   :  { %7088 = vmatpush3.msra.mxu1 %v8350_v56  ;;  %7091 = vmatprep.mubr.msk.f32.mxu1 %vm8037_vm6, %v10072_v1 }
 0xcd5   :  { %7089 = vmatprep.subr.mxu1 %v10072_v1 }
 0xcd6   :  { %7090 = vmatpush3.msra.mxu1 %v8358_v21 }
 0xcd7   :  { %7094 = vmatprep.subr.mxu1 %v10072_v1 }
 0xd27   :  { %v8537_v39 = vpop.f32.mrf.mxu1 }
 0xd29   :  { %v7057_v40 = vpop.f32.mrf.mxu1 }
 0xd2b   :  { %v1458_v46 = vpop.f32.mrf.mxu1 }
 0xd2c   :  { %v8542_v22 = vadd.f32 %v1458_v46, %v8539_v41 }
 0xd2d   :  { %v7075_v48 = vpop.f32.mrf.mxu1 }
 0xd2e   :  { %10146 = vst [vmem:[#allocation13_spill] sm:$0xff] %v8542_v22  ;;  %1685 = vrot.lane.b32.xlu0 %v8542_v22, %s8039_s10 }
 0xd93   :  { %v8546_v56 = vpop.f32.mrf.mxu1 }
 0xd95   :  { %v1675_v49 = vpop.f32.mrf.mxu1 }
 0xd96   :  { %v8549_v50 = vadd.f32 %v1675_v49, %v8285_v31  ;;  %v8561_v31 = vld [vmem:[#allocation3 + $0x58] sm:$0xff]  ;;  %v2323_v49 = vld [vmem:[#allocation2 + $0x30] sm:$0x3] }
 0xd98   :  { %10147 = vst [vmem:[#allocation14_spill] sm:$0xff] %v8549_v50  ;;  %v1683_v7 = vadd.f32 %v1681_v52, %v8549_v50  ;;  %v8599_v52 = vadd.f32 %v2323_v49, %v1573_v28  ;;  %v8662_v49 = vld [vmem:[#allocation3 + $0x10] sm:$0xff] }
 0xd9a   :  { %1693 = vrot.lane.b32.xlu0 %v1683_v7, %s8040_s11  ;;  %1690 = vrot.lane.b32.xlu1 %v1683_v7, %s8041_s12 }
 0xd9e   :  { %1703 = vrot.lane.b32.xlu0 %v8554_v3, %s8040_s11  ;;  %1705 = vrot.lane.b32.xlu1 %v7942_v8, %s8040_s11 }
 0xda0   :  { %v1686_v55 = vpop.permute.xlu0 %1685 }
 0xda1   :  { %v8570_v51 = vsel %vm560_vm12, %v852_v11, %v1686_v55 }
 0xda2   :  { %1699 = vrot.lane.b32.xlu0 %v8487_v60, %s8040_s11  ;;  %1701 = vrot.lane.b32.xlu1 %v8561_v31, %s8040_s11 }
 0xda6   :  { %1910 = vrot.lane.b32.xlu0 %v8537_v39, %s8035_s8 }
 0xe0c   :  { %v1691_v29 = vpop.permute.xlu1 %1690  ;;  %v1694_v16 = vpop.permute.xlu0 %1693 }
 0xe0d   :  { %v1696_v13 = vsel %vm560_vm12, %v1691_v29, %v1694_v16 }
 0xe0e   :  { %v1697_v57 = vadd.f32 %v1696_v13, %v8570_v51 }
 0xe10   :  { %7626 = vtanh.f32 %v1697_v57  ;;  %v1704_v19 = vpop.permute.xlu0 %1703  ;;  %v1706_v23 = vpop.permute.xlu1 %1705 }
 0xe11   :  { %7077 = vmatpush3.msra.mxu0 %v1706_v23 }
 0xe12   :  { %7078 = vmatprep.subr.mxu0 %v10072_v1 }
 0xe13   :  { %7079 = vmatpush3.msra.mxu0 %v1704_v19 }
 0xe14   :  { %v1702_v25 = vpop.permute.xlu1 %1701  ;;  %7080 = vmatprep.subr.mxu0 %v10072_v1  ;;  %v1700_v44 = vpop.permute.xlu0 %1699 }
 0xe15   :  { %7081 = vmatpush3.msra.mxu0 %v1702_v25 }
 0xe16   :  { %7082 = vmatprep.subr.mxu0 %v10072_v1 }
 0xe17   :  { %7083 = vmatpush3.msra.mxu0 %v1700_v44 }
 0xe18   :  { %7105 = vmatprep.subr.mxu0 %v10072_v1  ;;  %v1911_v46 = vpop.permute.xlu0 %1910 }
 0xe19   :  { %v1913_v48 = vadd.f32 %v1911_v46, %v8549_v50  ;;  %v8654_v46 = vld [vmem:[#allocation3 + $0x70] sm:$0xff] }
 0xe1d   :  { %v7627_v27 = vpop.eup %7626 }
 0xe1e   :  { %7085 = vmatmul.mubr.msk.f32.vlgmr.msra.gmra.mxu0 %vm161_vm2, %v7627_v27 }
 0xe1f   :  { %7106 = vmatpush3.msra.mxu0 %v8300_v58  ;;  %7113 = vmatprep.mubr.msk.f32.mxu0 %vm8037_vm6, %v10072_v1 }
 0xe20   :  { %7107 = vmatprep.subr.mxu0 %v10072_v1 }
 0xe21   :  { %7108 = vmatpush3.msra.mxu0 %v8302_v9 }
 0xe22   :  { %7109 = vmatprep.subr.mxu0 %v10072_v1 }
 0xe23   :  { %7110 = vmatpush3.msra.mxu0 %v8478_v37 }
 0xe24   :  { %7111 = vmatprep.subr.mxu0 %v10072_v1 }
 0xe25   :  { %7112 = vmatpush3.msra.mxu0 %v8496_v24 }
 0xe26   :  { %7127 = vmatprep.subr.mxu0 %v10072_v1 }
 0xede   :  { %v1780_v32 = vpop.f32.mrf.mxu0 }
 0xedf   :  { %v1785_v61 = vsel %vm1784_vm13, %v1780_v32, -inf }
 0xee0   :  { %1786 = vmax.xlane.f32.xlu1 %v1785_v61  ;;  %v7086_v62 = vpop.f32.mrf.mxu0 }
 0xf69   :  { %v1787_v2 = vpop.xlane.xlu1 %1786 }
 0xf6a   :  { %v1788_v5 = vsub.f32 %v1780_v32, %v1787_v2 }
 0xf6c   :  { %v1789_v33 = vmul.f32 1.442695, %v1788_v5 }
 0xf6e   :  { %7628 = vpow2.f32 %v1789_v33 }
 0xf6f   :  { %7630 = vtanh.f32 %v8549_v50 }
 0xf70   :  { %7632 = vtanh.f32 %v8599_v52 }
 0xf7b   :  { %v7629_v38 = vpop.eup %7628 }
 0xf7c   :  { %1797 = vperm.xlu1 %7508, %v7629_v38   ;;  %v1791_v40 = vsel %vm1784_vm13, %v7629_v38, 0.0  ;;  %v7631_v7 = vpop.eup %7630 }
 0xf7d   :  { %1792 = vadd.xlane.f32.xlu0 %v1791_v40  ;;  %v8649_v40 = vld [vmem:[#allocation3 + $0xa0] sm:$0xff] }
 0xf80   :  { %1464 = vrot.lane.b32.xlu1 %v8468_v10, %s8039_s10  ;;  %v8605_v10 = vadd.f32 %v8537_v39, %v8454_v4 }
 0xf82   :  { %7634 = vtanh.f32 %v8605_v10 }
 0xf84   :  { %1915 = vrot.lane.b32.xlu1 %v852_v11, %s8034_s29 }
 0xf88   :  { %1920 = vrot.lane.b32.xlu1 %v1913_v48, %s8036_s9 }
 0xf8c   :  { %1923 = vrot.lane.b32.xlu1 %v1913_v48, %s8041_s12  ;;  %v8658_v48 = vld [vmem:[#allocation3 + $0x40] sm:$0xff] }
 0xf90   :  { %1935 = vrot.lane.b32.xlu1 %v7942_v8, %s8043_s14  ;;  %v7633_v8 = vpop.eup %7632 }
 0xf91   :  { %v7635_v39 = vpop.eup %7634 }
 0xf93   :  { %1802 = vperm.xlu0 %7510, %v7629_v38  }
 0xf94   :  { %1933 = vrot.lane.b32.xlu1 %v8554_v3, %s8043_s14 }
 0xf97   :  { %2157 = vrot.lane.b32.xlu0 %v7631_v7, %s8038_s0  ;;  %v6741_v7 = vmul.f32 -1.442695, %v8599_v52 }
 0xf98   :  { %1931 = vrot.lane.b32.xlu1 %v8561_v31, %s8043_s14  ;;  %7512 = vset.pattern.permute.xlu0 %v10070_v0 }
 0xf9c   :  { %1929 = vrot.lane.b32.xlu1 %v8487_v60, %s8043_s14 }
 0xfa0   :  { %2335 = vrot.lane.b32.xlu1 %v7633_v8, %s8031_s18 }
 0xfa4   :  { %1275 = vrot.lane.b32.xlu1 %v7635_v39, %s8034_s29  ;;  %v1474_v39 = vld [vmem:[#allocation2 + $0x28] sm:$0x3] }
 0xff7   :  { %v1798_v3 = vpop.permute.xlu1 %1797 }
 0xff8   :  { %v1800_v27 = vmul.f32 %v1798_v3, %v8409_v43 }
 0xffb   :  { %v1465_v55 = vpop.permute.xlu1 %1464 }
 0xffc   :  { %v8626_v23 = vsel %vm560_vm12, %v8507_v47, %v1465_v55 }
 0xfff   :  { %v1916_v11 = vpop.permute.xlu1 %1915 }
0x1000   :  { %v8621_v19 = vsel %vm560_vm12, %v1916_v11, %v8542_v22 }
0x1003   :  { %v1921_v29 = vpop.permute.xlu1 %1920 }
0x1006   :  { %v1793_v16 = vpop.xlane.xlu0 %1792 }
0x1007   :  { %7636 = vrcp.f32 %v1793_v16  ;;  %v1924_v13 = vpop.permute.xlu1 %1923 }
0x1008   :  { %v1926_v31 = vsel %vm560_vm12, %v1921_v29, %v1924_v13 }
0x1009   :  { %v1927_v60 = vadd.f32 %v1926_v31, %v8621_v19 }
0x100b   :  { %v1936_v57 = vpop.permute.xlu1 %1935  ;;  %7638 = vtanh.f32 %v1927_v60 }
0x100c   :  { %7640 = vpow2.f32 %v6741_v7 }
0x100e   :  { %v1803_v25 = vpop.permute.xlu0 %1802 }
0x100f   :  { %v1805_v44 = vmul.f32 %v1803_v25, %v8626_v23  ;;  %v1934_v28 = vpop.permute.xlu1 %1933 }
0x1011   :  { %v1806_v32 = vadd.f32 %v1805_v44, %v1800_v27 }
0x1012   :  { %v2158_v38 = vpop.permute.xlu0 %2157 }
0x1013   :  { %v1932_v2 = vpop.permute.xlu1 %1931 }
0x1014   :  { %v7637_v61 = vpop.eup %7636 }
0x1015   :  { %v1807_v62 = vmul.f32 %v7637_v61, %v1806_v32  ;;  %v6724_v32 = vmul.f32 -1.442695, %v8605_v10 }
0x1017   :  { %7092 = vmatmul.mubr.msk.f32.vlgmr.msra.gmra.mxu1 %vm560_vm12, %v1807_v62  ;;  %v1930_v5 = vpop.permute.xlu1 %1929 }
0x1018   :  { %7095 = vmatpush3.msra.mxu1 %v1936_v57  ;;  %7102 = vmatprep.mubr.msk.f32.mxu1 %vm8037_vm6, %v10072_v1  ;;  %v7639_v33 = vpop.eup %7638 }
0x1019   :  { %7096 = vmatprep.subr.mxu1 %v10072_v1  ;;  %v7641_v8 = vpop.eup %7640 }
0x101a   :  { %7097 = vmatpush3.msra.mxu1 %v1934_v28  ;;  %v2329_v55 = vadd.f32 1.0, %v7641_v8 }
0x101b   :  { %7098 = vmatprep.subr.mxu1 %v10072_v1  ;;  %v2336_v60 = vpop.permute.xlu1 %2335 }
0x101c   :  { %7099 = vmatpush3.msra.mxu1 %v1932_v2 }
0x101d   :  { %7100 = vmatprep.subr.mxu1 %v10072_v1 }
0x101e   :  { %7101 = vmatpush3.msra.mxu1 %v1930_v5 }
0x101f   :  { %7103 = vmatmul.mubr.msk.f32.vlgmr.msra.gmra.mxu1 %vm161_vm2, %v7639_v33  ;;  %7116 = vmatprep.subr.mxu1 %v10072_v1  ;;  %v1276_v10 = vpop.permute.xlu1 %1275 }
0x1020   :  { %7117 = vmatpush3.msra.mxu1 %v8308_v36  ;;  %7124 = vmatprep.mubr.msk.f32.mxu1 %vm8037_vm6, %v10072_v1 }
0x1021   :  { %7118 = vmatprep.subr.mxu1 %v10072_v1 }
0x1022   :  { %7119 = vmatpush3.msra.mxu1 %v8315_v15 }
0x1023   :  { %7120 = vmatprep.subr.mxu1 %v10072_v1 }
0x1024   :  { %7121 = vmatpush3.msra.mxu1 %v8317_v17 }
0x1025   :  { %7122 = vmatprep.subr.mxu1 %v10072_v1 }
0x1026   :  { %7123 = vmatpush3.msra.mxu1 %v8323_v18 }
0x1027   :  { %7125 = vmatmul.mubr.msk.f32.vlgmr.msra.gmra.mxu1 %vm161_vm2, %v2158_v38  ;;  %2481 = vmatprep.subr.mxu1 %v8512_v34 }
0x1028   :  { %2482 = vmatpush1.msra.mxu1 %v8649_v40  ;;  %2521 = vmatprep.mubr.f32.mxu1 %v10072_v1 }
0x1029   :  { %2483 = vmatprep.subr.mxu1 %v8517_v35 }
0x102a   :  { %2484 = vmatpush1.msra.mxu1 %v8654_v46 }
0x102b   :  { %2485 = vmatprep.subr.mxu1 %v8521_v42 }
0x102c   :  { %2486 = vmatpush1.msra.mxu1 %v8658_v48 }
0x102d   :  { %2487 = vmatprep.subr.mxu1 %v8525_v45 }
0x102e   :  { %2488 = vmatpush1.msra.mxu1 %v8662_v49 }
0x102f   :  { %7149 = vmatprep.subr.mxu1 %v10072_v1 }
0x10d7   :  { %v8667_v3 = vpop.f32.mrf.mxu1 }
0x10d8   :  { %v1881_v11 = vadd.f32 %v8667_v3, %v1474_v39 }
0x10d9   :  { %v7093_v29 = vpop.f32.mrf.mxu1 }
0x10da   :  { %7642 = vtanh.f32 %v1881_v11  ;;  %v6734_v28 = vmul.f32 -1.442695, %v1881_v11 }
0x10db   :  { %7644 = vrcp.f32 %v2329_v55 }
0x10dc   :  { %7646 = vpow2.f32 %v6734_v28 }
0x10dd   :  { %7648 = vpow2.f32 %v6724_v32 }
0x10df   :  { %v2010_v16 = vpop.f32.mrf.mxu1 }
0x10e0   :  { %v2014_v13 = vsel %vm1784_vm13, %v2010_v16, -inf }
0x10e1   :  { %2015 = vmax.xlane.f32.xlu1 %v2014_v13  ;;  %v7104_v31 = vpop.f32.mrf.mxu1 }
0x10e7   :  { %v7643_v57 = vpop.eup %7642  ;;  %v2227_v25 = vpop.f32.mrf.mxu1 }
0x10e8   :  { %1894 = vrot.lane.b32.xlu0 %v7643_v57, %s8034_s29  ;;  %v7645_v52 = vpop.eup %7644 }
0x10e9   :  { %v7126_v44 = vpop.f32.mrf.mxu1  ;;  %v2338_v27 = vmul.f32 %v7645_v52, %v2336_v60  ;;  %v7647_v61 = vpop.eup %7646  ;;  %v2333_v39 = vmul.f32 %v7645_v52, %v8403_v14 }
0x10ea   :  { %v1885_v2 = vadd.f32 1.0, %v7647_v61  ;;  %v7649_v5 = vpop.eup %7648 }
0x10eb   :  { %v1265_v33 = vadd.f32 1.0, %v7649_v5 }
0x10ec   :  { %2340 = vrot.lane.b32.xlu0 %v2338_v27, %s8033_s22  ;;  %7650 = vrcp.f32 %v1885_v2 }
0x10ed   :  { %7652 = vrcp.f32 %v1265_v33 }
0x10f0   :  { %1889 = vrot.lane.b32.xlu0 %v1807_v62, %s8034_s29 }
0x10f9   :  { %v7651_v38 = vpop.eup %7650 }
0x10fa   :  { %v8683_v11 = vpop.eup %7652 }
0x10fb   :  { %10148 = vst [vmem:[#allocation15_spill] sm:$0xff] %v8683_v11  ;;  %v1278_v29 = vmul.f32 %v8683_v11, %v1276_v10 }
0x115a   :  { %v1895_v7 = vpop.permute.xlu0 %1894 }
0x115b   :  { %v1897_v8 = vmul.f32 %v7651_v38, %v1895_v7 }
0x115d   :  { %1899 = vrot.lane.b32.xlu0 %v1897_v8, %s8032_s19 }
0x115e   :  { %v2341_v55 = vpop.permute.xlu0 %2340 }
0x115f   :  { %v8677_v62 = vadd.f32 %v2341_v55, %v2333_v39 }
0x1161   :  { %7654 = vtanh.f32 %v8677_v62  ;;  %1270 = vrot.lane.b32.xlu0 %v8494_v6, %s8034_s29 }
0x1162   :  { %v1890_v44 = vpop.permute.xlu0 %1889 }
0x1163   :  { %v1892_v27 = vmul.f32 %v7651_v38, %v1890_v44 }
0x1165   :  { %2232 = vrot.lane.b32.xlu0 %v2227_v25, %s8030_s16 }
0x1169   :  { %1280 = vrot.lane.b32.xlu0 %v1278_v29, %s8032_s19 }
0x116a   :  { %v2016_v13 = vpop.xlane.xlu1 %2015 }
0x116b   :  { %v2017_v31 = vsub.f32 %v2010_v16, %v2016_v13 }
0x116d   :  { %v2018_v14 = vmul.f32 1.442695, %v2017_v31 }
0x116e   :  { %v7655_v57 = vpop.eup %7654 }
0x116f   :  { %7656 = vpow2.f32 %v2018_v14  ;;  %2346 = vrot.lane.b32.xlu0 %v7655_v57, %s8031_s18 }
0x117c   :  { %v7657_v60 = vpop.eup %7656 }
0x117d   :  { %2026 = vperm.xlu1 %7508, %v7657_v60   ;;  %v2020_v25 = vsel %vm1784_vm13, %v7657_v60, 0.0  ;;  %vm6683_vm13 = vcmask 588800  }
0x1181   :  { %7511 = vset.pattern.permute.xlu1 %v10068_v63 }
0x1182   :  { %2031 = vperm.xlu1 %7511, %v7657_v60  }
0x118e   :  { %2021 = vadd.xlane.f32.xlu0 %v2020_v25 }
0x11cf   :  { %v1900_v28 = vpop.permute.xlu0 %1899 }
0x11d0   :  { %v8690_v32 = vadd.f32 %v1900_v28, %v1892_v27 }
0x11d2   :  { %7658 = vtanh.f32 %v8690_v32 }
0x11d3   :  { %v1271_v16 = vpop.permute.xlu0 %1270 }
0x11d4   :  { %v1273_v5 = vmul.f32 %v8683_v11, %v1271_v16 }
0x11d7   :  { %v2233_v61 = vpop.permute.xlu0 %2232 }
0x11d8   :  { %v2235_v2 = vadd.f32 %v2233_v61, %v8549_v50 }
0x11da   :  { %7660 = vtanh.f32 %v2235_v2  ;;  %v8720_v2 = vld [vmem:[#allocation3 + $0x98] sm:$0xff] }
0x11db   :  { %v1281_v33 = vpop.permute.xlu0 %1280 }
0x11dc   :  { %v8695_v7 = vadd.f32 %v1281_v33, %v1273_v5  ;;  %v8729_v5 = vld [vmem:[#allocation3 + $0x68] sm:$0xff]  ;;  %v8732_v33 = vld [vmem:[#allocation3 + $0x60] sm:$0xff] }
0x11de   :  { %10149 = vst [vmem:[#allocation16_spill] sm:$0xff] %v8695_v7  ;;  %1469 = vrot.lane.b32.xlu0 %v8695_v7, %s8039_s10 }
0x11df   :  { %v7659_v8 = vpop.eup %7658 }
0x11e0   :  { %1905 = vrot.lane.b32.xlu1 %v7659_v8, %s8039_s10  ;;  %v8735_v8 = vld [vmem:[#allocation3 + $0x38] sm:$0xff] }
0x11e1   :  { %v2347_v55 = vpop.permute.xlu0 %2346 }
0x11e2   :  { %v2349_v10 = vmul.f32 %v7645_v52, %v2347_v55  ;;  %v8741_v55 = vld [vmem:[#allocation3 + $0x8] sm:$0xff] }
0x11e7   :  { %v7661_v39 = vpop.eup %7660 }
0x11e8   :  { %2238 = vrot.lane.b32.xlu1 %v7661_v39, %s8035_s8  ;;  %v8738_v39 = vld [vmem:[#allocation3 + $0x30] sm:$0xff] }
0x11ec   :  { %2351 = vrot.lane.b32.xlu1 %v2349_v10, %s8033_s22 }
0x11f8   :  { %v2027_v13 = vpop.permute.xlu1 %2026 }
0x11f9   :  { %v2029_v60 = vmul.f32 %v2027_v13, %v8494_v6 }
0x11fd   :  { %v2032_v31 = vpop.permute.xlu1 %2031 }
0x1217   :  { %v2022_v29 = vpop.xlane.xlu0 %2021 }
0x1218   :  { %7662 = vrcp.f32 %v2022_v29  ;;  %v8744_v29 = vld [vmem:[#allocation3] sm:$0xff] }
0x1225   :  { %v7663_v28 = vpop.eup %7662 }
0x1250   :  { %v1470_v14 = vpop.permute.xlu0 %1469 }
0x1251   :  { %v8704_v57 = vsel %vm560_vm12, %v8507_v47, %v1470_v14 }
0x1252   :  { %v2034_v25 = vmul.f32 %v2032_v31, %v8704_v57  ;;  %v1906_v44 = vpop.permute.xlu1 %1905 }
0x1253   :  { %v1908_v52 = vmul.f32 %v7651_v38, %v1906_v44  ;;  %v8725_v38 = vld [vmem:[#allocation3 + $0x90] sm:$0xff] }
0x1254   :  { %v2035_v27 = vadd.f32 %v2034_v25, %v2029_v60 }
0x1256   :  { %v8708_v16 = vmul.f32 %v7663_v28, %v2035_v27  ;;  %v8754_v27 = vld [vmem:[#allocation3 + $0x121] ss:$0 sm:$0xff] }
0x1258   :  { %v2037_v61 = vsel %vm560_vm12, %v8708_v16, %v1908_v52 }
0x1259   :  { %7114 = vmatmul.mubr.msk.f32.vlgmr.msra.gmra.mxu0 %vm161_vm2, %v2037_v61 }
0x125a   :  { %7128 = vmatpush3.msra.mxu0 %v8363_v30  ;;  %7131 = vmatprep.mubr.msk.f32.mxu0 %vm8037_vm6, %v10072_v1  ;;  %v8717_v47 = vpop.permute.xlu1 %2238 }
0x125b   :  { %7129 = vmatprep.subr.mxu0 %v10072_v1 }
0x125c   :  { %7130 = vmatpush3.msra.mxu0 %v8378_v54 }
0x125d   :  { %2379 = vmatprep.subr.mxu0 %v8720_v2  ;;  %7132 = vmatmul.mubr.msk.f32.vlgmr.msra.gmra.mxu0 %vm560_vm12, %v8717_v47 }
0x125e   :  { %2380 = vmatpush1.msra.mxu0 %v8725_v38  ;;  %2419 = vmatprep.mubr.f32.mxu0 %v10072_v1  ;;  %v2352_v10 = vpop.permute.xlu1 %2351 }
0x125f   :  { %2381 = vmatprep.subr.mxu0 %v8729_v5 }
0x1260   :  { %2382 = vmatpush1.msra.mxu0 %v8732_v33 }
0x1261   :  { %2383 = vmatprep.subr.mxu0 %v8735_v8 }
0x1262   :  { %2384 = vmatpush1.msra.mxu0 %v8738_v39 }
0x1263   :  { %2385 = vmatprep.subr.mxu0 %v8741_v55 }
0x1264   :  { %2386 = vmatpush1.msra.mxu0 %v8744_v29 }
0x1265   :  { %6742 = vmatmul.mubr.msk.f32.vlgmr.msra.gmra.mxu0 %vm161_vm2, %v2352_v10  ;;  %7134 = vmatprep.subr.mxu0 %v10072_v1 }
0x1266   :  { %7146 = vmatprep.mubr.msk.f32.mxu0 %vm8037_vm6, %v10072_v1 }
0x1319   :  { %v8751_v13 = vpop.f32.mrf.mxu0 }
0x131b   :  { %v7115_v31 = vpop.f32.mrf.mxu0 }
0x131d   :  { %v2308_v14 = vpop.f32.mrf.mxu0 }
0x131f   :  { %v7133_v60 = vpop.f32.mrf.mxu0 }
0x1325   :  { %v2421_v25 = vpop.f32.mrf.mxu0 }
0x1326   :  { %v2426_v44 = vadd.f32 %v2421_v25, %v8546_v56 }
0x1328   :  { %v2427_v28 = vadd.f32 %v8754_v27, %v2426_v44 }
0x132a   :  { %7664 = vtanh.f32 %v2427_v28  ;;  %v6743_v61 = vmul.f32 -1.442695, %v2427_v28 }
0x132c   :  { %7666 = vpow2.f32 %v6743_v61  ;;  %v8778_v61 = vld [vmem:[#allocation3 + $0x122] ss:$0 sm:$0xff] }
0x1337   :  { %v7665_v52 = vpop.eup %7664 }
0x1338   :  { %2437 = vrot.lane.b32.xlu1 %v7665_v52, %s8031_s18 }
0x1339   :  { %v7667_v10 = vpop.eup %7666 }
0x133a   :  { %v2431_v63 = vadd.f32 1.0, %v7667_v10 }
0x133c   :  { %7668 = vrcp.f32 %v2431_v63 }
0x1349   :  { %v7669_v0 = vpop.eup %7668 }
0x134a   :  { %v2435_v56 = vmul.f32 %v7669_v0, %v8465_v12  ;;  %v10150_v12 = vmov 0.0  }
0x13aa   :  { %v2438_v31 = vpop.permute.xlu1 %2437 }
0x13ab   :  { %v2440_v1 = vmul.f32 %v7669_v0, %v2438_v31 }
0x13ad   :  { %2442 = vrot.lane.b32.xlu1 %v2440_v1, %s8033_s22  ;;  %v8768_v1 = vld [vmem:[#allocation3 + $0xf0] sm:$0xff] }
0x141f   :  { %v2443_v60 = vpop.permute.xlu1 %2442 }
0x1420   :  { %v8760_v25 = vadd.f32 %v2443_v60, %v2435_v56  ;;  %v8787_v60 = vadd.f32 %v2308_v14, %v8539_v41  ;;  %v8802_v41 = vld [vmem:[#allocation3 + $0xb8] sm:$0xff]  ;;  %v8808_v14 = vld [vmem:[#allocation3 + $0x28] sm:$0xff] }
0x1422   :  { %7670 = vtanh.f32 %v8760_v25  ;;  %10152 = vst [vmem:[#allocation18_spill] sm:$0xff] %v8787_v60 }
0x142f   :  { %v7671_v44 = vpop.eup %7670 }
0x1430   :  { %2448 = vrot.lane.b32.xlu1 %v7671_v44, %s8031_s18  ;;  %v8794_v44 = vld [vmem:[#allocation3 + $0x118] sm:$0xff] }
0x1434   :  { %2530 = vrot.lane.b32.xlu1 %v8667_v3, %s8038_s0 }
0x14a2   :  { %v2449_v28 = vpop.permute.xlu1 %2448 }
0x14a3   :  { %v2451_v63 = vmul.f32 %v7669_v0, %v2449_v28  ;;  %v8800_v28 = vld [vmem:[#allocation3 + $0x88] sm:$0xff] }
0x14a5   :  { %2453 = vrot.lane.b32.xlu0 %v2451_v63, %s8033_s22  ;;  %v8810_v63 = vld [vmem:[#allocation3 + $0x58] sm:$0xff] }
0x14a6   :  { %v2531_v31 = vpop.permute.xlu1 %2530 }
0x1517   :  { %v2454_v52 = vpop.permute.xlu0 %2453 }
0x1518   :  { %6744 = vmatmul.mubr.msk.f32.vlgmr.msra.gmra.mxu1 %vm161_vm2, %v2454_v52 }
0x1519   :  { %7150 = vmatpush3.msra.mxu1 %v8768_v1  ;;  %7153 = vmatprep.mubr.msk.f32.mxu1 %vm8037_vm6, %v10150_v12 }
0x151a   :  { %7151 = vmatprep.subr.mxu1 %v10150_v12 }
0x151b   :  { %7152 = vmatpush3.msra.mxu1 %v8358_v21  ;;  %v8792_v21 = vld [vmem:[#allocation3 + $0xe8] sm:$0xff] }
0x151c   :  { %7156 = vmatprep.subr.mxu1 %v10150_v12 }
0x15d8   :  { %v8776_v3 = vpop.f32.mrf.mxu1 }
0x15da   :  { %v2525_v0 = vpop.f32.mrf.mxu1 }
0x15db   :  { %v8781_v10 = vadd.f32 %v8778_v61, %v2525_v0 }
0x15dd   :  { %10151 = vst [vmem:[#allocation17_spill] sm:$0xff] %v8781_v10  ;;  %v2533_v56 = vadd.f32 %v2531_v31, %v8781_v10 }
0x15df   :  { %2543 = vrot.lane.b32.xlu1 %v2533_v56, %s8040_s11  ;;  %2540 = vrot.lane.b32.xlu0 %v2533_v56, %s8041_s12 }
0x15e3   :  { %2546 = vrot.lane.b32.xlu1 %v2533_v56, %s8044_s15  ;;  %2535 = vrot.lane.b32.xlu0 %v8787_v60, %s8033_s22 }
0x15e7   :  { %2573 = vrot.lane.b32.xlu1 %v8792_v21, %s8040_s11  ;;  %2575 = vrot.lane.b32.xlu0 %v8794_v44, %s8040_s11 }
0x15eb   :  { %2569 = vrot.lane.b32.xlu1 %v8800_v28, %s8040_s11  ;;  %2571 = vrot.lane.b32.xlu0 %v8802_v41, %s8040_s11 }
0x15ef   :  { %2565 = vrot.lane.b32.xlu1 %v8808_v14, %s8040_s11  ;;  %2567 = vrot.lane.b32.xlu0 %v8810_v63, %s8040_s11 }
0x15f3   :  { %2789 = vrot.lane.b32.xlu1 %v8751_v13, %s8035_s8 }
0x1651   :  { %v2544_v52 = vpop.permute.xlu1 %2543  ;;  %v2541_v0 = vpop.permute.xlu0 %2540 }
0x1652   :  { %v2549_v31 = vsel %vm560_vm12, %v2541_v0, %v2544_v52 }
0x1655   :  { %v2547_v56 = vpop.permute.xlu1 %2546  ;;  %v2536_v53 = vpop.permute.xlu0 %2535 }
0x1656   :  { %v2550_v50 = vsel %vm161_vm2, %v2549_v31, %v2547_v56  ;;  %v8822_v20 = vsel %vm161_vm2, %v8570_v51, %v2536_v53 }
0x1657   :  { %v2551_v11 = vadd.f32 %v2550_v50, %v8822_v20 }
0x1659   :  { %7672 = vtanh.f32 %v2551_v11  ;;  %v2574_v59 = vpop.permute.xlu1 %2573  ;;  %v2576_v7 = vpop.permute.xlu0 %2575 }
0x165a   :  { %7135 = vmatpush3.msra.mxu0 %v2576_v7 }
0x165b   :  { %7136 = vmatprep.subr.mxu0 %v10150_v12 }
0x165c   :  { %7137 = vmatpush3.msra.mxu0 %v2574_v59 }
0x165d   :  { %v2570_v26 = vpop.permute.xlu1 %2569  ;;  %7138 = vmatprep.subr.mxu0 %v10150_v12  ;;  %v2572_v52 = vpop.permute.xlu0 %2571 }
0x165e   :  { %7139 = vmatpush3.msra.mxu0 %v2572_v52 }
0x165f   :  { %7140 = vmatprep.subr.mxu0 %v10150_v12 }
0x1660   :  { %7141 = vmatpush3.msra.mxu0 %v2570_v26  ;;  %v2423_v26 = vpop.f32.mrf.mxu0 }
0x1661   :  { %7142 = vmatprep.subr.mxu0 %v10150_v12  ;;  %v2568_v53 = vpop.permute.xlu0 %2567  ;;  %v2566_v50 = vpop.permute.xlu1 %2565 }
0x1662   :  { %7143 = vmatpush3.msra.mxu0 %v2568_v53  ;;  %v10081_v53 = vmov 2  }
0x1663   :  { %7144 = vmatprep.subr.mxu0 %v10150_v12 }
0x1664   :  { %7145 = vmatpush3.msra.mxu0 %v2566_v50  ;;  %v10153_v50 = vmov 0  }
0x1665   :  { %7171 = vmatprep.subr.mxu0 %v10150_v12 }
0x1666   :  { %v7673_v59 = vpop.eup %7672 }
0x1667   :  { %7147 = vmatmul.mubr.msk.f32.vlgmr.msra.gmra.mxu0 %vm2583_vm14, %v7673_v59 }
0x1668   :  { %7172 = vmatpush3.msra.mxu0 %v8300_v58  ;;  %7179 = vmatprep.mubr.msk.f32.mxu0 %vm8037_vm6, %v10150_v12 }
0x1669   :  { %7173 = vmatprep.subr.mxu0 %v10150_v12 }
0x166a   :  { %7174 = vmatpush3.msra.mxu0 %v8302_v9 }
0x166b   :  { %7175 = vmatprep.subr.mxu0 %v10150_v12 }
0x166c   :  { %7176 = vmatpush3.msra.mxu0 %v8478_v37 }
0x166d   :  { %7177 = vmatprep.subr.mxu0 %v10150_v12 }
0x166e   :  { %7178 = vmatpush3.msra.mxu0 %v8496_v24 }
0x166f   :  { %7193 = vmatprep.subr.mxu0 %v10150_v12 }
0x1727   :  { %v2653_v51 = vpop.f32.mrf.mxu0 }
0x1728   :  { %v2658_v11 = vsel %vm2657_vm15, %v2653_v51, -inf }
0x1729   :  { %2659 = vmax.xlane.f32.xlu0 %v2658_v11  ;;  %v7148_v7 = vpop.f32.mrf.mxu0  ;;  %v2790_v11 = vpop.permute.xlu1 %2789 }
0x172a   :  { %v2792_v7 = vadd.f32 %v2790_v11, %v8781_v10 }
0x17b2   :  { %v2660_v0 = vpop.xlane.xlu0 %2659 }
0x17b3   :  { %v2661_v31 = vsub.f32 %v2653_v51, %v2660_v0  ;;  %v3217_v0 = vld [vmem:[#allocation2 + $0x40] sm:$0x3] }
0x17b5   :  { %v2662_v56 = vmul.f32 1.442695, %v2661_v31  ;;  %v8861_v31 = vadd.f32 %v3217_v0, %v2423_v26 }
0x17b7   :  { %7674 = vpow2.f32 %v2662_v56  ;;  %v8866_v56 = vadd.f32 %v8751_v13, %v8454_v4 }
0x17b8   :  { %7676 = vtanh.f32 %v8781_v10 }
0x17b9   :  { %7678 = vtanh.f32 %v8861_v31 }
0x17ba   :  { %7680 = vtanh.f32 %v8866_v56 }
0x17c4   :  { %v7675_v52 = vpop.eup %7674 }
0x17c5   :  { %2675 = vperm.xlu1 %7511, %v7675_v52   ;;  %2670 = vperm.xlu0 %7512, %v7675_v52   ;;  %v7677_v59 = vpop.eup %7676  ;;  %v2664_v51 = vsel %vm2657_vm15, %v7675_v52, 0.0 }
0x17c9   :  { %7513 = vset.pattern.permute.xlu1 %v10081_v53  ;;  %2793 = vrot.lane.b32.xlu0 %v8787_v60, %s8039_s10 }
0x17ca   :  { %2681 = vperm.xlu1 %7513, %v7675_v52  }
0x17cd   :  { %2821 = vrot.lane.b32.xlu0 %v8794_v44, %s8043_s14 }
0x17ce   :  { %7514 = vset.pattern.permute.xlu1 %v10153_v50 }
0x17d1   :  { %2817 = vrot.lane.b32.xlu0 %v8802_v41, %s8043_s14 }
0x17d5   :  { %2813 = vrot.lane.b32.xlu0 %v8810_v63, %s8043_s14 }
0x17d9   :  { %3051 = vrot.lane.b32.xlu0 %v7677_v59, %s8038_s0 }
0x17ee   :  { %2665 = vadd.xlane.f32.xlu1 %v2664_v51 }
0x17ff   :  { %2314 = vrot.lane.b32.xlu1 %v8690_v32, %s8039_s10  ;;  %v7679_v32 = vpop.eup %7678 }
0x1800   :  { %v7681_v26 = vpop.eup %7680 }
0x1803   :  { %2798 = vrot.lane.b32.xlu1 %v2792_v7, %s8036_s9 }
0x1807   :  { %2801 = vrot.lane.b32.xlu1 %v2792_v7, %s8041_s12 }
0x180b   :  { %2804 = vrot.lane.b32.xlu1 %v2792_v7, %s8040_s11 }
0x180f   :  { %2819 = vrot.lane.b32.xlu1 %v8792_v21, %s8043_s14 }
0x1813   :  { %2815 = vrot.lane.b32.xlu1 %v8800_v28, %s8043_s14 }
0x1817   :  { %2811 = vrot.lane.b32.xlu1 %v8808_v14, %s8043_s14 }
0x181b   :  { %3229 = vrot.lane.b32.xlu1 %v7679_v32, %s8031_s18 }
0x181f   :  { %2125 = vrot.lane.b32.xlu1 %v7681_v26, %s8034_s29 }
0x1840   :  { %v2676_v4 = vpop.permute.xlu1 %2675  ;;  %v2671_v59 = vpop.permute.xlu0 %2670 }
0x1841   :  { %v2678_v7 = vmul.f32 %v2676_v4, %v8626_v23  ;;  %v2673_v0 = vmul.f32 %v2671_v59, %v8409_v43 }
0x1843   :  { %v2679_v26 = vadd.f32 %v2678_v7, %v2673_v0  ;;  %v2324_v0 = vld [vmem:[#allocation2 + $0x38] sm:$0x3] }
0x1844   :  { %v8884_v53 = vpop.permute.xlu0 %2793 }
0x1845   :  { %v2682_v13 = vpop.permute.xlu1 %2681  ;;  %v8893_v4 = vsel %vm161_vm2, %v8621_v19, %v8884_v53 }
0x1877   :  { %v2666_v52 = vpop.xlane.xlu1 %2665 }
0x1878   :  { %7682 = vrcp.f32 %v2666_v52  ;;  %v2822_v52 = vpop.permute.xlu0 %2821 }
0x187b   :  { %v2315_v51 = vpop.permute.xlu1 %2314 }
0x187c   :  { %v8880_v11 = vsel %vm560_vm12, %v8717_v47, %v2315_v51 }
0x187d   :  { %10154 = vst [vmem:[#allocation19_spill] sm:$0xff] %v8880_v11  ;;  %v2684_v60 = vmul.f32 %v2682_v13, %v8880_v11 }
0x187f   :  { %v2799_v32 = vpop.permute.xlu1 %2798  ;;  %v2685_v50 = vadd.f32 %v2684_v60, %v2679_v26 }
0x1883   :  { %v2802_v22 = vpop.permute.xlu1 %2801 }
0x1884   :  { %v2807_v9 = vsel %vm560_vm12, %v2799_v32, %v2802_v22 }
0x1885   :  { %v7683_v24 = vpop.eup %7682 }
0x1886   :  { %v8887_v37 = vmul.f32 %v7683_v24, %v2685_v50  ;;  %v2818_v24 = vpop.permute.xlu0 %2817 }
0x1887   :  { %v2805_v51 = vpop.permute.xlu1 %2804 }
0x1888   :  { %v2808_v59 = vsel %vm161_vm2, %v2807_v9, %v2805_v51  ;;  %7154 = vmatmul.mubr.msk.f32.vlgmr.msra.gmra.mxu1 %vm560_vm12, %v8887_v37 }
0x1889   :  { %v2809_v13 = vadd.f32 %v2808_v59, %v8893_v4  ;;  %7157 = vmatpush3.msra.mxu1 %v2822_v52  ;;  %7168 = vmatprep.mubr.msk.f32.mxu1 %vm8037_vm6, %v10150_v12 }
0x188a   :  { %7158 = vmatprep.subr.mxu1 %v10150_v12  ;;  %v2814_v9 = vpop.permute.xlu0 %2813 }
0x188b   :  { %7684 = vtanh.f32 %v2809_v13  ;;  %v2820_v22 = vpop.permute.xlu1 %2819 }
0x188c   :  { %7159 = vmatpush3.msra.mxu1 %v2820_v22  ;;  %v6737_v22 = vmul.f32 -1.442695, %v8866_v56 }
0x188d   :  { %7160 = vmatprep.subr.mxu1 %v10150_v12 }
0x188e   :  { %7161 = vmatpush3.msra.mxu1 %v2818_v24  ;;  %v3052_v7 = vpop.permute.xlu0 %3051 }
0x188f   :  { %v2816_v19 = vpop.permute.xlu1 %2815  ;;  %7162 = vmatprep.subr.mxu1 %v10150_v12 }
0x1890   :  { %7163 = vmatpush3.msra.mxu1 %v2816_v19 }
0x1891   :  { %7164 = vmatprep.subr.mxu1 %v10150_v12 }
0x1892   :  { %7165 = vmatpush3.msra.mxu1 %v2814_v9 }
0x1893   :  { %v2812_v60 = vpop.permute.xlu1 %2811  ;;  %7166 = vmatprep.subr.mxu1 %v10150_v12 }
0x1894   :  { %7167 = vmatpush3.msra.mxu1 %v2812_v60 }
0x1895   :  { %7182 = vmatprep.subr.mxu1 %v10150_v12 }
0x1898   :  { %v7685_v50 = vpop.eup %7684 }
0x1899   :  { %7169 = vmatmul.mubr.msk.f32.vlgmr.msra.gmra.mxu1 %vm2583_vm14, %v7685_v50 }
0x189a   :  { %7183 = vmatpush3.msra.mxu1 %v8308_v36  ;;  %7190 = vmatprep.mubr.msk.f32.mxu1 %vm8037_vm6, %v10150_v12 }
0x189b   :  { %7184 = vmatprep.subr.mxu1 %v10150_v12 }
0x189c   :  { %7185 = vmatpush3.msra.mxu1 %v8315_v15 }
0x189d   :  { %7186 = vmatprep.subr.mxu1 %v10150_v12 }
0x189e   :  { %7187 = vmatpush3.msra.mxu1 %v8317_v17 }
0x189f   :  { %7188 = vmatprep.subr.mxu1 %v10150_v12 }
0x18a0   :  { %7189 = vmatpush3.msra.mxu1 %v8323_v18 }
0x18a1   :  { %7191 = vmatmul.mubr.msk.f32.vlgmr.msra.gmra.mxu1 %vm161_vm2, %v3052_v7  ;;  %3375 = vmatprep.subr.mxu1 %v8512_v34  ;;  %v6754_v34 = vmul.f32 -1.442695, %v8861_v31 }
0x18a2   :  { %3376 = vmatpush1.msra.mxu1 %v8649_v40  ;;  %3415 = vmatprep.mubr.f32.mxu1 %v10150_v12 }
0x18a3   :  { %3377 = vmatprep.subr.mxu1 %v8517_v35  ;;  %7686 = vpow2.f32 %v6754_v34 }
0x18a4   :  { %3378 = vmatpush1.msra.mxu1 %v8654_v46 }
0x18a5   :  { %3379 = vmatprep.subr.mxu1 %v8521_v42 }
0x18a6   :  { %3380 = vmatpush1.msra.mxu1 %v8658_v48  ;;  %v3230_v48 = vpop.permute.xlu1 %3229 }
0x18a7   :  { %3381 = vmatprep.subr.mxu1 %v8525_v45 }
0x18a8   :  { %3382 = vmatpush1.msra.mxu1 %v8662_v49 }
0x18a9   :  { %7219 = vmatprep.subr.mxu1 %v10150_v12 }
0x18aa   :  { %v2126_v56 = vpop.permute.xlu1 %2125 }
0x18b0   :  { %v7687_v40 = vpop.eup %7686 }
0x18b1   :  { %v3223_v35 = vadd.f32 1.0, %v7687_v40 }
0x1948   :  { %v8929_v32 = vpop.f32.mrf.mxu1 }
0x1949   :  { %v2760_v46 = vadd.f32 %v8929_v32, %v2324_v0 }
0x194a   :  { %v7155_v26 = vpop.f32.mrf.mxu1 }
0x194b   :  { %7688 = vtanh.f32 %v2760_v46  ;;  %v6747_v24 = vmul.f32 -1.442695, %v2760_v46 }
0x194c   :  { %7690 = vrcp.f32 %v3223_v35 }
0x194d   :  { %7692 = vpow2.f32 %v6747_v24 }
0x194e   :  { %7694 = vpow2.f32 %v6737_v22 }
0x1958   :  { %v7689_v42 = vpop.eup %7688 }
0x1959   :  { %2773 = vrot.lane.b32.xlu0 %v7689_v42, %s8034_s29  ;;  %v2898_v45 = vpop.f32.mrf.mxu1  ;;  %v8933_v49 = vpop.eup %7690 }
0x195a   :  { %v2902_v31 = vsel %vm2657_vm15, %v2898_v45, -inf  ;;  %v3232_v52 = vmul.f32 %v8933_v49, %v3230_v48  ;;  %v7693_v19 = vpop.eup %7692 }
0x195b   :  { %2903 = vmax.xlane.f32.xlu1 %v2902_v31  ;;  %v7170_v51 = vpop.f32.mrf.mxu1  ;;  %v2764_v9 = vadd.f32 1.0, %v7693_v19  ;;  %v7695_v60 = vpop.eup %7694 }
0x195c   :  { %v2115_v50 = vadd.f32 1.0, %v7695_v60  ;;  %v10156_v51 = vmov 1  }
0x195d   :  { %3234 = vrot.lane.b32.xlu0 %v3232_v52, %s8033_s22  ;;  %7696 = vrcp.f32 %v2764_v9 }
0x195e   :  { %7698 = vrcp.f32 %v2115_v50 }
0x1961   :  { %v3121_v59 = vpop.f32.mrf.mxu1  ;;  %2768 = vrot.lane.b32.xlu0 %v8887_v37, %s8034_s29  ;;  %v3227_v37 = vmul.f32 %v8933_v49, %v8677_v62 }
0x1963   :  { %v7192_v13 = vpop.f32.mrf.mxu1 }
0x196a   :  { %v8941_v7 = vpop.eup %7696 }
0x196b   :  { %v8953_v46 = vpop.eup %7698 }
0x196c   :  { %10155 = vst [vmem:[#allocation20_spill] sm:$0xff] %v8953_v46  ;;  %v2128_v26 = vmul.f32 %v8953_v46, %v2126_v56 }
0x19cb   :  { %v2774_v34 = vpop.permute.xlu0 %2773 }
0x19cc   :  { %v2776_v40 = vmul.f32 %v8941_v7, %v2774_v34 }
0x19ce   :  { %2778 = vrot.lane.b32.xlu0 %v2776_v40, %s8032_s19 }
0x19cf   :  { %v3235_v0 = vpop.permute.xlu0 %3234 }
0x19d0   :  { %v8947_v35 = vadd.f32 %v3235_v0, %v3227_v37 }
0x19d2   :  { %7700 = vtanh.f32 %v8947_v35  ;;  %2120 = vrot.lane.b32.xlu0 %v8708_v16, %s8034_s29 }
0x19d3   :  { %v2769_v13 = vpop.permute.xlu0 %2768 }
0x19d4   :  { %v2771_v24 = vmul.f32 %v8941_v7, %v2769_v13 }
0x19d6   :  { %3126 = vrot.lane.b32.xlu0 %v3121_v59, %s8030_s16  ;;  %v10157_v59 = vmov 2  }
0x19da   :  { %2130 = vrot.lane.b32.xlu0 %v2128_v26, %s8032_s19 }
0x19df   :  { %v7701_v42 = vpop.eup %7700 }
0x19e0   :  { %3240 = vrot.lane.b32.xlu0 %v7701_v42, %s8031_s18 }
0x19e4   :  { %v2904_v62 = vpop.xlane.xlu1 %2903 }
0x19e5   :  { %v2905_v48 = vsub.f32 %v2898_v45, %v2904_v62 }
0x19e7   :  { %v2906_v31 = vmul.f32 1.442695, %v2905_v48 }
0x19e9   :  { %7702 = vpow2.f32 %v2906_v31 }
0x19f6   :  { %v7703_v52 = vpop.eup %7702 }
0x19f7   :  { %2914 = vperm.xlu1 %7514, %v7703_v52   ;;  %v2908_v16 = vsel %vm2657_vm15, %v7703_v52, 0.0 }
0x19fb   :  { %7515 = vset.pattern.permute.xlu1 %v10156_v51 }
0x19fc   :  { %2919 = vperm.xlu1 %7515, %v7703_v52  }
0x19ff   :  { %2909 = vadd.xlane.f32.xlu0 %v2908_v16 }
0x1a00   :  { %7516 = vset.pattern.permute.xlu1 %v10157_v59 }
0x1a01   :  { %2925 = vperm.xlu1 %7516, %v7703_v52  }
0x1a05   :  { %7517 = vset.pattern.permute.xlu1 %v10156_v51 }
0x1a40   :  { %v2779_v22 = vpop.permute.xlu0 %2778 }
0x1a41   :  { %v8963_v45 = vadd.f32 %v2779_v22, %v2771_v24 }
0x1a43   :  { %7704 = vtanh.f32 %v8963_v45 }
0x1a44   :  { %v2121_v19 = vpop.permute.xlu0 %2120 }
0x1a45   :  { %v2123_v50 = vmul.f32 %v8953_v46, %v2121_v19 }
0x1a48   :  { %v3127_v9 = vpop.permute.xlu0 %3126 }
0x1a49   :  { %v3129_v60 = vadd.f32 %v3127_v9, %v8781_v10  ;;  %v3218_v10 = vld [vmem:[#allocation2 + $0x48] sm:$0x3] }
0x1a4b   :  { %7706 = vtanh.f32 %v3129_v60 }
0x1a4c   :  { %v2131_v34 = vpop.permute.xlu0 %2130 }
0x1a4d   :  { %v8968_v40 = vadd.f32 %v2131_v34, %v2123_v50 }
0x1a4f   :  { %10158 = vst [vmem:[#allocation21_spill] sm:$0xff] %v8968_v40  ;;  %2319 = vrot.lane.b32.xlu0 %v8968_v40, %s8039_s10 }
0x1a50   :  { %v7705_v37 = vpop.eup %7704 }
0x1a51   :  { %2784 = vrot.lane.b32.xlu1 %v7705_v37, %s8039_s10 }
0x1a52   :  { %v3241_v56 = vpop.permute.xlu0 %3240 }
0x1a53   :  { %v3243_v26 = vmul.f32 %v8933_v49, %v3241_v56 }
0x1a58   :  { %v7707_v0 = vpop.eup %7706 }
0x1a59   :  { %3132 = vrot.lane.b32.xlu1 %v7707_v0, %s8035_s8 }
0x1a5d   :  { %3245 = vrot.lane.b32.xlu1 %v3243_v26, %s8033_s22 }
0x1a72   :  { %v2915_v42 = vpop.permute.xlu1 %2914 }
0x1a73   :  { %v2917_v16 = vmul.f32 %v2915_v42, %v8494_v6 }
0x1a77   :  { %v2920_v48 = vpop.permute.xlu1 %2919 }
0x1a78   :  { %v2922_v31 = vmul.f32 %v2920_v48, %v8704_v57 }
0x1a7a   :  { %v2923_v22 = vadd.f32 %v2922_v31, %v2917_v16  ;;  %v9024_v16 = vld [vmem:[#allocation3 + $0x123] ss:$0 sm:$0xff] }
0x1a7c   :  { %v2926_v52 = vpop.permute.xlu1 %2925 }
0x1a88   :  { %v2910_v62 = vpop.xlane.xlu0 %2909 }
0x1a89   :  { %7708 = vrcp.f32 %v2910_v62 }
0x1a96   :  { %v7709_v60 = vpop.eup %7708 }
0x1ac1   :  { %v2320_v13 = vpop.permute.xlu0 %2319 }
0x1ac2   :  { %v8980_v24 = vsel %vm560_vm12, %v8717_v47, %v2320_v13 }
0x1ac3   :  { %v2928_v19 = vmul.f32 %v2926_v52, %v8980_v24  ;;  %v2785_v49 = vpop.permute.xlu1 %2784 }
0x1ac4   :  { %v2787_v34 = vmul.f32 %v8941_v7, %v2785_v49 }
0x1ac5   :  { %v2929_v9 = vadd.f32 %v2928_v19, %v2923_v22 }
0x1ac7   :  { %v8983_v50 = vmul.f32 %v7709_v60, %v2929_v9 }
0x1ac9   :  { %v2931_v37 = vsel %vm560_vm12, %v8983_v50, %v2787_v34 }
0x1aca   :  { %7180 = vmatmul.mubr.msk.f32.vlgmr.msra.gmra.mxu0 %vm161_vm2, %v2931_v37  ;;  %v9049_v37 = vld [vmem:[#allocation3 + $0x178] sm:$0xff] }
0x1acb   :  { %7194 = vmatpush3.msra.mxu0 %v8363_v30  ;;  %7197 = vmatprep.mubr.msk.f32.mxu0 %vm8037_vm6, %v10150_v12  ;;  %v8993_v47 = vpop.permute.xlu1 %3132 }
0x1acc   :  { %7195 = vmatprep.subr.mxu0 %v10150_v12 }
0x1acd   :  { %7196 = vmatpush3.msra.mxu0 %v8378_v54 }
0x1ace   :  { %3273 = vmatprep.subr.mxu0 %v8720_v2  ;;  %7198 = vmatmul.mubr.msk.f32.vlgmr.msra.gmra.mxu0 %vm560_vm12, %v8993_v47 }
0x1acf   :  { %3274 = vmatpush1.msra.mxu0 %v8725_v38  ;;  %3313 = vmatprep.mubr.f32.mxu0 %v10150_v12  ;;  %v3246_v7 = vpop.permute.xlu1 %3245 }
0x1ad0   :  { %3275 = vmatprep.subr.mxu0 %v8729_v5 }
0x1ad1   :  { %3276 = vmatpush1.msra.mxu0 %v8732_v33 }
0x1ad2   :  { %3277 = vmatprep.subr.mxu0 %v8735_v8 }
0x1ad3   :  { %3278 = vmatpush1.msra.mxu0 %v8738_v39 }
0x1ad4   :  { %3279 = vmatprep.subr.mxu0 %v8741_v55 }
0x1ad5   :  { %3280 = vmatpush1.msra.mxu0 %v8744_v29 }
0x1ad6   :  { %6755 = vmatmul.mubr.msk.f32.vlgmr.msra.gmra.mxu0 %vm161_vm2, %v3246_v7  ;;  %7200 = vmatprep.subr.mxu0 %v10150_v12 }
0x1ad7   :  { %7216 = vmatprep.mubr.msk.f32.mxu0 %vm8037_vm6, %v10150_v12 }
0x1b8a   :  { %v9011_v2 = vpop.f32.mrf.mxu0 }
0x1b8c   :  { %v7181_v38 = vpop.f32.mrf.mxu0 }
0x1b8e   :  { %v3202_v5 = vpop.f32.mrf.mxu0 }
0x1b8f   :  { %v9027_v13 = vadd.f32 %v9024_v16, %v3202_v5 }
0x1b90   :  { %v7199_v33 = vpop.f32.mrf.mxu0 }
0x1b91   :  { %10159 = vst [vmem:[#allocation22_spill] sm:$0xff] %v9027_v13 }
0x1b96   :  { %v3315_v8 = vpop.f32.mrf.mxu0 }
0x1b97   :  { %v3320_v39 = vadd.f32 %v3315_v8, %v8776_v3 }
0x1b99   :  { %v3321_v55 = vadd.f32 %v8754_v27, %v3320_v39 }
0x1b9b   :  { %7710 = vtanh.f32 %v3321_v55  ;;  %v6756_v29 = vmul.f32 -1.442695, %v3321_v55 }
0x1b9d   :  { %7712 = vpow2.f32 %v6756_v29 }
0x1ba8   :  { %v7711_v0 = vpop.eup %7710 }
0x1ba9   :  { %3331 = vrot.lane.b32.xlu1 %v7711_v0, %s8031_s18 }
0x1baa   :  { %v7713_v56 = vpop.eup %7712 }
0x1bab   :  { %v3325_v26 = vadd.f32 1.0, %v7713_v56 }
0x1bad   :  { %7714 = vrcp.f32 %v3325_v26 }
0x1bba   :  { %v7715_v42 = vpop.eup %7714 }
0x1bbb   :  { %v3329_v31 = vmul.f32 %v7715_v42, %v8760_v25 }
0x1c1b   :  { %v3332_v62 = vpop.permute.xlu1 %3331 }
0x1c1c   :  { %v3334_v48 = vmul.f32 %v7715_v42, %v3332_v62 }
0x1c1e   :  { %3336 = vrot.lane.b32.xlu1 %v3334_v48, %s8033_s22 }
0x1c90   :  { %v3337_v52 = vpop.permute.xlu1 %3336 }
0x1c91   :  { %v9018_v3 = vadd.f32 %v3337_v52, %v3329_v31 }
0x1c93   :  { %7716 = vtanh.f32 %v9018_v3 }
0x1ca0   :  { %v7717_v27 = vpop.eup %7716 }
0x1ca1   :  { %3342 = vrot.lane.b32.xlu0 %v7717_v27, %s8031_s18 }
0x1ca5   :  { %3424 = vrot.lane.b32.xlu0 %v8929_v32, %s8038_s0  ;;  %v9037_v32 = vld [vmem:[#allocation3 + $0xc0] sm:$0xff] }
0x1ca9   :  { %3429 = vrot.lane.b32.xlu0 %v9027_v13, %s8027_s13 }
0x1d13   :  { %v3343_v25 = vpop.permute.xlu0 %3342 }
0x1d14   :  { %v3345_v22 = vmul.f32 %v7715_v42, %v3343_v25 }
0x1d16   :  { %3347 = vrot.lane.b32.xlu1 %v3345_v22, %s8033_s22  ;;  %v10167_v22 = vld [vmem:[#allocation7_spill] sm:$0xff] }
0x1d17   :  { %v3425_v34 = vpop.permute.xlu0 %3424 }
0x1d1b   :  { %v3430_v7 = vpop.permute.xlu0 %3429 }
0x1d1c   :  { %v3432_v56 = vsel %vm2583_vm14, %v8822_v20, %v3430_v7 }
0x1d88   :  { %v3348_v19 = vpop.permute.xlu1 %3347 }
0x1d89   :  { %6757 = vmatmul.mubr.msk.f32.vlgmr.msra.gmra.mxu1 %vm161_vm2, %v3348_v19  ;;  %v10168_v19 = vld [vmem:[#allocation11_spill] sm:$0xff] }
0x1d8a   :  { %7220 = vmatpush3.msra.mxu1 %v8768_v1  ;;  %7223 = vmatprep.mubr.msk.f32.mxu1 %vm8037_vm6, %v10150_v12 }
0x1d8b   :  { %7221 = vmatprep.subr.mxu1 %v10150_v12 }
0x1d8c   :  { %7222 = vmatpush3.msra.mxu1 %v9037_v32 }
0x1d8d   :  { %7226 = vmatprep.subr.mxu1 %v10150_v12 }
0x1e49   :  { %v9041_v49 = vpop.f32.mrf.mxu1 }
0x1e4b   :  { %v3419_v9 = vpop.f32.mrf.mxu1 }
0x1e4c   :  { %v9044_v60 = vadd.f32 %v8778_v61, %v3419_v9  ;;  %v9057_v61 = vld [vmem:[#allocation3 + $0x148] sm:$0xff]  ;;  %v10169_v9 = vld [vmem:[#allocation12_spill] sm:$0xff] }
0x1e4e   :  { %10160 = vst [vmem:[#allocation23_spill] sm:$0xff] %v9044_v60  ;;  %v3427_v1 = vadd.f32 %v3425_v34, %v9044_v60  ;;  %v3317_v34 = vpop.f32.mrf.mxu0 }
0x1e50   :  { %3437 = vrot.lane.b32.xlu0 %v3427_v1, %s8040_s11  ;;  %3434 = vrot.lane.b32.xlu1 %v3427_v1, %s8041_s12 }
0x1e54   :  { %3440 = vrot.lane.b32.xlu1 %v3427_v1, %s8044_s15  ;;  %3481 = vrot.lane.b32.xlu0 %v9049_v37, %s8040_s11 }
0x1e58   :  { %3443 = vrot.lane.b32.xlu1 %v3427_v1, %s8030_s16  ;;  %3477 = vrot.lane.b32.xlu0 %v8794_v44, %s8040_s11 }
0x1e5c   :  { %3479 = vrot.lane.b32.xlu1 %v9057_v61, %s8040_s11  ;;  %3473 = vrot.lane.b32.xlu0 %v8802_v41, %s8040_s11 }
0x1e60   :  { %3475 = vrot.lane.b32.xlu1 %v8792_v21, %s8040_s11  ;;  %3469 = vrot.lane.b32.xlu0 %v8810_v63, %s8040_s11 }
0x1e64   :  { %3471 = vrot.lane.b32.xlu1 %v8800_v28, %s8040_s11 }
0x1e68   :  { %3467 = vrot.lane.b32.xlu1 %v8808_v14, %s8040_s11 }
0x1e6c   :  { %3702 = vrot.lane.b32.xlu1 %v9011_v2, %s8035_s8 }
0x1ec2   :  { %v3435_v38 = vpop.permute.xlu1 %3434  ;;  %v3438_v5 = vpop.permute.xlu0 %3437 }
0x1ec3   :  { %v3446_v39 = vsel %vm560_vm12, %v3435_v38, %v3438_v5 }
0x1ec6   :  { %v3441_v33 = vpop.permute.xlu1 %3440  ;;  %v9073_v8 = vpop.permute.xlu0 %3481 }
0x1ec7   :  { %7201 = vmatpush3.msra.mxu0 %v9073_v8  ;;  %v3447_v55 = vsel %vm161_vm2, %v3446_v39, %v3441_v33 }
0x1ec8   :  { %7202 = vmatprep.subr.mxu0 %v10150_v12 }
0x1eca   :  { %v3444_v0 = vpop.permute.xlu1 %3443  ;;  %v9079_v29 = vpop.permute.xlu0 %3477 }
0x1ecb   :  { %10161 = vst [vmem:[#allocation24_spill] sm:$0xff] %v9079_v29  ;;  %v3448_v26 = vsel %vm2583_vm14, %v3447_v55, %v3444_v0  ;;  %v10093_v0 = vmov 3  }
0x1ecc   :  { %v3449_v42 = vadd.f32 %v3448_v26, %v3432_v56 }
0x1ece   :  { %7718 = vtanh.f32 %v3449_v42  ;;  %v9084_v62 = vpop.permute.xlu1 %3479  ;;  %v9088_v48 = vpop.permute.xlu0 %3473 }
0x1ecf   :  { %7203 = vmatpush3.msra.mxu0 %v9084_v62  ;;  %10162 = vst [vmem:[#allocation25_spill] sm:$0xff] %v9088_v48 }
0x1ed0   :  { %7204 = vmatprep.subr.mxu0 %v10150_v12 }
0x1ed1   :  { %7205 = vmatpush3.msra.mxu0 %v9079_v29 }
0x1ed2   :  { %v9091_v31 = vpop.permute.xlu1 %3475  ;;  %7206 = vmatprep.subr.mxu0 %v10150_v12  ;;  %v9100_v52 = vpop.permute.xlu0 %3469 }
0x1ed3   :  { %10163 = vst [vmem:[#allocation26_spill] sm:$0xff] %v9091_v31  ;;  %7207 = vmatpush3.msra.mxu0 %v9091_v31  ;;  %10165 = vst [vmem:[#allocation28_spill] sm:$0xff] %v9100_v52 }
0x1ed4   :  { %7208 = vmatprep.subr.mxu0 %v10150_v12 }
0x1ed5   :  { %7209 = vmatpush3.msra.mxu0 %v9088_v48 }
0x1ed6   :  { %v9097_v20 = vpop.permute.xlu1 %3471  ;;  %7210 = vmatprep.subr.mxu0 %v10150_v12 }
0x1ed7   :  { %10164 = vst [vmem:[#allocation27_spill] sm:$0xff] %v9097_v20  ;;  %7211 = vmatpush3.msra.mxu0 %v9097_v20 }
0x1ed8   :  { %7212 = vmatprep.subr.mxu0 %v10150_v12 }
0x1ed9   :  { %7213 = vmatpush3.msra.mxu0 %v9100_v52 }
0x1eda   :  { %v9105_v27 = vpop.permute.xlu1 %3467  ;;  %7214 = vmatprep.subr.mxu0 %v10150_v12 }
0x1edb   :  { %10166 = vst [vmem:[#allocation29_spill] sm:$0xff] %v9105_v27  ;;  %v7719_v25 = vpop.eup %7718  ;;  %7215 = vmatpush3.msra.mxu0 %v9105_v27 }
0x1edc   :  { %7217 = vmatmul.mubr.msk.f32.vlgmr.msra.gmra.mxu0 %vm300_vm3, %v7719_v25  ;;  %7245 = vmatprep.subr.mxu0 %v10150_v12 }
0x1edd   :  { %7246 = vmatpush3.msra.mxu0 %v8300_v58  ;;  %7253 = vmatprep.mubr.msk.f32.mxu0 %vm8037_vm6, %v10150_v12 }
0x1ede   :  { %7247 = vmatprep.subr.mxu0 %v10150_v12  ;;  %v3703_v56 = vpop.permute.xlu1 %3702 }
0x1edf   :  { %7248 = vmatpush3.msra.mxu0 %v10167_v22  ;;  %v3705_v26 = vadd.f32 %v3703_v56, %v9044_v60 }
0x1ee0   :  { %7249 = vmatprep.subr.mxu0 %v10150_v12 }
0x1ee1   :  { %7250 = vmatpush3.msra.mxu0 %v10168_v19 }
0x1ee2   :  { %7251 = vmatprep.subr.mxu0 %v10150_v12 }
0x1ee3   :  { %7252 = vmatpush3.msra.mxu0 %v10169_v9 }
0x1ee4   :  { %7267 = vmatprep.subr.mxu0 %v10150_v12 }
0x1f9c   :  { %v3560_v1 = vpop.f32.mrf.mxu0 }
0x1f9d   :  { %v3565_v7 = vsel %vm3564_vm1, %v3560_v1, -inf }
0x1f9e   :  { %3566 = vmax.xlane.f32.xlu0 %v3565_v7  ;;  %v7218_v38 = vpop.f32.mrf.mxu0 }
0x2027   :  { %v3567_v5 = vpop.xlane.xlu0 %3566 }
0x2028   :  { %v3568_v33 = vsub.f32 %v3560_v1, %v3567_v5 }
0x202a   :  { %v3569_v39 = vmul.f32 1.442695, %v3568_v33 }
0x202c   :  { %7720 = vpow2.f32 %v3569_v39 }
0x202d   :  { %7722 = vtanh.f32 %v9044_v60 }
0x2039   :  { %v7721_v55 = vpop.eup %7720 }
0x203a   :  { %3582 = vperm.xlu1 %7517, %v7721_v55   ;;  %3577 = vperm.xlu0 %7512, %v7721_v55   ;;  %v7723_v42 = vpop.eup %7722 }
0x203e   :  { %7518 = vset.pattern.permute.xlu0 %v10157_v59  ;;  %7519 = vset.pattern.permute.xlu1 %v10093_v0 }
0x203f   :  { %3588 = vperm.xlu0 %7518, %v7721_v55  }
0x2043   :  { %3208 = vrot.lane.b32.xlu0 %v8963_v45, %s8039_s10  ;;  %v3571_v45 = vsel %vm3564_vm1, %v7721_v55, 0.0 }
0x2044   :  { %7523 = vset.pattern.permute.xlu0 %v10093_v0 }
0x2047   :  { %3714 = vrot.lane.b32.xlu0 %v3705_v26, %s8041_s12 }
0x204b   :  { %3706 = vrot.lane.b32.xlu0 %v9027_v13, %s8033_s22 }
0x204f   :  { %3742 = vrot.lane.b32.xlu0 %v9049_v37, %s8043_s14  ;;  %v10170_v37 = vmov 0  }
0x2053   :  { %3738 = vrot.lane.b32.xlu0 %v8794_v44, %s8043_s14  ;;  %v4146_v44 = vld [vmem:[#allocation2 + $0x50] sm:$0x3] }
0x2057   :  { %3734 = vrot.lane.b32.xlu0 %v8802_v41, %s8043_s14  ;;  %v9146_v41 = vadd.f32 %v4146_v44, %v3317_v34 }
0x2059   :  { %7724 = vtanh.f32 %v9146_v41 }
0x205b   :  { %3730 = vrot.lane.b32.xlu0 %v8810_v63, %s8043_s14  ;;  %v9150_v63 = vld [vmem:[#allocation3 + $0x124] ss:$0 sm:$0xff] }
0x205c   :  { %v9154_v25 = vadd.f32 %v9150_v63, %v9011_v2 }
0x205e   :  { %3572 = vadd.xlane.f32.xlu1 %v3571_v45  ;;  %7726 = vtanh.f32 %v9154_v25 }
0x205f   :  { %3980 = vrot.lane.b32.xlu0 %v7723_v42, %s8038_s0 }
0x206f   :  { %3594 = vperm.xlu1 %7519, %v7721_v55  }
0x2073   :  { %3711 = vrot.lane.b32.xlu1 %v3705_v26, %s8036_s9 }
0x2074   :  { %7520 = vset.pattern.permute.xlu1 %v10170_v37 }
0x2077   :  { %3717 = vrot.lane.b32.xlu1 %v3705_v26, %s8040_s11 }
0x207b   :  { %3720 = vrot.lane.b32.xlu1 %v3705_v26, %s8044_s15 }
0x207f   :  { %3740 = vrot.lane.b32.xlu1 %v9057_v61, %s8043_s14  ;;  %v7725_v61 = vpop.eup %7724 }
0x2080   :  { %v7727_v34 = vpop.eup %7726 }
0x2083   :  { %3736 = vrot.lane.b32.xlu1 %v8792_v21, %s8043_s14 }
0x2087   :  { %3732 = vrot.lane.b32.xlu1 %v8800_v28, %s8043_s14 }
0x208b   :  { %3728 = vrot.lane.b32.xlu1 %v8808_v14, %s8043_s14 }
0x208f   :  { %4158 = vrot.lane.b32.xlu1 %v7725_v61, %s8031_s18 }
0x2093   :  { %3019 = vrot.lane.b32.xlu1 %v7727_v34, %s8034_s29 }
0x20b5   :  { %v3578_v2 = vpop.permute.xlu0 %3577  ;;  %v3583_v38 = vpop.permute.xlu1 %3582 }
0x20b6   :  { %v3585_v39 = vmul.f32 %v3583_v38, %v8626_v23  ;;  %v3580_v28 = vmul.f32 %v3578_v2, %v8409_v43 }
0x20b8   :  { %v3586_v45 = vadd.f32 %v3585_v39, %v3580_v28 }
0x20ba   :  { %v3589_v1 = vpop.permute.xlu0 %3588 }
0x20bb   :  { %v3591_v14 = vmul.f32 %v3589_v1, %v8880_v11 }
0x20bd   :  { %v3592_v44 = vadd.f32 %v3591_v14, %v3586_v45 }
0x20be   :  { %v3209_v7 = vpop.permute.xlu0 %3208 }
0x20bf   :  { %v9173_v56 = vsel %vm560_vm12, %v8993_v47, %v3209_v7 }
0x20c0   :  { %10171 = vst [vmem:[#allocation7_spill] sm:$0xff] %v9173_v56 }
0x20c2   :  { %v3715_v5 = vpop.permute.xlu0 %3714 }
0x20c6   :  { %v9168_v55 = vpop.permute.xlu0 %3706 }
0x20c7   :  { %v3709_v7 = vsel %vm2583_vm14, %v8893_v4, %v9168_v55 }
0x20ca   :  { %v9176_v61 = vpop.permute.xlu0 %3742 }
0x20e7   :  { %v3573_v21 = vpop.xlane.xlu1 %3572 }
0x20e8   :  { %7728 = vrcp.f32 %v3573_v21 }
0x20eb   :  { %v3595_v33 = vpop.permute.xlu1 %3594 }
0x20ec   :  { %v3597_v42 = vmul.f32 %v3595_v33, %v9173_v56  ;;  %v9188_v33 = vpop.permute.xlu0 %3738 }
0x20ee   :  { %v3598_v21 = vadd.f32 %v3597_v42, %v3592_v44 }
0x20ef   :  { %v3712_v26 = vpop.permute.xlu1 %3711 }
0x20f0   :  { %v3723_v43 = vsel %vm560_vm12, %v3712_v26, %v3715_v5  ;;  %v9199_v4 = vpop.permute.xlu0 %3734 }
0x20f3   :  { %v3718_v34 = vpop.permute.xlu1 %3717 }
0x20f4   :  { %v3724_v2 = vsel %vm161_vm2, %v3723_v43, %v3718_v34  ;;  %v9211_v45 = vpop.permute.xlu0 %3730  ;;  %v9238_v43 = vld [vmem:[#allocation3 + $0x78] sm:$0xff] }
0x20f5   :  { %v7729_v38 = vpop.eup %7728  ;;  %10174 = vst [vmem:[#allocation32_spill] sm:$0xff] %v9238_v43 }
0x20f6   :  { %v9178_v0 = vmul.f32 %v7729_v38, %v3598_v21  ;;  %v9231_v21 = vld [vmem:[#allocation3 + $0xa8] sm:$0xff]  ;;  %v9234_v38 = vld [vmem:[#allocation3 + $0xa0] sm:$0xff] }
0x20f7   :  { %v3721_v1 = vpop.permute.xlu1 %3720  ;;  %10172 = vst [vmem:[#allocation30_spill] sm:$0xff] %v9231_v21  ;;  %10173 = vst [vmem:[#allocation31_spill] sm:$0xff] %v9234_v38 }
0x20f8   :  { %v3725_v39 = vsel %vm2583_vm14, %v3724_v2, %v3721_v1  ;;  %7224 = vmatmul.mubr.msk.f32.vlgmr.msra.gmra.mxu1 %vm560_vm12, %v9178_v0  ;;  %v3981_v34 = vpop.permute.xlu0 %3980  ;;  %v9241_v2 = vld [vmem:[#allocation3 + $0x70] sm:$0xff]  ;;  %v9244_v1 = vld [vmem:[#allocation3 + $0x48] sm:$0xff] }
0x20f9   :  { %v3726_v28 = vadd.f32 %v3725_v39, %v3709_v7  ;;  %7227 = vmatpush3.msra.mxu1 %v9176_v61  ;;  %7242 = vmatprep.mubr.msk.f32.mxu1 %vm8037_vm6, %v10150_v12  ;;  %10175 = vst [vmem:[#allocation33_spill] sm:$0xff] %v9241_v2  ;;  %10176 = vst [vmem:[#allocation34_spill] sm:$0xff] %v9244_v1  ;;  %v9247_v7 = vld [vmem:[#allocation3 + $0x40] sm:$0xff]  ;;  %v9250_v39 = vld [vmem:[#allocation3 + $0x18] sm:$0xff] }
0x20fa   :  { %7228 = vmatprep.subr.mxu1 %v10150_v12  ;;  %10177 = vst [vmem:[#allocation35_spill] sm:$0xff] %v9247_v7  ;;  %10178 = vst [vmem:[#allocation36_spill] sm:$0xff] %v9250_v39 }
0x20fb   :  { %7730 = vtanh.f32 %v3726_v28  ;;  %v9194_v5 = vpop.permute.xlu1 %3740  ;;  %v9253_v28 = vld [vmem:[#allocation3 + $0x10] sm:$0xff] }
0x20fc   :  { %7229 = vmatpush3.msra.mxu1 %v9194_v5  ;;  %10179 = vst [vmem:[#allocation37_spill] sm:$0xff] %v9253_v28 }
0x20fd   :  { %7230 = vmatprep.subr.mxu1 %v10150_v12 }
0x20fe   :  { %7231 = vmatpush3.msra.mxu1 %v9188_v33 }
0x20ff   :  { %7232 = vmatprep.subr.mxu1 %v10150_v12  ;;  %v9202_v14 = vpop.permute.xlu1 %3736 }
0x2100   :  { %7233 = vmatpush3.msra.mxu1 %v9202_v14 }
0x2101   :  { %7234 = vmatprep.subr.mxu1 %v10150_v12 }
0x2102   :  { %7235 = vmatpush3.msra.mxu1 %v9199_v4 }
0x2103   :  { %7236 = vmatprep.subr.mxu1 %v10150_v12  ;;  %v9208_v26 = vpop.permute.xlu1 %3732 }
0x2104   :  { %7237 = vmatpush3.msra.mxu1 %v9208_v26 }
0x2105   :  { %7238 = vmatprep.subr.mxu1 %v10150_v12 }
0x2106   :  { %7239 = vmatpush3.msra.mxu1 %v9211_v45 }
0x2107   :  { %7240 = vmatprep.subr.mxu1 %v10150_v12  ;;  %v9216_v42 = vpop.permute.xlu1 %3728 }
0x2108   :  { %v7731_v44 = vpop.eup %7730  ;;  %7241 = vmatpush3.msra.mxu1 %v9216_v42 }
0x2109   :  { %7243 = vmatmul.mubr.msk.f32.vlgmr.msra.gmra.mxu1 %vm300_vm3, %v7731_v44  ;;  %7256 = vmatprep.subr.mxu1 %v10150_v12  ;;  %v6767_v44 = vmul.f32 -1.442695, %v9146_v41 }
0x210a   :  { %7257 = vmatpush3.msra.mxu1 %v8308_v36  ;;  %7264 = vmatprep.mubr.msk.f32.mxu1 %vm8037_vm6, %v10150_v12 }
0x210b   :  { %7258 = vmatprep.subr.mxu1 %v10150_v12  ;;  %7732 = vpow2.f32 %v6767_v44 }
0x210c   :  { %7259 = vmatpush3.msra.mxu1 %v8315_v15 }
0x210d   :  { %7260 = vmatprep.subr.mxu1 %v10150_v12 }
0x210e   :  { %7261 = vmatpush3.msra.mxu1 %v8317_v17 }
0x210f   :  { %7262 = vmatprep.subr.mxu1 %v10150_v12 }
0x2110   :  { %7263 = vmatpush3.msra.mxu1 %v8323_v18 }
0x2111   :  { %7265 = vmatmul.mubr.msk.f32.vlgmr.msra.gmra.mxu1 %vm161_vm2, %v3981_v34  ;;  %4304 = vmatprep.subr.mxu1 %v9231_v21 }
0x2112   :  { %4305 = vmatpush1.msra.mxu1 %v9234_v38  ;;  %4344 = vmatprep.mubr.f32.mxu1 %v10150_v12 }
0x2113   :  { %4306 = vmatprep.subr.mxu1 %v9238_v43 }
0x2114   :  { %4307 = vmatpush1.msra.mxu1 %v9241_v2  ;;  %v4159_v2 = vpop.permute.xlu1 %4158 }
0x2115   :  { %4308 = vmatprep.subr.mxu1 %v9244_v1 }
0x2116   :  { %4309 = vmatpush1.msra.mxu1 %v9247_v7 }
0x2117   :  { %4310 = vmatprep.subr.mxu1 %v9250_v39 }
0x2118   :  { %4311 = vmatpush1.msra.mxu1 %v9253_v28  ;;  %v7733_v34 = vpop.eup %7732 }
0x2119   :  { %7293 = vmatprep.subr.mxu1 %v10150_v12  ;;  %v4152_v40 = vadd.f32 1.0, %v7733_v34 }
0x21b8   :  { %v9258_v46 = vpop.f32.mrf.mxu1 }
0x21b9   :  { %v3673_v7 = vadd.f32 %v9258_v46, %v3218_v10 }
0x21ba   :  { %v7225_v1 = vpop.f32.mrf.mxu1 }
0x21bb   :  { %7734 = vtanh.f32 %v3673_v7  ;;  %v6750_v1 = vmul.f32 -1.442695, %v9154_v25  ;;  %v3020_v25 = vpop.permute.xlu1 %3019 }
0x21bc   :  { %7736 = vrcp.f32 %v4152_v40  ;;  %v6760_v40 = vmul.f32 -1.442695, %v3673_v7 }
0x21be   :  { %7738 = vpow2.f32 %v6760_v40 }
0x21bf   :  { %7740 = vpow2.f32 %v6750_v1 }
0x21c8   :  { %v7735_v39 = vpop.eup %7734 }
0x21c9   :  { %3686 = vrot.lane.b32.xlu0 %v7735_v39, %s8034_s29  ;;  %v3821_v28 = vpop.f32.mrf.mxu1  ;;  %v9262_v43 = vpop.eup %7736 }
0x21ca   :  { %v3825_v41 = vsel %vm3564_vm1, %v3821_v28, -inf  ;;  %v4161_v44 = vmul.f32 %v9262_v43, %v4159_v2 }
0x21cb   :  { %3826 = vmax.xlane.f32.xlu1 %v3825_v41  ;;  %v7244_v38 = vpop.f32.mrf.mxu1  ;;  %v7739_v39 = vpop.eup %7738 }
0x21cc   :  { %v3677_v21 = vadd.f32 1.0, %v7739_v39  ;;  %v7741_v2 = vpop.eup %7740 }
0x21cd   :  { %4163 = vrot.lane.b32.xlu0 %v4161_v44, %s8033_s22  ;;  %v3009_v38 = vadd.f32 1.0, %v7741_v2 }
0x21ce   :  { %7742 = vrcp.f32 %v3677_v21 }
0x21cf   :  { %7744 = vrcp.f32 %v3009_v38 }
0x21d1   :  { %v4050_v34 = vpop.f32.mrf.mxu1  ;;  %3681 = vrot.lane.b32.xlu0 %v9178_v0, %s8034_s29 }
0x21d3   :  { %v7266_v10 = vpop.f32.mrf.mxu1 }
0x21d5   :  { %3014 = vrot.lane.b32.xlu0 %v8983_v50, %s8034_s29  ;;  %v4156_v50 = vmul.f32 %v9262_v43, %v8947_v35 }
0x21db   :  { %v9272_v41 = vpop.eup %7742 }
0x21dc   :  { %v9282_v21 = vpop.eup %7744 }
0x21dd   :  { %10181 = vst [vmem:[#allocation39_spill] sm:$0xff] %v9282_v21  ;;  %v3022_v40 = vmul.f32 %v9282_v21, %v3020_v25 }
0x223b   :  { %v3687_v44 = vpop.permute.xlu0 %3686 }
0x223c   :  { %v3689_v0 = vmul.f32 %v9272_v41, %v3687_v44 }
0x223e   :  { %3691 = vrot.lane.b32.xlu0 %v3689_v0, %s8032_s19 }
0x223f   :  { %v4164_v7 = vpop.permute.xlu0 %4163 }
0x2240   :  { %v9278_v10 = vadd.f32 %v4164_v7, %v4156_v50 }
0x2242   :  { %10180 = vst [vmem:[#allocation38_spill] sm:$0xff] %v9278_v10  ;;  %7746 = vtanh.f32 %v9278_v10  ;;  %4055 = vrot.lane.b32.xlu0 %v4050_v34, %s8030_s16 }
0x2243   :  { %v3682_v44 = vpop.permute.xlu0 %3681 }
0x2244   :  { %v3684_v0 = vmul.f32 %v9272_v41, %v3682_v44 }
0x2246   :  { %3024 = vrot.lane.b32.xlu0 %v3022_v40, %s8032_s19 }
0x224f   :  { %v7747_v1 = vpop.eup %7746 }
0x2250   :  { %4169 = vrot.lane.b32.xlu0 %v7747_v1, %s8031_s18 }
0x2254   :  { %v3827_v39 = vpop.xlane.xlu1 %3826 }
0x2255   :  { %v3828_v2 = vsub.f32 %v3821_v28, %v3827_v39  ;;  %v3015_v28 = vpop.permute.xlu0 %3014 }
0x2256   :  { %v3017_v1 = vmul.f32 %v9282_v21, %v3015_v28 }
0x2257   :  { %v3829_v35 = vmul.f32 1.442695, %v3828_v2 }
0x2259   :  { %7748 = vpow2.f32 %v3829_v35 }
0x2266   :  { %v7749_v38 = vpop.eup %7748 }
0x2267   :  { %3837 = vperm.xlu1 %7520, %v7749_v38   ;;  %v3831_v34 = vsel %vm3564_vm1, %v7749_v38, 0.0 }
0x226b   :  { %7521 = vset.pattern.permute.xlu1 %v10156_v51 }
0x226c   :  { %3842 = vperm.xlu1 %7521, %v7749_v38  }
0x226f   :  { %3832 = vadd.xlane.f32.xlu0 %v3831_v34 }
0x2270   :  { %7522 = vset.pattern.permute.xlu1 %v10157_v59 }
0x2271   :  { %3848 = vperm.xlu1 %7522, %v7749_v38  }
0x2275   :  { %7524 = vset.pattern.permute.xlu1 %v10170_v37 }
0x2285   :  { %3854 = vperm.xlu0 %7523, %v7749_v38  }
0x2289   :  { %7525 = vset.pattern.permute.xlu0 %v10156_v51 }
0x22b0   :  { %v3692_v50 = vpop.permute.xlu0 %3691 }
0x22b1   :  { %v9293_v7 = vadd.f32 %v3692_v50, %v3684_v0 }
0x22b3   :  { %7750 = vtanh.f32 %v9293_v7 }
0x22b4   :  { %v4056_v25 = vpop.permute.xlu0 %4055 }
0x22b5   :  { %v4058_v40 = vadd.f32 %v4056_v25, %v9044_v60 }
0x22b7   :  { %7752 = vtanh.f32 %v4058_v40 }
0x22b8   :  { %v3025_v39 = vpop.permute.xlu0 %3024 }
0x22b9   :  { %v9298_v2 = vadd.f32 %v3025_v39, %v3017_v1 }
0x22bb   :  { %10182 = vst [vmem:[#allocation40_spill] sm:$0xff] %v9298_v2  ;;  %3213 = vrot.lane.b32.xlu1 %v9298_v2, %s8039_s10 }
0x22c0   :  { %v7751_v35 = vpop.eup %7750 }
0x22c1   :  { %3697 = vrot.lane.b32.xlu1 %v7751_v35, %s8039_s10 }
0x22c2   :  { %v4170_v34 = vpop.permute.xlu0 %4169 }
0x22c3   :  { %v4172_v44 = vmul.f32 %v9262_v43, %v4170_v34 }
0x22c4   :  { %v7753_v38 = vpop.eup %7752 }
0x22c5   :  { %4061 = vrot.lane.b32.xlu1 %v7753_v38, %s8035_s8 }
0x22c9   :  { %4174 = vrot.lane.b32.xlu1 %v4172_v44, %s8033_s22 }
0x22e2   :  { %v3838_v0 = vpop.permute.xlu1 %3837 }
0x22e3   :  { %v3840_v1 = vmul.f32 %v3838_v0, %v8494_v6  ;;  %v9345_v0 = vld [vmem:[#allocation3 + $0x30] sm:$0xff] }
0x22e7   :  { %v3843_v28 = vpop.permute.xlu1 %3842 }
0x22e8   :  { %v3845_v40 = vmul.f32 %v3843_v28, %v8704_v57 }
0x22ea   :  { %v3846_v35 = vadd.f32 %v3845_v40, %v3840_v1  ;;  %v9351_v1 = vld [vmem:[#allocation3] sm:$0xff] }
0x22ec   :  { %v3849_v25 = vpop.permute.xlu1 %3848 }
0x22ed   :  { %v3851_v39 = vmul.f32 %v3849_v25, %v8980_v24  ;;  %v9348_v25 = vld [vmem:[#allocation3 + $0x8] sm:$0xff] }
0x22ef   :  { %v3852_v43 = vadd.f32 %v3851_v39, %v3846_v35 }
0x22f8   :  { %v3833_v50 = vpop.xlane.xlu0 %3832 }
0x22f9   :  { %7754 = vrcp.f32 %v3833_v50 }
0x2300   :  { %v3855_v21 = vpop.permute.xlu0 %3854 }
0x2306   :  { %v7755_v2 = vpop.eup %7754 }
0x232d   :  { %v3214_v60 = vpop.permute.xlu1 %3213 }
0x232e   :  { %v9311_v38 = vsel %vm560_vm12, %v8993_v47, %v3214_v60  ;;  %v9327_v60 = vld [vmem:[#allocation3 + $0x98] sm:$0xff] }
0x232f   :  { %v3857_v34 = vmul.f32 %v3855_v21, %v9311_v38  ;;  %v9339_v21 = vld [vmem:[#allocation3 + $0x60] sm:$0xff] }
0x2331   :  { %v3858_v44 = vadd.f32 %v3857_v34, %v3852_v43 }
0x2333   :  { %v9314_v50 = vmul.f32 %v7755_v2, %v3858_v44  ;;  %v3698_v10 = vpop.permute.xlu1 %3697  ;;  %v9342_v2 = vld [vmem:[#allocation3 + $0x38] sm:$0xff] }
0x2334   :  { %v3700_v28 = vmul.f32 %v9272_v41, %v3698_v10  ;;  %v9332_v41 = vld [vmem:[#allocation3 + $0x90] sm:$0xff]  ;;  %v9336_v10 = vld [vmem:[#allocation3 + $0x68] sm:$0xff] }
0x2336   :  { %v3860_v6 = vsel %vm560_vm12, %v9314_v50, %v3700_v28 }
0x2337   :  { %7254 = vmatmul.mubr.msk.f32.vlgmr.msra.gmra.mxu0 %vm161_vm2, %v3860_v6  ;;  %v9324_v47 = vpop.permute.xlu1 %4061  ;;  %v9377_v6 = vld [vmem:[#allocation3 + $0x121] ss:$0 sm:$0xff] }
0x2338   :  { %7268 = vmatpush3.msra.mxu0 %v8363_v30  ;;  %7271 = vmatprep.mubr.msk.f32.mxu0 %vm8037_vm6, %v10150_v12 }
0x2339   :  { %7269 = vmatprep.subr.mxu0 %v10150_v12 }
0x233a   :  { %7270 = vmatpush3.msra.mxu0 %v8378_v54 }
0x233b   :  { %4202 = vmatprep.subr.mxu0 %v9327_v60  ;;  %7272 = vmatmul.mubr.msk.f32.vlgmr.msra.gmra.mxu0 %vm560_vm12, %v9324_v47  ;;  %v4175_v40 = vpop.permute.xlu1 %4174 }
0x233c   :  { %4203 = vmatpush1.msra.mxu0 %v9332_v41  ;;  %4242 = vmatprep.mubr.f32.mxu0 %v10150_v12 }
0x233d   :  { %4204 = vmatprep.subr.mxu0 %v9336_v10 }
0x233e   :  { %4205 = vmatpush1.msra.mxu0 %v9339_v21 }
0x233f   :  { %4206 = vmatprep.subr.mxu0 %v9342_v2 }
0x2340   :  { %4207 = vmatpush1.msra.mxu0 %v9345_v0 }
0x2341   :  { %4208 = vmatprep.subr.mxu0 %v9348_v25 }
0x2342   :  { %4209 = vmatpush1.msra.mxu0 %v9351_v1 }
0x2343   :  { %6768 = vmatmul.mubr.msk.f32.vlgmr.msra.gmra.mxu0 %vm161_vm2, %v4175_v40  ;;  %7274 = vmatprep.subr.mxu0 %v10150_v12 }
0x2344   :  { %7275 = vmatpush3.msra.mxu0 %v9073_v8  ;;  %7290 = vmatprep.mubr.msk.f32.mxu0 %vm8037_vm6, %v10150_v12 }
0x2345   :  { %7276 = vmatprep.subr.mxu0 %v10150_v12 }
0x2346   :  { %7277 = vmatpush3.msra.mxu0 %v9084_v62 }
0x2347   :  { %7278 = vmatprep.subr.mxu0 %v10150_v12 }
0x2348   :  { %7279 = vmatpush3.msra.mxu0 %v9079_v29 }
0x2349   :  { %7280 = vmatprep.subr.mxu0 %v10150_v12 }
0x234a   :  { %7281 = vmatpush3.msra.mxu0 %v9091_v31 }
0x234b   :  { %7282 = vmatprep.subr.mxu0 %v10150_v12 }
0x234c   :  { %7283 = vmatpush3.msra.mxu0 %v9088_v48 }
0x234d   :  { %7284 = vmatprep.subr.mxu0 %v10150_v12 }
0x234e   :  { %7285 = vmatpush3.msra.mxu0 %v9097_v20 }
0x234f   :  { %7286 = vmatprep.subr.mxu0 %v10150_v12 }
0x2350   :  { %7287 = vmatpush3.msra.mxu0 %v9100_v52 }
0x2351   :  { %7288 = vmatprep.subr.mxu0 %v10150_v12 }
0x2352   :  { %7289 = vmatpush3.msra.mxu0 %v9105_v27 }
0x2353   :  { %7319 = vmatprep.subr.mxu0 %v10150_v12 }
0x23f7   :  { %v9374_v39 = vpop.f32.mrf.mxu0 }
0x23f9   :  { %v7255_v35 = vpop.f32.mrf.mxu0 }
0x23fb   :  { %v4131_v43 = vpop.f32.mrf.mxu0 }
0x23fd   :  { %v7273_v34 = vpop.f32.mrf.mxu0 }
0x2403   :  { %v4244_v44 = vpop.f32.mrf.mxu0 }
0x2404   :  { %v4249_v28 = vadd.f32 %v4244_v44, %v9041_v49 }
0x2406   :  { %v4250_v40 = vadd.f32 %v9377_v6, %v4249_v28 }
0x2408   :  { %7756 = vtanh.f32 %v4250_v40  ;;  %v6769_v20 = vmul.f32 -1.442695, %v4250_v40 }
0x240a   :  { %7758 = vpow2.f32 %v6769_v20 }
0x2415   :  { %v7757_v52 = vpop.eup %7756 }
0x2416   :  { %4260 = vrot.lane.b32.xlu1 %v7757_v52, %s8031_s18 }
0x2417   :  { %v7759_v27 = vpop.eup %7758 }
0x2418   :  { %v4254_v48 = vadd.f32 1.0, %v7759_v27 }
0x241a   :  { %7760 = vrcp.f32 %v4254_v48 }
0x2427   :  { %v7761_v31 = vpop.eup %7760 }
0x2428   :  { %v4258_v49 = vmul.f32 %v7761_v31, %v9018_v3 }
0x2488   :  { %v4261_v35 = vpop.permute.xlu1 %4260 }
0x2489   :  { %v4263_v29 = vmul.f32 %v7761_v31, %v4261_v35 }
0x248b   :  { %4265 = vrot.lane.b32.xlu1 %v4263_v29, %s8033_s22  ;;  %v9391_v29 = vld [vmem:[#allocation3 + $0xf0] sm:$0xff] }
0x248c   :  { %10184 = vst [vmem:[#allocation42_spill] sm:$0xff] %v9391_v29 }
0x24fd   :  { %v4266_v34 = vpop.permute.xlu1 %4265 }
0x24fe   :  { %v9383_v44 = vadd.f32 %v4266_v34, %v4258_v49 }
0x2500   :  { %10183 = vst [vmem:[#allocation41_spill] sm:$0xff] %v9383_v44  ;;  %7762 = vtanh.f32 %v9383_v44 }
0x250d   :  { %v7763_v28 = vpop.eup %7762 }
0x250e   :  { %4271 = vrot.lane.b32.xlu1 %v7763_v28, %s8031_s18 }
0x2580   :  { %v4272_v52 = vpop.permute.xlu1 %4271 }
0x2581   :  { %v4274_v20 = vmul.f32 %v7761_v31, %v4272_v52 }
0x2583   :  { %4276 = vrot.lane.b32.xlu1 %v4274_v20, %s8033_s22 }
0x2587   :  { %4353 = vrot.lane.b32.xlu1 %v9258_v46, %s8038_s0  ;;  %v9401_v46 = vld [vmem:[#allocation3 + $0x122] ss:$0 sm:$0xff] }
0x2588   :  { %10185 = vst [vmem:[#allocation43_spill] sm:$0xff] %v9401_v46 }
0x25f5   :  { %v4277_v48 = vpop.permute.xlu1 %4276 }
0x25f6   :  { %6770 = vmatmul.mubr.msk.f32.vlgmr.msra.gmra.mxu1 %vm161_vm2, %v4277_v48  ;;  %v10188_v48 = vld [vmem:[#allocation13_spill] sm:$0xff] }
0x25f7   :  { %7294 = vmatpush3.msra.mxu1 %v9391_v29  ;;  %7297 = vmatprep.mubr.msk.f32.mxu1 %vm8037_vm6, %v10150_v12 }
0x25f8   :  { %7295 = vmatprep.subr.mxu1 %v10150_v12 }
0x25f9   :  { %7296 = vmatpush3.msra.mxu1 %v9037_v32  ;;  %v4354_v40 = vpop.permute.xlu1 %4353  ;;  %v9412_v32 = vadd.f32 %v9024_v16, %v4131_v43 }
0x25fa   :  { %7300 = vmatprep.subr.mxu1 %v10150_v12 }
0x25fb   :  { %10187 = vst [vmem:[#allocation45_spill] sm:$0xff] %v9412_v32 }
0x26b6   :  { %v9399_v3 = vpop.f32.mrf.mxu1 }
0x26b8   :  { %v4348_v31 = vpop.f32.mrf.mxu1 }
0x26b9   :  { %v9404_v27 = vadd.f32 %v9401_v46, %v4348_v31  ;;  %v4361_v31 = vsel %vm560_vm12, %v10188_v48, %v8884_v53  ;;  %v4246_v53 = vpop.f32.mrf.mxu0 }
0x26ba   :  { %v4362_v16 = vsel %vm161_vm2, %v4361_v31, %v9168_v55  ;;  %v5020_v31 = vld [vmem:[#allocation2 + $0x60] sm:$0x3] }
0x26bb   :  { %10186 = vst [vmem:[#allocation44_spill] sm:$0xff] %v9404_v27  ;;  %v4356_v35 = vadd.f32 %v4354_v40, %v9404_v27 }
0x26bd   :  { %4371 = vrot.lane.b32.xlu0 %v4356_v35, %s8044_s15  ;;  %4365 = vrot.lane.b32.xlu1 %v4356_v35, %s8041_s12 }
0x26c1   :  { %4374 = vrot.lane.b32.xlu0 %v4356_v35, %s8030_s16  ;;  %4368 = vrot.lane.b32.xlu1 %v4356_v35, %s8040_s11 }
0x26c5   :  { %4592 = vrot.lane.b32.xlu0 %v9374_v39, %s8035_s8  ;;  %4358 = vrot.lane.b32.xlu1 %v9412_v32, %s8027_s13 }
0x272f   :  { %v4366_v49 = vpop.permute.xlu1 %4365  ;;  %v4372_v34 = vpop.permute.xlu0 %4371 }
0x2733   :  { %v4369_v28 = vpop.permute.xlu1 %4368  ;;  %v4375_v43 = vpop.permute.xlu0 %4374 }
0x2734   :  { %v4377_v52 = vsel %vm560_vm12, %v4366_v49, %v4369_v28 }
0x2735   :  { %v4378_v20 = vsel %vm161_vm2, %v4377_v52, %v4372_v34 }
0x2736   :  { %v4379_v35 = vsel %vm2583_vm14, %v4378_v20, %v4375_v43  ;;  %v10189_v20 = vmov 3  }
0x2737   :  { %v4359_v40 = vpop.permute.xlu1 %4358  ;;  %v4593_v43 = vpop.permute.xlu0 %4592 }
0x2738   :  { %v4363_v46 = vsel %vm2583_vm14, %v4362_v16, %v4359_v40  ;;  %v9445_v16 = vadd.f32 %v5020_v31, %v4246_v53  ;;  %v4595_v40 = vadd.f32 %v4593_v43, %v9404_v27 }
0x2739   :  { %v4380_v29 = vadd.f32 %v4379_v35, %v4363_v46  ;;  %v9452_v35 = vadd.f32 %v9150_v63, %v9374_v39 }
0x273b   :  { %7764 = vtanh.f32 %v4380_v29 }
0x2748   :  { %v7765_v44 = vpop.eup %7764 }
0x2749   :  { %7291 = vmatmul.mubr.msk.f32.vlgmr.msra.gmra.mxu0 %vm300_vm3, %v7765_v44 }
0x274a   :  { %7320 = vmatpush3.msra.mxu0 %v8300_v58  ;;  %7327 = vmatprep.mubr.msk.f32.mxu0 %vm8037_vm6, %v10150_v12 }
0x274b   :  { %7321 = vmatprep.subr.mxu0 %v10150_v12 }
0x274c   :  { %7322 = vmatpush3.msra.mxu0 %v10167_v22 }
0x274d   :  { %7323 = vmatprep.subr.mxu0 %v10150_v12 }
0x274e   :  { %7324 = vmatpush3.msra.mxu0 %v10168_v19 }
0x274f   :  { %7325 = vmatprep.subr.mxu0 %v10150_v12 }
0x2750   :  { %7326 = vmatpush3.msra.mxu0 %v10169_v9 }
0x2751   :  { %7341 = vmatprep.subr.mxu0 %v10150_v12 }
0x2809   :  { %v4451_v55 = vpop.f32.mrf.mxu0 }
0x280a   :  { %v4455_v44 = vsel %vm3564_vm1, %v4451_v55, -inf }
0x280b   :  { %4456 = vmax.xlane.f32.xlu1 %v4455_v44  ;;  %v7292_v29 = vpop.f32.mrf.mxu0 }
0x2894   :  { %v4457_v46 = vpop.xlane.xlu1 %4456 }
0x2895   :  { %v4458_v49 = vsub.f32 %v4451_v55, %v4457_v46 }
0x2897   :  { %v4459_v34 = vmul.f32 1.442695, %v4458_v49 }
0x2899   :  { %7766 = vpow2.f32 %v4459_v34 }
0x289a   :  { %7768 = vtanh.f32 %v9445_v16 }
0x289b   :  { %7770 = vtanh.f32 %v9404_v27 }
0x289c   :  { %7772 = vtanh.f32 %v9452_v35 }
0x28a6   :  { %v7767_v28 = vpop.eup %7766 }
0x28a7   :  { %4467 = vperm.xlu1 %7524, %v7767_v28   ;;  %v4461_v52 = vsel %vm3564_vm1, %v7767_v28, 0.0  ;;  %v7769_v63 = vpop.eup %7768 }
0x28a8   :  { %4462 = vadd.xlane.f32.xlu0 %v4461_v52 }
0x28ab   :  { %7526 = vset.pattern.permute.xlu1 %v10157_v59 }
0x28ac   :  { %4478 = vperm.xlu1 %7526, %v7767_v28  }
0x28b0   :  { %7527 = vset.pattern.permute.xlu1 %v10189_v20 }
0x28b1   :  { %4484 = vperm.xlu1 %7527, %v7767_v28  }
0x28b5   :  { %4137 = vrot.lane.b32.xlu1 %v9293_v7, %s8039_s10  ;;  %v7771_v7 = vpop.eup %7770 }
0x28b6   :  { %7529 = vset.pattern.permute.xlu1 %v10156_v51  ;;  %v7773_v39 = vpop.eup %7772 }
0x28b9   :  { %4596 = vrot.lane.b32.xlu1 %v10188_v48, %s8034_s29 }
0x28bd   :  { %4609 = vrot.lane.b32.xlu1 %v4595_v40, %s8036_s9 }
0x28be   :  { %4472 = vperm.xlu0 %7525, %v7767_v28  }
0x28c1   :  { %4612 = vrot.lane.b32.xlu1 %v4595_v40, %s8041_s12 }
0x28c2   :  { %4615 = vrot.lane.b32.xlu0 %v4595_v40, %s8040_s11 }
0x28c3   :  { %7528 = vset.pattern.permute.xlu0 %v10170_v37 }
0x28c5   :  { %4599 = vrot.lane.b32.xlu1 %v9027_v13, %s8039_s10 }
0x28c6   :  { %4618 = vrot.lane.b32.xlu0 %v4595_v40, %s8044_s15 }
0x28c9   :  { %4602 = vrot.lane.b32.xlu1 %v9412_v32, %s8033_s22 }
0x28ca   :  { %5032 = vrot.lane.b32.xlu0 %v7769_v63, %s8031_s18 }
0x28cd   :  { %4854 = vrot.lane.b32.xlu1 %v7771_v7, %s8038_s0 }
0x28ce   :  { %3948 = vrot.lane.b32.xlu0 %v7773_v39, %s8034_s29 }
0x2922   :  { %v4468_v48 = vpop.permute.xlu1 %4467 }
0x2923   :  { %v4470_v28 = vmul.f32 %v4468_v48, %v8626_v23 }
0x2927   :  { %v4479_v53 = vpop.permute.xlu1 %4478 }
0x2928   :  { %v4481_v43 = vmul.f32 %v4479_v53, %v9173_v56 }
0x292c   :  { %v4485_v55 = vpop.permute.xlu1 %4484 }
0x2930   :  { %v4138_v44 = vpop.permute.xlu1 %4137 }
0x2931   :  { %v4463_v29 = vpop.xlane.xlu0 %4462  ;;  %v9473_v31 = vsel %vm560_vm12, %v9324_v47, %v4138_v44 }
0x2932   :  { %7774 = vrcp.f32 %v4463_v29  ;;  %v4487_v39 = vmul.f32 %v4485_v55, %v9473_v31 }
0x2934   :  { %v4597_v46 = vpop.permute.xlu1 %4596 }
0x2938   :  { %v4610_v49 = vpop.permute.xlu1 %4609 }
0x2939   :  { %v4473_v34 = vpop.permute.xlu0 %4472 }
0x293a   :  { %v4475_v52 = vmul.f32 %v4473_v34, %v8880_v11  ;;  %v10190_v11 = vld [vmem:[#allocation18_spill] sm:$0xff] }
0x293b   :  { %v4605_v44 = vsel %vm560_vm12, %v4597_v46, %v10190_v11 }
0x293c   :  { %v4476_v40 = vadd.f32 %v4475_v52, %v4470_v28  ;;  %v4613_v63 = vpop.permute.xlu1 %4612 }
0x293d   :  { %v4616_v7 = vpop.permute.xlu0 %4615  ;;  %v4621_v23 = vsel %vm560_vm12, %v4610_v49, %v4613_v63  ;;  %v10193_v63 = vld [vmem:[#allocation32_spill] sm:$0xff] }
0x293e   :  { %v4482_v13 = vadd.f32 %v4481_v43, %v4476_v40  ;;  %v4622_v53 = vsel %vm161_vm2, %v4621_v23, %v4616_v7  ;;  %v10191_v43 = vld [vmem:[#allocation30_spill] sm:$0xff]  ;;  %v10192_v40 = vld [vmem:[#allocation31_spill] sm:$0xff]  ;;  %v10194_v7 = vld [vmem:[#allocation33_spill] sm:$0xff] }
0x293f   :  { %v7775_v9 = vpop.eup %7774  ;;  %v10197_v23 = vld [vmem:[#allocation36_spill] sm:$0xff] }
0x2940   :  { %v4488_v29 = vadd.f32 %v4487_v39, %v4482_v13  ;;  %v9477_v32 = vpop.permute.xlu1 %4599  ;;  %v10195_v39 = vld [vmem:[#allocation34_spill] sm:$0xff] }
0x2941   :  { %v4619_v34 = vpop.permute.xlu0 %4618  ;;  %v4606_v28 = vsel %vm161_vm2, %v4605_v44, %v9477_v32  ;;  %v6780_v44 = vmul.f32 -1.442695, %v9445_v16 }
0x2942   :  { %v9480_v48 = vmul.f32 %v7775_v9, %v4488_v29  ;;  %v4623_v13 = vsel %vm2583_vm14, %v4622_v53, %v4619_v34  ;;  %v10196_v29 = vld [vmem:[#allocation35_spill] sm:$0xff]  ;;  %v10198_v34 = vld [vmem:[#allocation37_spill] sm:$0xff] }
0x2944   :  { %v9487_v52 = vpop.permute.xlu1 %4602  ;;  %7298 = vmatmul.mubr.msk.f32.vlgmr.msra.gmra.mxu1 %vm560_vm12, %v9480_v48 }
0x2945   :  { %v4607_v9 = vsel %vm2583_vm14, %v4606_v28, %v9487_v52  ;;  %7301 = vmatpush3.msra.mxu1 %v9176_v61  ;;  %7316 = vmatprep.mubr.msk.f32.mxu1 %vm8037_vm6, %v10150_v12  ;;  %v4147_v28 = vld [vmem:[#allocation2 + $0x58] sm:$0x3] }
0x2946   :  { %v4624_v55 = vadd.f32 %v4623_v13, %v4607_v9  ;;  %7302 = vmatprep.subr.mxu1 %v10150_v12 }
0x2947   :  { %7303 = vmatpush3.msra.mxu1 %v9194_v5 }
0x2948   :  { %7776 = vtanh.f32 %v4624_v55  ;;  %7304 = vmatprep.subr.mxu1 %v10150_v12  ;;  %v4855_v49 = vpop.permute.xlu1 %4854 }
0x2949   :  { %7305 = vmatpush3.msra.mxu1 %v9188_v33  ;;  %7778 = vpow2.f32 %v6780_v44  ;;  %v6763_v44 = vmul.f32 -1.442695, %v9452_v35 }
0x294a   :  { %7306 = vmatprep.subr.mxu1 %v10150_v12 }
0x294b   :  { %7307 = vmatpush3.msra.mxu1 %v9202_v14 }
0x294c   :  { %7308 = vmatprep.subr.mxu1 %v10150_v12 }
0x294d   :  { %7309 = vmatpush3.msra.mxu1 %v9199_v4 }
0x294e   :  { %7310 = vmatprep.subr.mxu1 %v10150_v12 }
0x294f   :  { %7311 = vmatpush3.msra.mxu1 %v9208_v26 }
0x2950   :  { %7312 = vmatprep.subr.mxu1 %v10150_v12 }
0x2951   :  { %7313 = vmatpush3.msra.mxu1 %v9211_v45 }
0x2952   :  { %7314 = vmatprep.subr.mxu1 %v10150_v12 }
0x2953   :  { %7315 = vmatpush3.msra.mxu1 %v9216_v42 }
0x2954   :  { %7330 = vmatprep.subr.mxu1 %v10150_v12 }
0x2955   :  { %v7777_v46 = vpop.eup %7776 }
0x2956   :  { %7317 = vmatmul.mubr.msk.f32.vlgmr.msra.gmra.mxu1 %vm300_vm3, %v7777_v46  ;;  %v7779_v53 = vpop.eup %7778 }
0x2957   :  { %7331 = vmatpush3.msra.mxu1 %v8308_v36  ;;  %7338 = vmatprep.mubr.msk.f32.mxu1 %vm8037_vm6, %v10150_v12  ;;  %v5026_v9 = vadd.f32 1.0, %v7779_v53 }
0x2958   :  { %7332 = vmatprep.subr.mxu1 %v10150_v12 }
0x2959   :  { %7333 = vmatpush3.msra.mxu1 %v8315_v15 }
0x295a   :  { %7334 = vmatprep.subr.mxu1 %v10150_v12 }
0x295b   :  { %7335 = vmatpush3.msra.mxu1 %v8317_v17 }
0x295c   :  { %7336 = vmatprep.subr.mxu1 %v10150_v12 }
0x295d   :  { %7337 = vmatpush3.msra.mxu1 %v8323_v18 }
0x295e   :  { %7339 = vmatmul.mubr.msk.f32.vlgmr.msra.gmra.mxu1 %vm161_vm2, %v4855_v49  ;;  %5178 = vmatprep.subr.mxu1 %v10191_v43  ;;  %v5033_v43 = vpop.permute.xlu0 %5032 }
0x295f   :  { %5179 = vmatpush1.msra.mxu1 %v10192_v40  ;;  %5218 = vmatprep.mubr.f32.mxu1 %v10150_v12 }
0x2960   :  { %5180 = vmatprep.subr.mxu1 %v10193_v63 }
0x2961   :  { %5181 = vmatpush1.msra.mxu1 %v10194_v7 }
0x2962   :  { %5182 = vmatprep.subr.mxu1 %v10195_v39  ;;  %v3949_v35 = vpop.permute.xlu0 %3948 }
0x2963   :  { %5183 = vmatpush1.msra.mxu1 %v10196_v29 }
0x2964   :  { %5184 = vmatprep.subr.mxu1 %v10197_v23 }
0x2965   :  { %5185 = vmatpush1.msra.mxu1 %v10198_v34 }
0x2966   :  { %7367 = vmatprep.subr.mxu1 %v10150_v12 }
0x2a04   :  { %v9534_v13 = vpop.f32.mrf.mxu1 }
0x2a05   :  { %v4563_v55 = vadd.f32 %v9534_v13, %v4147_v28 }
0x2a06   :  { %v7299_v46 = vpop.f32.mrf.mxu1 }
0x2a07   :  { %7780 = vtanh.f32 %v4563_v55  ;;  %v6773_v34 = vmul.f32 -1.442695, %v4563_v55 }
0x2a08   :  { %7782 = vrcp.f32 %v5026_v9 }
0x2a09   :  { %7784 = vpow2.f32 %v6773_v34 }
0x2a0a   :  { %7786 = vpow2.f32 %v6763_v44 }
0x2a14   :  { %v7781_v49 = vpop.eup %7780 }
0x2a15   :  { %4576 = vrot.lane.b32.xlu1 %v7781_v49, %s8034_s29  ;;  %v7783_v40 = vpop.eup %7782 }
0x2a16   :  { %v4695_v63 = vpop.f32.mrf.mxu1  ;;  %v5035_v7 = vmul.f32 %v7783_v40, %v5033_v43  ;;  %v7785_v53 = vpop.eup %7784 }
0x2a17   :  { %v4699_v16 = vsel %vm3564_vm1, %v4695_v63, -inf  ;;  %v4567_v28 = vadd.f32 1.0, %v7785_v53  ;;  %v7787_v9 = vpop.eup %7786 }
0x2a18   :  { %4700 = vmax.xlane.f32.xlu0 %v4699_v16  ;;  %v7318_v39 = vpop.f32.mrf.mxu1  ;;  %v3938_v46 = vadd.f32 1.0, %v7787_v9 }
0x2a19   :  { %5037 = vrot.lane.b32.xlu1 %v5035_v7, %s8033_s22  ;;  %7788 = vrcp.f32 %v4567_v28 }
0x2a1a   :  { %7790 = vrcp.f32 %v3938_v46 }
0x2a1d   :  { %4571 = vrot.lane.b32.xlu1 %v9480_v48, %s8034_s29  ;;  %v10199_v48 = vld [vmem:[#allocation38_spill] sm:$0xff] }
0x2a1e   :  { %v4924_v29 = vpop.f32.mrf.mxu1  ;;  %v5030_v16 = vmul.f32 %v7783_v40, %v10199_v48 }
0x2a20   :  { %v7340_v23 = vpop.f32.mrf.mxu1 }
0x2a26   :  { %v9543_v49 = vpop.eup %7788 }
0x2a27   :  { %v9554_v23 = vpop.eup %7790 }
0x2a28   :  { %10200 = vst [vmem:[#allocation13_spill] sm:$0xff] %v9554_v23  ;;  %v3951_v34 = vmul.f32 %v9554_v23, %v3949_v35 }
0x2a87   :  { %v4577_v43 = vpop.permute.xlu1 %4576 }
0x2a88   :  { %v4579_v7 = vmul.f32 %v9543_v49, %v4577_v43 }
0x2a8a   :  { %4581 = vrot.lane.b32.xlu1 %v4579_v7, %s8032_s19 }
0x2a8b   :  { %v5038_v55 = vpop.permute.xlu1 %5037 }
0x2a8c   :  { %v9548_v39 = vadd.f32 %v5038_v55, %v5030_v16 }
0x2a8e   :  { %7792 = vtanh.f32 %v9548_v39  ;;  %3943 = vrot.lane.b32.xlu1 %v9314_v50, %s8034_s29 }
0x2a8f   :  { %v4572_v50 = vpop.permute.xlu1 %4571 }
0x2a92   :  { %4929 = vrot.lane.b32.xlu1 %v4924_v29, %s8030_s16  ;;  %v4574_v29 = vmul.f32 %v9543_v49, %v4572_v50 }
0x2a96   :  { %3953 = vrot.lane.b32.xlu1 %v3951_v34, %s8032_s19 }
0x2a9b   :  { %v7793_v44 = vpop.eup %7792 }
0x2a9c   :  { %5043 = vrot.lane.b32.xlu1 %v7793_v44, %s8031_s18 }
0x2aa1   :  { %v4701_v53 = vpop.xlane.xlu0 %4700 }
0x2aa2   :  { %v4702_v28 = vsub.f32 %v4695_v63, %v4701_v53 }
0x2aa4   :  { %v4703_v9 = vmul.f32 1.442695, %v4702_v28 }
0x2aa6   :  { %7794 = vpow2.f32 %v4703_v9 }
0x2ab3   :  { %v7795_v46 = vpop.eup %7794 }
0x2ab4   :  { %4716 = vperm.xlu1 %7529, %v7795_v46   ;;  %4711 = vperm.xlu0 %7528, %v7795_v46   ;;  %v4705_v9 = vsel %vm3564_vm1, %v7795_v46, 0.0 }
0x2ab8   :  { %7530 = vset.pattern.permute.xlu0 %v10157_v59  ;;  %7531 = vset.pattern.permute.xlu1 %v10189_v20 }
0x2ab9   :  { %4722 = vperm.xlu0 %7530, %v7795_v46  }
0x2abd   :  { %7533 = vset.pattern.permute.xlu0 %v10156_v51 }
0x2afc   :  { %v4582_v43 = vpop.permute.xlu1 %4581 }
0x2afd   :  { %v9563_v7 = vadd.f32 %v4582_v43, %v4574_v29 }
0x2aff   :  { %7796 = vtanh.f32 %v9563_v7 }
0x2b00   :  { %v3944_v63 = vpop.permute.xlu1 %3943 }
0x2b01   :  { %v3946_v16 = vmul.f32 %v9554_v23, %v3944_v63 }
0x2b04   :  { %v4930_v48 = vpop.permute.xlu1 %4929 }
0x2b05   :  { %v4932_v28 = vadd.f32 %v4930_v48, %v9404_v27 }
0x2b07   :  { %7798 = vtanh.f32 %v4932_v28 }
0x2b08   :  { %v3954_v55 = vpop.permute.xlu1 %3953 }
0x2b09   :  { %v9567_v35 = vadd.f32 %v3954_v55, %v3946_v16 }
0x2b0b   :  { %10201 = vst [vmem:[#allocation18_spill] sm:$0xff] %v9567_v35  ;;  %4142 = vrot.lane.b32.xlu1 %v9567_v35, %s8039_s10 }
0x2b0c   :  { %v7797_v34 = vpop.eup %7796 }
0x2b0d   :  { %4587 = vrot.lane.b32.xlu0 %v7797_v34, %s8039_s10 }
0x2b0e   :  { %v5044_v44 = vpop.permute.xlu1 %5043 }
0x2b0f   :  { %v5046_v53 = vmul.f32 %v7783_v40, %v5044_v44  ;;  %4728 = vperm.xlu1 %7531, %v7795_v46  }
0x2b11   :  { %5048 = vrot.lane.b32.xlu0 %v5046_v53, %s8033_s22 }
0x2b13   :  { %7532 = vset.pattern.permute.xlu1 %v10170_v37 }
0x2b14   :  { %v7799_v50 = vpop.eup %7798 }
0x2b2f   :  { %v4717_v29 = vpop.permute.xlu1 %4716  ;;  %v4712_v16 = vpop.permute.xlu0 %4711 }
0x2b30   :  { %v4719_v34 = vmul.f32 %v4717_v29, %v8980_v24  ;;  %v4714_v44 = vmul.f32 %v4712_v16, %v8704_v57 }
0x2b32   :  { %v4720_v53 = vadd.f32 %v4719_v34, %v4714_v44 }
0x2b33   :  { %4706 = vadd.xlane.f32.xlu1 %v4705_v9 }
0x2b34   :  { %v4723_v40 = vpop.permute.xlu0 %4722 }
0x2b35   :  { %v4725_v48 = vmul.f32 %v4723_v40, %v9311_v38 }
0x2b37   :  { %v4726_v9 = vadd.f32 %v4725_v48, %v4720_v53 }
0x2b44   :  { %4935 = vrot.lane.b32.xlu1 %v7799_v50, %s8035_s8 }
0x2b7d   :  { %v4143_v43 = vpop.permute.xlu1 %4142 }
0x2b7e   :  { %v9582_v46 = vsel %vm560_vm12, %v9324_v47, %v4143_v43 }
0x2b7f   :  { %v4588_v50 = vpop.permute.xlu0 %4587 }
0x2b8a   :  { %v4729_v63 = vpop.permute.xlu1 %4728 }
0x2b8b   :  { %v4731_v28 = vmul.f32 %v4729_v63, %v9582_v46 }
0x2b8d   :  { %v4732_v27 = vadd.f32 %v4731_v28, %v4726_v9  ;;  %v10208_v9 = vld [vmem:[#allocation41_spill] sm:$0xff] }
0x2bbc   :  { %v4707_v55 = vpop.xlane.xlu1 %4706 }
0x2bbd   :  { %7800 = vrcp.f32 %v4707_v55  ;;  %v4590_v55 = vmul.f32 %v9543_v49, %v4588_v50 }
0x2bc0   :  { %v9595_v47 = vpop.permute.xlu1 %4935 }
0x2bca   :  { %v7801_v23 = vpop.eup %7800 }
0x2bcb   :  { %v9586_v35 = vmul.f32 %v7801_v23, %v4732_v27  ;;  %v5049_v27 = vpop.permute.xlu0 %5048 }
0x2bcd   :  { %v4734_v57 = vsel %vm560_vm12, %v9586_v35, %v4590_v55 }
0x2bce   :  { %7328 = vmatmul.mubr.msk.f32.vlgmr.msra.gmra.mxu0 %vm161_vm2, %v4734_v57 }
0x2bcf   :  { %7342 = vmatpush3.msra.mxu0 %v8363_v30  ;;  %7345 = vmatprep.mubr.msk.f32.mxu0 %vm8037_vm6, %v10150_v12 }
0x2bd0   :  { %7343 = vmatprep.subr.mxu0 %v10150_v12 }
0x2bd1   :  { %7344 = vmatpush3.msra.mxu0 %v8378_v54 }
0x2bd2   :  { %5076 = vmatprep.subr.mxu0 %v9327_v60  ;;  %7346 = vmatmul.mubr.msk.f32.vlgmr.msra.gmra.mxu0 %vm560_vm12, %v9595_v47  ;;  %v10202_v60 = vld [vmem:[#allocation24_spill] sm:$0xff] }
0x2bd3   :  { %5077 = vmatpush1.msra.mxu0 %v9332_v41  ;;  %5116 = vmatprep.mubr.f32.mxu0 %v10150_v12  ;;  %v10203_v41 = vld [vmem:[#allocation26_spill] sm:$0xff] }
0x2bd4   :  { %5078 = vmatprep.subr.mxu0 %v9336_v10  ;;  %v10204_v10 = vld [vmem:[#allocation25_spill] sm:$0xff] }
0x2bd5   :  { %5079 = vmatpush1.msra.mxu0 %v9339_v21  ;;  %v10205_v21 = vld [vmem:[#allocation27_spill] sm:$0xff] }
0x2bd6   :  { %5080 = vmatprep.subr.mxu0 %v9342_v2  ;;  %v10206_v2 = vld [vmem:[#allocation28_spill] sm:$0xff] }
0x2bd7   :  { %5081 = vmatpush1.msra.mxu0 %v9345_v0  ;;  %v10207_v0 = vld [vmem:[#allocation29_spill] sm:$0xff] }
0x2bd8   :  { %5082 = vmatprep.subr.mxu0 %v9348_v25 }
0x2bd9   :  { %5083 = vmatpush1.msra.mxu0 %v9351_v1 }
0x2bda   :  { %6781 = vmatmul.mubr.msk.f32.vlgmr.msra.gmra.mxu0 %vm161_vm2, %v5049_v27  ;;  %7348 = vmatprep.subr.mxu0 %v10150_v12 }
0x2bdb   :  { %7349 = vmatpush3.msra.mxu0 %v9073_v8  ;;  %7364 = vmatprep.mubr.msk.f32.mxu0 %vm8037_vm6, %v10150_v12 }
0x2bdc   :  { %7350 = vmatprep.subr.mxu0 %v10150_v12 }
0x2bdd   :  { %7351 = vmatpush3.msra.mxu0 %v9084_v62 }
0x2bde   :  { %7352 = vmatprep.subr.mxu0 %v10150_v12 }
0x2bdf   :  { %7353 = vmatpush3.msra.mxu0 %v10202_v60 }
0x2be0   :  { %7354 = vmatprep.subr.mxu0 %v10150_v12 }
0x2be1   :  { %7355 = vmatpush3.msra.mxu0 %v10203_v41 }
0x2be2   :  { %7356 = vmatprep.subr.mxu0 %v10150_v12 }
0x2be3   :  { %7357 = vmatpush3.msra.mxu0 %v10204_v10 }
0x2be4   :  { %7358 = vmatprep.subr.mxu0 %v10150_v12 }
0x2be5   :  { %7359 = vmatpush3.msra.mxu0 %v10205_v21 }
0x2be6   :  { %7360 = vmatprep.subr.mxu0 %v10150_v12 }
0x2be7   :  { %7361 = vmatpush3.msra.mxu0 %v10206_v2 }
0x2be8   :  { %7362 = vmatprep.subr.mxu0 %v10150_v12 }
0x2be9   :  { %7363 = vmatpush3.msra.mxu0 %v10207_v0 }
0x2bea   :  { %7393 = vmatprep.subr.mxu0 %v10150_v12 }
0x2c8e   :  { %v9629_v25 = vpop.f32.mrf.mxu0 }
0x2c90   :  { %v7329_v1 = vpop.f32.mrf.mxu0 }
0x2c92   :  { %v5005_v49 = vpop.f32.mrf.mxu0 }
0x2c94   :  { %v7347_v23 = vpop.f32.mrf.mxu0 }
0x2c95   :  { %v10209_v23 = vld [vmem:[#allocation42_spill] sm:$0xff] }
0x2c9a   :  { %v5118_v29 = vpop.f32.mrf.mxu0 }
0x2c9b   :  { %v5123_v43 = vadd.f32 %v5118_v29, %v9399_v3  ;;  %v9648_v29 = vld [vmem:[#allocation3 + $0xc0] sm:$0xff] }
0x2c9d   :  { %v5124_v63 = vadd.f32 %v9377_v6, %v5123_v43 }
0x2c9f   :  { %7802 = vtanh.f32 %v5124_v63  ;;  %v6782_v40 = vmul.f32 -1.442695, %v5124_v63  ;;  %v10210_v63 = vld [vmem:[#allocation43_spill] sm:$0xff] }
0x2ca1   :  { %7804 = vpow2.f32 %v6782_v40 }
0x2cac   :  { %v7803_v16 = vpop.eup %7802 }
0x2cad   :  { %5134 = vrot.lane.b32.xlu1 %v7803_v16, %s8031_s18 }
0x2cae   :  { %v7805_v34 = vpop.eup %7804 }
0x2caf   :  { %v5128_v44 = vadd.f32 1.0, %v7805_v34 }
0x2cb1   :  { %7806 = vrcp.f32 %v5128_v44  ;;  %v9660_v44 = vld [vmem:[#allocation3 + $0x123] ss:$0 sm:$0xff] }
0x2cbe   :  { %v7807_v48 = vpop.eup %7806 }
0x2cbf   :  { %v5132_v50 = vmul.f32 %v7807_v48, %v10208_v9 }
0x2d1f   :  { %v5135_v53 = vpop.permute.xlu1 %5134 }
0x2d20   :  { %v5137_v28 = vmul.f32 %v7807_v48, %v5135_v53 }
0x2d22   :  { %5139 = vrot.lane.b32.xlu0 %v5137_v28, %s8033_s22 }
0x2d94   :  { %v5140_v55 = vpop.permute.xlu0 %5139 }
0x2d95   :  { %v9636_v3 = vadd.f32 %v5140_v55, %v5132_v50  ;;  %v5235_v55 = vsel %vm560_vm12, %v10190_v11, %v9477_v32  ;;  %v10212_v32 = vld [vmem:[#allocation12_spill] sm:$0xff] }
0x2d97   :  { %7808 = vtanh.f32 %v9636_v3 }
0x2da4   :  { %v7809_v6 = vpop.eup %7808 }
0x2da5   :  { %5145 = vrot.lane.b32.xlu1 %v7809_v6, %s8031_s18  ;;  %v5236_v6 = vsel %vm161_vm2, %v5235_v55, %v9487_v52  ;;  %v5120_v52 = vpop.f32.mrf.mxu0 }
0x2da9   :  { %5227 = vrot.lane.b32.xlu1 %v9534_v13, %s8038_s0 }
0x2e17   :  { %v5146_v57 = vpop.permute.xlu1 %5145 }
0x2e18   :  { %v5148_v27 = vmul.f32 %v7807_v48, %v5146_v57  ;;  %v9663_v48 = vadd.f32 %v9660_v44, %v5005_v49 }
0x2e1a   :  { %5150 = vrot.lane.b32.xlu0 %v5148_v27, %s8033_s22  ;;  %10211 = vst [vmem:[#allocation30_spill] sm:$0xff] %v9663_v48 }
0x2e1b   :  { %v5228_v40 = vpop.permute.xlu1 %5227 }
0x2e8c   :  { %v5151_v1 = vpop.permute.xlu0 %5150 }
0x2e8d   :  { %6783 = vmatmul.mubr.msk.f32.vlgmr.msra.gmra.mxu1 %vm161_vm2, %v5151_v1 }
0x2e8e   :  { %7368 = vmatpush3.msra.mxu1 %v10209_v23  ;;  %7371 = vmatprep.mubr.msk.f32.mxu1 %vm8037_vm6, %v10150_v12 }
0x2e8f   :  { %7369 = vmatprep.subr.mxu1 %v10150_v12 }
0x2e90   :  { %7370 = vmatpush3.msra.mxu1 %v9648_v29 }
0x2e91   :  { %7374 = vmatprep.subr.mxu1 %v10150_v12 }
0x2f4d   :  { %v9652_v13 = vpop.f32.mrf.mxu1 }
0x2f4f   :  { %v5222_v43 = vpop.f32.mrf.mxu1 }
0x2f50   :  { %v9655_v16 = vadd.f32 %v10210_v63, %v5222_v43 }
0x2f52   :  { %v5230_v34 = vadd.f32 %v5228_v40, %v9655_v16 }
0x2f54   :  { %5242 = vrot.lane.b32.xlu1 %v5230_v34, %s8040_s11  ;;  %5239 = vrot.lane.b32.xlu0 %v5230_v34, %s8041_s12 }
0x2f58   :  { %5232 = vrot.lane.b32.xlu1 %v9663_v48, %s8027_s13  ;;  %5245 = vrot.lane.b32.xlu0 %v5230_v34, %s8044_s15 }
0x2f5c   :  { %5248 = vrot.lane.b32.xlu0 %v5230_v34, %s8030_s16 }
0x2f60   :  { %5466 = vrot.lane.b32.xlu0 %v9629_v25, %s8035_s8 }
0x2fc6   :  { %v5243_v53 = vpop.permute.xlu1 %5242  ;;  %v5240_v28 = vpop.permute.xlu0 %5239 }
0x2fc7   :  { %v5251_v49 = vsel %vm560_vm12, %v5240_v28, %v5243_v53 }
0x2fca   :  { %v5246_v9 = vpop.permute.xlu0 %5245  ;;  %v5233_v50 = vpop.permute.xlu1 %5232 }
0x2fcb   :  { %v5252_v57 = vsel %vm161_vm2, %v5251_v49, %v5246_v9  ;;  %v5237_v1 = vsel %vm2583_vm14, %v5236_v6, %v5233_v50  ;;  %v5894_v6 = vld [vmem:[#allocation2 + $0x70] sm:$0x3] }
0x2fce   :  { %v5249_v27 = vpop.permute.xlu0 %5248 }
0x2fcf   :  { %v5253_v23 = vsel %vm2583_vm14, %v5252_v57, %v5249_v27  ;;  %v9698_v57 = vadd.f32 %v5894_v6, %v5120_v52 }
0x2fd0   :  { %v5254_v43 = vadd.f32 %v5253_v23, %v5237_v1  ;;  %v9703_v23 = vld [vmem:[#allocation3 + $0x124] ss:$0 sm:$0xff] }
0x2fd1   :  { %10213 = vst [vmem:[#allocation31_spill] sm:$0xff] %v9703_v23 }
0x2fd2   :  { %7810 = vtanh.f32 %v5254_v43  ;;  %v5467_v27 = vpop.permute.xlu0 %5466  ;;  %v9707_v43 = vadd.f32 %v9703_v23, %v9629_v25 }
0x2fd3   :  { %v5469_v1 = vadd.f32 %v5467_v27, %v9655_v16 }
0x2fdf   :  { %v7811_v63 = vpop.eup %7810 }
0x2fe0   :  { %7365 = vmatmul.mubr.msk.f32.vlgmr.msra.gmra.mxu0 %vm300_vm3, %v7811_v63 }
0x2fe1   :  { %7394 = vmatpush3.msra.mxu0 %v8300_v58  ;;  %7401 = vmatprep.mubr.msk.f32.mxu0 %vm8037_vm6, %v10150_v12 }
0x2fe2   :  { %7395 = vmatprep.subr.mxu0 %v10150_v12 }
0x2fe3   :  { %7396 = vmatpush3.msra.mxu0 %v10167_v22 }
0x2fe4   :  { %7397 = vmatprep.subr.mxu0 %v10150_v12 }
0x2fe5   :  { %7398 = vmatpush3.msra.mxu0 %v10168_v19 }
0x2fe6   :  { %7399 = vmatprep.subr.mxu0 %v10150_v12 }
0x2fe7   :  { %7400 = vmatpush3.msra.mxu0 %v10212_v32 }
0x2fe8   :  { %7415 = vmatprep.subr.mxu0 %v10150_v12 }
0x30a0   :  { %v5325_v40 = vpop.f32.mrf.mxu0 }
0x30a1   :  { %v5329_v34 = vsel %vm3564_vm1, %v5325_v40, -inf }
0x30a2   :  { %5330 = vmax.xlane.f32.xlu1 %v5329_v34  ;;  %v7366_v53 = vpop.f32.mrf.mxu0 }
0x312b   :  { %v5331_v28 = vpop.xlane.xlu1 %5330 }
0x312c   :  { %v5332_v9 = vsub.f32 %v5325_v40, %v5331_v28 }
0x312e   :  { %v5333_v50 = vmul.f32 1.442695, %v5332_v9 }
0x3130   :  { %7812 = vpow2.f32 %v5333_v50 }
0x3131   :  { %7814 = vtanh.f32 %v9698_v57 }
0x3132   :  { %7816 = vtanh.f32 %v9655_v16 }
0x3133   :  { %7818 = vtanh.f32 %v9707_v43 }
0x313d   :  { %v7813_v55 = vpop.eup %7812 }
0x313e   :  { %5341 = vperm.xlu1 %7532, %v7813_v55   ;;  %v5335_v49 = vsel %vm3564_vm1, %v7813_v55, 0.0 }
0x313f   :  { %5336 = vadd.xlane.f32.xlu0 %v5335_v49  ;;  %v10215_v49 = vld [vmem:[#allocation19_spill] sm:$0xff] }
0x3142   :  { %7534 = vset.pattern.permute.xlu1 %v10157_v59 }
0x3143   :  { %5352 = vperm.xlu1 %7534, %v7813_v55  }
0x3147   :  { %7535 = vset.pattern.permute.xlu1 %v10189_v20 }
0x3148   :  { %5358 = vperm.xlu1 %7535, %v7813_v55  }
0x314c   :  { %5011 = vrot.lane.b32.xlu1 %v9563_v7, %s8039_s10  ;;  %v7815_v7 = vpop.eup %7814 }
0x314d   :  { %7537 = vset.pattern.permute.xlu1 %v10156_v51  ;;  %v7817_v25 = vpop.eup %7816 }
0x314e   :  { %v7819_v63 = vpop.eup %7818 }
0x3150   :  { %5470 = vrot.lane.b32.xlu1 %v10190_v11, %s8034_s29  ;;  %v10214_v11 = vld [vmem:[#allocation45_spill] sm:$0xff] }
0x3154   :  { %5483 = vrot.lane.b32.xlu1 %v5469_v1, %s8036_s9 }
0x3155   :  { %5346 = vperm.xlu0 %7533, %v7813_v55  }
0x3158   :  { %5486 = vrot.lane.b32.xlu1 %v5469_v1, %s8041_s12 }
0x3159   :  { %5489 = vrot.lane.b32.xlu0 %v5469_v1, %s8040_s11 }
0x315a   :  { %7536 = vset.pattern.permute.xlu0 %v10170_v37 }
0x315c   :  { %5473 = vrot.lane.b32.xlu1 %v10214_v11, %s8039_s10 }
0x315d   :  { %5492 = vrot.lane.b32.xlu0 %v5469_v1, %s8044_s15 }
0x3160   :  { %5476 = vrot.lane.b32.xlu1 %v9663_v48, %s8033_s22 }
0x3161   :  { %5906 = vrot.lane.b32.xlu0 %v7815_v7, %s8031_s18 }
0x3164   :  { %5728 = vrot.lane.b32.xlu1 %v7817_v25, %s8038_s0 }
0x3165   :  { %4822 = vrot.lane.b32.xlu0 %v7819_v63, %s8034_s29 }
0x31b9   :  { %v5342_v52 = vpop.permute.xlu1 %5341 }
0x31ba   :  { %v5344_v6 = vmul.f32 %v5342_v52, %v10215_v49 }
0x31be   :  { %v5353_v40 = vpop.permute.xlu1 %5352 }
0x31bf   :  { %v5355_v7 = vmul.f32 %v5353_v40, %v9473_v31 }
0x31c3   :  { %v5359_v34 = vpop.permute.xlu1 %5358 }
0x31c7   :  { %v5012_v53 = vpop.permute.xlu1 %5011 }
0x31c8   :  { %v5337_v28 = vpop.xlane.xlu0 %5336  ;;  %v9728_v1 = vsel %vm560_vm12, %v9595_v47, %v5012_v53 }
0x31c9   :  { %7820 = vrcp.f32 %v5337_v28  ;;  %v5361_v48 = vmul.f32 %v5359_v34, %v9728_v1 }
0x31cb   :  { %v5471_v9 = vpop.permute.xlu1 %5470 }
0x31cf   :  { %v5484_v50 = vpop.permute.xlu1 %5483 }
0x31d0   :  { %v5347_v55 = vpop.permute.xlu0 %5346 }
0x31d1   :  { %v5349_v27 = vmul.f32 %v5347_v55, %v9173_v56  ;;  %v10216_v56 = vld [vmem:[#allocation22_spill] sm:$0xff] }
0x31d2   :  { %v5479_v53 = vsel %vm560_vm12, %v5471_v9, %v10216_v56  ;;  %v7984_v9 = vld [vmem:[#allocation3 + $0xa8] sm:$0xff] }
0x31d3   :  { %v5350_v25 = vadd.f32 %v5349_v27, %v5344_v6  ;;  %v5487_v63 = vpop.permute.xlu1 %5486 }
0x31d4   :  { %v5490_v11 = vpop.permute.xlu0 %5489  ;;  %v5495_v52 = vsel %vm560_vm12, %v5484_v50, %v5487_v63  ;;  %v7986_v50 = vld [vmem:[#allocation3 + $0x78] sm:$0xff]  ;;  %v7991_v63 = vld [vmem:[#allocation3 + $0x10] sm:$0xff] }
0x31d5   :  { %v5356_v23 = vadd.f32 %v5355_v7, %v5350_v25  ;;  %v5496_v40 = vsel %vm161_vm2, %v5495_v52, %v5490_v11  ;;  %v7988_v7 = vld [vmem:[#allocation3 + $0x48] sm:$0xff]  ;;  %v7990_v25 = vld [vmem:[#allocation3 + $0x18] sm:$0xff] }
0x31d6   :  { %v7821_v19 = vpop.eup %7820  ;;  %v5021_v52 = vld [vmem:[#allocation2 + $0x68] sm:$0x3] }
0x31d7   :  { %v5362_v28 = vadd.f32 %v5361_v48, %v5356_v23  ;;  %v9732_v32 = vpop.permute.xlu1 %5473 }
0x31d8   :  { %v5493_v55 = vpop.permute.xlu0 %5492  ;;  %v5480_v6 = vsel %vm161_vm2, %v5479_v53, %v9732_v32 }
0x31d9   :  { %v9735_v49 = vmul.f32 %v7821_v19, %v5362_v28  ;;  %v5497_v48 = vsel %vm2583_vm14, %v5496_v40, %v5493_v55 }
0x31db   :  { %v9742_v27 = vpop.permute.xlu1 %5476  ;;  %7372 = vmatmul.mubr.msk.f32.vlgmr.msra.gmra.mxu1 %vm560_vm12, %v9735_v49 }
0x31dc   :  { %v5481_v19 = vsel %vm2583_vm14, %v5480_v6, %v9742_v27  ;;  %7375 = vmatpush3.msra.mxu1 %v9176_v61  ;;  %7390 = vmatprep.mubr.msk.f32.mxu1 %vm8037_vm6, %v10150_v12 }
0x31dd   :  { %v5498_v23 = vadd.f32 %v5497_v48, %v5481_v19  ;;  %7376 = vmatprep.subr.mxu1 %v10150_v12  ;;  %v5907_v19 = vpop.permute.xlu0 %5906 }
0x31de   :  { %7377 = vmatpush3.msra.mxu1 %v9194_v5 }
0x31df   :  { %7822 = vtanh.f32 %v5498_v23  ;;  %7378 = vmatprep.subr.mxu1 %v10150_v12  ;;  %v5729_v34 = vpop.permute.xlu1 %5728 }
0x31e0   :  { %7379 = vmatpush3.msra.mxu1 %v9188_v33 }
0x31e1   :  { %7380 = vmatprep.subr.mxu1 %v10150_v12 }
0x31e2   :  { %7381 = vmatpush3.msra.mxu1 %v9202_v14 }
0x31e3   :  { %7382 = vmatprep.subr.mxu1 %v10150_v12 }
0x31e4   :  { %7383 = vmatpush3.msra.mxu1 %v9199_v4 }
0x31e5   :  { %7384 = vmatprep.subr.mxu1 %v10150_v12 }
0x31e6   :  { %7385 = vmatpush3.msra.mxu1 %v9208_v26 }
0x31e7   :  { %7386 = vmatprep.subr.mxu1 %v10150_v12 }
0x31e8   :  { %7387 = vmatpush3.msra.mxu1 %v9211_v45 }
0x31e9   :  { %7388 = vmatprep.subr.mxu1 %v10150_v12 }
0x31ea   :  { %7389 = vmatpush3.msra.mxu1 %v9216_v42 }
0x31eb   :  { %7404 = vmatprep.subr.mxu1 %v10150_v12 }
0x31ec   :  { %v7823_v11 = vpop.eup %7822 }
0x31ed   :  { %7391 = vmatmul.mubr.msk.f32.vlgmr.msra.gmra.mxu1 %vm300_vm3, %v7823_v11 }
0x31ee   :  { %7405 = vmatpush3.msra.mxu1 %v8308_v36  ;;  %7412 = vmatprep.mubr.msk.f32.mxu1 %vm8037_vm6, %v10150_v12  ;;  %v7985_v36 = vld [vmem:[#allocation3 + $0xa0] sm:$0xff] }
0x31ef   :  { %7406 = vmatprep.subr.mxu1 %v10150_v12 }
0x31f0   :  { %7407 = vmatpush3.msra.mxu1 %v8315_v15  ;;  %v7987_v15 = vld [vmem:[#allocation3 + $0x70] sm:$0xff] }
0x31f1   :  { %7408 = vmatprep.subr.mxu1 %v10150_v12 }
0x31f2   :  { %7409 = vmatpush3.msra.mxu1 %v8317_v17  ;;  %v7989_v17 = vld [vmem:[#allocation3 + $0x40] sm:$0xff] }
0x31f3   :  { %7410 = vmatprep.subr.mxu1 %v10150_v12 }
0x31f4   :  { %7411 = vmatpush3.msra.mxu1 %v8323_v18  ;;  %v6793_v18 = vmul.f32 -1.442695, %v9698_v57 }
0x31f5   :  { %7413 = vmatmul.mubr.msk.f32.vlgmr.msra.gmra.mxu1 %vm161_vm2, %v5729_v34  ;;  %6051 = vmatprep.subr.mxu1 %v7984_v9 }
0x31f6   :  { %6052 = vmatpush1.msra.mxu1 %v7985_v36  ;;  %6091 = vmatprep.mubr.f32.mxu1 %v10150_v12  ;;  %7824 = vpow2.f32 %v6793_v18 }
0x31f7   :  { %6053 = vmatprep.subr.mxu1 %v7986_v50 }
0x31f8   :  { %6054 = vmatpush1.msra.mxu1 %v7987_v15 }
0x31f9   :  { %6055 = vmatprep.subr.mxu1 %v7988_v7  ;;  %v6776_v7 = vmul.f32 -1.442695, %v9707_v43  ;;  %v4823_v43 = vpop.permute.xlu0 %4822 }
0x31fa   :  { %6056 = vmatpush1.msra.mxu1 %v7989_v17 }
0x31fb   :  { %6057 = vmatprep.subr.mxu1 %v7990_v25 }
0x31fc   :  { %6058 = vmatpush1.msra.mxu1 %v7991_v63 }
0x31fd   :  { %7441 = vmatprep.subr.mxu1 %v10150_v12 }
0x3203   :  { %v7825_v28 = vpop.eup %7824 }
0x3204   :  { %v5900_v53 = vadd.f32 1.0, %v7825_v28 }
0x329b   :  { %v9781_v55 = vpop.f32.mrf.mxu1 }
0x329c   :  { %v5437_v40 = vadd.f32 %v9781_v55, %v5021_v52 }
0x329d   :  { %v7373_v6 = vpop.f32.mrf.mxu1 }
0x329e   :  { %7826 = vtanh.f32 %v5437_v40  ;;  %v6786_v15 = vmul.f32 -1.442695, %v5437_v40 }
0x329f   :  { %7828 = vrcp.f32 %v5900_v53 }
0x32a0   :  { %7830 = vpow2.f32 %v6786_v15 }
0x32a1   :  { %7832 = vpow2.f32 %v6776_v7 }
0x32ab   :  { %v7827_v48 = vpop.eup %7826 }
0x32ac   :  { %5450 = vrot.lane.b32.xlu1 %v7827_v48, %s8034_s29  ;;  %v7829_v23 = vpop.eup %7828 }
0x32ad   :  { %v5569_v11 = vpop.f32.mrf.mxu1  ;;  %v5909_v34 = vmul.f32 %v7829_v23, %v5907_v19  ;;  %v7831_v17 = vpop.eup %7830 }
0x32ae   :  { %v5573_v57 = vsel %vm3564_vm1, %v5569_v11, -inf  ;;  %v5441_v25 = vadd.f32 1.0, %v7831_v17  ;;  %v7833_v63 = vpop.eup %7832 }
0x32af   :  { %5574 = vmax.xlane.f32.xlu0 %v5573_v57  ;;  %v7392_v9 = vpop.f32.mrf.mxu1  ;;  %v4812_v18 = vadd.f32 1.0, %v7833_v63 }
0x32b0   :  { %5911 = vrot.lane.b32.xlu1 %v5909_v34, %s8033_s22  ;;  %7834 = vrcp.f32 %v5441_v25 }
0x32b1   :  { %7836 = vrcp.f32 %v4812_v18 }
0x32b4   :  { %5445 = vrot.lane.b32.xlu1 %v9735_v49, %s8034_s29  ;;  %v5904_v49 = vmul.f32 %v7829_v23, %v9548_v39 }
0x32b5   :  { %v5798_v36 = vpop.f32.mrf.mxu1 }
0x32b7   :  { %v7414_v50 = vpop.f32.mrf.mxu1 }
0x32bd   :  { %v9790_v28 = vpop.eup %7834 }
0x32be   :  { %v9798_v48 = vpop.eup %7836 }
0x32bf   :  { %v4825_v19 = vmul.f32 %v9798_v48, %v4823_v43 }
0x331e   :  { %v5451_v52 = vpop.permute.xlu1 %5450 }
0x331f   :  { %v5453_v53 = vmul.f32 %v9790_v28, %v5451_v52 }
0x3321   :  { %5455 = vrot.lane.b32.xlu1 %v5453_v53, %s8032_s19 }
0x3322   :  { %v5912_v40 = vpop.permute.xlu1 %5911 }
0x3323   :  { %v5914_v6 = vadd.f32 %v5912_v40, %v5904_v49 }
0x3325   :  { %7838 = vtanh.f32 %v5914_v6  ;;  %4817 = vrot.lane.b32.xlu1 %v9586_v35, %s8034_s29 }
0x3326   :  { %v5446_v35 = vpop.permute.xlu1 %5445 }
0x3329   :  { %5803 = vrot.lane.b32.xlu1 %v5798_v36, %s8030_s16  ;;  %v5448_v36 = vmul.f32 %v9790_v28, %v5446_v35 }
0x332d   :  { %4827 = vrot.lane.b32.xlu1 %v4825_v19, %s8032_s19 }
0x3332   :  { %v7839_v34 = vpop.eup %7838 }
0x3333   :  { %5917 = vrot.lane.b32.xlu1 %v7839_v34, %s8031_s18 }
0x3338   :  { %v5575_v57 = vpop.xlane.xlu0 %5574 }
0x3339   :  { %v5576_v39 = vsub.f32 %v5569_v11, %v5575_v57 }
0x333b   :  { %v5577_v9 = vmul.f32 1.442695, %v5576_v39 }
0x333d   :  { %7840 = vpow2.f32 %v5577_v9 }
0x334a   :  { %v7841_v50 = vpop.eup %7840 }
0x334b   :  { %5590 = vperm.xlu1 %7537, %v7841_v50   ;;  %5585 = vperm.xlu0 %7536, %v7841_v50   ;;  %v5579_v40 = vsel %vm3564_vm1, %v7841_v50, 0.0 }
0x334f   :  { %7538 = vset.pattern.permute.xlu0 %v10157_v59  ;;  %7539 = vset.pattern.permute.xlu1 %v10189_v20 }
0x3350   :  { %5596 = vperm.xlu0 %7538, %v7841_v50  }
0x3354   :  { %7541 = vset.pattern.permute.xlu0 %v10156_v51 }
0x3393   :  { %v5456_v15 = vpop.permute.xlu1 %5455 }
0x3394   :  { %v9807_v7 = vadd.f32 %v5456_v15, %v5448_v36 }
0x3396   :  { %7842 = vtanh.f32 %v9807_v7 }
0x3397   :  { %v4818_v11 = vpop.permute.xlu1 %4817 }
0x3398   :  { %v4820_v25 = vmul.f32 %v9798_v48, %v4818_v11 }
0x339b   :  { %v5804_v17 = vpop.permute.xlu1 %5803 }
0x339c   :  { %v5806_v49 = vadd.f32 %v5804_v17, %v9655_v16 }
0x339e   :  { %7844 = vtanh.f32 %v5806_v49  ;;  %v7992_v49 = vld [vmem:[#allocation3 + $0x98] sm:$0xff] }
0x339f   :  { %v4828_v63 = vpop.permute.xlu1 %4827 }
0x33a0   :  { %v9811_v18 = vadd.f32 %v4828_v63, %v4820_v25 }
0x33a2   :  { %5016 = vrot.lane.b32.xlu1 %v9811_v18, %s8039_s10 }
0x33a3   :  { %v7843_v52 = vpop.eup %7842 }
0x33a4   :  { %5461 = vrot.lane.b32.xlu0 %v7843_v52, %s8039_s10 }
0x33a5   :  { %v5918_v51 = vpop.permute.xlu1 %5917 }
0x33a6   :  { %v5920_v53 = vmul.f32 %v7829_v23, %v5918_v51  ;;  %5602 = vperm.xlu1 %7539, %v7841_v50  }
0x33a8   :  { %5922 = vrot.lane.b32.xlu0 %v5920_v53, %s8033_s22 }
0x33aa   :  { %7540 = vset.pattern.permute.xlu1 %v10170_v37 }
0x33ab   :  { %v7845_v6 = vpop.eup %7844 }
0x33c6   :  { %v5591_v43 = vpop.permute.xlu1 %5590  ;;  %v5586_v57 = vpop.permute.xlu0 %5585 }
0x33c7   :  { %v5593_v9 = vmul.f32 %v5591_v43, %v9311_v38  ;;  %v5588_v35 = vmul.f32 %v5586_v57, %v8980_v24  ;;  %v7997_v43 = vld [vmem:[#allocation3 + $0x30] sm:$0xff] }
0x33c9   :  { %v5594_v15 = vadd.f32 %v5593_v9, %v5588_v35 }
0x33ca   :  { %5580 = vadd.xlane.f32.xlu1 %v5579_v40  ;;  %v7994_v40 = vld [vmem:[#allocation3 + $0x68] sm:$0xff] }
0x33cb   :  { %v5597_v23 = vpop.permute.xlu0 %5596 }
0x33cc   :  { %v5599_v36 = vmul.f32 %v5597_v23, %v9582_v46 }
0x33ce   :  { %v5600_v17 = vadd.f32 %v5599_v36, %v5594_v15 }
0x33db   :  { %5809 = vrot.lane.b32.xlu1 %v7845_v6, %s8035_s8  ;;  %v7996_v6 = vld [vmem:[#allocation3 + $0x38] sm:$0xff] }
0x3414   :  { %v5017_v19 = vpop.permute.xlu1 %5016 }
0x3415   :  { %v9826_v50 = vsel %vm560_vm12, %v9595_v47, %v5017_v19  ;;  %v7998_v19 = vld [vmem:[#allocation3 + $0x8] sm:$0xff] }
0x3416   :  { %v5462_v25 = vpop.permute.xlu0 %5461 }
0x3417   :  { %v5464_v51 = vmul.f32 %v9790_v28, %v5462_v25  ;;  %v7993_v28 = vld [vmem:[#allocation3 + $0x90] sm:$0xff] }
0x3421   :  { %v5603_v34 = vpop.permute.xlu1 %5602 }
0x3422   :  { %v5605_v11 = vmul.f32 %v5603_v34, %v9826_v50  ;;  %v7999_v34 = vld [vmem:[#allocation3] sm:$0xff] }
0x3424   :  { %v5606_v63 = vadd.f32 %v5605_v11, %v5600_v17 }
0x3453   :  { %v5581_v39 = vpop.xlane.xlu1 %5580 }
0x3454   :  { %7846 = vrcp.f32 %v5581_v39 }
0x3457   :  { %v9839_v47 = vpop.permute.xlu1 %5809 }
0x3461   :  { %v7847_v52 = vpop.eup %7846 }
0x3462   :  { %v9830_v53 = vmul.f32 %v7847_v52, %v5606_v63 }
0x3464   :  { %v5608_v24 = vsel %vm560_vm12, %v9830_v53, %v5464_v51 }
0x3465   :  { %7402 = vmatmul.mubr.msk.f32.vlgmr.msra.gmra.mxu0 %vm161_vm2, %v5608_v24 }
0x3466   :  { %7416 = vmatpush3.msra.mxu0 %v8363_v30  ;;  %7419 = vmatprep.mubr.msk.f32.mxu0 %vm8037_vm6, %v10150_v12  ;;  %v7995_v30 = vld [vmem:[#allocation3 + $0x60] sm:$0xff] }
0x3467   :  { %7417 = vmatprep.subr.mxu0 %v10150_v12 }
0x3468   :  { %7418 = vmatpush3.msra.mxu0 %v8378_v54  ;;  %v5923_v54 = vpop.permute.xlu0 %5922 }
0x3469   :  { %5950 = vmatprep.subr.mxu0 %v7992_v49  ;;  %7420 = vmatmul.mubr.msk.f32.vlgmr.msra.gmra.mxu0 %vm560_vm12, %v9839_v47  ;;  %v8001_v49 = vld [vmem:[#allocation3 + $0xf0] sm:$0xff] }
0x346a   :  { %5951 = vmatpush1.msra.mxu0 %v7993_v28  ;;  %5990 = vmatprep.mubr.f32.mxu0 %v10150_v12  ;;  %v8002_v28 = vld [vmem:[#allocation3 + $0x122] ss:$0 sm:$0xff] }
0x346b   :  { %5952 = vmatprep.subr.mxu0 %v7994_v40 }
0x346c   :  { %5953 = vmatpush1.msra.mxu0 %v7995_v30 }
0x346d   :  { %5954 = vmatprep.subr.mxu0 %v7996_v6 }
0x346e   :  { %5955 = vmatpush1.msra.mxu0 %v7997_v43 }
0x346f   :  { %5956 = vmatprep.subr.mxu0 %v7998_v19 }
0x3470   :  { %5957 = vmatpush1.msra.mxu0 %v7999_v34 }
0x3471   :  { %6794 = vmatmul.mubr.msk.f32.vlgmr.msra.gmra.mxu0 %vm161_vm2, %v5923_v54  ;;  %7422 = vmatprep.subr.mxu0 %v10150_v12 }
0x3472   :  { %7423 = vmatpush3.msra.mxu0 %v9073_v8  ;;  %7438 = vmatprep.mubr.msk.f32.mxu0 %vm8037_vm6, %v10150_v12 }
0x3473   :  { %7424 = vmatprep.subr.mxu0 %v10150_v12 }
0x3474   :  { %7425 = vmatpush3.msra.mxu0 %v9084_v62 }
0x3475   :  { %7426 = vmatprep.subr.mxu0 %v10150_v12 }
0x3476   :  { %7427 = vmatpush3.msra.mxu0 %v10202_v60 }
0x3477   :  { %7428 = vmatprep.subr.mxu0 %v10150_v12 }
0x3478   :  { %7429 = vmatpush3.msra.mxu0 %v10203_v41 }
0x3479   :  { %7430 = vmatprep.subr.mxu0 %v10150_v12 }
0x347a   :  { %7431 = vmatpush3.msra.mxu0 %v10204_v10 }
0x347b   :  { %7432 = vmatprep.subr.mxu0 %v10150_v12 }
0x347c   :  { %7433 = vmatpush3.msra.mxu0 %v10205_v21  ;;  %v8000_v21 = vld [vmem:[#allocation3 + $0x121] ss:$0 sm:$0xff] }
0x347d   :  { %7434 = vmatprep.subr.mxu0 %v10150_v12 }
0x347e   :  { %7435 = vmatpush3.msra.mxu0 %v10206_v2 }
0x347f   :  { %7436 = vmatprep.subr.mxu0 %v10150_v12 }
0x3480   :  { %7437 = vmatpush3.msra.mxu0 %v10207_v0 }
0x3481   :  { %7467 = vmatprep.subr.mxu0 %v10150_v12 }
0x3525   :  { %v9865_v8 = vpop.f32.mrf.mxu0 }
0x3527   :  { %v7403_v62 = vpop.f32.mrf.mxu0 }
0x3528   :  { %v6107_v62 = vsel %vm560_vm12, %v10216_v56, %v9732_v32  ;;  %v10217_v32 = vld [vmem:[#allocation11_spill] sm:$0xff] }
0x3529   :  { %v5879_v60 = vpop.f32.mrf.mxu0 }
0x352a   :  { %v5880_v43 = vadd.f32 %v9660_v44, %v5879_v60  ;;  %v6108_v44 = vsel %vm161_vm2, %v6107_v62, %v9742_v27  ;;  %v10218_v27 = vld [vmem:[#allocation12_spill] sm:$0xff] }
0x352b   :  { %v7421_v41 = vpop.f32.mrf.mxu0 }
0x3531   :  { %v5992_v10 = vpop.f32.mrf.mxu0 }
0x3532   :  { %v5996_v57 = vadd.f32 %v5992_v10, %v9652_v13 }
0x3533   :  { %v5994_v39 = vpop.f32.mrf.mxu0 }
0x3534   :  { %v5997_v23 = vadd.f32 %v8000_v21, %v5996_v57 }
0x3536   :  { %7848 = vtanh.f32 %v5997_v23  ;;  %v6795_v2 = vmul.f32 -1.442695, %v5997_v23 }
0x3538   :  { %7850 = vpow2.f32 %v6795_v2 }
0x3543   :  { %v7849_v9 = vpop.eup %7848 }
0x3544   :  { %6007 = vrot.lane.b32.xlu1 %v7849_v9, %s8031_s18 }
0x3545   :  { %v7851_v0 = vpop.eup %7850 }
0x3546   :  { %v6001_v35 = vadd.f32 1.0, %v7851_v0 }
0x3548   :  { %7852 = vrcp.f32 %v6001_v35 }
0x3555   :  { %v7853_v36 = vpop.eup %7852 }
0x3556   :  { %v6005_v17 = vmul.f32 %v7853_v36, %v9636_v3 }
0x35b6   :  { %v6008_v15 = vpop.permute.xlu1 %6007 }
0x35b7   :  { %v6010_v11 = vmul.f32 %v7853_v36, %v6008_v15 }
0x35b9   :  { %6012 = vrot.lane.b32.xlu0 %v6010_v11, %s8033_s22  ;;  %v10219_v11 = vld [vmem:[#allocation31_spill] sm:$0xff] }
0x362b   :  { %v6013_v13 = vpop.permute.xlu0 %6012 }
0x362c   :  { %v6015_v25 = vadd.f32 %v6013_v13, %v6005_v17  ;;  %v9920_v17 = vadd.f32 %v10219_v11, %v9865_v8 }
0x362e   :  { %7854 = vtanh.f32 %v6015_v25 }
0x363b   :  { %v7855_v63 = vpop.eup %7854 }
0x363c   :  { %6018 = vrot.lane.b32.xlu1 %v7855_v63, %s8031_s18 }
0x3640   :  { %6099 = vrot.lane.b32.xlu1 %v9781_v55, %s8038_s0 }
0x36ae   :  { %v6019_v52 = vpop.permute.xlu1 %6018 }
0x36af   :  { %v6021_v51 = vmul.f32 %v7853_v36, %v6019_v52 }
0x36b1   :  { %6023 = vrot.lane.b32.xlu0 %v6021_v51, %s8033_s22 }
0x36b2   :  { %v6100_v30 = vpop.permute.xlu1 %6099 }
0x3723   :  { %v6024_v24 = vpop.permute.xlu0 %6023 }
0x3724   :  { %6796 = vmatmul.mubr.msk.f32.vlgmr.msra.gmra.mxu1 %vm161_vm2, %v6024_v24 }
0x3725   :  { %7442 = vmatpush3.msra.mxu1 %v8001_v49  ;;  %7445 = vmatprep.mubr.msk.f32.mxu1 %vm8037_vm6, %v10150_v12 }
0x3726   :  { %7443 = vmatprep.subr.mxu1 %v10150_v12 }
0x3727   :  { %7444 = vmatpush3.msra.mxu1 %v9648_v29 }
0x3728   :  { %7448 = vmatprep.subr.mxu1 %v10150_v12 }
0x37e4   :  { %v6093_v3 = vpop.f32.mrf.mxu1 }
0x37e6   :  { %v6094_v55 = vpop.f32.mrf.mxu1 }
0x37e7   :  { %v9881_v40 = vadd.f32 %v8002_v28, %v6094_v55  ;;  %v10221_v55 = vld [vmem:[#allocation7_spill] sm:$0xff] }
0x37e9   :  { %v6102_v6 = vadd.f32 %v6100_v30, %v9881_v40 }
0x37eb   :  { %6114 = vrot.lane.b32.xlu1 %v6102_v6, %s8040_s11  ;;  %6111 = vrot.lane.b32.xlu0 %v6102_v6, %s8041_s12 }
0x37ef   :  { %6104 = vrot.lane.b32.xlu1 %v5880_v43, %s8027_s13  ;;  %6117 = vrot.lane.b32.xlu0 %v6102_v6, %s8044_s15 }
0x37f3   :  { %6120 = vrot.lane.b32.xlu0 %v6102_v6, %s8030_s16 }
0x37f7   :  { %6338 = vrot.lane.b32.xlu0 %v9865_v8, %s8035_s8 }
0x385d   :  { %v6115_v29 = vpop.permute.xlu1 %6114  ;;  %v6112_v19 = vpop.permute.xlu0 %6111 }
0x385e   :  { %v6123_v41 = vsel %vm560_vm12, %v6112_v19, %v6115_v29 }
0x3861   :  { %v6118_v54 = vpop.permute.xlu0 %6117  ;;  %v6105_v34 = vpop.permute.xlu1 %6104 }
0x3862   :  { %v6124_v60 = vsel %vm161_vm2, %v6123_v41, %v6118_v54  ;;  %v6109_v57 = vsel %vm2583_vm14, %v6108_v44, %v6105_v34 }
0x3865   :  { %v6121_v10 = vpop.permute.xlu0 %6120 }
0x3866   :  { %v6125_v39 = vsel %vm2583_vm14, %v6124_v60, %v6121_v10 }
0x3867   :  { %v6126_v21 = vadd.f32 %v6125_v39, %v6109_v57 }
0x3869   :  { %7856 = vtanh.f32 %v6126_v21  ;;  %v6339_v13 = vpop.permute.xlu0 %6338  ;;  %v10222_v21 = vld [vmem:[#allocation45_spill] sm:$0xff] }
0x386a   :  { %v6341_v25 = vadd.f32 %v6339_v13, %v9881_v40 }
0x3876   :  { %v7857_v23 = vpop.eup %7856 }
0x3877   :  { %7439 = vmatmul.mubr.msk.f32.vlgmr.msra.gmra.mxu0 %vm300_vm3, %v7857_v23 }
0x3878   :  { %7468 = vmatpush3.msra.mxu0 %v8300_v58  ;;  %7475 = vmatprep.mubr.msk.f32.mxu0 %vm8037_vm6, %v10150_v12 }
0x3879   :  { %7469 = vmatprep.subr.mxu0 %v10150_v12 }
0x387a   :  { %7470 = vmatpush3.msra.mxu0 %v10167_v22 }
0x387b   :  { %7471 = vmatprep.subr.mxu0 %v10150_v12 }
0x387c   :  { %7472 = vmatpush3.msra.mxu0 %v10217_v32 }
0x387d   :  { %7473 = vmatprep.subr.mxu0 %v10150_v12 }
0x387e   :  { %7474 = vmatpush3.msra.mxu0 %v10218_v27 }
0x3937   :  { %v6197_v9 = vpop.f32.mrf.mxu0 }
0x3938   :  { %v6201_v2 = vsel %vm3564_vm1, %v6197_v9, -inf }
0x3939   :  { %6202 = vmax.xlane.f32.xlu1 %v6201_v2  ;;  %v7440_v58 = vpop.f32.mrf.mxu0 }
0x39c2   :  { %v6203_v0 = vpop.xlane.xlu1 %6202 }
0x39c3   :  { %v6204_v35 = vsub.f32 %v6197_v9, %v6203_v0 }
0x39c5   :  { %v6205_v36 = vmul.f32 1.442695, %v6204_v35 }
0x39c7   :  { %7858 = vpow2.f32 %v6205_v36 }
0x39c8   :  { %7860 = vtanh.f32 %v9920_v17 }
0x39d4   :  { %v7859_v15 = vpop.eup %7858 }
0x39d5   :  { %6213 = vperm.xlu1 %7540, %v7859_v15   ;;  %v6207_v22 = vsel %vm3564_vm1, %v7859_v15, 0.0 }
0x39d6   :  { %6208 = vadd.xlane.f32.xlu0 %v6207_v22 }
0x39d9   :  { %7542 = vset.pattern.permute.xlu1 %v10157_v59 }
0x39da   :  { %6224 = vperm.xlu1 %7542, %v7859_v15  }
0x39de   :  { %7543 = vset.pattern.permute.xlu1 %v10189_v20 }
0x39df   :  { %6230 = vperm.xlu1 %7543, %v7859_v15  }
0x39e3   :  { %5885 = vrot.lane.b32.xlu1 %v9807_v7, %s8039_s10  ;;  %v7861_v7 = vpop.eup %7860 }
0x39e4   :  { %7544 = vset.pattern.permute.xlu1 %v10170_v37  ;;  %v10220_v37 = vld [vmem:[#allocation30_spill] sm:$0xff] }
0x39e7   :  { %6342 = vrot.lane.b32.xlu1 %v10216_v56, %s8034_s29 }
0x39eb   :  { %6355 = vrot.lane.b32.xlu1 %v6341_v25, %s8036_s9 }
0x39ec   :  { %6218 = vperm.xlu0 %7541, %v7859_v15  }
0x39ef   :  { %6358 = vrot.lane.b32.xlu1 %v6341_v25, %s8041_s12 }
0x39f0   :  { %6361 = vrot.lane.b32.xlu0 %v6341_v25, %s8040_s11 }
0x39f3   :  { %6345 = vrot.lane.b32.xlu1 %v10220_v37, %s8039_s10 }
0x39f4   :  { %6364 = vrot.lane.b32.xlu0 %v6341_v25, %s8044_s15 }
0x39f7   :  { %6348 = vrot.lane.b32.xlu1 %v5880_v43, %s8033_s22 }
0x39f8   :  { %5696 = vrot.lane.b32.xlu0 %v7861_v7, %s8034_s29 }
0x3a50   :  { %v6214_v56 = vpop.permute.xlu1 %6213 }
0x3a51   :  { %v6216_v28 = vmul.f32 %v6214_v56, %v10221_v55 }
0x3a55   :  { %v6225_v8 = vpop.permute.xlu1 %6224 }
0x3a56   :  { %v6227_v43 = vmul.f32 %v6225_v8, %v9728_v1 }
0x3a5a   :  { %v6231_v63 = vpop.permute.xlu1 %6230 }
0x3a5e   :  { %v5886_v52 = vpop.permute.xlu1 %5885 }
0x3a5f   :  { %v6209_v51 = vpop.xlane.xlu0 %6208  ;;  %v5888_v6 = vsel %vm560_vm12, %v9839_v47, %v5886_v52 }
0x3a60   :  { %7862 = vrcp.f32 %v6209_v51  ;;  %v6233_v34 = vmul.f32 %v6231_v63, %v5888_v6 }
0x3a62   :  { %v6343_v24 = vpop.permute.xlu1 %6342 }
0x3a66   :  { %v6356_v49 = vpop.permute.xlu1 %6355 }
0x3a67   :  { %v6219_v3 = vpop.permute.xlu0 %6218 }
0x3a68   :  { %v6221_v30 = vmul.f32 %v6219_v3, %v9473_v31  ;;  %v6351_v31 = vsel %vm560_vm12, %v6343_v24, %v10222_v21 }
0x3a6a   :  { %v6222_v29 = vadd.f32 %v6221_v30, %v6216_v28  ;;  %v6359_v19 = vpop.permute.xlu1 %6358 }
0x3a6b   :  { %v6362_v54 = vpop.permute.xlu0 %6361  ;;  %v6367_v10 = vsel %vm560_vm12, %v6356_v49, %v6359_v19 }
0x3a6c   :  { %v6228_v62 = vadd.f32 %v6227_v43, %v6222_v29  ;;  %v6368_v23 = vsel %vm161_vm2, %v6367_v10, %v6362_v54 }
0x3a6d   :  { %v7863_v60 = vpop.eup %7862 }
0x3a6e   :  { %v6234_v41 = vadd.f32 %v6233_v34, %v6228_v62  ;;  %v6346_v44 = vpop.permute.xlu1 %6345 }
0x3a6f   :  { %v6365_v57 = vpop.permute.xlu0 %6364  ;;  %v6352_v32 = vsel %vm161_vm2, %v6351_v31, %v6346_v44  ;;  %v10223_v44 = vld [vmem:[#allocation10_spill] sm:$0xff] }
0x3a70   :  { %v6235_v39 = vmul.f32 %v7863_v60, %v6234_v41  ;;  %v6369_v27 = vsel %vm2583_vm14, %v6368_v23, %v6365_v57 }
0x3a72   :  { %v6349_v1 = vpop.permute.xlu1 %6348  ;;  %6317 = vrot.lane.b32.xlu0 %v6235_v39, %s8034_s29  ;;  %7446 = vmatmul.mubr.msk.f32.vlgmr.msra.gmra.mxu1 %vm560_vm12, %v6235_v39 }
0x3a73   :  { %v6353_v9 = vsel %vm2583_vm14, %v6352_v32, %v6349_v1  ;;  %7449 = vmatpush3.msra.mxu1 %v9176_v61  ;;  %7464 = vmatprep.mubr.msk.f32.mxu1 %vm8037_vm6, %v10150_v12  ;;  %v5697_v7 = vpop.permute.xlu0 %5696  ;;  %v10224_v1 = vld [vmem:[#allocation40_spill] sm:$0xff]  ;;  %vm6661_vm6 = vcmask 195584  }
0x3a74   :  { %v6370_v2 = vadd.f32 %v6369_v27, %v6353_v9  ;;  %7450 = vmatprep.subr.mxu1 %v10150_v12 }
0x3a75   :  { %7451 = vmatpush3.msra.mxu1 %v9194_v5 }
0x3a76   :  { %7864 = vtanh.f32 %v6370_v2  ;;  %7452 = vmatprep.subr.mxu1 %v10150_v12 }
0x3a77   :  { %7453 = vmatpush3.msra.mxu1 %v9188_v33  ;;  %v5895_v33 = vld [vmem:[#allocation2 + $0x78] sm:$0x3] }
0x3a78   :  { %7454 = vmatprep.subr.mxu1 %v10150_v12 }
0x3a79   :  { %7455 = vmatpush3.msra.mxu1 %v9202_v14 }
0x3a7a   :  { %7456 = vmatprep.subr.mxu1 %v10150_v12 }
0x3a7b   :  { %7457 = vmatpush3.msra.mxu1 %v9199_v4 }
0x3a7c   :  { %7458 = vmatprep.subr.mxu1 %v10150_v12 }
0x3a7d   :  { %7459 = vmatpush3.msra.mxu1 %v9208_v26 }
0x3a7e   :  { %7460 = vmatprep.subr.mxu1 %v10150_v12 }
0x3a7f   :  { %7461 = vmatpush3.msra.mxu1 %v9211_v45 }
0x3a80   :  { %7462 = vmatprep.subr.mxu1 %v10150_v12  ;;  %v6789_v12 = vmul.f32 -1.442695, %v9920_v17 }
0x3a81   :  { %7463 = vmatpush3.msra.mxu1 %v9216_v42 }
0x3a83   :  { %v7865_v61 = vpop.eup %7864 }
0x3a84   :  { %7465 = vmatmul.mubr.msk.f32.vlgmr.msra.gmra.mxu1 %vm300_vm3, %v7865_v61 }
0x3b32   :  { %v6305_v5 = vpop.f32.mrf.mxu1 }
0x3b33   :  { %v6309_v14 = vadd.f32 %v6305_v5, %v5895_v33 }
0x3b34   :  { %v7447_v58 = vpop.f32.mrf.mxu1 }
0x3b35   :  { %7866 = vtanh.f32 %v6309_v14  ;;  %v6799_v45 = vmul.f32 -1.442695, %v6309_v14 }
0x3b37   :  { %7868 = vpow2.f32 %v6799_v45 }
0x3b38   :  { %7870 = vpow2.f32 %v6789_v12 }
0x3b42   :  { %v7867_v4 = vpop.eup %7866 }
0x3b43   :  { %6322 = vrot.lane.b32.xlu1 %v7867_v4, %s8034_s29 }
0x3b44   :  { %v6441_v26 = vpop.f32.mrf.mxu1  ;;  %v7869_v42 = vpop.eup %7868 }
0x3b45   :  { %v6445_v35 = vsel %vm3564_vm1, %v6441_v26, -inf  ;;  %v6313_v36 = vadd.f32 1.0, %v7869_v42  ;;  %v7871_v15 = vpop.eup %7870  ;;  %v10227_v42 = vld [vmem:[#allocation18_spill] sm:$0xff] }
0x3b46   :  { %v7466_v0 = vpop.f32.mrf.mxu1  ;;  %v5686_v22 = vadd.f32 1.0, %v7871_v15 }
0x3b47   :  { %7872 = vrcp.f32 %v6313_v36  ;;  %v10225_v0 = vld [vmem:[#allocation16_spill] sm:$0xff] }
0x3b48   :  { %7874 = vrcp.f32 %v5686_v22 }
0x3b54   :  { %v7873_v13 = vpop.eup %7872 }
0x3b55   :  { %v9972_v56 = vpop.eup %7874 }
0x3b56   :  { %v5699_v17 = vmul.f32 %v9972_v56, %v5697_v7 }
0x3b67   :  { %6446 = vmax.xlane.f32.xlu1 %v6445_v35  ;;  %v10226_v35 = vld [vmem:[#allocation21_spill] sm:$0xff] }
0x3bb5   :  { %v6323_v25 = vpop.permute.xlu1 %6322 }
0x3bb6   :  { %v6325_v37 = vmul.f32 %v7873_v13, %v6323_v25 }
0x3bb8   :  { %6327 = vrot.lane.b32.xlu0 %v6325_v37, %s8032_s19 }
0x3bbc   :  { %5691 = vrot.lane.b32.xlu0 %v9830_v53, %s8034_s29  ;;  %v6318_v53 = vpop.permute.xlu0 %6317 }
0x3bbd   :  { %v6320_v49 = vmul.f32 %v7873_v13, %v6318_v53 }
0x3bc0   :  { %5701 = vrot.lane.b32.xlu0 %v5699_v17, %s8032_s19  ;;  %v10228_v17 = vld [vmem:[#allocation9_spill] sm:$0xff] }
0x3bf0   :  { %v6447_v8 = vpop.xlane.xlu1 %6446 }
0x3bf1   :  { %v6448_v63 = vsub.f32 %v6441_v26, %v6447_v8 }
0x3bf3   :  { %v6449_v52 = vmul.f32 1.442695, %v6448_v63 }
0x3bf5   :  { %7876 = vpow2.f32 %v6449_v52 }
0x3c02   :  { %v7877_v51 = vpop.eup %7876 }
0x3c03   :  { %6457 = vperm.xlu1 %7544, %v7877_v51   ;;  %v6451_v24 = vsel %vm3564_vm1, %v7877_v51, 0.0 }
0x3c04   :  { %6452 = vadd.xlane.f32.xlu0 %v6451_v24 }
0x3c07   :  { %7545 = vset.pattern.permute.xlu1 %v10157_v59 }
0x3c08   :  { %6468 = vperm.xlu1 %7545, %v7877_v51  }
0x3c0c   :  { %7546 = vset.pattern.permute.xlu1 %v10189_v20 }
0x3c0d   :  { %6474 = vperm.xlu1 %7546, %v7877_v51  }
0x3c1a   :  { %6462 = vperm.xlu0 %7541, %v7877_v51  }
0x3c1e   :  { %7547 = vset.pattern.permute.xlu0 %v10189_v20 }
0x3c2a   :  { %v6328_v3 = vpop.permute.xlu0 %6327 }
0x3c2b   :  { %v6330_v55 = vadd.f32 %v6328_v3, %v6320_v49  ;;  %v10229_v3 = vld [vmem:[#allocation20_spill] sm:$0xff] }
0x3c2d   :  { %7878 = vtanh.f32 %v6330_v55 }
0x3c2e   :  { %v5692_v28 = vpop.permute.xlu0 %5691 }
0x3c2f   :  { %v5694_v30 = vmul.f32 %v9972_v56, %v5692_v28 }
0x3c32   :  { %v5702_v6 = vpop.permute.xlu0 %5701 }
0x3c33   :  { %v5704_v43 = vadd.f32 %v5702_v6, %v5694_v30  ;;  %v10230_v6 = vld [vmem:[#allocation13_spill] sm:$0xff] }
0x3c35   :  { %5890 = vrot.lane.b32.xlu1 %v5704_v43, %s8039_s10 }
0x3c3a   :  { %v7879_v59 = vpop.eup %7878 }
0x3c3b   :  { %6333 = vrot.lane.b32.xlu1 %v7879_v59, %s8039_s10 }
0x3c7e   :  { %v6458_v29 = vpop.permute.xlu1 %6457 }
0x3c7f   :  { %v6460_v62 = vmul.f32 %v6458_v29, %v9311_v38  ;;  %v10231_v29 = vld [vmem:[#allocation15_spill] sm:$0xff] }
0x3c83   :  { %v6469_v54 = vpop.permute.xlu1 %6468 }
0x3c84   :  { %v6471_v10 = vmul.f32 %v6469_v54, %v9826_v50 }
0x3c88   :  { %v6475_v41 = vpop.permute.xlu1 %6474 }
0x3c8d   :  { %v6453_v19 = vpop.xlane.xlu0 %6452 }
0x3c8e   :  { %7880 = vrcp.f32 %v6453_v19 }
0x3c8f   :  { %7882 = vtanh.f32 %v10223_v44 }
0x3c90   :  { %7884 = vtanh.f32 %v10224_v1 }
0x3c91   :  { %7886 = vtanh.f32 %v9811_v18 }
0x3c95   :  { %v6463_v34 = vpop.permute.xlu0 %6462 }
0x3c96   :  { %v6465_v20 = vmul.f32 %v6463_v34, %v9582_v46 }
0x3c98   :  { %v6466_v60 = vadd.f32 %v6465_v20, %v6460_v62 }
0x3c9a   :  { %v6472_v21 = vadd.f32 %v6471_v10, %v6466_v60 }
0x3c9b   :  { %v7881_v32 = vpop.eup %7880 }
0x3c9c   :  { %v7883_v50 = vpop.eup %7882 }
0x3c9d   :  { %v7885_v2 = vpop.eup %7884 }
0x3c9e   :  { %v7887_v61 = vpop.eup %7886 }
0x3ca7   :  { %v5891_v57 = vpop.permute.xlu1 %5890 }
0x3ca8   :  { %v5893_v39 = vsel %vm560_vm12, %v9839_v47, %v5891_v57  ;;  %v651_v47 = vld [vmem:[#allocation3 + $0x125] ss:$0 sm:$0xff] }
0x3ca9   :  { %v6477_v31 = vmul.f32 %v6475_v41, %v5893_v39  ;;  %v10232_v41 = vld [vmem:[#allocation39_spill] sm:$0xff] }
0x3cab   :  { %v6478_v23 = vadd.f32 %v6477_v31, %v6472_v21 }
0x3cad   :  { %v6479_v27 = vmul.f32 %v7881_v32, %v6478_v23  ;;  %v6334_v46 = vpop.permute.xlu1 %6333 }
0x3cae   :  { %v6336_v9 = vmul.f32 %v7873_v13, %v6334_v46 }
0x3caf   :  { %6563 = vrot.lane.b32.xlu0 %v6479_v27, %s8034_s29 }
0x3cb0   :  { %v6480_v38 = vsel %vm560_vm12, %v6479_v27, %v6336_v9 }
0x3cb1   :  { %7476 = vmatmul.mubr.msk.f32.vlgmr.msra.gmra.mxu0 %vm161_vm2, %v6480_v38 }
0x3cb3   :  { %647 = vrot.lane.b32.xlu0 %v7883_v50, %s8034_s29 }
0x3cb7   :  { %653 = vrot.lane.b32.xlu0 %v651_v47, %s8039_s10 }
0x3cbb   :  { %3030 = vrot.lane.b32.xlu0 %v7885_v2, %s8039_s10 }
0x3cbf   :  { %4833 = vrot.lane.b32.xlu0 %v7887_v61, %s8039_s10 }
0x3d21   :  { %v6564_v15 = vpop.permute.xlu0 %6563 }
0x3d25   :  { %v648_v13 = vpop.permute.xlu0 %647 }
0x3d26   :  { %v650_v8 = vmul.f32 %v10228_v17, %v648_v13  ;;  %v10236_v13 = vld [vmem:[#allocation17_spill] sm:$0xff] }
0x3d29   :  { %v654_v7 = vpop.permute.xlu0 %653 }
0x3d2a   :  { %v656_v63 = vmul.f32 %v654_v7, %v650_v8 }
0x3d2d   :  { %v3031_v59 = vpop.permute.xlu0 %3030 }
0x3d2e   :  { %v3033_v44 = vmul.f32 %v10232_v41, %v3031_v59 }
0x3d30   :  { %v3034_v39 = vmul.f32 %v3033_v44, %v654_v7 }
0x3d31   :  { %v4834_v57 = vpop.permute.xlu0 %4833 }
0x3d32   :  { %v4836_v21 = vmul.f32 %v9798_v48, %v4834_v57 }
0x3d34   :  { %v4837_v31 = vmul.f32 %v4836_v21, %v654_v7 }
0x3d71   :  { %v6550_v33 = vpop.f32.mrf.mxu0 }
0x3d72   :  { %v6554_v5 = vadd.f32 %v10219_v11, %v6550_v33 }
0x3d73   :  { %v7477_v14 = vpop.f32.mrf.mxu0 }
0x3d74   :  { %7888 = vtanh.f32 %v6554_v5  ;;  %v6802_v58 = vmul.f32 -1.442695, %v6554_v5 }
0x3d76   :  { %7890 = vpow2.f32 %v6802_v58  ;;  %v10031_v58 = vld [vmem:[#allocation3 + $0x126] ss:$0 sm:$0xff] }
0x3d81   :  { %v7889_v18 = vpop.eup %7888 }
0x3d82   :  { %6568 = vrot.lane.b32.xlu1 %v7889_v18, %s8034_s29 }
0x3d83   :  { %v7891_v4 = vpop.eup %7890 }
0x3d84   :  { %v6558_v26 = vadd.f32 1.0, %v7891_v4 }
0x3d86   :  { %7892 = vrcp.f32 %v6558_v26 }
0x3d87   :  { %7894 = vtanh.f32 %v10225_v0 }
0x3d88   :  { %7896 = vtanh.f32 %v10226_v35  ;;  %v10233_v35 = vld [vmem:[#allocation8_spill] sm:$0xff] }
0x3d89   :  { %7898 = vtanh.f32 %v10227_v42 }
0x3d8a   :  { %7900 = vtanh.f32 %v5704_v43 }
0x3d93   :  { %v7893_v45 = vpop.eup %7892 }
0x3d94   :  { %v7895_v11 = vpop.eup %7894  ;;  %v6566_v52 = vmul.f32 %v7893_v45, %v6564_v15 }
0x3d95   :  { %v7897_v22 = vpop.eup %7896 }
0x3d96   :  { %v7899_v25 = vpop.eup %7898 }
0x3d97   :  { %v7901_v37 = vpop.eup %7900 }
0x3df4   :  { %v6569_v12 = vpop.permute.xlu1 %6568 }
0x3df5   :  { %v6571_v36 = vmul.f32 %v7893_v45, %v6569_v12 }
0x3df7   :  { %6573 = vrot.lane.b32.xlu1 %v6571_v36, %s8032_s19  ;;  %s8052_s19 = smov 68  }
0x3dfb   :  { %1286 = vrot.lane.b32.xlu1 %v7895_v11, %s8039_s10 }
0x3dff   :  { %2136 = vrot.lane.b32.xlu1 %v7897_v22, %s8039_s10  ;;  %v10235_v22 = vld [vmem:[#allocation14_spill] sm:$0xff] }
0x3e03   :  { %3959 = vrot.lane.b32.xlu1 %v7899_v25, %s8039_s10  ;;  %v10237_v25 = vld [vmem:[#allocation44_spill] sm:$0xff] }
0x3e07   :  { %5707 = vrot.lane.b32.xlu1 %v7901_v37, %s8039_s10 }
0x3e0b   :  { %658 = vrot.lane.b32.xlu1 %v656_v63, %s8034_s29 }
0x3e69   :  { %v6574_v51 = vpop.permute.xlu1 %6573 }
0x3e6a   :  { %v6576_v24 = vadd.f32 %v6574_v51, %v6566_v52 }
0x3e6c   :  { %7902 = vtanh.f32 %v6576_v24 }
0x3e6d   :  { %v1287_v53 = vpop.permute.xlu1 %1286 }
0x3e6e   :  { %v1289_v19 = vmul.f32 %v10231_v29, %v1287_v53 }
0x3e70   :  { %v1290_v60 = vmul.f32 %v1289_v19, %v654_v7 }
0x3e71   :  { %v2137_v49 = vpop.permute.xlu1 %2136 }
0x3e72   :  { %v2139_v55 = vmul.f32 %v10229_v3, %v2137_v49 }
0x3e74   :  { %v2140_v28 = vmul.f32 %v2139_v55, %v654_v7 }
0x3e75   :  { %v3960_v30 = vpop.permute.xlu1 %3959 }
0x3e76   :  { %v3962_v43 = vmul.f32 %v10230_v6, %v3960_v30  ;;  %2142 = vrot.lane.b32.xlu1 %v2140_v28, %s8034_s29 }
0x3e78   :  { %v3963_v54 = vmul.f32 %v3962_v43, %v654_v7 }
0x3e79   :  { %v7903_v34 = vpop.eup %7902  ;;  %v5708_v20 = vpop.permute.xlu1 %5707 }
0x3e7a   :  { %v5710_v62 = vmul.f32 %v9972_v56, %v5708_v20  ;;  %3965 = vrot.lane.b32.xlu1 %v3963_v54, %s8034_s29  ;;  %6579 = vrot.lane.b32.xlu0 %v7903_v34, %s8039_s10 }
0x3e7c   :  { %v5711_v10 = vmul.f32 %v5710_v62, %v654_v7 }
0x3e7d   :  { %v659_v56 = vpop.permute.xlu1 %658 }
0x3e7e   :  { %5713 = vrot.lane.b32.xlu1 %v5711_v10, %s8034_s29  ;;  %1292 = vrot.lane.b32.xlu0 %v1290_v60, %s8034_s29  ;;  %v662_v23 = vsel %vm661_vm4, %v659_v56, 0.0 }
0x3e82   :  { %3036 = vrot.lane.b32.xlu0 %v3034_v39, %s8034_s29 }
0x3e86   :  { %4839 = vrot.lane.b32.xlu0 %v4837_v31, %s8034_s29 }
0x3ea2   :  { %663 = vadd.xlane.f32.xlu1 %v662_v23 }
0x3ee8   :  { %v2143_v47 = vpop.permute.xlu1 %2142 }
0x3ee9   :  { %v2145_v33 = vsel %vm661_vm4, %v2143_v47, 0.0 }
0x3eec   :  { %v6580_v32 = vpop.permute.xlu0 %6579  ;;  %v3966_v61 = vpop.permute.xlu1 %3965 }
0x3eed   :  { %v6582_v1 = vmul.f32 %v7893_v45, %v6580_v32  ;;  %v3968_v5 = vsel %vm661_vm4, %v3966_v61, 0.0  ;;  %v10234_v45 = vld [vmem:[#allocation23_spill] sm:$0xff] }
0x3eef   :  { %v6583_v27 = vmul.f32 %v6582_v1, %v654_v7 }
0x3ef0   :  { %v1293_v46 = vpop.permute.xlu0 %1292  ;;  %v5714_v14 = vpop.permute.xlu1 %5713 }
0x3ef1   :  { %6585 = vrot.lane.b32.xlu0 %v6583_v27, %s8034_s29  ;;  %v1295_v2 = vsel %vm661_vm4, %v1293_v46, 0.0  ;;  %v5716_v18 = vsel %vm661_vm4, %v5714_v14, 0.0 }
0x3ef4   :  { %v3037_v9 = vpop.permute.xlu0 %3036 }
0x3ef5   :  { %v3039_v38 = vsel %vm661_vm4, %v3037_v9, 0.0 }
0x3ef6   :  { %3040 = vadd.xlane.f32.xlu1 %v3039_v38 }
0x3ef8   :  { %v4840_v48 = vpop.permute.xlu0 %4839 }
0x3ef9   :  { %v4842_v50 = vsel %vm661_vm4, %v4840_v48, 0.0 }
0x3efa   :  { %4843 = vadd.xlane.f32.xlu1 %v4842_v50 }
0x3f10   :  { %1296 = vadd.xlane.f32.xlu0 %v1295_v2 }
0x3f14   :  { %2146 = vadd.xlane.f32.xlu0 %v2145_v33 }
0x3f18   :  { %3969 = vadd.xlane.f32.xlu0 %v3968_v5  ;;  %v10238_v5 = vld [vmem:[#allocation6_spill] sm:$0xff] }
0x3f1c   :  { %5717 = vadd.xlane.f32.xlu0 %v5716_v18 }
0x3f2b   :  { %v664_v4 = vpop.xlane.xlu1 %663 }
0x3f2c   :  { %v666_v26 = vadd.f32 %v10031_v58, %v664_v4 }
0x3f2e   :  { %v6714_v0 = vmul.f32 -1.442695, %v666_v26 }
0x3f30   :  { %7904 = vpow2.f32 %v6714_v0 }
0x3f32   :  { %6599 = vrot.lane.b32.xlu0 %v10233_v35, %s8040_s11 }
0x3f36   :  { %6611 = vrot.lane.b32.xlu0 %v10234_v45, %s8033_s22 }
0x3f3a   :  { %6619 = vrot.lane.b32.xlu0 %v9655_v16, %s8027_s13  ;;  %s8047_s13 = smov 56  }
0x3f3d   :  { %v7905_v12 = vpop.eup %7904 }
0x3f3e   :  { %v670_v42 = vadd.f32 1.0, %v7905_v12 }
0x3f40   :  { %7906 = vrcp.f32 %v670_v42 }
0x3f4d   :  { %v7907_v36 = vpop.eup %7906 }
0x3f4e   :  { %6627 = vrot.lane.b32.xlu0 %v7907_v36, %s8031_s18  ;;  %s8051_s18 = smov 69  }
0x3f63   :  { %v6586_v11 = vpop.permute.xlu0 %6585 }
0x3f64   :  { %v6588_v15 = vsel %vm661_vm4, %v6586_v11, 0.0 }
0x3f65   :  { %6589 = vadd.xlane.f32.xlu1 %v6588_v15 }
0x3f76   :  { %6603 = vrot.lane.b32.xlu1 %v10235_v22, %s8039_s10 }
0x3f7a   :  { %6607 = vrot.lane.b32.xlu1 %v10236_v13, %s8044_s15 }
0x3f7e   :  { %6615 = vrot.lane.b32.xlu1 %v10237_v25, %s8030_s16  ;;  %s8048_s16 = smov 65  }
0x3f7f   :  { %v3041_v16 = vpop.xlane.xlu1 %3040 }
0x3f80   :  { %v3042_v37 = vadd.f32 %v3041_v16, %v10031_v58 }
0x3f82   :  { %6623 = vrot.lane.b32.xlu1 %v9881_v40, %s8047_s13  ;;  %v6751_v17 = vmul.f32 -1.442695, %v3042_v37 }
0x3f83   :  { %v4844_v7 = vpop.xlane.xlu1 %4843 }
0x3f84   :  { %v4845_v8 = vadd.f32 %v4844_v7, %v10031_v58  ;;  %7908 = vpow2.f32 %v6751_v17 }
0x3f86   :  { %v6777_v24 = vmul.f32 -1.442695, %v4845_v8 }
0x3f91   :  { %v7909_v59 = vpop.eup %7908 }
0x3f92   :  { %v3046_v54 = vadd.f32 1.0, %v7909_v59 }
0x3f99   :  { %v1297_v63 = vpop.xlane.xlu0 %1296 }
0x3f9a   :  { %v1298_v52 = vadd.f32 %v1297_v63, %v10031_v58 }
0x3f9c   :  { %v6725_v51 = vmul.f32 -1.442695, %v1298_v52 }
0x3f9d   :  { %v2147_v53 = vpop.xlane.xlu0 %2146 }
0x3f9e   :  { %7910 = vpow2.f32 %v6725_v51  ;;  %v2148_v49 = vadd.f32 %v2147_v53, %v10031_v58 }
0x3f9f   :  { %7912 = vpow2.f32 %v6777_v24 }
0x3fa0   :  { %v6738_v3 = vmul.f32 -1.442695, %v2148_v49 }
0x3fa1   :  { %v3970_v40 = vpop.xlane.xlu0 %3969 }
0x3fa2   :  { %7914 = vpow2.f32 %v6738_v3  ;;  %v3971_v55 = vadd.f32 %v3970_v40, %v10031_v58 }
0x3fa4   :  { %v6764_v28 = vmul.f32 -1.442695, %v3971_v55 }
0x3fa5   :  { %v5718_v30 = vpop.xlane.xlu0 %5717 }
0x3fa6   :  { %7916 = vpow2.f32 %v6764_v28  ;;  %v5719_v6 = vadd.f32 %v5718_v30, %v10031_v58 }
0x3fa8   :  { %v6790_v43 = vmul.f32 -1.442695, %v5719_v6 }
0x3fa9   :  { %v6600_v47 = vpop.permute.xlu0 %6599 }
0x3faa   :  { %7918 = vpow2.f32 %v6790_v43  ;;  %v6659_v14 = vsel %vm6658_vm5, %v10238_v5, %v6600_v47 }
0x3fab   :  { %v7911_v29 = vpop.eup %7910 }
0x3fac   :  { %v1302_v19 = vadd.f32 1.0, %v7911_v29  ;;  %v7913_v34 = vpop.eup %7912 }
0x3fad   :  { %v4849_v41 = vadd.f32 1.0, %v7913_v34  ;;  %v6612_v61 = vpop.permute.xlu0 %6611 }
0x3fae   :  { %7920 = vrcp.f32 %v1302_v19 }
0x3faf   :  { %v7915_v20 = vpop.eup %7914  ;;  %7922 = vrcp.f32 %v3046_v54 }
0x3fb0   :  { %v2152_v62 = vadd.f32 1.0, %v7915_v20 }
0x3fb1   :  { %v6620_v18 = vpop.permute.xlu0 %6619 }
0x3fb2   :  { %7924 = vrcp.f32 %v2152_v62 }
0x3fb3   :  { %v7917_v44 = vpop.eup %7916  ;;  %7926 = vrcp.f32 %v4849_v41 }
0x3fb4   :  { %v3975_v60 = vadd.f32 1.0, %v7917_v44 }
0x3fb6   :  { %7928 = vrcp.f32 %v3975_v60 }
0x3fb7   :  { %v7919_v10 = vpop.eup %7918 }
0x3fb8   :  { %v5723_v57 = vadd.f32 1.0, %v7919_v10 }
0x3fba   :  { %7930 = vrcp.f32 %v5723_v57 }
0x3fbb   :  { %v7921_v39 = vpop.eup %7920 }
0x3fbc   :  { %6631 = vrot.lane.b32.xlu1 %v7921_v39, %s8048_s16  ;;  %v7923_v21 = vpop.eup %7922 }
0x3fbf   :  { %v7925_v31 = vpop.eup %7924 }
0x3fc0   :  { %6639 = vrot.lane.b32.xlu1 %v7923_v21, %s8049_s1  ;;  %6635 = vrot.lane.b32.xlu0 %v7925_v31, %s8050_s17  ;;  %v7927_v56 = vpop.eup %7926  ;;  %v6628_v0 = vpop.permute.xlu0 %6627 }
0x3fc3   :  { %v7929_v23 = vpop.eup %7928 }
0x3fc4   :  { %6647 = vrot.lane.b32.xlu1 %v7927_v56, %s8051_s18  ;;  %6643 = vrot.lane.b32.xlu0 %v7929_v23, %s8052_s19 }
0x3fc7   :  { %v7931_v32 = vpop.eup %7930 }
0x3fc8   :  { %6651 = vrot.lane.b32.xlu0 %v7931_v32, %s8053_s20 }
0x3fee   :  { %v6590_v1 = vpop.xlane.xlu1 %6589 }
0x3fef   :  { %v6591_v27 = vadd.f32 %v6590_v1, %v10031_v58 }
0x3ff1   :  { %v6803_v46 = vmul.f32 -1.442695, %v6591_v27 }
0x3ff2   :  { %v6604_v50 = vpop.permute.xlu1 %6603 }
0x3ff3   :  { %7932 = vpow2.f32 %v6803_v46  ;;  %v6660_v58 = vsel %vm560_vm12, %v6659_v14, %v6604_v50  ;;  %vm6681_vm12 = vcmask 580608  }
0x3ff6   :  { %v6608_v2 = vpop.permute.xlu1 %6607 }
0x3ff7   :  { %v6662_v4 = vsel %vm6661_vm6, %v6660_v58, %v6608_v2 }
0x3ff8   :  { %v6663_v35 = vsel %vm161_vm2, %v6662_v4, %v6612_v61  ;;  %vm6679_vm2 = vcmask 572416  }
0x3ffa   :  { %v6616_v33 = vpop.permute.xlu1 %6615 }
0x3ffb   :  { %v6664_v45 = vsel %vm144_vm0, %v6663_v35, %v6616_v33  ;;  %vm6677_vm0 = vcmask 564224  }
0x3ffc   :  { %v6665_v36 = vsel %vm2583_vm14, %v6664_v45, %v6620_v18 }
0x3ffe   :  { %v6624_v26 = vpop.permute.xlu1 %6623 }
0x3fff   :  { %v6667_v11 = vsel %vm6666_vm7, %v6665_v36, %v6624_v26 }
0x4000   :  { %v7933_v9 = vpop.eup %7932  ;;  %v6668_v15 = vsel %vm300_vm3, %v6667_v11, %v6628_v0 }
0x4001   :  { %v6595_v38 = vadd.f32 1.0, %v7933_v9 }
0x4003   :  { %7934 = vrcp.f32 %v6595_v38 }
0x4010   :  { %v7935_v48 = vpop.eup %7934 }
0x4011   :  { %6655 = vrot.lane.b32.xlu1 %v7935_v48, %s8054_s21 }
0x402e   :  { %v6632_v12 = vpop.permute.xlu1 %6631 }
0x402f   :  { %v6670_v13 = vsel %vm6669_vm8, %v6668_v15, %v6632_v12 }
0x4032   :  { %v6636_v42 = vpop.permute.xlu0 %6635  ;;  %v6640_v22 = vpop.permute.xlu1 %6639 }
0x4033   :  { %v6672_v16 = vsel %vm6671_vm9, %v6670_v13, %v6636_v42 }
0x4034   :  { %v6674_v37 = vsel %vm6673_vm10, %v6672_v16, %v6640_v22 }
0x4036   :  { %v6644_v25 = vpop.permute.xlu0 %6643  ;;  %v6648_v7 = vpop.permute.xlu1 %6647 }
0x4037   :  { %v6676_v17 = vsel %vm6675_vm11, %v6674_v37, %v6644_v25 }
0x4038   :  { %v6678_v63 = vsel %vm6677_vm0, %v6676_v17, %v6648_v7 }
0x403a   :  { %v6652_v8 = vpop.permute.xlu0 %6651 }
0x403b   :  { %v6680_v52 = vsel %vm6679_vm2, %v6678_v63, %v6652_v8 }
0x4083   :  { %v6656_v51 = vpop.permute.xlu1 %6655 }
0x4084   :  { %v6682_v24 = vsel %vm6681_vm12, %v6680_v52, %v6656_v51 }
0x4085   :  { %v6684_v53 = vsel %vm6683_vm13, %v6682_v24, 0.0 }
0x4086   :  { %6685 = vst [vmem:[%s10067_s2] sm:$0x3] %v6684_v53 }
0x4087   :  { %6690 = vsyncpa [#allocation4], 1 }

</bundles_post_ra>
